<compile_context>
chip_gen: v7x
topology: tpu7x:2x2x1
jax: 0.10.0
libtpu: 0.0.40
codegen_flags: <defaults>
</compile_context>

<pallas_src>
import numpy as np

import jax
import jax.numpy as jnp
from jax import lax
from jax.experimental import pallas as pl
from jax.experimental.pallas import tpu as pltpu

LANES = 128


def _round_up(x, m):
    return ((x + m - 1) // m) * m


# ------------------------------ fused kernel ---------------------------------
def _disc_kernel(x1_ref, w1_ref, sel2_ref, w2_ref, b2_ref,
                 sel3_ref, w3_ref, b3_ref, w4_ref, r4_ref, o_ref):
    """DigitDiscriminator forward for NPACK lane-packed images (grid over groups).

    x1_ref : (1, 196, NPACK*nc*16)  bf16  layer-1 im2col, NPACK images along K lanes
    w1_ref : (NPACK*nc*16, NPACK*C1) bf16 block-diagonal layer-1 weight
    sel2/3 : (taps*HWo_pad, HWi_pad) bf16 concatenated 0/1 spatial-selection matrices
    w2/3   : (taps, NPACK*Ci, NPACK*Co) bf16 block-diag conv weights (BN scale folded)
    b2/3   : (1, NPACK*Co)           f32  BN shift, tiled per packed image
    w4_ref : (HW3_pad, NPACK*C3)     f32  final 4x4 conv weights, tiled per packed image
    r4_ref : (NPACK*C3, 128)         f32  0/1 lane-group reduction matrix
    o_ref  : (1, 8, 128)             f32  sigmoid(logit) of packed image g in lane g
    """
    f32 = jnp.float32
    bf16 = jnp.bfloat16

    # ---- layer 1: conv(nc -> ndf, 4, 2, 1) for NPACK images + LeakyReLU(0.2) ----
    y1 = jnp.dot(x1_ref[0], w1_ref[...], preferred_element_type=f32)  # (196, NPACK*C1)
    y1 = jnp.where(y1 >= 0.0, y1, 0.2 * y1).astype(bf16)

    # ---- layer 2: conv(ndf -> 2ndf, 4, 2, 1) + BN + LeakyReLU ----
    taps2 = w2_ref.shape[0]
    hw2p = sel2_ref.shape[0] // taps2
    lanes2 = w2_ref.shape[2]
    # One tall spatial-gather matmul (exact: 0/1 selection of bf16 values).
    p2 = jnp.dot(sel2_ref[...], y1, preferred_element_type=f32).astype(bf16)
    y2 = jnp.zeros((hw2p, lanes2), f32)
    for t in range(taps2):                       # static unroll; 8-aligned slices
        y2 = y2 + jnp.dot(p2[t * hw2p:(t + 1) * hw2p, :], w2_ref[t],
                          preferred_element_type=f32)
    y2 = y2 + b2_ref[...]                        # BN scale already folded into w2
    y2 = jnp.where(y2 >= 0.0, y2, 0.2 * y2).astype(bf16)

    # ---- layer 3: conv(2ndf -> 4ndf, 3, 2, 1) + BN + LeakyReLU ----
    taps3 = w3_ref.shape[0]
    hw3p = sel3_ref.shape[0] // taps3
    lanes3 = w3_ref.shape[2]
    p3 = jnp.dot(sel3_ref[...], y2, preferred_element_type=f32).astype(bf16)
    y3 = jnp.zeros((hw3p, lanes3), f32)
    for t in range(taps3):
        y3 = y3 + jnp.dot(p3[t * hw3p:(t + 1) * hw3p, :], w3_ref[t],
                          preferred_element_type=f32)
    y3 = y3 + b3_ref[...]
    y3 = jnp.where(y3 >= 0.0, y3, 0.2 * y3)

    # ---- layer 4: conv(4ndf -> 1, 4, 1, 0) = weighted full reduce, + sigmoid ----
    prod = y3 * w4_ref[...]                                       # (HW3_pad, NPACK*C3)
    # Lane-group reduce: r4 sums each image's C3 lanes into its own output lane.
    logits = jnp.sum(jnp.dot(prod, r4_ref[...], preferred_element_type=f32),
                     axis=0, keepdims=True)                       # (1, 128)
    z = jnp.exp(-jnp.abs(logits))                                 # stable, exact sigmoid
    sig = jnp.where(logits >= 0.0, 1.0, z) / (1.0 + z)
    o_ref[...] = jnp.broadcast_to(sig, (8, LANES)).reshape(1, 8, LANES)


# ------------------------------ host-side glue -------------------------------
def _im2col_l1(x_nchw, kh, kw, stride, pad):
    """(N, C, H, W) -> (N, Ho*Wo, C*kh*kw); column order (cin, i, j) matches the
    PyTorch OIHW weight flattening.  Entry-point layout conversion only."""
    n, c, h, w = x_nchw.shape
    xp = jnp.pad(x_nchw, ((0, 0), (0, 0), (pad, pad), (pad, pad)))
    ho = (h + 2 * pad - kh) // stride + 1
    wo = (w + 2 * pad - kw) // stride + 1
    taps = []
    for i in range(kh):
        for j in range(kw):
            taps.append(xp[:, :, i:i + stride * ho:stride, j:j + stride * wo:stride])
    cols = jnp.stack(taps, axis=0).reshape(kh, kw, n, c, ho, wo)
    cols = cols.transpose(2, 4, 5, 3, 0, 1)                 # (N, Ho, Wo, C, kh, kw)
    return cols.reshape(n, ho * wo, c * kh * kw), ho, wo


def _selection_taps(hin, win, kh, kw, stride, pad):
    """0/1 matrices S[t] such that (S[t] @ y)[p, :] = y[input_row(p, t), :]
    (or 0 where the conv padding falls outside)."""
    ho = (hin + 2 * pad - kh) // stride + 1
    wo = (win + 2 * pad - kw) // stride + 1
    sel = np.zeros((kh * kw, ho * wo, hin * win), np.float32)
    for i in range(kh):
        for j in range(kw):
            t = i * kw + j
            for oh in range(ho):
                ih = oh * stride - pad + i
                if ih < 0 or ih >= hin:
                    continue
                for ow in range(wo):
                    iw = ow * stride - pad + j
                    if 0 <= iw < win:
                        sel[t, oh * wo + ow, ih * win + iw] = 1.0
    return sel, ho, wo


def digit_discriminator_forward(params, x):
    """x: (N, nc, 28, 28) -> (N, 1, 1, 1), matching the PyTorch module (eval-mode BN)."""
    n, nc_in, _, _ = x.shape
    c1 = params["w1"].shape[0]                   # ndf
    c2 = params["w2"].shape[0]                   # 2*ndf
    c3 = params["w3"].shape[0]                   # 4*ndf
    npack = max(1, LANES // c1)                  # images packed into the lane axis

    # ---- layer-1 im2col on host (only entry-point layout work) ----
    cols1, ho1, wo1 = _im2col_l1(x, 4, 4, 2, 1)  # (N, 196, nc*16) f32
    k1 = nc_in * 16
    hw1 = ho1 * wo1

    # Pad the batch to a multiple of NPACK and pack NPACK images along the K lanes.
    num_groups = -(-n // npack)
    n_pad = num_groups * npack
    cols1 = jnp.pad(cols1, ((0, n_pad - n), (0, 0), (0, 0)))
    x1p = cols1.reshape(num_groups, npack, hw1, k1).transpose(0, 2, 1, 3)
    x1p = x1p.reshape(num_groups, hw1, npack * k1).astype(jnp.bfloat16)

    # ---- concatenated spatial-selection matrices (compile-time constants) ----
    sel2_np, ho2, wo2 = _selection_taps(ho1, wo1, 4, 4, 2, 1)   # (16, 49, 196)
    sel3_np, ho3, wo3 = _selection_taps(ho2, wo2, 3, 3, 2, 1)   # (9, 16, 49)
    taps2, hw2 = sel2_np.shape[0], sel2_np.shape[1]
    taps3, hw3 = sel3_np.shape[0], sel3_np.shape[1]
    hw2p = _round_up(hw2, 8)                                    # 56 (tap slabs 8-aligned)
    hw3p = _round_up(hw3, 8)                                    # 16
    kh4, kw4 = params["w4"].shape[2], params["w4"].shape[3]
    assert (ho3, wo3) == (kh4, kw4), "final conv expects a 4x4 feature map (28x28 input)"

    sel2_cat = np.zeros((taps2 * hw2p, hw1), np.float32)
    for t in range(taps2):
        sel2_cat[t * hw2p:t * hw2p + hw2] = sel2_np[t]
    sel3_cat = np.zeros((taps3 * hw3p, hw2p), np.float32)
    for t in range(taps3):
        sel3_cat[t * hw3p:t * hw3p + hw3, :hw2] = sel3_np[t]
    sel2c = jnp.asarray(sel2_cat, jnp.bfloat16)
    sel3c = jnp.asarray(sel3_cat, jnp.bfloat16)

    # ---- block-diagonal packed weights (BN scale folded in), bf16 MXU operands ----
    eye = jnp.eye(npack, dtype=jnp.float32)

    w1_mat = params["w1"].reshape(c1, k1).T                            # (k1, c1)
    w1_bd = jnp.einsum("gh,ko->gkho", eye, w1_mat)
    w1_bd = w1_bd.reshape(npack * k1, npack * c1).astype(jnp.bfloat16)

    w2s = params["w2"] * params["bn2_scale"][:, None, None, None]      # fold BN scale
    wt2 = jnp.transpose(w2s, (2, 3, 1, 0)).reshape(taps2, c1, c2)
    w2_bd = jnp.einsum("gh,tio->tgiho", eye, wt2)
    w2_bd = w2_bd.reshape(taps2, npack * c1, npack * c2).astype(jnp.bfloat16)

    w3s = params["w3"] * params["bn3_scale"][:, None, None, None]
    wt3 = jnp.transpose(w3s, (2, 3, 1, 0)).reshape(taps3, c2, c3)
    w3_bd = jnp.einsum("gh,tio->tgiho", eye, wt3)
    w3_bd = w3_bd.reshape(taps3, npack * c2, npack * c3).astype(jnp.bfloat16)

    b2t = jnp.tile(params["bn2_shift"], npack).reshape(1, npack * c2).astype(jnp.float32)
    b3t = jnp.tile(params["bn3_shift"], npack).reshape(1, npack * c3).astype(jnp.float32)

    w4_mat = jnp.transpose(params["w4"][0], (1, 2, 0)).reshape(hw3, c3)
    w4t = jnp.zeros((hw3p, npack * c3), jnp.float32)
    w4t = w4t.at[:hw3].set(jnp.tile(w4_mat, (1, npack)).astype(jnp.float32))

    r4_np = np.zeros((npack * c3, LANES), np.float32)                  # lane-group reduce
    for g in range(npack):
        r4_np[g * c3:(g + 1) * c3, g] = 1.0
    r4 = jnp.asarray(r4_np)

    out = pl.pallas_call(
        _disc_kernel,
        out_shape=jax.ShapeDtypeStruct((num_groups, 8, LANES), jnp.float32),
        grid=(num_groups,),
        in_specs=[
            pl.BlockSpec((1, hw1, npack * k1), lambda i: (i, 0, 0)),   # streamed per group
            pl.BlockSpec(w1_bd.shape, lambda i: (0, 0)),               # VMEM-resident consts
            pl.BlockSpec(sel2c.shape, lambda i: (0, 0)),
            pl.BlockSpec(w2_bd.shape, lambda i: (0, 0, 0)),
            pl.BlockSpec(b2t.shape, lambda i: (0, 0)),
            pl.BlockSpec(sel3c.shape, lambda i: (0, 0)),
            pl.BlockSpec(w3_bd.shape, lambda i: (0, 0, 0)),
            pl.BlockSpec(b3t.shape, lambda i: (0, 0)),
            pl.BlockSpec(w4t.shape, lambda i: (0, 0)),
            pl.BlockSpec(r4.shape, lambda i: (0, 0)),
        ],
        out_specs=pl.BlockSpec((1, 8, LANES), lambda i: (i, 0, 0)),    # lane-dense store
        compiler_params=pltpu.CompilerParams(
            dimension_semantics=("parallel",),       # megacore: shard groups across TCs
            vmem_limit_bytes=32 * 1024 * 1024),      # ~10 MiB used incl. double buffers
    )(x1p, w1_bd, sel2c, w2_bd, b2t, sel3c, w3_bd, b3t, w4t, r4)

    sig = out[:, 0, :npack].reshape(-1)[:n]          # image g of group k -> lane g, row 0
    return sig.reshape(n, 1, 1, 1)


# --------------------------- model construction ------------------------------
def init_params(key, ndf, nc):
    ks = jax.random.split(key, 8)
    eps = 1e-5

    def bn_affine(kg, c):
        gamma = 1.0 + 0.02 * jax.random.normal(kg, (c,), jnp.float32)
        beta = jnp.zeros((c,), jnp.float32)
        run_mean = jnp.zeros((c,), jnp.float32)
        run_var = jnp.ones((c,), jnp.float32)
        scale = gamma / jnp.sqrt(run_var + eps)
        shift = beta - run_mean * scale
        return scale, shift

    p = {}
    p["w1"] = 0.02 * jax.random.normal(ks[0], (ndf, nc, 4, 4), jnp.float32)
    p["w2"] = 0.02 * jax.random.normal(ks[1], (ndf * 2, ndf, 4, 4), jnp.float32)
    p["bn2_scale"], p["bn2_shift"] = bn_affine(ks[2], ndf * 2)
    p["w3"] = 0.02 * jax.random.normal(ks[3], (ndf * 4, ndf * 2, 3, 3), jnp.float32)
    p["bn3_scale"], p["bn3_shift"] = bn_affine(ks[4], ndf * 4)
    p["w4"] = 0.02 * jax.random.normal(ks[5], (1, ndf * 4, 4, 4), jnp.float32)
    return p


# --------------------------- pure-JAX reference -------------------------------
def _conv_ref(x, w, stride, pad):
    return lax.conv_general_dilated(
        x, w, window_strides=(stride, stride),
        padding=((pad, pad), (pad, pad)),
        dimension_numbers=("NCHW", "OIHW", "NCHW"))


def reference_forward(params, x):
    def leaky(v):
        return jnp.where(v >= 0, v, 0.2 * v)

    h = leaky(_conv_ref(x, params["w1"], 2, 1))
    h = _conv_ref(h, params["w2"], 2, 1)
    h = leaky(h * params["bn2_scale"][None, :, None, None]
              + params["bn2_shift"][None, :, None, None])
    h = _conv_ref(h, params["w3"], 2, 1)
    h = leaky(h * params["bn3_scale"][None, :, None, None]
              + params["bn3_shift"][None, :, None, None])
    h = _conv_ref(h, params["w4"], 1, 0)
    return jax.nn.sigmoid(h)


# ---------------------------------- main --------------------------------------
if __name__ == "__main__":
    key = jax.random.PRNGKey(0)
    k_param, k_x = jax.random.split(key)

    ndf, nc, batch = 8, 1, 2
    params = init_params(k_param, ndf, nc)
    x = jax.random.normal(k_x, (batch, nc, 28, 28), jnp.float32)

    fwd = jax.jit(digit_discriminator_forward)
    out = jax.block_until_ready(fwd(params, x))
    assert out.shape == (batch, 1, 1, 1), out.shape

    ref = jax.block_until_ready(reference_forward(params, x))
    assert jnp.allclose(out, ref, atol=1e-2, rtol=1e-2), (
        "Pallas output mismatch vs reference: "
        f"{np.asarray(out).ravel()} vs {np.asarray(ref).ravel()}")

    print("KERNEL_OK")
</pallas_src>

<mosaic_0001>
module attributes {stable_mosaic.version = 11 : i64} {
  func.func @_disc_kernel(%arg0: i32, %arg1: memref<1x196x256xbf16, #tpu.memory_space<vmem>>, %arg2: memref<256x128xbf16, #tpu.memory_space<vmem>>, %arg3: memref<896x196xbf16, #tpu.memory_space<vmem>>, %arg4: memref<16x128x256xbf16, #tpu.memory_space<vmem>>, %arg5: memref<1x256xf32, #tpu.memory_space<vmem>>, %arg6: memref<144x56xbf16, #tpu.memory_space<vmem>>, %arg7: memref<9x256x512xbf16, #tpu.memory_space<vmem>>, %arg8: memref<1x512xf32, #tpu.memory_space<vmem>>, %arg9: memref<16x512xf32, #tpu.memory_space<vmem>>, %arg10: memref<512x128xf32, #tpu.memory_space<vmem>>, %arg11: memref<1x8x128xf32, #tpu.memory_space<vmem>>) attributes {dimension_semantics = [#tpu.dimension_semantics<parallel>], iteration_bounds = array<i64: 1>, scalar_prefetch = 0 : i64, scratch_operands = 0 : i64, tpu.core_type = #tpu.core_type<tc>, window_params = [{transform_indices = @transform_0, window_bounds = array<i64: 1, 196, 256>}, {pipeline_mode = #tpu.pipeline_mode<synchronous>, transform_indices = @transform_1, window_bounds = array<i64: 256, 128>}, {pipeline_mode = #tpu.pipeline_mode<synchronous>, transform_indices = @transform_2, window_bounds = array<i64: 896, 196>}, {pipeline_mode = #tpu.pipeline_mode<synchronous>, transform_indices = @transform_3, window_bounds = array<i64: 16, 128, 256>}, {pipeline_mode = #tpu.pipeline_mode<synchronous>, transform_indices = @transform_4, window_bounds = array<i64: 1, 256>}, {pipeline_mode = #tpu.pipeline_mode<synchronous>, transform_indices = @transform_5, window_bounds = array<i64: 144, 56>}, {pipeline_mode = #tpu.pipeline_mode<synchronous>, transform_indices = @transform_6, window_bounds = array<i64: 9, 256, 512>}, {pipeline_mode = #tpu.pipeline_mode<synchronous>, transform_indices = @transform_7, window_bounds = array<i64: 1, 512>}, {pipeline_mode = #tpu.pipeline_mode<synchronous>, transform_indices = @transform_8, window_bounds = array<i64: 16, 512>}, {pipeline_mode = #tpu.pipeline_mode<synchronous>, transform_indices = @transform_9, window_bounds = array<i64: 512, 128>}, {transform_indices = @transform_10, window_bounds = array<i64: 1, 8, 128>}]} {
    %c0 = arith.constant 0 : index
    %c0_0 = arith.constant 0 : index
    %c0_1 = arith.constant 0 : index
    %0 = vector.load %arg1[%c0, %c0_0, %c0_1] : memref<1x196x256xbf16, #tpu.memory_space<vmem>>, vector<1x196x256xbf16>
    %1 = vector.shape_cast %0 : vector<1x196x256xbf16> to vector<196x256xbf16>
    %c0_2 = arith.constant 0 : index
    %c0_3 = arith.constant 0 : index
    %2 = vector.load %arg2[%c0_2, %c0_3] : memref<256x128xbf16, #tpu.memory_space<vmem>>, vector<256x128xbf16>
    %cst = arith.constant dense<0.000000e+00> : vector<196x128xf32>
    %3 = tpu.matmul %1, %2, %cst {dimension_numbers = #tpu.dot_dimension_numbers<[1], [0], [0], [1], [0, 0, 1, 1], [], []>} : vector<196x256xbf16>, vector<256x128xbf16>, vector<196x128xf32> -> vector<196x128xf32>
    %cst_4 = arith.constant 0.000000e+00 : f32
    %4 = vector.broadcast %cst_4 : f32 to vector<196x128xf32>
    %5 = arith.cmpf oge, %3, %4 : vector<196x128xf32>
    %cst_5 = arith.constant 2.000000e-01 : f32
    %6 = vector.broadcast %cst_5 : f32 to vector<196x128xf32>
    %7 = arith.mulf %6, %3 : vector<196x128xf32>
    %8 = arith.select %5, %3, %7 : vector<196x128xi1>, vector<196x128xf32>
    %9 = arith.truncf %8 : vector<196x128xf32> to vector<196x128xbf16>
    %c0_6 = arith.constant 0 : index
    %c0_7 = arith.constant 0 : index
    %10 = vector.load %arg3[%c0_6, %c0_7] : memref<896x196xbf16, #tpu.memory_space<vmem>>, vector<896x196xbf16>
    %cst_8 = arith.constant dense<0.000000e+00> : vector<896x128xf32>
    %11 = tpu.matmul %10, %9, %cst_8 {dimension_numbers = #tpu.dot_dimension_numbers<[1], [0], [0], [1], [0, 0, 1, 1], [], []>} : vector<896x196xbf16>, vector<196x128xbf16>, vector<896x128xf32> -> vector<896x128xf32>
    %12 = arith.truncf %11 : vector<896x128xf32> to vector<896x128xbf16>
    %cst_9 = arith.constant 0.000000e+00 : f32
    %13 = vector.broadcast %cst_9 : f32 to vector<56x256xf32>
    %14 = vector.extract_strided_slice %12 {offsets = [0, 0], sizes = [56, 128], strides = [1, 1]} : vector<896x128xbf16> to vector<56x128xbf16>
    %c0_10 = arith.constant 0 : index
    %c0_11 = arith.constant 0 : index
    %c0_12 = arith.constant 0 : index
    %15 = vector.load %arg4[%c0_10, %c0_11, %c0_12] : memref<16x128x256xbf16, #tpu.memory_space<vmem>>, vector<1x128x256xbf16>
    %16 = vector.shape_cast %15 : vector<1x128x256xbf16> to vector<128x256xbf16>
    %cst_13 = arith.constant dense<0.000000e+00> : vector<56x256xf32>
    %17 = tpu.matmul %14, %16, %cst_13 {dimension_numbers = #tpu.dot_dimension_numbers<[1], [0], [0], [1], [0, 0, 1, 1], [], []>} : vector<56x128xbf16>, vector<128x256xbf16>, vector<56x256xf32> -> vector<56x256xf32>
    %18 = arith.addf %13, %17 : vector<56x256xf32>
    %19 = vector.extract_strided_slice %12 {offsets = [56, 0], sizes = [56, 128], strides = [1, 1]} : vector<896x128xbf16> to vector<56x128xbf16>
    %c1 = arith.constant 1 : index
    %c0_14 = arith.constant 0 : index
    %c0_15 = arith.constant 0 : index
    %20 = vector.load %arg4[%c1, %c0_14, %c0_15] : memref<16x128x256xbf16, #tpu.memory_space<vmem>>, vector<1x128x256xbf16>
    %21 = vector.shape_cast %20 : vector<1x128x256xbf16> to vector<128x256xbf16>
    %cst_16 = arith.constant dense<0.000000e+00> : vector<56x256xf32>
    %22 = tpu.matmul %19, %21, %cst_16 {dimension_numbers = #tpu.dot_dimension_numbers<[1], [0], [0], [1], [0, 0, 1, 1], [], []>} : vector<56x128xbf16>, vector<128x256xbf16>, vector<56x256xf32> -> vector<56x256xf32>
    %23 = arith.addf %18, %22 : vector<56x256xf32>
    %24 = vector.extract_strided_slice %12 {offsets = [112, 0], sizes = [56, 128], strides = [1, 1]} : vector<896x128xbf16> to vector<56x128xbf16>
    %c2 = arith.constant 2 : index
    %c0_17 = arith.constant 0 : index
    %c0_18 = arith.constant 0 : index
    %25 = vector.load %arg4[%c2, %c0_17, %c0_18] : memref<16x128x256xbf16, #tpu.memory_space<vmem>>, vector<1x128x256xbf16>
    %26 = vector.shape_cast %25 : vector<1x128x256xbf16> to vector<128x256xbf16>
    %cst_19 = arith.constant dense<0.000000e+00> : vector<56x256xf32>
    %27 = tpu.matmul %24, %26, %cst_19 {dimension_numbers = #tpu.dot_dimension_numbers<[1], [0], [0], [1], [0, 0, 1, 1], [], []>} : vector<56x128xbf16>, vector<128x256xbf16>, vector<56x256xf32> -> vector<56x256xf32>
    %28 = arith.addf %23, %27 : vector<56x256xf32>
    %29 = vector.extract_strided_slice %12 {offsets = [168, 0], sizes = [56, 128], strides = [1, 1]} : vector<896x128xbf16> to vector<56x128xbf16>
    %c3 = arith.constant 3 : index
    %c0_20 = arith.constant 0 : index
    %c0_21 = arith.constant 0 : index
    %30 = vector.load %arg4[%c3, %c0_20, %c0_21] : memref<16x128x256xbf16, #tpu.memory_space<vmem>>, vector<1x128x256xbf16>
    %31 = vector.shape_cast %30 : vector<1x128x256xbf16> to vector<128x256xbf16>
    %cst_22 = arith.constant dense<0.000000e+00> : vector<56x256xf32>
    %32 = tpu.matmul %29, %31, %cst_22 {dimension_numbers = #tpu.dot_dimension_numbers<[1], [0], [0], [1], [0, 0, 1, 1], [], []>} : vector<56x128xbf16>, vector<128x256xbf16>, vector<56x256xf32> -> vector<56x256xf32>
    %33 = arith.addf %28, %32 : vector<56x256xf32>
    %34 = vector.extract_strided_slice %12 {offsets = [224, 0], sizes = [56, 128], strides = [1, 1]} : vector<896x128xbf16> to vector<56x128xbf16>
    %c4 = arith.constant 4 : index
    %c0_23 = arith.constant 0 : index
    %c0_24 = arith.constant 0 : index
    %35 = vector.load %arg4[%c4, %c0_23, %c0_24] : memref<16x128x256xbf16, #tpu.memory_space<vmem>>, vector<1x128x256xbf16>
    %36 = vector.shape_cast %35 : vector<1x128x256xbf16> to vector<128x256xbf16>
    %cst_25 = arith.constant dense<0.000000e+00> : vector<56x256xf32>
    %37 = tpu.matmul %34, %36, %cst_25 {dimension_numbers = #tpu.dot_dimension_numbers<[1], [0], [0], [1], [0, 0, 1, 1], [], []>} : vector<56x128xbf16>, vector<128x256xbf16>, vector<56x256xf32> -> vector<56x256xf32>
    %38 = arith.addf %33, %37 : vector<56x256xf32>
    %39 = vector.extract_strided_slice %12 {offsets = [280, 0], sizes = [56, 128], strides = [1, 1]} : vector<896x128xbf16> to vector<56x128xbf16>
    %c5 = arith.constant 5 : index
    %c0_26 = arith.constant 0 : index
    %c0_27 = arith.constant 0 : index
    %40 = vector.load %arg4[%c5, %c0_26, %c0_27] : memref<16x128x256xbf16, #tpu.memory_space<vmem>>, vector<1x128x256xbf16>
    %41 = vector.shape_cast %40 : vector<1x128x256xbf16> to vector<128x256xbf16>
    %cst_28 = arith.constant dense<0.000000e+00> : vector<56x256xf32>
    %42 = tpu.matmul %39, %41, %cst_28 {dimension_numbers = #tpu.dot_dimension_numbers<[1], [0], [0], [1], [0, 0, 1, 1], [], []>} : vector<56x128xbf16>, vector<128x256xbf16>, vector<56x256xf32> -> vector<56x256xf32>
    %43 = arith.addf %38, %42 : vector<56x256xf32>
    %44 = vector.extract_strided_slice %12 {offsets = [336, 0], sizes = [56, 128], strides = [1, 1]} : vector<896x128xbf16> to vector<56x128xbf16>
    %c6 = arith.constant 6 : index
    %c0_29 = arith.constant 0 : index
    %c0_30 = arith.constant 0 : index
    %45 = vector.load %arg4[%c6, %c0_29, %c0_30] : memref<16x128x256xbf16, #tpu.memory_space<vmem>>, vector<1x128x256xbf16>
    %46 = vector.shape_cast %45 : vector<1x128x256xbf16> to vector<128x256xbf16>
    %cst_31 = arith.constant dense<0.000000e+00> : vector<56x256xf32>
    %47 = tpu.matmul %44, %46, %cst_31 {dimension_numbers = #tpu.dot_dimension_numbers<[1], [0], [0], [1], [0, 0, 1, 1], [], []>} : vector<56x128xbf16>, vector<128x256xbf16>, vector<56x256xf32> -> vector<56x256xf32>
    %48 = arith.addf %43, %47 : vector<56x256xf32>
    %49 = vector.extract_strided_slice %12 {offsets = [392, 0], sizes = [56, 128], strides = [1, 1]} : vector<896x128xbf16> to vector<56x128xbf16>
    %c7 = arith.constant 7 : index
    %c0_32 = arith.constant 0 : index
    %c0_33 = arith.constant 0 : index
    %50 = vector.load %arg4[%c7, %c0_32, %c0_33] : memref<16x128x256xbf16, #tpu.memory_space<vmem>>, vector<1x128x256xbf16>
    %51 = vector.shape_cast %50 : vector<1x128x256xbf16> to vector<128x256xbf16>
    %cst_34 = arith.constant dense<0.000000e+00> : vector<56x256xf32>
    %52 = tpu.matmul %49, %51, %cst_34 {dimension_numbers = #tpu.dot_dimension_numbers<[1], [0], [0], [1], [0, 0, 1, 1], [], []>} : vector<56x128xbf16>, vector<128x256xbf16>, vector<56x256xf32> -> vector<56x256xf32>
    %53 = arith.addf %48, %52 : vector<56x256xf32>
    %54 = vector.extract_strided_slice %12 {offsets = [448, 0], sizes = [56, 128], strides = [1, 1]} : vector<896x128xbf16> to vector<56x128xbf16>
    %c8 = arith.constant 8 : index
    %c0_35 = arith.constant 0 : index
    %c0_36 = arith.constant 0 : index
    %55 = vector.load %arg4[%c8, %c0_35, %c0_36] : memref<16x128x256xbf16, #tpu.memory_space<vmem>>, vector<1x128x256xbf16>
    %56 = vector.shape_cast %55 : vector<1x128x256xbf16> to vector<128x256xbf16>
    %cst_37 = arith.constant dense<0.000000e+00> : vector<56x256xf32>
    %57 = tpu.matmul %54, %56, %cst_37 {dimension_numbers = #tpu.dot_dimension_numbers<[1], [0], [0], [1], [0, 0, 1, 1], [], []>} : vector<56x128xbf16>, vector<128x256xbf16>, vector<56x256xf32> -> vector<56x256xf32>
    %58 = arith.addf %53, %57 : vector<56x256xf32>
    %59 = vector.extract_strided_slice %12 {offsets = [504, 0], sizes = [56, 128], strides = [1, 1]} : vector<896x128xbf16> to vector<56x128xbf16>
    %c9 = arith.constant 9 : index
    %c0_38 = arith.constant 0 : index
    %c0_39 = arith.constant 0 : index
    %60 = vector.load %arg4[%c9, %c0_38, %c0_39] : memref<16x128x256xbf16, #tpu.memory_space<vmem>>, vector<1x128x256xbf16>
    %61 = vector.shape_cast %60 : vector<1x128x256xbf16> to vector<128x256xbf16>
    %cst_40 = arith.constant dense<0.000000e+00> : vector<56x256xf32>
    %62 = tpu.matmul %59, %61, %cst_40 {dimension_numbers = #tpu.dot_dimension_numbers<[1], [0], [0], [1], [0, 0, 1, 1], [], []>} : vector<56x128xbf16>, vector<128x256xbf16>, vector<56x256xf32> -> vector<56x256xf32>
    %63 = arith.addf %58, %62 : vector<56x256xf32>
    %64 = vector.extract_strided_slice %12 {offsets = [560, 0], sizes = [56, 128], strides = [1, 1]} : vector<896x128xbf16> to vector<56x128xbf16>
    %c10 = arith.constant 10 : index
    %c0_41 = arith.constant 0 : index
    %c0_42 = arith.constant 0 : index
    %65 = vector.load %arg4[%c10, %c0_41, %c0_42] : memref<16x128x256xbf16, #tpu.memory_space<vmem>>, vector<1x128x256xbf16>
    %66 = vector.shape_cast %65 : vector<1x128x256xbf16> to vector<128x256xbf16>
    %cst_43 = arith.constant dense<0.000000e+00> : vector<56x256xf32>
    %67 = tpu.matmul %64, %66, %cst_43 {dimension_numbers = #tpu.dot_dimension_numbers<[1], [0], [0], [1], [0, 0, 1, 1], [], []>} : vector<56x128xbf16>, vector<128x256xbf16>, vector<56x256xf32> -> vector<56x256xf32>
    %68 = arith.addf %63, %67 : vector<56x256xf32>
    %69 = vector.extract_strided_slice %12 {offsets = [616, 0], sizes = [56, 128], strides = [1, 1]} : vector<896x128xbf16> to vector<56x128xbf16>
    %c11 = arith.constant 11 : index
    %c0_44 = arith.constant 0 : index
    %c0_45 = arith.constant 0 : index
    %70 = vector.load %arg4[%c11, %c0_44, %c0_45] : memref<16x128x256xbf16, #tpu.memory_space<vmem>>, vector<1x128x256xbf16>
    %71 = vector.shape_cast %70 : vector<1x128x256xbf16> to vector<128x256xbf16>
    %cst_46 = arith.constant dense<0.000000e+00> : vector<56x256xf32>
    %72 = tpu.matmul %69, %71, %cst_46 {dimension_numbers = #tpu.dot_dimension_numbers<[1], [0], [0], [1], [0, 0, 1, 1], [], []>} : vector<56x128xbf16>, vector<128x256xbf16>, vector<56x256xf32> -> vector<56x256xf32>
    %73 = arith.addf %68, %72 : vector<56x256xf32>
    %74 = vector.extract_strided_slice %12 {offsets = [672, 0], sizes = [56, 128], strides = [1, 1]} : vector<896x128xbf16> to vector<56x128xbf16>
    %c12 = arith.constant 12 : index
    %c0_47 = arith.constant 0 : index
    %c0_48 = arith.constant 0 : index
    %75 = vector.load %arg4[%c12, %c0_47, %c0_48] : memref<16x128x256xbf16, #tpu.memory_space<vmem>>, vector<1x128x256xbf16>
    %76 = vector.shape_cast %75 : vector<1x128x256xbf16> to vector<128x256xbf16>
    %cst_49 = arith.constant dense<0.000000e+00> : vector<56x256xf32>
    %77 = tpu.matmul %74, %76, %cst_49 {dimension_numbers = #tpu.dot_dimension_numbers<[1], [0], [0], [1], [0, 0, 1, 1], [], []>} : vector<56x128xbf16>, vector<128x256xbf16>, vector<56x256xf32> -> vector<56x256xf32>
    %78 = arith.addf %73, %77 : vector<56x256xf32>
    %79 = vector.extract_strided_slice %12 {offsets = [728, 0], sizes = [56, 128], strides = [1, 1]} : vector<896x128xbf16> to vector<56x128xbf16>
    %c13 = arith.constant 13 : index
    %c0_50 = arith.constant 0 : index
    %c0_51 = arith.constant 0 : index
    %80 = vector.load %arg4[%c13, %c0_50, %c0_51] : memref<16x128x256xbf16, #tpu.memory_space<vmem>>, vector<1x128x256xbf16>
    %81 = vector.shape_cast %80 : vector<1x128x256xbf16> to vector<128x256xbf16>
    %cst_52 = arith.constant dense<0.000000e+00> : vector<56x256xf32>
    %82 = tpu.matmul %79, %81, %cst_52 {dimension_numbers = #tpu.dot_dimension_numbers<[1], [0], [0], [1], [0, 0, 1, 1], [], []>} : vector<56x128xbf16>, vector<128x256xbf16>, vector<56x256xf32> -> vector<56x256xf32>
    %83 = arith.addf %78, %82 : vector<56x256xf32>
    %84 = vector.extract_strided_slice %12 {offsets = [784, 0], sizes = [56, 128], strides = [1, 1]} : vector<896x128xbf16> to vector<56x128xbf16>
    %c14 = arith.constant 14 : index
    %c0_53 = arith.constant 0 : index
    %c0_54 = arith.constant 0 : index
    %85 = vector.load %arg4[%c14, %c0_53, %c0_54] : memref<16x128x256xbf16, #tpu.memory_space<vmem>>, vector<1x128x256xbf16>
    %86 = vector.shape_cast %85 : vector<1x128x256xbf16> to vector<128x256xbf16>
    %cst_55 = arith.constant dense<0.000000e+00> : vector<56x256xf32>
    %87 = tpu.matmul %84, %86, %cst_55 {dimension_numbers = #tpu.dot_dimension_numbers<[1], [0], [0], [1], [0, 0, 1, 1], [], []>} : vector<56x128xbf16>, vector<128x256xbf16>, vector<56x256xf32> -> vector<56x256xf32>
    %88 = arith.addf %83, %87 : vector<56x256xf32>
    %89 = vector.extract_strided_slice %12 {offsets = [840, 0], sizes = [56, 128], strides = [1, 1]} : vector<896x128xbf16> to vector<56x128xbf16>
    %c15 = arith.constant 15 : index
    %c0_56 = arith.constant 0 : index
    %c0_57 = arith.constant 0 : index
    %90 = vector.load %arg4[%c15, %c0_56, %c0_57] : memref<16x128x256xbf16, #tpu.memory_space<vmem>>, vector<1x128x256xbf16>
    %91 = vector.shape_cast %90 : vector<1x128x256xbf16> to vector<128x256xbf16>
    %cst_58 = arith.constant dense<0.000000e+00> : vector<56x256xf32>
    %92 = tpu.matmul %89, %91, %cst_58 {dimension_numbers = #tpu.dot_dimension_numbers<[1], [0], [0], [1], [0, 0, 1, 1], [], []>} : vector<56x128xbf16>, vector<128x256xbf16>, vector<56x256xf32> -> vector<56x256xf32>
    %93 = arith.addf %88, %92 : vector<56x256xf32>
    %c0_59 = arith.constant 0 : index
    %c0_60 = arith.constant 0 : index
    %94 = vector.load %arg5[%c0_59, %c0_60] : memref<1x256xf32, #tpu.memory_space<vmem>>, vector<1x256xf32>
    %95 = vector.broadcast %94 : vector<1x256xf32> to vector<56x256xf32>
    %96 = arith.addf %93, %95 : vector<56x256xf32>
    %cst_61 = arith.constant 0.000000e+00 : f32
    %97 = vector.broadcast %cst_61 : f32 to vector<56x256xf32>
    %98 = arith.cmpf oge, %96, %97 : vector<56x256xf32>
    %cst_62 = arith.constant 2.000000e-01 : f32
    %99 = vector.broadcast %cst_62 : f32 to vector<56x256xf32>
    %100 = arith.mulf %99, %96 : vector<56x256xf32>
    %101 = arith.select %98, %96, %100 : vector<56x256xi1>, vector<56x256xf32>
    %102 = arith.truncf %101 : vector<56x256xf32> to vector<56x256xbf16>
    %c0_63 = arith.constant 0 : index
    %c0_64 = arith.constant 0 : index
    %103 = vector.load %arg6[%c0_63, %c0_64] : memref<144x56xbf16, #tpu.memory_space<vmem>>, vector<144x56xbf16>
    %cst_65 = arith.constant dense<0.000000e+00> : vector<144x256xf32>
    %104 = tpu.matmul %103, %102, %cst_65 {dimension_numbers = #tpu.dot_dimension_numbers<[1], [0], [0], [1], [0, 0, 1, 1], [], []>} : vector<144x56xbf16>, vector<56x256xbf16>, vector<144x256xf32> -> vector<144x256xf32>
    %105 = arith.truncf %104 : vector<144x256xf32> to vector<144x256xbf16>
    %cst_66 = arith.constant 0.000000e+00 : f32
    %106 = vector.broadcast %cst_66 : f32 to vector<16x512xf32>
    %107 = vector.extract_strided_slice %105 {offsets = [0, 0], sizes = [16, 256], strides = [1, 1]} : vector<144x256xbf16> to vector<16x256xbf16>
    %c0_67 = arith.constant 0 : index
    %c0_68 = arith.constant 0 : index
    %c0_69 = arith.constant 0 : index
    %108 = vector.load %arg7[%c0_67, %c0_68, %c0_69] : memref<9x256x512xbf16, #tpu.memory_space<vmem>>, vector<1x256x512xbf16>
    %109 = vector.shape_cast %108 : vector<1x256x512xbf16> to vector<256x512xbf16>
    %cst_70 = arith.constant dense<0.000000e+00> : vector<16x512xf32>
    %110 = tpu.matmul %107, %109, %cst_70 {dimension_numbers = #tpu.dot_dimension_numbers<[1], [0], [0], [1], [0, 0, 1, 1], [], []>} : vector<16x256xbf16>, vector<256x512xbf16>, vector<16x512xf32> -> vector<16x512xf32>
    %111 = arith.addf %106, %110 : vector<16x512xf32>
    %112 = vector.extract_strided_slice %105 {offsets = [16, 0], sizes = [16, 256], strides = [1, 1]} : vector<144x256xbf16> to vector<16x256xbf16>
    %c1_71 = arith.constant 1 : index
    %c0_72 = arith.constant 0 : index
    %c0_73 = arith.constant 0 : index
    %113 = vector.load %arg7[%c1_71, %c0_72, %c0_73] : memref<9x256x512xbf16, #tpu.memory_space<vmem>>, vector<1x256x512xbf16>
    %114 = vector.shape_cast %113 : vector<1x256x512xbf16> to vector<256x512xbf16>
    %cst_74 = arith.constant dense<0.000000e+00> : vector<16x512xf32>
    %115 = tpu.matmul %112, %114, %cst_74 {dimension_numbers = #tpu.dot_dimension_numbers<[1], [0], [0], [1], [0, 0, 1, 1], [], []>} : vector<16x256xbf16>, vector<256x512xbf16>, vector<16x512xf32> -> vector<16x512xf32>
    %116 = arith.addf %111, %115 : vector<16x512xf32>
    %117 = vector.extract_strided_slice %105 {offsets = [32, 0], sizes = [16, 256], strides = [1, 1]} : vector<144x256xbf16> to vector<16x256xbf16>
    %c2_75 = arith.constant 2 : index
    %c0_76 = arith.constant 0 : index
    %c0_77 = arith.constant 0 : index
    %118 = vector.load %arg7[%c2_75, %c0_76, %c0_77] : memref<9x256x512xbf16, #tpu.memory_space<vmem>>, vector<1x256x512xbf16>
    %119 = vector.shape_cast %118 : vector<1x256x512xbf16> to vector<256x512xbf16>
    %cst_78 = arith.constant dense<0.000000e+00> : vector<16x512xf32>
    %120 = tpu.matmul %117, %119, %cst_78 {dimension_numbers = #tpu.dot_dimension_numbers<[1], [0], [0], [1], [0, 0, 1, 1], [], []>} : vector<16x256xbf16>, vector<256x512xbf16>, vector<16x512xf32> -> vector<16x512xf32>
    %121 = arith.addf %116, %120 : vector<16x512xf32>
    %122 = vector.extract_strided_slice %105 {offsets = [48, 0], sizes = [16, 256], strides = [1, 1]} : vector<144x256xbf16> to vector<16x256xbf16>
    %c3_79 = arith.constant 3 : index
    %c0_80 = arith.constant 0 : index
    %c0_81 = arith.constant 0 : index
    %123 = vector.load %arg7[%c3_79, %c0_80, %c0_81] : memref<9x256x512xbf16, #tpu.memory_space<vmem>>, vector<1x256x512xbf16>
    %124 = vector.shape_cast %123 : vector<1x256x512xbf16> to vector<256x512xbf16>
    %cst_82 = arith.constant dense<0.000000e+00> : vector<16x512xf32>
    %125 = tpu.matmul %122, %124, %cst_82 {dimension_numbers = #tpu.dot_dimension_numbers<[1], [0], [0], [1], [0, 0, 1, 1], [], []>} : vector<16x256xbf16>, vector<256x512xbf16>, vector<16x512xf32> -> vector<16x512xf32>
    %126 = arith.addf %121, %125 : vector<16x512xf32>
    %127 = vector.extract_strided_slice %105 {offsets = [64, 0], sizes = [16, 256], strides = [1, 1]} : vector<144x256xbf16> to vector<16x256xbf16>
    %c4_83 = arith.constant 4 : index
    %c0_84 = arith.constant 0 : index
    %c0_85 = arith.constant 0 : index
    %128 = vector.load %arg7[%c4_83, %c0_84, %c0_85] : memref<9x256x512xbf16, #tpu.memory_space<vmem>>, vector<1x256x512xbf16>
    %129 = vector.shape_cast %128 : vector<1x256x512xbf16> to vector<256x512xbf16>
    %cst_86 = arith.constant dense<0.000000e+00> : vector<16x512xf32>
    %130 = tpu.matmul %127, %129, %cst_86 {dimension_numbers = #tpu.dot_dimension_numbers<[1], [0], [0], [1], [0, 0, 1, 1], [], []>} : vector<16x256xbf16>, vector<256x512xbf16>, vector<16x512xf32> -> vector<16x512xf32>
    %131 = arith.addf %126, %130 : vector<16x512xf32>
    %132 = vector.extract_strided_slice %105 {offsets = [80, 0], sizes = [16, 256], strides = [1, 1]} : vector<144x256xbf16> to vector<16x256xbf16>
    %c5_87 = arith.constant 5 : index
    %c0_88 = arith.constant 0 : index
    %c0_89 = arith.constant 0 : index
    %133 = vector.load %arg7[%c5_87, %c0_88, %c0_89] : memref<9x256x512xbf16, #tpu.memory_space<vmem>>, vector<1x256x512xbf16>
    %134 = vector.shape_cast %133 : vector<1x256x512xbf16> to vector<256x512xbf16>
    %cst_90 = arith.constant dense<0.000000e+00> : vector<16x512xf32>
    %135 = tpu.matmul %132, %134, %cst_90 {dimension_numbers = #tpu.dot_dimension_numbers<[1], [0], [0], [1], [0, 0, 1, 1], [], []>} : vector<16x256xbf16>, vector<256x512xbf16>, vector<16x512xf32> -> vector<16x512xf32>
    %136 = arith.addf %131, %135 : vector<16x512xf32>
    %137 = vector.extract_strided_slice %105 {offsets = [96, 0], sizes = [16, 256], strides = [1, 1]} : vector<144x256xbf16> to vector<16x256xbf16>
    %c6_91 = arith.constant 6 : index
    %c0_92 = arith.constant 0 : index
    %c0_93 = arith.constant 0 : index
    %138 = vector.load %arg7[%c6_91, %c0_92, %c0_93] : memref<9x256x512xbf16, #tpu.memory_space<vmem>>, vector<1x256x512xbf16>
    %139 = vector.shape_cast %138 : vector<1x256x512xbf16> to vector<256x512xbf16>
    %cst_94 = arith.constant dense<0.000000e+00> : vector<16x512xf32>
    %140 = tpu.matmul %137, %139, %cst_94 {dimension_numbers = #tpu.dot_dimension_numbers<[1], [0], [0], [1], [0, 0, 1, 1], [], []>} : vector<16x256xbf16>, vector<256x512xbf16>, vector<16x512xf32> -> vector<16x512xf32>
    %141 = arith.addf %136, %140 : vector<16x512xf32>
    %142 = vector.extract_strided_slice %105 {offsets = [112, 0], sizes = [16, 256], strides = [1, 1]} : vector<144x256xbf16> to vector<16x256xbf16>
    %c7_95 = arith.constant 7 : index
    %c0_96 = arith.constant 0 : index
    %c0_97 = arith.constant 0 : index
    %143 = vector.load %arg7[%c7_95, %c0_96, %c0_97] : memref<9x256x512xbf16, #tpu.memory_space<vmem>>, vector<1x256x512xbf16>
    %144 = vector.shape_cast %143 : vector<1x256x512xbf16> to vector<256x512xbf16>
    %cst_98 = arith.constant dense<0.000000e+00> : vector<16x512xf32>
    %145 = tpu.matmul %142, %144, %cst_98 {dimension_numbers = #tpu.dot_dimension_numbers<[1], [0], [0], [1], [0, 0, 1, 1], [], []>} : vector<16x256xbf16>, vector<256x512xbf16>, vector<16x512xf32> -> vector<16x512xf32>
    %146 = arith.addf %141, %145 : vector<16x512xf32>
    %147 = vector.extract_strided_slice %105 {offsets = [128, 0], sizes = [16, 256], strides = [1, 1]} : vector<144x256xbf16> to vector<16x256xbf16>
    %c8_99 = arith.constant 8 : index
    %c0_100 = arith.constant 0 : index
    %c0_101 = arith.constant 0 : index
    %148 = vector.load %arg7[%c8_99, %c0_100, %c0_101] : memref<9x256x512xbf16, #tpu.memory_space<vmem>>, vector<1x256x512xbf16>
    %149 = vector.shape_cast %148 : vector<1x256x512xbf16> to vector<256x512xbf16>
    %cst_102 = arith.constant dense<0.000000e+00> : vector<16x512xf32>
    %150 = tpu.matmul %147, %149, %cst_102 {dimension_numbers = #tpu.dot_dimension_numbers<[1], [0], [0], [1], [0, 0, 1, 1], [], []>} : vector<16x256xbf16>, vector<256x512xbf16>, vector<16x512xf32> -> vector<16x512xf32>
    %151 = arith.addf %146, %150 : vector<16x512xf32>
    %c0_103 = arith.constant 0 : index
    %c0_104 = arith.constant 0 : index
    %152 = vector.load %arg8[%c0_103, %c0_104] : memref<1x512xf32, #tpu.memory_space<vmem>>, vector<1x512xf32>
    %153 = vector.broadcast %152 : vector<1x512xf32> to vector<16x512xf32>
    %154 = arith.addf %151, %153 : vector<16x512xf32>
    %cst_105 = arith.constant 0.000000e+00 : f32
    %155 = vector.broadcast %cst_105 : f32 to vector<16x512xf32>
    %156 = arith.cmpf oge, %154, %155 : vector<16x512xf32>
    %cst_106 = arith.constant 2.000000e-01 : f32
    %157 = vector.broadcast %cst_106 : f32 to vector<16x512xf32>
    %158 = arith.mulf %157, %154 : vector<16x512xf32>
    %159 = arith.select %156, %154, %158 : vector<16x512xi1>, vector<16x512xf32>
    %c0_107 = arith.constant 0 : index
    %c0_108 = arith.constant 0 : index
    %160 = vector.load %arg9[%c0_107, %c0_108] : memref<16x512xf32, #tpu.memory_space<vmem>>, vector<16x512xf32>
    %161 = arith.mulf %159, %160 : vector<16x512xf32>
    %c0_109 = arith.constant 0 : index
    %c0_110 = arith.constant 0 : index
    %162 = vector.load %arg10[%c0_109, %c0_110] : memref<512x128xf32, #tpu.memory_space<vmem>>, vector<512x128xf32>
    %cst_111 = arith.constant dense<0.000000e+00> : vector<16x128xf32>
    %163 = tpu.matmul %161, %162, %cst_111 {dimension_numbers = #tpu.dot_dimension_numbers<[1], [0], [0], [1], [0, 0, 1, 1], [], []>} : vector<16x512xf32>, vector<512x128xf32>, vector<16x128xf32> -> vector<16x128xf32>
    %cst_112 = arith.constant dense<0.000000e+00> : vector<128xf32>
    %164 = vector.multi_reduction <add>, %163, %cst_112 [0] : vector<16x128xf32> to vector<128xf32>
    %165 = vector.shape_cast %164 : vector<128xf32> to vector<1x128xf32>
    %166 = math.absf %165 : vector<1x128xf32>
    %cst_113 = arith.constant 0.000000e+00 : f32
    %167 = vector.broadcast %cst_113 : f32 to vector<1x128xf32>
    %168 = arith.subf %167, %166 : vector<1x128xf32>
    %169 = math.exp %168 : vector<1x128xf32>
    %cst_114 = arith.constant 0.000000e+00 : f32
    %170 = vector.broadcast %cst_114 : f32 to vector<1x128xf32>
    %171 = arith.cmpf oge, %165, %170 : vector<1x128xf32>
    %cst_115 = arith.constant 1.000000e+00 : f32
    %172 = vector.broadcast %cst_115 : f32 to vector<1x128xf32>
    %173 = arith.select %171, %172, %169 : vector<1x128xi1>, vector<1x128xf32>
    %cst_116 = arith.constant 1.000000e+00 : f32
    %174 = vector.broadcast %cst_116 : f32 to vector<1x128xf32>
    %175 = arith.addf %174, %169 : vector<1x128xf32>
    %176 = arith.divf %173, %175 : vector<1x128xf32>
    %177 = vector.shape_cast %176 : vector<1x128xf32> to vector<1x128xf32>
    %178 = vector.broadcast %177 : vector<1x128xf32> to vector<8x128xf32>
    %179 = vector.shape_cast %178 : vector<8x128xf32> to vector<1x8x128xf32>
    %c0_117 = arith.constant 0 : index
    %c0_118 = arith.constant 0 : index
    %c0_119 = arith.constant 0 : index
    %180 = vector.load %arg11[%c0_117, %c0_118, %c0_119] : memref<1x8x128xf32, #tpu.memory_space<vmem>>, vector<1x8x128xf32>
    tpu.vector_store %arg11[%c0_117, %c0_118, %c0_119], %179 {strides = array<i32>} : memref<1x8x128xf32, #tpu.memory_space<vmem>>, vector<1x8x128xf32>,
    return
  }
  func.func @transform_0(%arg0: i32) -> (i32, i32, i32) {
    %c0_i32 = arith.constant 0 : i32
    %c0_i32_0 = arith.constant 0 : i32
    %c0_i32_1 = arith.constant 0 : i32
    return %arg0, %c0_i32, %c0_i32_0 : i32, i32, i32
  }
  func.func @transform_1(%arg0: i32) -> (i32, i32) {
    %c0_i32 = arith.constant 0 : i32
    %c0_i32_0 = arith.constant 0 : i32
    %c0_i32_1 = arith.constant 0 : i32
    return %c0_i32, %c0_i32_0 : i32, i32
  }
  func.func @transform_2(%arg0: i32) -> (i32, i32) {
    %c0_i32 = arith.constant 0 : i32
    %c0_i32_0 = arith.constant 0 : i32
    %c0_i32_1 = arith.constant 0 : i32
    return %c0_i32, %c0_i32_0 : i32, i32
  }
  func.func @transform_3(%arg0: i32) -> (i32, i32, i32) {
    %c0_i32 = arith.constant 0 : i32
    %c0_i32_0 = arith.constant 0 : i32
    %c0_i32_1 = arith.constant 0 : i32
    %c0_i32_2 = arith.constant 0 : i32
    return %c0_i32, %c0_i32_0, %c0_i32_1 : i32, i32, i32
  }
  func.func @transform_4(%arg0: i32) -> (i32, i32) {
    %c0_i32 = arith.constant 0 : i32
    %c0_i32_0 = arith.constant 0 : i32
    %c0_i32_1 = arith.constant 0 : i32
    return %c0_i32, %c0_i32_0 : i32, i32
  }
  func.func @transform_5(%arg0: i32) -> (i32, i32) {
    %c0_i32 = arith.constant 0 : i32
    %c0_i32_0 = arith.constant 0 : i32
    %c0_i32_1 = arith.constant 0 : i32
    return %c0_i32, %c0_i32_0 : i32, i32
  }
  func.func @transform_6(%arg0: i32) -> (i32, i32, i32) {
    %c0_i32 = arith.constant 0 : i32
    %c0_i32_0 = arith.constant 0 : i32
    %c0_i32_1 = arith.constant 0 : i32
    %c0_i32_2 = arith.constant 0 : i32
    return %c0_i32, %c0_i32_0, %c0_i32_1 : i32, i32, i32
  }
  func.func @transform_7(%arg0: i32) -> (i32, i32) {
    %c0_i32 = arith.constant 0 : i32
    %c0_i32_0 = arith.constant 0 : i32
    %c0_i32_1 = arith.constant 0 : i32
    return %c0_i32, %c0_i32_0 : i32, i32
  }
  func.func @transform_8(%arg0: i32) -> (i32, i32) {
    %c0_i32 = arith.constant 0 : i32
    %c0_i32_0 = arith.constant 0 : i32
    %c0_i32_1 = arith.constant 0 : i32
    return %c0_i32, %c0_i32_0 : i32, i32
  }
  func.func @transform_9(%arg0: i32) -> (i32, i32) {
    %c0_i32 = arith.constant 0 : i32
    %c0_i32_0 = arith.constant 0 : i32
    %c0_i32_1 = arith.constant 0 : i32
    return %c0_i32, %c0_i32_0 : i32, i32
  }
  func.func @transform_10(%arg0: i32) -> (i32, i32, i32) {
    %c0_i32 = arith.constant 0 : i32
    %c0_i32_0 = arith.constant 0 : i32
    %c0_i32_1 = arith.constant 0 : i32
    return %arg0, %c0_i32, %c0_i32_0 : i32, i32, i32
  }
}

</mosaic_0001>

<bundles_post_ra>
// kernel: tile.22
= control target key start
LH: loop header
LB: loop body
LE: loop exit
PB: predicated region body
PF: predicated region fallthrough
CT: control target
= control target key end

     0   :  { %s28_s0 = inlined_call_operand.vmem [shape: f32[32], index: 0, kind: input, shape index: {}]   ;;  %s29_s1 = inlined_call_operand.vmem [shape: f32[16,32], index: 1, kind: output, shape index: {}]  }
   0x1   :  { %v4_v0 = vld [vmem:[%s28_s0] ss:$0 sm:$0xff] }
   0x2   :  { %5 = vst [vmem:[%s29_s1] sm:$0xff] %v4_v0  ;;  %8 = vst [vmem:[%s29_s1 + $0x8] sm:$0xff] %v4_v0 }

// kernel: tile.23
= control target key start
LH: loop header
LB: loop body
LE: loop exit
PB: predicated region body
PF: predicated region fallthrough
CT: control target
= control target key end

     0   :  { %s57_s8 = smov 96   ;;  %vm3_vm0 = vcmask 261120   ;;  %s59_s15 = smov 64   ;;  %vm9_vm1 = vcmask 1048320   ;;  %vm15_vm2 = vcmask 785920   ;;  %vm21_vm3 = vcmask 523520   ;;  %s94_s0 = inlined_call_operand.vmem [shape: f32[16,32], index: 0, kind: input, shape index: {}]   ;;  %s95_s1 = inlined_call_operand.vmem [shape: f32[1,512], index: 1, kind: output, shape index: {}]  }
   0x1   :  { %v48_v0 = vld [vmem:[%s94_s0 + $0x3] ss:$4 sm:$0xf]   ;;  %v49_v1 = vld [vmem:[%s94_s0 + $0x2] ss:$4 sm:$0xf]  }
   0x2   :  { %7 = vrot.lane.b32.xlu0 %v48_v0, %s57_s8  ;;  %v50_v2 = vld [vmem:[%s94_s0 + $0x1] ss:$4 sm:$0xf]   ;;  %v2_v3 = vld [vmem:[%s94_s0] ss:$4 sm:$0xf]  }
   0x3   :  { %s58_s0 = smov 32   ;;  %4 = vst.msk [vmem:[#allocation0] ss:$8 sm:$0xf] %vm3_vm0, %v2_v3  }
   0x4   :  { %19 = vrot.lane.b32.xlu1 %v50_v2, %s58_s0 }
   0x6   :  { %13 = vrot.lane.b32.xlu0 %v49_v1, %s59_s15 }
  0x74   :  { %v8_v4 = vpop.permute.xlu0 %7  }
  0x75   :  { %10 = vst.msk [vmem:[#allocation0] ss:$8 sm:$0xf] %vm9_vm1, %v8_v4  }
  0x76   :  { %v20_v5 = vpop.permute.xlu1 %19  }
  0x78   :  { %v14_v6 = vpop.permute.xlu0 %13  }
  0x79   :  { %16 = vst.msk [vmem:[#allocation0] ss:$8 sm:$0xf] %vm15_vm2, %v14_v6  }
  0x7a   :  { %22 = vst.msk [vmem:[#allocation0] ss:$8 sm:$0xf] %vm21_vm3, %v20_v5  }
  0x81   :  { %v26_v7 = vld [vmem:[#allocation0] sm:$0x1]  ;;  %v30_v8 = vld [vmem:[#allocation0 + $0x8] sm:$0x1]  ;;  %v35_v9 = vld [vmem:[#allocation0 + $0x10] sm:$0x1] }
  0x82   :  { %28 = vst [vmem:[%s95_s1] sm:$0x1] %v26_v7  ;;  %51 = vst [vmem:[%s95_s1 + $0x1] sm:$0x1] %v30_v8  ;;  %v41_v10 = vld [vmem:[#allocation0 + $0x18] sm:$0x1] }
  0x83   :  { %52 = vst [vmem:[%s95_s1 + $0x2] sm:$0x1] %v35_v9  ;;  %53 = vst [vmem:[%s95_s1 + $0x3] sm:$0x1] %v41_v10 }

// kernel: tile.17
= control target key start
LH: loop header
LB: loop body
LE: loop exit
PB: predicated region body
PF: predicated region fallthrough
CT: control target
= control target key end

     0   :  { %s28_s0 = inlined_call_operand.vmem [shape: f32[16], index: 0, kind: input, shape index: {}]   ;;  %s29_s1 = inlined_call_operand.vmem [shape: f32[16,16], index: 1, kind: output, shape index: {}]  }
   0x1   :  { %v4_v0 = vld [vmem:[%s28_s0] ss:$0 sm:$0xff] }
   0x2   :  { %5 = vst [vmem:[%s29_s1] sm:$0xff] %v4_v0  ;;  %8 = vst [vmem:[%s29_s1 + $0x8] sm:$0xff] %v4_v0 }

// kernel: tile.18
= control target key start
LH: loop header
LB: loop body
LE: loop exit
PB: predicated region body
PF: predicated region fallthrough
CT: control target
= control target key end

     0   :  { %s7_s6 = smov 3  ;;  %s21_s9 = smov 3  ;;  %vm4_vm0 = vcmask 130048   ;;  %vm11_vm1 = vcmask 1048448   ;;  %vm18_vm2 = vcmask 917248   ;;  %vm25_vm3 = vcmask 786048   ;;  %s128_s0 = inlined_call_operand.vmem [shape: f32[16,16], index: 0, kind: input, shape index: {}]   ;;  %s129_s1 = inlined_call_operand.vmem [shape: f32[1,256], index: 1, kind: output, shape index: {}]  }
   0x1   :  { %v66_v0 = vld [vmem:[%s128_s0 + $0x7] ss:$8 sm:%s7_s6]   ;;  %s81_s10 = smov 112   ;;  %v68_v1 = vld [vmem:[%s128_s0 + $0x5] ss:$8 sm:%s21_s9]   ;;  %s14_s13 = smov 3 }
   0x2   :  { %9 = vrot.lane.b32.xlu0 %v66_v0, %s81_s10  ;;  %s82_s14 = smov 80   ;;  %v67_v2 = vld [vmem:[%s128_s0 + $0x6] ss:$8 sm:%s14_s13]   ;;  %s28_s17 = smov 3  ;;  %vm32_vm4 = vcmask 654848   ;;  %vm39_vm5 = vcmask 523648  }
   0x3   :  { %23 = vrot.lane.b32.xlu1 %v68_v1, %s82_s14  ;;  %v69_v3 = vld [vmem:[%s128_s0 + $0x4] ss:$8 sm:%s28_s17]   ;;  %s35_s20 = smov 3  ;;  %s42_s21 = smov 3  ;;  %vm46_vm6 = vcmask 392448   ;;  %vm53_vm7 = vcmask 261248  }
   0x4   :  { %s83_s22 = smov 96   ;;  %s84_s23 = smov 64   ;;  %v70_v4 = vld [vmem:[%s128_s0 + $0x3] ss:$8 sm:%s35_s20]   ;;  %v71_v5 = vld [vmem:[%s128_s0 + $0x2] ss:$8 sm:%s42_s21]  }
   0x5   :  { %s2_s26 = smov 3  ;;  %s49_s29 = smov 3 }
   0x6   :  { %16 = vrot.lane.b32.xlu0 %v67_v2, %s83_s22  ;;  %v3_v6 = vld [vmem:[%s128_s0] ss:$8 sm:%s2_s26]   ;;  %s85_s3 = smov 48   ;;  %s86_s4 = smov 32  }
   0x7   :  { %30 = vrot.lane.b32.xlu1 %v69_v3, %s84_s23  ;;  %5 = vst.msk [vmem:[#allocation0] ss:$8 sm:$0x3] %vm4_vm0, %v3_v6   ;;  %v72_v7 = vld [vmem:[%s128_s0 + $0x1] ss:$8 sm:%s49_s29]   ;;  %s87_s0 = smov 16  }
   0xa   :  { %37 = vrot.lane.b32.xlu0 %v70_v4, %s85_s3 }
   0xb   :  { %44 = vrot.lane.b32.xlu1 %v71_v5, %s86_s4 }
   0xe   :  { %51 = vrot.lane.b32.xlu0 %v72_v7, %s87_s0 }
  0x74   :  { %v10_v8 = vpop.permute.xlu0 %9  }
  0x75   :  { %12 = vst.msk [vmem:[#allocation0] ss:$8 sm:$0x3] %vm11_vm1, %v10_v8   ;;  %v24_v9 = vpop.permute.xlu1 %23  }
  0x78   :  { %v17_v10 = vpop.permute.xlu0 %16  }
  0x79   :  { %19 = vst.msk [vmem:[#allocation0] ss:$8 sm:$0x3] %vm18_vm2, %v17_v10   ;;  %v31_v11 = vpop.permute.xlu1 %30  }
  0x7a   :  { %26 = vst.msk [vmem:[#allocation0] ss:$8 sm:$0x3] %vm25_vm3, %v24_v9  }
  0x7b   :  { %33 = vst.msk [vmem:[#allocation0] ss:$8 sm:$0x3] %vm32_vm4, %v31_v11  }
  0x7c   :  { %v38_v12 = vpop.permute.xlu0 %37  }
  0x7d   :  { %40 = vst.msk [vmem:[#allocation0] ss:$8 sm:$0x3] %vm39_vm5, %v38_v12   ;;  %v45_v13 = vpop.permute.xlu1 %44  }
  0x7e   :  { %47 = vst.msk [vmem:[#allocation0] ss:$8 sm:$0x3] %vm46_vm6, %v45_v13  }
  0x80   :  { %v52_v14 = vpop.permute.xlu0 %51  }
  0x81   :  { %54 = vst.msk [vmem:[#allocation0] ss:$8 sm:$0x3] %vm53_vm7, %v52_v14  }
  0x88   :  { %v58_v15 = vld [vmem:[#allocation0] sm:$0x1]  ;;  %v62_v16 = vld [vmem:[#allocation0 + $0x8] sm:$0x1] }
  0x89   :  { %60 = vst [vmem:[%s129_s1] sm:$0x1] %v58_v15  ;;  %73 = vst [vmem:[%s129_s1 + $0x1] sm:$0x1] %v62_v16 }

// kernel: digit_discriminator_forward.1
= control target key start
LH: loop header
LB: loop body
LE: loop exit
PB: predicated region body
PF: predicated region fallthrough
CT: control target
= control target key end

     0   :  { %v13567_v43 = vmov 0   ;;  %vm1156_vm0 = vcmask 556032   ;;  %s17472_s1 = inlined_call_operand.vmem [shape: bf16[256,128], index: 1, kind: input, shape index: {}]   ;;  %s17473_s0 = inlined_call_operand.vmem [shape: bf16[1,196,256], index: 0, kind: input, shape index: {}]   ;;  %s17474_s2 = inlined_call_operand.vmem [shape: bf16[896,196], index: 2, kind: input, shape index: {}]   ;;  %s17475_s3 = inlined_call_operand.vmem [shape: bf16[16,128,256], index: 3, kind: input, shape index: {}]   ;;  %s17476_s5 = inlined_call_operand.vmem [shape: bf16[144,56], index: 5, kind: input, shape index: {}]   ;;  %s17477_s6 = inlined_call_operand.vmem [shape: bf16[9,256,512], index: 6, kind: input, shape index: {}]   ;;  %s17478_s4 = inlined_call_operand.vmem [shape: f32[1,256], index: 4, kind: input, shape index: {}]   ;;  %s17479_s9 = inlined_call_operand.vmem [shape: f32[512,128], index: 9, kind: input, shape index: {}]   ;;  %s17480_s7 = inlined_call_operand.vmem [shape: f32[1,512], index: 7, kind: input, shape index: {}]   ;;  %s17481_s8 = inlined_call_operand.vmem [shape: f32[16,512], index: 8, kind: input, shape index: {}]   ;;  %s17482_s10 = inlined_call_operand.vmem [shape: f32[1,8,128], index: 10, kind: output, shape index: {}]  }
   0x1   :  { %v12084_v0 = vld [vmem:[%s17472_s1 + $0x40] sm:$0xff]   ;;  %v12086_v2 = vld [vmem:[%s17472_s1 + $0x48] sm:$0xff]   ;;  %v12088_v4 = vld [vmem:[%s17472_s1 + $0x50] sm:$0xff]   ;;  %5086 = vmatprep.mubr.bf16.mxu1 %v13567_v43 }
   0x2   :  { %v12085_v1 = vld [vmem:[%s17472_s1] sm:$0xff]   ;;  %11597 = vmatprep.subr.bf16.mxu0 %v12084_v0  ;;  %v12087_v3 = vld [vmem:[%s17472_s1 + $0x8] sm:$0xff]   ;;  %v12089_v5 = vld [vmem:[%s17472_s1 + $0x10] sm:$0xff]  }
   0x3   :  { %11598 = vmatpush3.bf16.msra.mxu0 %v12085_v1  ;;  %v12090_v6 = vld [vmem:[%s17472_s1 + $0x58] sm:$0xff]   ;;  %v12092_v8 = vld [vmem:[%s17472_s1 + $0x60] sm:$0xff]   ;;  %v12094_v10 = vld [vmem:[%s17472_s1 + $0x68] sm:$0xff]  }
   0x4   :  { %11599 = vmatprep.subr.bf16.mxu0 %v12086_v2  ;;  %v12091_v7 = vld [vmem:[%s17472_s1 + $0x18] sm:$0xff]   ;;  %v12093_v9 = vld [vmem:[%s17472_s1 + $0x20] sm:$0xff]   ;;  %v12095_v12 = vld [vmem:[%s17472_s1 + $0x28] sm:$0xff]  }
   0x5   :  { %v12102_v11 = vld [vmem:[%s17473_s0 + $0x4] ss:$8 sps:$4 sm:$0xff]   ;;  %v12096_v13 = vld [vmem:[%s17472_s1 + $0x70] sm:$0xff]   ;;  %v12098_v15 = vld [vmem:[%s17472_s1 + $0x78] sm:$0xff]  }
   0x6   :  { %348 = vmatprep.mubr.bf16.mxu0 %v12102_v11  ;;  %v12097_v14 = vld [vmem:[%s17472_s1 + $0x30] sm:$0xff]   ;;  %v12099_v16 = vld [vmem:[%s17472_s1 + $0x38] sm:$0xff]   ;;  %v12100_v17 = vld [vmem:[%s17473_s0] ss:$8 sps:$4 sm:$0xff]  }
   0x7   :  { %11600 = vmatpush3.bf16.msra.mxu0 %v12087_v3  ;;  %v12103_v18 = vld [vmem:[%s17473_s0 + $0x14] ss:$8 sps:$4 sm:$0xff]   ;;  %v12105_v19 = vld [vmem:[%s17473_s0 + $0x10] ss:$8 sps:$4 sm:$0xff]   ;;  %v12106_v20 = vld [vmem:[%s17473_s0 + $0x24] ss:$8 sps:$4 sm:$0xff]  }
   0x8   :  { %11601 = vmatprep.subr.bf16.mxu0 %v12088_v4  ;;  %v12108_v21 = vld [vmem:[%s17473_s0 + $0x20] ss:$8 sps:$4 sm:$0xff]   ;;  %v12109_v22 = vld [vmem:[%s17473_s0 + $0x34] ss:$8 sps:$4 sm:$0xff]   ;;  %v12111_v23 = vld [vmem:[%s17473_s0 + $0x30] ss:$8 sps:$4 sm:$0xff]  }
   0x9   :  { %v12112_v24 = vld [vmem:[%s17473_s0 + $0x44] ss:$8 sps:$4 sm:$0xff]   ;;  %v12114_v25 = vld [vmem:[%s17473_s0 + $0x40] ss:$8 sps:$4 sm:$0xff]   ;;  %v12115_v26 = vld [vmem:[%s17473_s0 + $0x54] ss:$8 sps:$4 sm:$0xff]  }
   0xa   :  { %v12117_v27 = vld [vmem:[%s17473_s0 + $0x50] ss:$8 sps:$4 sm:$0xff]   ;;  %v12118_v28 = vld [vmem:[%s17473_s0 + $0x64] ss:$8 sps:$4 sm:$0xff]   ;;  %v12120_v29 = vld [vmem:[%s17473_s0 + $0x60] ss:$8 sps:$4 sm:$0xff]  }
   0xb   :  { %11602 = vmatpush3.bf16.msra.mxu0 %v12089_v5  ;;  %v12121_v30 = vld [vmem:[%s17473_s0 + $0x74] ss:$8 sps:$4 sm:$0xff]   ;;  %v12123_v31 = vld [vmem:[%s17473_s0 + $0x70] ss:$8 sps:$4 sm:$0xff]   ;;  %v12124_v32 = vld [vmem:[%s17473_s0 + $0x84] ss:$8 sps:$4 sm:$0xff]  }
   0xc   :  { %11603 = vmatprep.subr.bf16.mxu0 %v12090_v6  ;;  %v12126_v33 = vld [vmem:[%s17473_s0 + $0x80] ss:$8 sps:$4 sm:$0xff]   ;;  %v12127_v34 = vld [vmem:[%s17473_s0 + $0x94] ss:$8 sps:$4 sm:$0xff]   ;;  %v12129_v35 = vld [vmem:[%s17473_s0 + $0x90] ss:$8 sps:$4 sm:$0xff]  }
   0xd   :  { %v12130_v36 = vld [vmem:[%s17473_s0 + $0xa4] ss:$8 sps:$4 sm:$0xff]   ;;  %v12132_v37 = vld [vmem:[%s17473_s0 + $0xa0] ss:$8 sps:$4 sm:$0xff]   ;;  %v12133_v38 = vld [vmem:[%s17473_s0 + $0xb4] ss:$8 sps:$4 sm:$0xff]  }
   0xe   :  { %v60_v39 = vld [vmem:[%s17473_s0 + $0xc0] sm:$0x33]  ;;  %v12135_v40 = vld [vmem:[%s17473_s0 + $0xb0] ss:$8 sps:$4 sm:$0xff]  }
   0xf   :  { %11604 = vmatpush3.bf16.msra.mxu0 %v12091_v7  ;;  %v9809_v41 = vcombine.high %v60_v39, %v60_v39  ;;  %v9808_v42 = vcombine.low %v60_v39, %v60_v39  ;;  %v12140_v44 = vld [vmem:[%s17474_s2 + $0x4] ss:$8 sps:$4 sm:$0xff]  }
  0x10   :  { %11605 = vmatprep.subr.bf16.mxu0 %v12092_v8 }
  0x13   :  { %11606 = vmatpush3.bf16.msra.mxu0 %v12093_v9 }
  0x14   :  { %11607 = vmatprep.subr.bf16.mxu0 %v12094_v10 }
  0x17   :  { %11608 = vmatpush3.bf16.msra.mxu0 %v12095_v12 }
  0x18   :  { %11609 = vmatprep.subr.bf16.mxu0 %v12096_v13 }
  0x1b   :  { %11610 = vmatpush3.bf16.msra.mxu0 %v12097_v14 }
  0x1c   :  { %11611 = vmatprep.subr.bf16.mxu0 %v12098_v15 }
  0x1f   :  { %11612 = vmatpush3.bf16.msra.mxu0 %v12099_v16 }
  0x20   :  { %1329 = vmatprep.subr.bf16.mxu0 %v13567_v43 }
  0x22   :  { %349 = vmatmul.mubr.bf16.vlgmr.msra.gmra.mrb[0].mxu0 %v12100_v17 }
  0x23   :  { %356 = vmatprep.mubr.bf16.mxu0 %v12103_v18 }
  0x2a   :  { %357 = vmatmul.mubr.bf16.gmra.mrb[4].mxu0 %v12105_v19 }
  0x2b   :  { %364 = vmatprep.mubr.bf16.mxu0 %v12106_v20 }
  0x32   :  { %365 = vmatmul.mubr.bf16.gmra.mrb[8].mxu0 %v12108_v21 }
  0x33   :  { %372 = vmatprep.mubr.bf16.mxu0 %v12109_v22 }
  0x3a   :  { %373 = vmatmul.mubr.bf16.gmra.mrb[12].mxu0 %v12111_v23 }
  0x3b   :  { %380 = vmatprep.mubr.bf16.mxu0 %v12112_v24 }
  0x42   :  { %381 = vmatmul.mubr.bf16.gmra.mrb[16].mxu0 %v12114_v25 }
  0x43   :  { %388 = vmatprep.mubr.bf16.mxu0 %v12115_v26 }
  0x4a   :  { %389 = vmatmul.mubr.bf16.gmra.mrb[20].mxu0 %v12117_v27 }
  0x4b   :  { %396 = vmatprep.mubr.bf16.mxu0 %v12118_v28 }
  0x52   :  { %397 = vmatmul.mubr.bf16.gmra.mrb[24].mxu0 %v12120_v29 }
  0x53   :  { %404 = vmatprep.mubr.bf16.mxu0 %v12121_v30 }
  0x5a   :  { %405 = vmatmul.mubr.bf16.gmra.mrb[28].mxu0 %v12123_v31 }
  0x5b   :  { %412 = vmatprep.mubr.bf16.mxu0 %v12124_v32 }
  0x62   :  { %413 = vmatmul.mubr.bf16.gmra.mrb[32].mxu0 %v12126_v33 }
  0x63   :  { %420 = vmatprep.mubr.bf16.mxu0 %v12127_v34 }
  0x6a   :  { %421 = vmatmul.mubr.bf16.gmra.mrb[36].mxu0 %v12129_v35 }
  0x6b   :  { %428 = vmatprep.mubr.bf16.mxu0 %v12130_v36 }
  0x72   :  { %429 = vmatmul.mubr.bf16.gmra.mrb[40].mxu0 %v12132_v37 }
  0x73   :  { %436 = vmatprep.mubr.bf16.mxu0 %v12133_v38 }
  0x7a   :  { %437 = vmatmul.mubr.bf16.gmra.mrb[44].mxu0 %v12135_v40 }
  0x7b   :  { %444 = vmatprep.mubr.bf16.mxu0 %v9809_v41 }
  0x82   :  { %445 = vmatmul.mubr.bf16.gmra.mrb[48].mxu0 %v9808_v42 }
  0x83   :  { %9938 = vmatprep.mubr.msk.bf16.mxu0 %vm1156_vm0, %v12140_v44 }
  0xf5   :  { %v11613_v45 = vpop.f32.mrb[0].mxu0 }
  0xf6   :  { %v11614_v46 = vpop.f32.mrb[1].mxu0 }
  0xf7   :  { %v11615_v47 = vadd.f32 %v11614_v46, %v11613_v45  ;;  %v11616_v48 = vpop.f32.mrb[2].mxu0 }
  0xf8   :  { %v11617_v49 = vpop.f32.mrb[3].mxu0 }
  0xf9   :  { %v477_v50 = vmul.f32 0.2, %v11615_v47  ;;  %v11618_v51 = vadd.f32 %v11617_v49, %v11616_v48  ;;  %vm452_vm1 = vcmp.ge.f32.partialorder %v11615_v47, 0.0 }
  0xfb   :  { %vm453_vm2 = vcmp.ge.f32.partialorder %v11618_v51, 0.0  ;;  %v478_v52 = vmul.f32 0.2, %v11618_v51  ;;  %v502_v53 = vsel %vm452_vm1, %v11615_v47, %v477_v50 }
  0xfd   :  { %v503_v54 = vsel %vm453_vm2, %v11618_v51, %v478_v52  ;;  %v11619_v55 = vpop.f32.mrb[4].mxu0 }
  0xfe   :  { %v11620_v56 = vpop.f32.mrb[5].mxu0  ;;  %v527_v57 = vpack.c.bf16 %v503_v54, %v502_v53 }
  0xff   :  { %v11621_v58 = vadd.f32 %v11620_v56, %v11619_v55  ;;  %v11622_v59 = vpop.f32.mrb[6].mxu0 }
 0x100   :  { %v11623_v60 = vpop.f32.mrb[7].mxu0  ;;  %1330 = vmatpush1.bf16.msra.mxu0 %v527_v57 }
 0x101   :  { %v479_v61 = vmul.f32 0.2, %v11621_v58  ;;  %v11624_v62 = vadd.f32 %v11623_v60, %v11622_v59  ;;  %1331 = vmatprep.subr.bf16.mxu0 %v13567_v43  ;;  %vm454_vm3 = vcmp.ge.f32.partialorder %v11621_v58, 0.0 }
 0x103   :  { %vm455_vm4 = vcmp.ge.f32.partialorder %v11624_v62, 0.0  ;;  %v480_v63 = vmul.f32 0.2, %v11624_v62  ;;  %v504_v0 = vsel %vm454_vm3, %v11621_v58, %v479_v61 }
 0x105   :  { %v505_v1 = vsel %vm455_vm4, %v11624_v62, %v480_v63  ;;  %v11625_v2 = vpop.f32.mrb[8].mxu0 }
 0x106   :  { %v11626_v3 = vpop.f32.mrb[9].mxu0  ;;  %v528_v4 = vpack.c.bf16 %v505_v1, %v504_v0 }
 0x107   :  { %v11627_v5 = vadd.f32 %v11626_v3, %v11625_v2  ;;  %v11628_v6 = vpop.f32.mrb[10].mxu0 }
 0x108   :  { %v11629_v7 = vpop.f32.mrb[11].mxu0  ;;  %1332 = vmatpush1.bf16.msra.mxu0 %v528_v4 }
 0x109   :  { %v481_v8 = vmul.f32 0.2, %v11627_v5  ;;  %v11630_v9 = vadd.f32 %v11629_v7, %v11628_v6  ;;  %1333 = vmatprep.subr.bf16.mxu0 %v13567_v43  ;;  %vm456_vm5 = vcmp.ge.f32.partialorder %v11627_v5, 0.0 }
 0x10b   :  { %vm457_vm6 = vcmp.ge.f32.partialorder %v11630_v9, 0.0  ;;  %v482_v10 = vmul.f32 0.2, %v11630_v9  ;;  %v506_v11 = vsel %vm456_vm5, %v11627_v5, %v481_v8 }
 0x10d   :  { %v507_v12 = vsel %vm457_vm6, %v11630_v9, %v482_v10  ;;  %v11631_v13 = vpop.f32.mrb[12].mxu0 }
 0x10e   :  { %v11632_v14 = vpop.f32.mrb[13].mxu0  ;;  %v529_v15 = vpack.c.bf16 %v507_v12, %v506_v11 }
 0x10f   :  { %v11633_v16 = vadd.f32 %v11632_v14, %v11631_v13  ;;  %v11634_v17 = vpop.f32.mrb[14].mxu0 }
 0x110   :  { %v11635_v18 = vpop.f32.mrb[15].mxu0  ;;  %1334 = vmatpush1.bf16.msra.mxu0 %v529_v15 }
 0x111   :  { %v483_v19 = vmul.f32 0.2, %v11633_v16  ;;  %v11636_v20 = vadd.f32 %v11635_v18, %v11634_v17  ;;  %1335 = vmatprep.subr.bf16.mxu0 %v13567_v43  ;;  %vm458_vm7 = vcmp.ge.f32.partialorder %v11633_v16, 0.0 }
 0x113   :  { %vm459_vm8 = vcmp.ge.f32.partialorder %v11636_v20, 0.0  ;;  %v484_v21 = vmul.f32 0.2, %v11636_v20  ;;  %v508_v22 = vsel %vm458_vm7, %v11633_v16, %v483_v19 }
 0x115   :  { %v509_v23 = vsel %vm459_vm8, %v11636_v20, %v484_v21  ;;  %v11637_v24 = vpop.f32.mrb[16].mxu0 }
 0x116   :  { %v11638_v25 = vpop.f32.mrb[17].mxu0  ;;  %v530_v26 = vpack.c.bf16 %v509_v23, %v508_v22 }
 0x117   :  { %v11639_v27 = vadd.f32 %v11638_v25, %v11637_v24  ;;  %v11640_v28 = vpop.f32.mrb[18].mxu0 }
 0x118   :  { %v11641_v29 = vpop.f32.mrb[19].mxu0  ;;  %1336 = vmatpush1.bf16.msra.mxu0 %v530_v26 }
 0x119   :  { %v485_v30 = vmul.f32 0.2, %v11639_v27  ;;  %v11642_v31 = vadd.f32 %v11641_v29, %v11640_v28  ;;  %1337 = vmatprep.subr.bf16.mxu0 %v13567_v43  ;;  %vm460_vm9 = vcmp.ge.f32.partialorder %v11639_v27, 0.0 }
 0x11b   :  { %vm461_vm10 = vcmp.ge.f32.partialorder %v11642_v31, 0.0  ;;  %v486_v32 = vmul.f32 0.2, %v11642_v31  ;;  %v510_v33 = vsel %vm460_vm9, %v11639_v27, %v485_v30 }
 0x11d   :  { %v511_v34 = vsel %vm461_vm10, %v11642_v31, %v486_v32  ;;  %v11643_v35 = vpop.f32.mrb[20].mxu0 }
 0x11e   :  { %v11644_v36 = vpop.f32.mrb[21].mxu0  ;;  %v531_v37 = vpack.c.bf16 %v511_v34, %v510_v33 }
 0x11f   :  { %v11646_v38 = vpop.f32.mrb[22].mxu0  ;;  %v11645_v39 = vadd.f32 %v11644_v36, %v11643_v35 }
 0x120   :  { %v11647_v40 = vpop.f32.mrb[23].mxu0  ;;  %1338 = vmatpush1.bf16.msra.mxu0 %v531_v37 }
 0x121   :  { %1339 = vmatprep.subr.bf16.mxu0 %v13567_v43  ;;  %v11648_v41 = vadd.f32 %v11647_v40, %v11646_v38  ;;  %v487_v42 = vmul.f32 0.2, %v11645_v39  ;;  %vm462_vm11 = vcmp.ge.f32.partialorder %v11645_v39, 0.0 }
 0x123   :  { %vm463_vm12 = vcmp.ge.f32.partialorder %v11648_v41, 0.0  ;;  %v488_v44 = vmul.f32 0.2, %v11648_v41  ;;  %v512_v46 = vsel %vm462_vm11, %v11645_v39, %v487_v42  ;;  %vm1325_vm11 = vcmask 1041408  }
 0x125   :  { %v11649_v45 = vpop.f32.mrb[24].mxu0  ;;  %v513_v47 = vsel %vm463_vm12, %v11648_v41, %v488_v44  ;;  %vm1903_vm12 = vcmask 1043456  }
 0x126   :  { %v11650_v48 = vpop.f32.mrb[25].mxu0  ;;  %v532_v49 = vpack.c.bf16 %v513_v47, %v512_v46 }
 0x127   :  { %v11652_v50 = vpop.f32.mrb[26].mxu0  ;;  %v11651_v51 = vadd.f32 %v11650_v48, %v11649_v45 }
 0x128   :  { %v11653_v52 = vpop.f32.mrb[27].mxu0  ;;  %1340 = vmatpush1.bf16.msra.mxu0 %v532_v49 }
 0x129   :  { %1341 = vmatprep.subr.bf16.mxu0 %v13567_v43  ;;  %v11654_v53 = vadd.f32 %v11653_v52, %v11652_v50  ;;  %v489_v54 = vmul.f32 0.2, %v11651_v51  ;;  %vm464_vm13 = vcmp.ge.f32.partialorder %v11651_v51, 0.0 }
 0x12b   :  { %vm465_vm14 = vcmp.ge.f32.partialorder %v11654_v53, 0.0  ;;  %v490_v55 = vmul.f32 0.2, %v11654_v53  ;;  %v514_v57 = vsel %vm464_vm13, %v11651_v51, %v489_v54 }
 0x12d   :  { %v11655_v56 = vpop.f32.mrb[28].mxu0  ;;  %v515_v58 = vsel %vm465_vm14, %v11654_v53, %v490_v55 }
 0x12e   :  { %v11656_v59 = vpop.f32.mrb[29].mxu0  ;;  %v533_v60 = vpack.c.bf16 %v515_v58, %v514_v57  ;;  %v12143_v58 = vld [vmem:[%s17475_s3 + $0x84] ss:$8 sps:$4 sm:$0xff]  }
 0x12f   :  { %v11658_v61 = vpop.f32.mrb[30].mxu0  ;;  %v11657_v62 = vadd.f32 %v11656_v59, %v11655_v56 }
 0x130   :  { %v11659_v63 = vpop.f32.mrb[31].mxu0  ;;  %1342 = vmatpush1.bf16.msra.mxu0 %v533_v60  ;;  %v12138_v60 = vld [vmem:[%s17474_s2] ss:$8 sps:$4 sm:$0xff]  }
 0x131   :  { %1343 = vmatprep.subr.bf16.mxu0 %v13567_v43  ;;  %v11660_v0 = vadd.f32 %v11659_v63, %v11658_v61  ;;  %v491_v1 = vmul.f32 0.2, %v11657_v62  ;;  %vm466_vm15 = vcmp.ge.f32.partialorder %v11657_v62, 0.0  ;;  %v12141_v61 = vld [vmem:[%s17475_s3 + $0x80] ss:$8 sps:$4 sm:$0xff]  }
 0x133   :  { %vm467_vm1 = vcmp.ge.f32.partialorder %v11660_v0, 0.0  ;;  %v492_v2 = vmul.f32 0.2, %v11660_v0  ;;  %v516_v4 = vsel %vm466_vm15, %v11657_v62, %v491_v1  ;;  %v12144_v62 = vld [vmem:[%s17474_s2 + $0x14] ss:$8 sps:$4 sm:$0xff]  }
 0x134   :  { %v12165_v1 = vld [vmem:[%s17475_s3 + $0x90] ss:$8 sps:$4 sm:$0xff]  }
 0x135   :  { %v11661_v3 = vpop.f32.mrb[32].mxu0  ;;  %v517_v5 = vsel %vm467_vm1, %v11660_v0, %v492_v2  ;;  %v12167_v0 = vld [vmem:[%s17475_s3 + $0x94] ss:$8 sps:$4 sm:$0xff]   ;;  %v12191_v2 = vld [vmem:[%s17475_s3 + $0xa4] ss:$8 sps:$4 sm:$0xff]  }
 0x136   :  { %v11662_v6 = vpop.f32.mrb[33].mxu0  ;;  %v534_v7 = vpack.c.bf16 %v517_v5, %v516_v4  ;;  %v12147_v4 = vld [vmem:[%s17474_s2 + $0x24] ss:$8 sps:$4 sm:$0xff]   ;;  %v12189_v5 = vld [vmem:[%s17475_s3 + $0xa0] ss:$8 sps:$4 sm:$0xff]  }
 0x137   :  { %v11663_v8 = vadd.f32 %v11662_v6, %v11661_v3  ;;  %v11664_v9 = vpop.f32.mrb[34].mxu0  ;;  %v12146_v3 = vld [vmem:[%s17474_s2 + $0x10] ss:$8 sps:$4 sm:$0xff]   ;;  %v12149_v6 = vld [vmem:[%s17474_s2 + $0x20] ss:$8 sps:$4 sm:$0xff]  }
 0x138   :  { %v11665_v10 = vpop.f32.mrb[35].mxu0  ;;  %1344 = vmatpush1.bf16.msra.mxu0 %v534_v7  ;;  %v12150_v7 = vld [vmem:[%s17474_s2 + $0x34] ss:$8 sps:$4 sm:$0xff]  }
 0x139   :  { %v493_v11 = vmul.f32 0.2, %v11663_v8  ;;  %v11666_v12 = vadd.f32 %v11665_v10, %v11664_v9  ;;  %1345 = vmatprep.subr.bf16.mxu0 %v13567_v43  ;;  %vm468_vm2 = vcmp.ge.f32.partialorder %v11663_v8, 0.0  ;;  %v12153_v9 = vld [vmem:[%s17474_s2 + $0x44] ss:$8 sps:$4 sm:$0xff]  }
 0x13a   :  { %v12155_v10 = vld [vmem:[%s17474_s2 + $0x40] ss:$8 sps:$4 sm:$0xff]  }
 0x13b   :  { %vm469_vm3 = vcmp.ge.f32.partialorder %v11666_v12, 0.0  ;;  %v494_v13 = vmul.f32 0.2, %v11666_v12  ;;  %v518_v14 = vsel %vm468_vm2, %v11663_v8, %v493_v11  ;;  %v12152_v8 = vld [vmem:[%s17474_s2 + $0x30] ss:$8 sps:$4 sm:$0xff]  }
 0x13c   :  { %v12156_v11 = vld [vmem:[%s17474_s2 + $0x54] ss:$8 sps:$4 sm:$0xff]  }
 0x13d   :  { %v519_v15 = vsel %vm469_vm3, %v11666_v12, %v494_v13  ;;  %v11667_v16 = vpop.f32.mrb[36].mxu0  ;;  %v12158_v12 = vld [vmem:[%s17474_s2 + $0x50] ss:$8 sps:$4 sm:$0xff]   ;;  %v12159_v13 = vld [vmem:[%s17474_s2 + $0x64] ss:$8 sps:$4 sm:$0xff]  }
 0x13e   :  { %v11668_v17 = vpop.f32.mrb[37].mxu0  ;;  %v535_v18 = vpack.c.bf16 %v519_v15, %v518_v14  ;;  %v12213_v14 = vld [vmem:[%s17475_s3 + $0xb0] ss:$8 sps:$4 sm:$0xff]   ;;  %v12215_v15 = vld [vmem:[%s17475_s3 + $0xb4] ss:$8 sps:$4 sm:$0xff]  }
 0x13f   :  { %v11669_v19 = vadd.f32 %v11668_v17, %v11667_v16  ;;  %v11670_v20 = vpop.f32.mrb[38].mxu0  ;;  %v12161_v16 = vld [vmem:[%s17474_s2 + $0x60] ss:$8 sps:$4 sm:$0xff]   ;;  %v12162_v17 = vld [vmem:[%s17474_s2 + $0x74] ss:$8 sps:$4 sm:$0xff]  }
 0x140   :  { %v11671_v21 = vpop.f32.mrb[39].mxu0  ;;  %1346 = vmatpush1.bf16.msra.mxu0 %v535_v18  ;;  %v12164_v18 = vld [vmem:[%s17474_s2 + $0x70] ss:$8 sps:$4 sm:$0xff]  }
 0x141   :  { %v495_v22 = vmul.f32 0.2, %v11669_v19  ;;  %v11672_v23 = vadd.f32 %v11671_v21, %v11670_v20  ;;  %1347 = vmatprep.subr.bf16.mxu0 %v13567_v43  ;;  %vm470_vm4 = vcmp.ge.f32.partialorder %v11669_v19, 0.0  ;;  %v12170_v20 = vld [vmem:[%s17474_s2 + $0x80] ss:$8 sps:$4 sm:$0xff]  }
 0x142   :  { %v12171_v21 = vld [vmem:[%s17474_s2 + $0x94] ss:$8 sps:$4 sm:$0xff]  }
 0x143   :  { %vm471_vm5 = vcmp.ge.f32.partialorder %v11672_v23, 0.0  ;;  %v496_v24 = vmul.f32 0.2, %v11672_v23  ;;  %v520_v25 = vsel %vm470_vm4, %v11669_v19, %v495_v22  ;;  %v12168_v19 = vld [vmem:[%s17474_s2 + $0x84] ss:$8 sps:$4 sm:$0xff]  }
 0x144   :  { %v12173_v22 = vld [vmem:[%s17474_s2 + $0x90] ss:$8 sps:$4 sm:$0xff]  }
 0x145   :  { %v521_v26 = vsel %vm471_vm5, %v11672_v23, %v496_v24  ;;  %v11673_v27 = vpop.f32.mrb[40].mxu0  ;;  %v12174_v23 = vld [vmem:[%s17474_s2 + $0xa4] ss:$8 sps:$4 sm:$0xff]   ;;  %v12176_v24 = vld [vmem:[%s17474_s2 + $0xa0] ss:$8 sps:$4 sm:$0xff]  }
 0x146   :  { %v11674_v28 = vpop.f32.mrb[41].mxu0  ;;  %v536_v29 = vpack.c.bf16 %v521_v26, %v520_v25  ;;  %v12177_v25 = vld [vmem:[%s17474_s2 + $0xb4] ss:$8 sps:$4 sm:$0xff]   ;;  %v12179_v26 = vld [vmem:[%s17474_s2 + $0xb0] ss:$8 sps:$4 sm:$0xff]  }
 0x147   :  { %v11675_v30 = vadd.f32 %v11674_v28, %v11673_v27  ;;  %v11676_v31 = vpop.f32.mrb[42].mxu0  ;;  %v12180_v27 = vld [vmem:[%s17474_s2 + $0xc4] ss:$8 sps:$4 sm:$0xff]   ;;  %v12182_v28 = vld [vmem:[%s17474_s2 + $0xc0] ss:$8 sps:$4 sm:$0xff]  }
 0x148   :  { %v11677_v32 = vpop.f32.mrb[43].mxu0  ;;  %1348 = vmatpush1.bf16.msra.mxu0 %v536_v29  ;;  %v12183_v29 = vld [vmem:[%s17474_s2 + $0xd4] ss:$8 sps:$4 sm:$0xff]  }
 0x149   :  { %v497_v33 = vmul.f32 0.2, %v11675_v30  ;;  %v11678_v34 = vadd.f32 %v11677_v32, %v11676_v31  ;;  %1349 = vmatprep.subr.bf16.mxu0 %v13567_v43  ;;  %vm472_vm6 = vcmp.ge.f32.partialorder %v11675_v30, 0.0  ;;  %v12239_v31 = vld [vmem:[%s17475_s3 + $0xc4] ss:$8 sps:$4 sm:$0xff]  }
 0x14a   :  { %v12185_v32 = vld [vmem:[%s17474_s2 + $0xd0] ss:$8 sps:$4 sm:$0xff]  }
 0x14b   :  { %vm473_vm7 = vcmp.ge.f32.partialorder %v11678_v34, 0.0  ;;  %v498_v35 = vmul.f32 0.2, %v11678_v34  ;;  %v522_v36 = vsel %vm472_vm6, %v11675_v30, %v497_v33  ;;  %v12237_v30 = vld [vmem:[%s17475_s3 + $0xc0] ss:$8 sps:$4 sm:$0xff]  }
 0x14c   :  { %v12186_v33 = vld [vmem:[%s17474_s2 + $0xe4] ss:$8 sps:$4 sm:$0xff]  }
 0x14d   :  { %v523_v37 = vsel %vm473_vm7, %v11678_v34, %v498_v35  ;;  %v11679_v38 = vpop.f32.mrb[44].mxu0  ;;  %v12188_v34 = vld [vmem:[%s17474_s2 + $0xe0] ss:$8 sps:$4 sm:$0xff]   ;;  %v12192_v35 = vld [vmem:[%s17474_s2 + $0xf4] ss:$8 sps:$4 sm:$0xff]  }
 0x14e   :  { %v11680_v39 = vpop.f32.mrb[45].mxu0  ;;  %v537_v40 = vpack.c.bf16 %v523_v37, %v522_v36  ;;  %v12194_v36 = vld [vmem:[%s17474_s2 + $0xf0] ss:$8 sps:$4 sm:$0xff]   ;;  %v12195_v37 = vld [vmem:[%s17474_s2 + $0x104] ss:$8 sps:$4 sm:$0xff]  }
 0x14f   :  { %v11681_v41 = vadd.f32 %v11680_v39, %v11679_v38  ;;  %v11682_v42 = vpop.f32.mrb[46].mxu0  ;;  %v12197_v38 = vld [vmem:[%s17474_s2 + $0x100] ss:$8 sps:$4 sm:$0xff]   ;;  %v12198_v39 = vld [vmem:[%s17474_s2 + $0x114] ss:$8 sps:$4 sm:$0xff]  }
 0x150   :  { %v11683_v44 = vpop.f32.mrb[47].mxu0  ;;  %1350 = vmatpush1.bf16.msra.mxu0 %v537_v40  ;;  %v12200_v40 = vld [vmem:[%s17474_s2 + $0x110] ss:$8 sps:$4 sm:$0xff]  }
 0x151   :  { %v499_v45 = vmul.f32 0.2, %v11681_v41  ;;  %v11684_v46 = vadd.f32 %v11683_v44, %v11682_v42  ;;  %1351 = vmatprep.subr.bf16.mxu0 %v13567_v43  ;;  %vm474_vm8 = vcmp.ge.f32.partialorder %v11681_v41, 0.0  ;;  %v12203_v42 = vld [vmem:[%s17474_s2 + $0x120] ss:$8 sps:$4 sm:$0xff]  }
 0x152   :  { %v12204_v44 = vld [vmem:[%s17474_s2 + $0x134] ss:$8 sps:$4 sm:$0xff]  }
 0x153   :  { %vm475_vm9 = vcmp.ge.f32.partialorder %v11684_v46, 0.0  ;;  %v500_v47 = vmul.f32 0.2, %v11684_v46  ;;  %v524_v48 = vsel %vm474_vm8, %v11681_v41, %v499_v45  ;;  %v12201_v41 = vld [vmem:[%s17474_s2 + $0x124] ss:$8 sps:$4 sm:$0xff]  }
 0x154   :  { %v12206_v45 = vld [vmem:[%s17474_s2 + $0x130] ss:$8 sps:$4 sm:$0xff]  }
 0x155   :  { %v525_v49 = vsel %vm475_vm9, %v11684_v46, %v500_v47  ;;  %v11685_v50 = vpop.f32.mrb[48].mxu0  ;;  %v12207_v46 = vld [vmem:[%s17474_s2 + $0x144] ss:$8 sps:$4 sm:$0xff]   ;;  %v12261_v47 = vld [vmem:[%s17475_s3 + $0xd0] ss:$8 sps:$4 sm:$0xff]  }
 0x156   :  { %v11686_v51 = vpop.f32.mrb[49].mxu0  ;;  %v538_v52 = vpack.c.bf16 %v525_v49, %v524_v48  ;;  %v12263_v48 = vld [vmem:[%s17475_s3 + $0xd4] ss:$8 sps:$4 sm:$0xff]   ;;  %v12209_v49 = vld [vmem:[%s17474_s2 + $0x140] ss:$8 sps:$4 sm:$0xff]  }
 0x157   :  { %v11687_v53 = vadd.f32 %v11686_v51, %v11685_v50  ;;  %v11688_v54 = vpop.f32.mrb[50].mxu0  ;;  %v12210_v50 = vld [vmem:[%s17474_s2 + $0x154] ss:$8 sps:$4 sm:$0xff]   ;;  %v12212_v51 = vld [vmem:[%s17474_s2 + $0x150] ss:$8 sps:$4 sm:$0xff]  }
 0x158   :  { %v11689_v55 = vpop.f32.mrb[51].mxu0  ;;  %1352 = vmatpush1.bf16.msra.mxu0 %v538_v52  ;;  %v12216_v52 = vld [vmem:[%s17474_s2 + $0x164] ss:$8 sps:$4 sm:$0xff]   ;;  %v12219_v54 = vld [vmem:[%s17474_s2 + $0x174] ss:$8 sps:$4 sm:$0xff]  }
 0x159   :  { %v501_v56 = vmul.f32 0.2, %v11687_v53  ;;  %1353 = vmatprep.subr.bf16.mxu0 %v13567_v43  ;;  %vm476_vm10 = vcmp.ge.f32.partialorder %v11687_v53, 0.0  ;;  %v12221_v55 = vld [vmem:[%s17474_s2 + $0x170] ss:$8 sps:$4 sm:$0xff]  }
 0x15b   :  { %v526_v57 = vsel %vm476_vm10, %v11687_v53, %v501_v56  ;;  %v12218_v53 = vld [vmem:[%s17474_s2 + $0x160] ss:$8 sps:$4 sm:$0xff]   ;;  %v12222_v56 = vld [vmem:[%s17474_s2 + $0x184] ss:$8 sps:$4 sm:$0xff]  }
 0x15c   :  { %v539_v59 = vpack.c.bf16 %v526_v57, %v526_v57  ;;  %v12224_v57 = vld [vmem:[%s17474_s2 + $0x180] ss:$8 sps:$4 sm:$0xff]  }
 0x15e   :  { %v1327_v63 = vsel %vm1325_vm11, %v539_v59, 0  ;;  %v12227_v59 = vld [vmem:[%s17474_s2 + $0x190] ss:$8 sps:$4 sm:$0xff]   ;;  %vm5009_vm11 = vcmask 457728  }
 0x15f   :  { %1354 = vmatpush1.bf16.msra.mxu0 %v1327_v63  ;;  %v12285_v63 = vld [vmem:[%s17475_s3 + $0xe0] ss:$8 sps:$4 sm:$0xff]  }
 0x160   :  { %1995 = vmatprep.subr.bf16.mxu0 %v12143_v58  ;;  %v12225_v58 = vld [vmem:[%s17474_s2 + $0x194] ss:$8 sps:$4 sm:$0xff]  }
 0x162   :  { %1362 = vmatmul.mubr.bf16.vlgmr.msra.gmra.mrb[52].mxu0 %v12138_v60  ;;  %v12228_v60 = vld [vmem:[%s17474_s2 + $0x1a4] ss:$8 sps:$4 sm:$0xff]  }
 0x163   :  { %1996 = vmatpush1.bf16.msra.mxu0 %v12141_v61  ;;  %9939 = vmatprep.mubr.msk.bf16.mxu0 %vm1156_vm0, %v12144_v62  ;;  %v12230_v61 = vld [vmem:[%s17474_s2 + $0x1a0] ss:$8 sps:$4 sm:$0xff]   ;;  %v12231_v62 = vld [vmem:[%s17474_s2 + $0x1b4] ss:$8 sps:$4 sm:$0xff]  }
 0x164   :  { %1997 = vmatprep.subr.bf16.mxu0 %v12167_v0  ;;  %v12287_v0 = vld [vmem:[%s17475_s3 + $0xe4] ss:$8 sps:$4 sm:$0xff]  }
 0x167   :  { %1998 = vmatpush1.bf16.msra.mxu0 %v12165_v1 }
 0x168   :  { %1999 = vmatprep.subr.bf16.mxu0 %v12191_v2 }
 0x16a   :  { %1370 = vmatmul.mubr.bf16.gmra.mrb[56].mxu0 %v12146_v3  ;;  %v12233_v3 = vld [vmem:[%s17474_s2 + $0x1b0] ss:$8 sps:$4 sm:$0xff]  }
 0x16b   :  { %9940 = vmatprep.mubr.msk.bf16.mxu0 %vm1156_vm0, %v12147_v4  ;;  %2000 = vmatpush1.bf16.msra.mxu0 %v12189_v5  ;;  %v12234_v5 = vld [vmem:[%s17474_s2 + $0x1c4] ss:$8 sps:$4 sm:$0xff]  }
 0x16c   :  { %2001 = vmatprep.subr.bf16.mxu0 %v12215_v15 }
 0x16f   :  { %2002 = vmatpush1.bf16.msra.mxu0 %v12213_v14 }
 0x170   :  { %2003 = vmatprep.subr.bf16.mxu0 %v12239_v31  ;;  %v12248_v31 = vld [vmem:[%s17474_s2 + $0x1f0] ss:$8 sps:$4 sm:$0xff]  }
 0x172   :  { %1378 = vmatmul.mubr.bf16.gmra.mrb[60].mxu0 %v12149_v6 }
 0x173   :  { %9941 = vmatprep.mubr.msk.bf16.mxu0 %vm1156_vm0, %v12150_v7  ;;  %2004 = vmatpush1.bf16.msra.mxu0 %v12237_v30 }
 0x174   :  { %2005 = vmatprep.subr.bf16.mxu0 %v12263_v48 }
 0x177   :  { %2006 = vmatpush1.bf16.msra.mxu0 %v12261_v47 }
 0x178   :  { %2007 = vmatprep.subr.bf16.mxu0 %v12287_v0  ;;  %v12258_v0 = vld [vmem:[%s17474_s2 + $0x234] ss:$8 sps:$4 sm:$0xff]  }
 0x17a   :  { %1386 = vmatmul.mubr.bf16.gmra.mrb[64].mxu0 %v12152_v8 }
 0x17b   :  { %9942 = vmatprep.mubr.msk.bf16.mxu0 %vm1156_vm0, %v12153_v9  ;;  %2008 = vmatpush1.bf16.msra.mxu0 %v12285_v63 }
 0x182   :  { %1394 = vmatmul.mubr.bf16.gmra.mrb[68].mxu0 %v12155_v10  ;;  %v12236_v10 = vld [vmem:[%s17474_s2 + $0x1c0] ss:$8 sps:$4 sm:$0xff]  }
 0x183   :  { %9943 = vmatprep.mubr.msk.bf16.mxu0 %vm1156_vm0, %v12156_v11 }
 0x18a   :  { %1402 = vmatmul.mubr.bf16.gmra.mrb[72].mxu0 %v12158_v12  ;;  %v12240_v12 = vld [vmem:[%s17474_s2 + $0x1d4] ss:$8 sps:$4 sm:$0xff]  }
 0x18b   :  { %9944 = vmatprep.mubr.msk.bf16.mxu0 %vm1156_vm0, %v12159_v13 }
 0x192   :  { %1410 = vmatmul.mubr.bf16.gmra.mrb[76].mxu0 %v12161_v16 }
 0x193   :  { %9945 = vmatprep.mubr.msk.bf16.mxu0 %vm1156_vm0, %v12162_v17  ;;  %v12242_v17 = vld [vmem:[%s17474_s2 + $0x1d0] ss:$8 sps:$4 sm:$0xff]  }
 0x19a   :  { %1418 = vmatmul.mubr.bf16.gmra.mrb[80].mxu0 %v12164_v18 }
 0x19b   :  { %9946 = vmatprep.mubr.msk.bf16.mxu0 %vm1156_vm0, %v12168_v19  ;;  %v12243_v19 = vld [vmem:[%s17474_s2 + $0x1e4] ss:$8 sps:$4 sm:$0xff]  }
 0x1a2   :  { %1426 = vmatmul.mubr.bf16.gmra.mrb[84].mxu0 %v12170_v20 }
 0x1a3   :  { %9947 = vmatprep.mubr.msk.bf16.mxu0 %vm1156_vm0, %v12171_v21 }
 0x1aa   :  { %1434 = vmatmul.mubr.bf16.gmra.mrb[88].mxu0 %v12173_v22 }
 0x1ab   :  { %9948 = vmatprep.mubr.msk.bf16.mxu0 %vm1156_vm0, %v12174_v23 }
 0x1b2   :  { %1442 = vmatmul.mubr.bf16.gmra.mrb[92].mxu0 %v12176_v24  ;;  %v12245_v24 = vld [vmem:[%s17474_s2 + $0x1e0] ss:$8 sps:$4 sm:$0xff]  }
 0x1b3   :  { %9949 = vmatprep.mubr.msk.bf16.mxu0 %vm1156_vm0, %v12177_v25 }
 0x1ba   :  { %1450 = vmatmul.mubr.bf16.gmra.mrb[96].mxu0 %v12179_v26  ;;  %v12246_v26 = vld [vmem:[%s17474_s2 + $0x1f4] ss:$8 sps:$4 sm:$0xff]  }
 0x1bb   :  { %9950 = vmatprep.mubr.msk.bf16.mxu0 %vm1156_vm0, %v12180_v27 }
 0x1c2   :  { %1458 = vmatmul.mubr.bf16.gmra.mrb[100].mxu0 %v12182_v28 }
 0x1c3   :  { %9951 = vmatprep.mubr.msk.bf16.mxu0 %vm1156_vm0, %v12183_v29 }
 0x1ca   :  { %1466 = vmatmul.mubr.bf16.gmra.mrb[104].mxu0 %v12185_v32 }
 0x1cb   :  { %9952 = vmatprep.mubr.msk.bf16.mxu0 %vm1156_vm0, %v12186_v33  ;;  %v12249_v33 = vld [vmem:[%s17474_s2 + $0x204] ss:$8 sps:$4 sm:$0xff]  }
 0x1d2   :  { %1474 = vmatmul.mubr.bf16.gmra.mrb[108].mxu0 %v12188_v34 }
 0x1d3   :  { %9953 = vmatprep.mubr.msk.bf16.mxu0 %vm1156_vm0, %v12192_v35 }
 0x1da   :  { %1482 = vmatmul.mubr.bf16.gmra.mrb[112].mxu0 %v12194_v36 }
 0x1db   :  { %9954 = vmatprep.mubr.msk.bf16.mxu0 %vm1156_vm0, %v12195_v37 }
 0x1e2   :  { %1490 = vmatmul.mubr.bf16.gmra.mrb[116].mxu0 %v12197_v38 }
 0x1e3   :  { %9955 = vmatprep.mubr.msk.bf16.mxu0 %vm1156_vm0, %v12198_v39 }
 0x1ea   :  { %1498 = vmatmul.mubr.bf16.gmra.mrb[120].mxu0 %v12200_v40 }
 0x1eb   :  { %9956 = vmatprep.mubr.msk.bf16.mxu0 %vm1156_vm0, %v12201_v41  ;;  %v12251_v41 = vld [vmem:[%s17474_s2 + $0x200] ss:$8 sps:$4 sm:$0xff]  }
 0x1f2   :  { %1506 = vmatmul.mubr.bf16.gmra.mrb[124].mxu0 %v12203_v42 }
 0x1f3   :  { %9957 = vmatprep.mubr.msk.bf16.mxu0 %vm1156_vm0, %v12204_v44  ;;  %v12252_v44 = vld [vmem:[%s17474_s2 + $0x214] ss:$8 sps:$4 sm:$0xff]  }
 0x1fa   :  { %1514 = vmatmul.mubr.bf16.gmra.mrb[128].mxu0 %v12206_v45 }
 0x1fb   :  { %9958 = vmatprep.mubr.msk.bf16.mxu0 %vm1156_vm0, %v12207_v46 }
 0x202   :  { %1522 = vmatmul.mubr.bf16.gmra.mrb[132].mxu0 %v12209_v49 }
 0x203   :  { %9959 = vmatprep.mubr.msk.bf16.mxu0 %vm1156_vm0, %v12210_v50 }
 0x20a   :  { %1530 = vmatmul.mubr.bf16.gmra.mrb[136].mxu0 %v12212_v51  ;;  %v12254_v51 = vld [vmem:[%s17474_s2 + $0x210] ss:$8 sps:$4 sm:$0xff]  }
 0x20b   :  { %9960 = vmatprep.mubr.msk.bf16.mxu0 %vm1156_vm0, %v12216_v52 }
 0x212   :  { %1538 = vmatmul.mubr.bf16.gmra.mrb[140].mxu0 %v12218_v53  ;;  %v12255_v53 = vld [vmem:[%s17474_s2 + $0x224] ss:$8 sps:$4 sm:$0xff]  }
 0x213   :  { %9961 = vmatprep.mubr.msk.bf16.mxu0 %vm1156_vm0, %v12219_v54 }
 0x21a   :  { %1546 = vmatmul.mubr.bf16.gmra.mrb[144].mxu0 %v12221_v55 }
 0x21b   :  { %9962 = vmatprep.mubr.msk.bf16.mxu0 %vm1156_vm0, %v12222_v56 }
 0x222   :  { %1554 = vmatmul.mubr.bf16.gmra.mrb[148].mxu0 %v12224_v57  ;;  %v12309_v57 = vld [vmem:[%s17475_s3 + $0xf0] ss:$8 sps:$4 sm:$0xff]  }
 0x223   :  { %9963 = vmatprep.mubr.msk.bf16.mxu0 %vm1156_vm0, %v12225_v58  ;;  %v12311_v58 = vld [vmem:[%s17475_s3 + $0xf4] ss:$8 sps:$4 sm:$0xff]  }
 0x224   :  { %2009 = vmatprep.subr.bf16.mxu0 %v12311_v58 }
 0x225   :  { %2010 = vmatpush1.bf16.msra.mxu0 %v12309_v57 }
 0x22a   :  { %1562 = vmatmul.mubr.bf16.gmra.mrb[152].mxu0 %v12227_v59 }
 0x22b   :  { %9964 = vmatprep.mubr.msk.bf16.mxu0 %vm1156_vm0, %v12228_v60 }
 0x232   :  { %1570 = vmatmul.mubr.bf16.gmra.mrb[156].mxu0 %v12230_v61 }
 0x233   :  { %9965 = vmatprep.mubr.msk.bf16.mxu0 %vm1156_vm0, %v12231_v62  ;;  %v12257_v62 = vld [vmem:[%s17474_s2 + $0x220] ss:$8 sps:$4 sm:$0xff]  }
 0x235   :  { %v13995_v1 = vpop.f32.mrb[52].mxu0 }
 0x236   :  { %v1365_v2 = vpop.f32.mrb[53].mxu0 }
 0x237   :  { %v14000_v4 = vpop.f32.mrb[54].mxu0 }
 0x238   :  { %v1810_v6 = vpack.c.bf16 %v14000_v4, %v13995_v1  ;;  %v1368_v7 = vpop.f32.mrb[55].mxu0  ;;  %v12360_v1 = vld [vmem:[%s17475_s3 + $0x120] ss:$8 sps:$4 sm:$0xff]  }
 0x23a   :  { %1578 = vmatmul.mubr.bf16.gmra.mrb[160].mxu0 %v12233_v3 }
 0x23b   :  { %9966 = vmatprep.mubr.msk.bf16.mxu0 %vm1156_vm0, %v12234_v5 }
 0x23d   :  { %v14008_v8 = vpop.f32.mrb[56].mxu0 }
 0x23e   :  { %v1373_v9 = vpop.f32.mrb[57].mxu0 }
 0x23f   :  { %v14013_v11 = vpop.f32.mrb[58].mxu0  ;;  %v12260_v9 = vld [vmem:[%s17474_s2 + $0x230] ss:$8 sps:$4 sm:$0xff]  }
 0x240   :  { %v1811_v13 = vpack.c.bf16 %v14013_v11, %v14008_v8  ;;  %v1376_v14 = vpop.f32.mrb[59].mxu0 }
 0x242   :  { %1586 = vmatmul.mubr.bf16.gmra.mrb[164].mxu0 %v12236_v10 }
 0x243   :  { %9967 = vmatprep.mubr.msk.bf16.mxu0 %vm1156_vm0, %v12240_v12  ;;  %v12264_v12 = vld [vmem:[%s17474_s2 + $0x244] ss:$8 sps:$4 sm:$0xff]  }
 0x245   :  { %v14021_v15 = vpop.f32.mrb[60].mxu0 }
 0x246   :  { %v1381_v16 = vpop.f32.mrb[61].mxu0 }
 0x247   :  { %v14026_v18 = vpop.f32.mrb[62].mxu0 }
 0x248   :  { %v1812_v20 = vpack.c.bf16 %v14026_v18, %v14021_v15  ;;  %v1384_v21 = vpop.f32.mrb[63].mxu0  ;;  %v12372_v15 = vld [vmem:[%s17475_s3 + $0x160] ss:$8 sps:$4 sm:$0xff]  }
 0x249   :  { %v12266_v21 = vld [vmem:[%s17474_s2 + $0x240] ss:$8 sps:$4 sm:$0xff]  }
 0x24a   :  { %1594 = vmatmul.mubr.bf16.gmra.mrb[168].mxu0 %v12242_v17 }
 0x24b   :  { %9968 = vmatprep.mubr.msk.bf16.mxu0 %vm1156_vm0, %v12243_v19 }
 0x24d   :  { %v1387_v22 = vpop.f32.mrb[64].mxu0 }
 0x24e   :  { %v1389_v23 = vpop.f32.mrb[65].mxu0 }
 0x24f   :  { %v1390_v25 = vpop.f32.mrb[66].mxu0  ;;  %v12267_v23 = vld [vmem:[%s17474_s2 + $0x254] ss:$8 sps:$4 sm:$0xff]  }
 0x250   :  { %v14040_v27 = vpack.c.bf16 %v1390_v25, %v1387_v22  ;;  %v1392_v28 = vpop.f32.mrb[67].mxu0 }
 0x252   :  { %1602 = vmatmul.mubr.bf16.gmra.mrb[172].mxu0 %v12245_v24  ;;  %v1904_v36 = vrot.slane %v14040_v27, 4  ;;  %v12353_v24 = vld [vmem:[%s17475_s3 + $0x74] ss:$8 sps:$4 sm:$0xff]  }
 0x253   :  { %9969 = vmatprep.mubr.msk.bf16.mxu0 %vm1156_vm0, %v12246_v26 }
 0x255   :  { %v1395_v29 = vpop.f32.mrb[68].mxu0 }
 0x256   :  { %v1397_v30 = vpop.f32.mrb[69].mxu0 }
 0x257   :  { %v1398_v32 = vpop.f32.mrb[70].mxu0 }
 0x258   :  { %v1814_v34 = vpack.c.bf16 %v1398_v32, %v1395_v29  ;;  %v1400_v35 = vpop.f32.mrb[71].mxu0  ;;  %v12269_v29 = vld [vmem:[%s17474_s2 + $0x250] ss:$8 sps:$4 sm:$0xff]  }
 0x25a   :  { %v1905_v37 = vrot.slane %v1814_v34, 4  ;;  %1610 = vmatmul.mubr.bf16.gmra.mrb[176].mxu0 %v12248_v31  ;;  %v12270_v31 = vld [vmem:[%s17474_s2 + $0x264] ss:$8 sps:$4 sm:$0xff]  }
 0x25b   :  { %9970 = vmatprep.mubr.msk.bf16.mxu0 %vm1156_vm0, %v12249_v33 }
 0x25c   :  { %v14052_v38 = vsel %vm1903_vm12, %v1904_v36, %v1905_v37  ;;  %v12272_v36 = vld [vmem:[%s17474_s2 + $0x260] ss:$8 sps:$4 sm:$0xff]  }
 0x25d   :  { %v1403_v39 = vpop.f32.mrb[72].mxu0 }
 0x25e   :  { %v1405_v40 = vpop.f32.mrb[73].mxu0 }
 0x25f   :  { %v1406_v42 = vpop.f32.mrb[74].mxu0 }
 0x260   :  { %v1815_v45 = vpack.c.bf16 %v1406_v42, %v1403_v39  ;;  %v1408_v46 = vpop.f32.mrb[75].mxu0  ;;  %v12273_v39 = vld [vmem:[%s17474_s2 + $0x274] ss:$8 sps:$4 sm:$0xff]  }
 0x262   :  { %v1907_v47 = vrot.slane %v1815_v45, 4  ;;  %1618 = vmatmul.mubr.bf16.gmra.mrb[180].mxu0 %v12251_v41 }
 0x263   :  { %9971 = vmatprep.mubr.msk.bf16.mxu0 %vm1156_vm0, %v12252_v44 }
 0x264   :  { %v14062_v48 = vsel %vm1903_vm12, %v1905_v37, %v1907_v47 }
 0x265   :  { %v1411_v49 = vpop.f32.mrb[76].mxu0 }
 0x266   :  { %v1413_v50 = vpop.f32.mrb[77].mxu0 }
 0x267   :  { %v1414_v52 = vpop.f32.mrb[78].mxu0 }
 0x268   :  { %v1816_v54 = vpack.c.bf16 %v1414_v52, %v1411_v49  ;;  %v1416_v55 = vpop.f32.mrb[79].mxu0  ;;  %v12275_v49 = vld [vmem:[%s17474_s2 + $0x270] ss:$8 sps:$4 sm:$0xff]  }
 0x26a   :  { %v14070_v56 = vrot.slane %v1816_v54, 4  ;;  %1626 = vmatmul.mubr.bf16.gmra.mrb[184].mxu0 %v12254_v51  ;;  %v12276_v51 = vld [vmem:[%s17474_s2 + $0x284] ss:$8 sps:$4 sm:$0xff]  }
 0x26b   :  { %9972 = vmatprep.mubr.msk.bf16.mxu0 %vm1156_vm0, %v12255_v53 }
 0x26c   :  { %v14081_v59 = vsel %vm1903_vm12, %v1907_v47, %v14070_v56 }
 0x26d   :  { %v14083_v60 = vpop.f32.mrb[80].mxu0 }
 0x26e   :  { %v1421_v61 = vpop.f32.mrb[81].mxu0 }
 0x26f   :  { %v14088_v63 = vpop.f32.mrb[82].mxu0  ;;  %v12278_v61 = vld [vmem:[%s17474_s2 + $0x280] ss:$8 sps:$4 sm:$0xff]  }
 0x270   :  { %v1817_v2 = vpack.c.bf16 %v14088_v63, %v14083_v60  ;;  %v1424_v3 = vpop.f32.mrb[83].mxu0  ;;  %v12384_v60 = vld [vmem:[%s17475_s3 + $0x1a0] ss:$8 sps:$4 sm:$0xff]  }
 0x272   :  { %1634 = vmatmul.mubr.bf16.gmra.mrb[188].mxu0 %v12257_v62 }
 0x273   :  { %9973 = vmatprep.mubr.msk.bf16.mxu0 %vm1156_vm0, %v12258_v0  ;;  %v12279_v0 = vld [vmem:[%s17474_s2 + $0x294] ss:$8 sps:$4 sm:$0xff]  }
 0x275   :  { %v14096_v5 = vpop.f32.mrb[84].mxu0 }
 0x276   :  { %v1429_v7 = vpop.f32.mrb[85].mxu0 }
 0x277   :  { %v14101_v10 = vpop.f32.mrb[86].mxu0 }
 0x278   :  { %v1432_v16 = vpop.f32.mrb[87].mxu0 }
 0x27a   :  { %1642 = vmatmul.mubr.bf16.gmra.mrb[192].mxu0 %v12260_v9  ;;  %v12332_v9 = vld [vmem:[%s17475_s3 + $0x4] ss:$8 sps:$4 sm:$0xff]  }
 0x27b   :  { %9974 = vmatprep.mubr.msk.bf16.mxu0 %vm1156_vm0, %v12264_v12  ;;  %2146 = vmatprep.subr.bf16.mxu0 %v12332_v9 }
 0x27d   :  { %v14109_v17 = vpop.f32.mrb[88].mxu0 }
 0x27e   :  { %v1437_v19 = vpop.f32.mrb[89].mxu0 }
 0x27f   :  { %v14114_v22 = vpop.f32.mrb[90].mxu0 }
 0x280   :  { %v1440_v25 = vpop.f32.mrb[91].mxu0 }
 0x282   :  { %1650 = vmatmul.mubr.bf16.gmra.mrb[196].mxu0 %v12266_v21 }
 0x283   :  { %9975 = vmatprep.mubr.msk.bf16.mxu0 %vm1156_vm0, %v12267_v23  ;;  %v12281_v23 = vld [vmem:[%s17474_s2 + $0x290] ss:$8 sps:$4 sm:$0xff]  }
 0x285   :  { %v1443_v26 = vpop.f32.mrb[92].mxu0 }
 0x286   :  { %v1445_v28 = vpop.f32.mrb[93].mxu0 }
 0x287   :  { %v1446_v30 = vpop.f32.mrb[94].mxu0 }
 0x288   :  { %v14128_v32 = vpack.c.bf16 %v1446_v30, %v1443_v26  ;;  %v1448_v33 = vpop.f32.mrb[95].mxu0  ;;  %v12282_v26 = vld [vmem:[%s17474_s2 + $0x2a4] ss:$8 sps:$4 sm:$0xff]  }
 0x289   :  { %v12284_v33 = vld [vmem:[%s17474_s2 + $0x2a0] ss:$8 sps:$4 sm:$0xff]  }
 0x28a   :  { %1658 = vmatmul.mubr.bf16.gmra.mrb[200].mxu0 %v12269_v29  ;;  %v2420_v42 = vrot.slane %v14128_v32, 4 }
 0x28b   :  { %9976 = vmatprep.mubr.msk.bf16.mxu0 %vm1156_vm0, %v12270_v31 }
 0x28d   :  { %v1451_v34 = vpop.f32.mrb[96].mxu0 }
 0x28e   :  { %v1453_v35 = vpop.f32.mrb[97].mxu0 }
 0x28f   :  { %v1454_v37 = vpop.f32.mrb[98].mxu0  ;;  %v12288_v35 = vld [vmem:[%s17474_s2 + $0x2b4] ss:$8 sps:$4 sm:$0xff]  }
 0x290   :  { %v1821_v40 = vpack.c.bf16 %v1454_v37, %v1451_v34  ;;  %v1456_v41 = vpop.f32.mrb[99].mxu0 }
 0x291   :  { %v12290_v41 = vld [vmem:[%s17474_s2 + $0x2b0] ss:$8 sps:$4 sm:$0xff]  }
 0x292   :  { %v2421_v44 = vrot.slane %v1821_v40, 4  ;;  %1666 = vmatmul.mubr.bf16.gmra.mrb[204].mxu0 %v12272_v36 }
 0x293   :  { %9977 = vmatprep.mubr.msk.bf16.mxu0 %vm1156_vm0, %v12273_v39 }
 0x294   :  { %v14140_v45 = vsel %vm1903_vm12, %v2420_v42, %v2421_v44 }
 0x295   :  { %v1459_v46 = vpop.f32.mrb[100].mxu0 }
 0x296   :  { %v1461_v47 = vpop.f32.mrb[101].mxu0 }
 0x297   :  { %v1462_v50 = vpop.f32.mrb[102].mxu0 }
 0x298   :  { %v1822_v52 = vpack.c.bf16 %v1462_v50, %v1459_v46  ;;  %v1464_v53 = vpop.f32.mrb[103].mxu0  ;;  %v12329_v46 = vld [vmem:[%s17474_s2 + $0x374] ss:$8 sps:$4 sm:$0xff]  }
 0x299   :  { %v12294_v53 = vld [vmem:[%s17474_s2 + $0x2d4] ss:$8 sps:$4 sm:$0xff]  }
 0x29a   :  { %v2423_v54 = vrot.slane %v1822_v52, 4  ;;  %1674 = vmatmul.mubr.bf16.gmra.mrb[208].mxu0 %v12275_v49 }
 0x29b   :  { %9978 = vmatprep.mubr.msk.bf16.mxu0 %vm1156_vm0, %v12276_v51  ;;  %v12293_v51 = vld [vmem:[%s17474_s2 + $0x2c0] ss:$8 sps:$4 sm:$0xff]  }
 0x29c   :  { %v14150_v55 = vsel %vm1903_vm12, %v2421_v44, %v2423_v54  ;;  %v12291_v44 = vld [vmem:[%s17474_s2 + $0x2c4] ss:$8 sps:$4 sm:$0xff]  }
 0x29d   :  { %v1467_v57 = vpop.f32.mrb[104].mxu0 }
 0x29e   :  { %v1469_v58 = vpop.f32.mrb[105].mxu0 }
 0x29f   :  { %v1470_v62 = vpop.f32.mrb[106].mxu0 }
 0x2a0   :  { %v1823_v3 = vpack.c.bf16 %v1470_v62, %v1467_v57  ;;  %v1472_v7 = vpop.f32.mrb[107].mxu0  ;;  %v12296_v62 = vld [vmem:[%s17474_s2 + $0x2d0] ss:$8 sps:$4 sm:$0xff]  }
 0x2a2   :  { %v14161_v12 = vrot.slane %v1823_v3, 4  ;;  %1682 = vmatmul.mubr.bf16.gmra.mrb[212].mxu0 %v12278_v61  ;;  %v12297_v3 = vld [vmem:[%s17474_s2 + $0x2e4] ss:$8 sps:$4 sm:$0xff]  }
 0x2a3   :  { %9979 = vmatprep.mubr.msk.bf16.mxu0 %vm1156_vm0, %v12279_v0 }
 0x2a4   :  { %v14166_v16 = vsel %vm1903_vm12, %v2423_v54, %v14161_v12 }
 0x2a5   :  { %v14168_v19 = vpop.f32.mrb[108].mxu0 }
 0x2a6   :  { %v1477_v21 = vpop.f32.mrb[109].mxu0 }
 0x2a7   :  { %v14173_v25 = vpop.f32.mrb[110].mxu0 }
 0x2a8   :  { %v1480_v29 = vpop.f32.mrb[111].mxu0 }
 0x2aa   :  { %1690 = vmatmul.mubr.bf16.gmra.mrb[216].mxu0 %v12281_v23 }
 0x2ab   :  { %9980 = vmatprep.mubr.msk.bf16.mxu0 %vm1156_vm0, %v12282_v26 }
 0x2ad   :  { %v14181_v30 = vpop.f32.mrb[112].mxu0 }
 0x2ae   :  { %v1485_v31 = vpop.f32.mrb[113].mxu0 }
 0x2af   :  { %v14186_v34 = vpop.f32.mrb[114].mxu0 }
 0x2b0   :  { %v1488_v37 = vpop.f32.mrb[115].mxu0 }
 0x2b1   :  { %v12300_v37 = vld [vmem:[%s17474_s2 + $0x2f4] ss:$8 sps:$4 sm:$0xff]  }
 0x2b2   :  { %1698 = vmatmul.mubr.bf16.gmra.mrb[220].mxu0 %v12284_v33  ;;  %v12299_v33 = vld [vmem:[%s17474_s2 + $0x2e0] ss:$8 sps:$4 sm:$0xff]  }
 0x2b3   :  { %9981 = vmatprep.mubr.msk.bf16.mxu0 %vm1156_vm0, %v12288_v35 }
 0x2b5   :  { %v14194_v39 = vpop.f32.mrb[116].mxu0 }
 0x2b6   :  { %v1493_v40 = vpop.f32.mrb[117].mxu0 }
 0x2b7   :  { %v14199_v42 = vpop.f32.mrb[118].mxu0 }
 0x2b8   :  { %v1496_v47 = vpop.f32.mrb[119].mxu0 }
 0x2ba   :  { %1706 = vmatmul.mubr.bf16.gmra.mrb[224].mxu0 %v12290_v41 }
 0x2bb   :  { %9982 = vmatprep.mubr.msk.bf16.mxu0 %vm1156_vm0, %v12291_v44 }
 0x2bd   :  { %v1499_v49 = vpop.f32.mrb[120].mxu0 }
 0x2be   :  { %v1501_v50 = vpop.f32.mrb[121].mxu0 }
 0x2bf   :  { %v1502_v52 = vpop.f32.mrb[122].mxu0 }
 0x2c0   :  { %v14213_v54 = vpack.c.bf16 %v1502_v52, %v1499_v49  ;;  %v1504_v57 = vpop.f32.mrb[123].mxu0 }
 0x2c2   :  { %1714 = vmatmul.mubr.bf16.gmra.mrb[228].mxu0 %v12293_v51  ;;  %v2799_v21 = vrot.slane %v14213_v54, 4  ;;  %v12302_v51 = vld [vmem:[%s17474_s2 + $0x2f0] ss:$8 sps:$4 sm:$0xff]  }
 0x2c3   :  { %9983 = vmatprep.mubr.msk.bf16.mxu0 %vm1156_vm0, %v12294_v53  ;;  %v12303_v53 = vld [vmem:[%s17474_s2 + $0x304] ss:$8 sps:$4 sm:$0xff]  }
 0x2c5   :  { %v1507_v58 = vpop.f32.mrb[124].mxu0 }
 0x2c6   :  { %v1509_v61 = vpop.f32.mrb[125].mxu0 }
 0x2c7   :  { %v1510_v0 = vpop.f32.mrb[126].mxu0 }
 0x2c8   :  { %v1828_v7 = vpack.c.bf16 %v1510_v0, %v1507_v58  ;;  %v1512_v9 = vpop.f32.mrb[127].mxu0 }
 0x2ca   :  { %v2800_v23 = vrot.slane %v1828_v7, 4  ;;  %1722 = vmatmul.mubr.bf16.gmra.mrb[232].mxu0 %v12296_v62  ;;  %v12305_v7 = vld [vmem:[%s17474_s2 + $0x300] ss:$8 sps:$4 sm:$0xff]  }
 0x2cb   :  { %9984 = vmatprep.mubr.msk.bf16.mxu0 %vm1156_vm0, %v12297_v3 }
 0x2cc   :  { %v14225_v26 = vsel %vm1903_vm12, %v2799_v21, %v2800_v23  ;;  %v12306_v21 = vld [vmem:[%s17474_s2 + $0x314] ss:$8 sps:$4 sm:$0xff]  }
 0x2cd   :  { %v1515_v29 = vpop.f32.mrb[128].mxu0 }
 0x2ce   :  { %v1517_v31 = vpop.f32.mrb[129].mxu0 }
 0x2cf   :  { %v1518_v35 = vpop.f32.mrb[130].mxu0 }
 0x2d0   :  { %v1829_v40 = vpack.c.bf16 %v1518_v35, %v1515_v29  ;;  %v1520_v41 = vpop.f32.mrb[131].mxu0  ;;  %v12308_v35 = vld [vmem:[%s17474_s2 + $0x310] ss:$8 sps:$4 sm:$0xff]  }
 0x2d2   :  { %v2802_v44 = vrot.slane %v1829_v40, 4  ;;  %1730 = vmatmul.mubr.bf16.gmra.mrb[236].mxu0 %v12299_v33  ;;  %v12312_v40 = vld [vmem:[%s17474_s2 + $0x324] ss:$8 sps:$4 sm:$0xff]  }
 0x2d3   :  { %9985 = vmatprep.mubr.msk.bf16.mxu0 %vm1156_vm0, %v12300_v37 }
 0x2d4   :  { %v14235_v47 = vsel %vm1903_vm12, %v2800_v23, %v2802_v44 }
 0x2d5   :  { %v1523_v49 = vpop.f32.mrb[132].mxu0 }
 0x2d6   :  { %v1525_v50 = vpop.f32.mrb[133].mxu0 }
 0x2d7   :  { %v1526_v52 = vpop.f32.mrb[134].mxu0 }
 0x2d8   :  { %v1830_v57 = vpack.c.bf16 %v1526_v52, %v1523_v49  ;;  %v1528_v58 = vpop.f32.mrb[135].mxu0 }
 0x2da   :  { %v14243_v61 = vrot.slane %v1830_v57, 4  ;;  %1738 = vmatmul.mubr.bf16.gmra.mrb[240].mxu0 %v12302_v51  ;;  %v12314_v51 = vld [vmem:[%s17474_s2 + $0x320] ss:$8 sps:$4 sm:$0xff]  }
 0x2db   :  { %9986 = vmatprep.mubr.msk.bf16.mxu0 %vm1156_vm0, %v12303_v53  ;;  %v12317_v53 = vld [vmem:[%s17474_s2 + $0x334] ss:$8 sps:$4 sm:$0xff]  }
 0x2dc   :  { %v14248_v62 = vsel %vm1903_vm12, %v2802_v44, %v14243_v61 }
 0x2dd   :  { %v14250_v0 = vpop.f32.mrb[136].mxu0 }
 0x2de   :  { %v1533_v3 = vpop.f32.mrb[137].mxu0 }
 0x2df   :  { %v14255_v9 = vpop.f32.mrb[138].mxu0 }
 0x2e0   :  { %v1536_v29 = vpop.f32.mrb[139].mxu0 }
 0x2e2   :  { %1746 = vmatmul.mubr.bf16.gmra.mrb[244].mxu0 %v12305_v7 }
 0x2e3   :  { %9987 = vmatprep.mubr.msk.bf16.mxu0 %vm1156_vm0, %v12306_v21  ;;  %v12315_v21 = vld [vmem:[%s17474_s2 + $0x330] ss:$8 sps:$4 sm:$0xff]  }
 0x2e5   :  { %v14263_v31 = vpop.f32.mrb[140].mxu0 }
 0x2e6   :  { %v1541_v33 = vpop.f32.mrb[141].mxu0 }
 0x2e7   :  { %v14268_v37 = vpop.f32.mrb[142].mxu0  ;;  %v12320_v33 = vld [vmem:[%s17474_s2 + $0x344] ss:$8 sps:$4 sm:$0xff]  }
 0x2e8   :  { %v1544_v44 = vpop.f32.mrb[143].mxu0 }
 0x2ea   :  { %1754 = vmatmul.mubr.bf16.gmra.mrb[248].mxu0 %v12308_v35 }
 0x2eb   :  { %9988 = vmatprep.mubr.msk.bf16.mxu0 %vm1156_vm0, %v12312_v40 }
 0x2ed   :  { %v14276_v49 = vpop.f32.mrb[144].mxu0 }
 0x2ee   :  { %v1549_v50 = vpop.f32.mrb[145].mxu0 }
 0x2ef   :  { %v14281_v52 = vpop.f32.mrb[146].mxu0 }
 0x2f0   :  { %v1552_v58 = vpop.f32.mrb[147].mxu0 }
 0x2f1   :  { %v12323_v58 = vld [vmem:[%s17474_s2 + $0x354] ss:$8 sps:$4 sm:$0xff]  }
 0x2f2   :  { %1762 = vmatmul.mubr.bf16.gmra.mrb[252].mxu0 %v12314_v51  ;;  %v12318_v51 = vld [vmem:[%s17474_s2 + $0x340] ss:$8 sps:$4 sm:$0xff]  }
 0x2f3   :  { %9989 = vmatprep.mubr.msk.bf16.mxu0 %vm1156_vm0, %v12317_v53 }
 0x2f5   :  { %v1555_v3 = vpop.f32.mrb[148].mxu0 }
 0x2f6   :  { %v1557_v7 = vpop.f32.mrb[149].mxu0 }
 0x2f7   :  { %v1558_v29 = vpop.f32.mrb[150].mxu0 }
 0x2f8   :  { %v14295_v35 = vpack.c.bf16 %v1558_v29, %v1555_v3  ;;  %v1560_v40 = vpop.f32.mrb[151].mxu0 }
 0x2fa   :  { %1770 = vmatmul.mubr.bf16.gmra.mrb[0].mxu0 %v12315_v21  ;;  %v3178_v3 = vrot.slane %v14295_v35, 4 }
 0x2fb   :  { %9990 = vmatprep.mubr.msk.bf16.mxu0 %vm1156_vm0, %v12320_v33 }
 0x2fd   :  { %v1563_v44 = vpop.f32.mrb[152].mxu0 }
 0x2fe   :  { %v1565_v50 = vpop.f32.mrb[153].mxu0 }
 0x2ff   :  { %v1566_v53 = vpop.f32.mrb[154].mxu0  ;;  %v12321_v50 = vld [vmem:[%s17474_s2 + $0x350] ss:$8 sps:$4 sm:$0xff]  }
 0x300   :  { %v1835_v7 = vpack.c.bf16 %v1566_v53, %v1563_v44  ;;  %v1568_v57 = vpop.f32.mrb[155].mxu0 }
 0x301   :  { %v12326_v57 = vld [vmem:[%s17474_s2 + $0x364] ss:$8 sps:$4 sm:$0xff]  }
 0x302   :  { %v3179_v29 = vrot.slane %v1835_v7, 4  ;;  %1778 = vmatmul.mubr.bf16.gmra.mrb[4].mxu0 %v12318_v51 }
 0x303   :  { %9991 = vmatprep.mubr.msk.bf16.mxu0 %vm1156_vm0, %v12323_v58 }
 0x304   :  { %v14307_v21 = vsel %vm1903_vm12, %v3178_v3, %v3179_v29 }
 0x305   :  { %v1571_v33 = vpop.f32.mrb[156].mxu0 }
 0x306   :  { %v1573_v40 = vpop.f32.mrb[157].mxu0 }
 0x307   :  { %v1574_v41 = vpop.f32.mrb[158].mxu0  ;;  %v12324_v40 = vld [vmem:[%s17474_s2 + $0x360] ss:$8 sps:$4 sm:$0xff]  }
 0x308   :  { %v1836_v44 = vpack.c.bf16 %v1574_v41, %v1571_v33  ;;  %v1576_v53 = vpop.f32.mrb[159].mxu0 }
 0x309   :  { %v12327_v53 = vld [vmem:[%s17474_s2 + $0x370] ss:$8 sps:$4 sm:$0xff]  }
 0x30a   :  { %v3181_v7 = vrot.slane %v1836_v44, 4  ;;  %1786 = vmatmul.mubr.bf16.gmra.mrb[8].mxu0 %v12321_v50 }
 0x30b   :  { %9992 = vmatprep.mubr.msk.bf16.mxu0 %vm1156_vm0, %v12326_v57 }
 0x30c   :  { %v14317_v51 = vsel %vm1903_vm12, %v3179_v29, %v3181_v7 }
 0x30d   :  { %v1579_v58 = vpop.f32.mrb[160].mxu0 }
 0x30e   :  { %v1581_v3 = vpop.f32.mrb[161].mxu0 }
 0x30f   :  { %v1582_v23 = vpop.f32.mrb[162].mxu0 }
 0x310   :  { %v1837_v41 = vpack.c.bf16 %v1582_v23, %v1579_v58  ;;  %v1584_v33 = vpop.f32.mrb[163].mxu0 }
 0x312   :  { %v14325_v44 = vrot.slane %v1837_v41, 4  ;;  %1794 = vmatmul.mubr.bf16.gmra.mrb[12].mxu0 %v12324_v40  ;;  %v12330_v41 = vld [vmem:[%s17475_s3] ss:$8 sps:$4 sm:$0xff]  }
 0x313   :  { %9993 = vmatprep.mubr.msk.bf16.mxu0 %vm1156_vm0, %v12329_v46 }
 0x314   :  { %v14330_v29 = vsel %vm1903_vm12, %v3181_v7, %v14325_v44 }
 0x315   :  { %v14332_v50 = vpop.f32.mrb[164].mxu0 }
 0x316   :  { %v1589_v57 = vpop.f32.mrb[165].mxu0 }
 0x317   :  { %v14337_v3 = vpop.f32.mrb[166].mxu0 }
 0x318   :  { %v1592_v58 = vpop.f32.mrb[167].mxu0 }
 0x319   :  { %v12335_v58 = vld [vmem:[%s17475_s3 + $0x14] ss:$8 sps:$4 sm:$0xff]  }
 0x31a   :  { %1802 = vmatmul.mubr.bf16.gmra.mrb[16].mxu0 %v12327_v53  ;;  %v12333_v53 = vld [vmem:[%s17475_s3 + $0x10] ss:$8 sps:$4 sm:$0xff]  }
 0x31b   :  { %2027 = vmatprep.mubr.bf16.mxu0 %v13567_v43 }
 0x31d   :  { %v14342_v46 = vpop.f32.mrb[168].mxu0 }
 0x31e   :  { %v1597_v7 = vpop.f32.mrb[169].mxu0 }
 0x31f   :  { %v14344_v40 = vpop.f32.mrb[170].mxu0  ;;  %v12338_v7 = vld [vmem:[%s17475_s3 + $0x24] ss:$8 sps:$4 sm:$0xff]  }
 0x320   :  { %v1600_v57 = vpop.f32.mrb[171].mxu0 }
 0x322   :  { %2028 = vmatmul.mubr.bf16.vlgmr.msra.gmra.mrb[20].mxu0 %v14052_v38  ;;  %v12336_v38 = vld [vmem:[%s17475_s3 + $0x20] ss:$8 sps:$4 sm:$0xff]  }
 0x323   :  { %2147 = vmatpush1.bf16.msra.mxu0 %v12330_v41  ;;  %2037 = vmatprep.mubr.bf16.mxu0 %v13567_v43 }
 0x324   :  { %2148 = vmatprep.subr.bf16.mxu0 %v12335_v58  ;;  %v12341_v58 = vld [vmem:[%s17475_s3 + $0x34] ss:$8 sps:$4 sm:$0xff]  }
 0x325   :  { %v14362_v33 = vpop.f32.mrb[172].mxu0 }
 0x326   :  { %v1605_v57 = vpop.f32.mrb[173].mxu0 }
 0x327   :  { %2149 = vmatpush1.bf16.msra.mxu0 %v12333_v53  ;;  %v14364_v23 = vpop.f32.mrb[174].mxu0  ;;  %v12339_v53 = vld [vmem:[%s17475_s3 + $0x30] ss:$8 sps:$4 sm:$0xff]   ;;  %v12344_v57 = vld [vmem:[%s17475_s3 + $0x44] ss:$8 sps:$4 sm:$0xff]  }
 0x328   :  { %2150 = vmatprep.subr.bf16.mxu0 %v12338_v7  ;;  %v1608_v36 = vpop.f32.mrb[175].mxu0 }
 0x32a   :  { %2038 = vmatmul.mubr.bf16.gmra.mrb[24].mxu0 %v14062_v48  ;;  %v12342_v48 = vld [vmem:[%s17475_s3 + $0x40] ss:$8 sps:$4 sm:$0xff]  }
 0x32b   :  { %2151 = vmatpush1.bf16.msra.mxu0 %v12336_v38  ;;  %2047 = vmatprep.mubr.bf16.mxu0 %v13567_v43 }
 0x32c   :  { %2152 = vmatprep.subr.bf16.mxu0 %v12341_v58  ;;  %v12347_v58 = vld [vmem:[%s17475_s3 + $0x54] ss:$8 sps:$4 sm:$0xff]  }
 0x32d   :  { %v1611_v7 = vpop.f32.mrb[176].mxu0 }
 0x32e   :  { %v1613_v36 = vpop.f32.mrb[177].mxu0 }
 0x32f   :  { %2153 = vmatpush1.bf16.msra.mxu0 %v12339_v53  ;;  %v1614_v41 = vpop.f32.mrb[178].mxu0  ;;  %v12345_v53 = vld [vmem:[%s17475_s3 + $0x50] ss:$8 sps:$4 sm:$0xff]  }
 0x330   :  { %v14385_v38 = vpack.c.bf16 %v1614_v41, %v1611_v7  ;;  %2154 = vmatprep.subr.bf16.mxu0 %v12344_v57  ;;  %v1616_v28 = vpop.f32.mrb[179].mxu0  ;;  %v12350_v41 = vld [vmem:[%s17475_s3 + $0x64] ss:$8 sps:$4 sm:$0xff]  }
 0x332   :  { %2048 = vmatmul.mubr.bf16.gmra.mrb[28].mxu0 %v14081_v59  ;;  %v12348_v59 = vld [vmem:[%s17475_s3 + $0x60] ss:$8 sps:$4 sm:$0xff]  }
 0x333   :  { %2155 = vmatpush1.bf16.msra.mxu0 %v12342_v48  ;;  %2057 = vmatprep.mubr.bf16.mxu0 %v13567_v43 }
 0x334   :  { %2156 = vmatprep.subr.bf16.mxu0 %v12347_v58  ;;  %v3557_v58 = vrot.slane %v14385_v38, 4 }
 0x335   :  { %v1619_v57 = vpop.f32.mrb[180].mxu0 }
 0x336   :  { %v1621_v28 = vpop.f32.mrb[181].mxu0 }
 0x337   :  { %v1622_v7 = vpop.f32.mrb[182].mxu0  ;;  %2157 = vmatpush1.bf16.msra.mxu0 %v12345_v53  ;;  %v12351_v53 = vld [vmem:[%s17475_s3 + $0x70] ss:$8 sps:$4 sm:$0xff]  }
 0x338   :  { %v1842_v36 = vpack.c.bf16 %v1622_v7, %v1619_v57  ;;  %2158 = vmatprep.subr.bf16.mxu0 %v12350_v41  ;;  %v1624_v48 = vpop.f32.mrb[183].mxu0  ;;  %v12356_v41 = vld [vmem:[%s17475_s3 + $0x104] ss:$8 sps:$4 sm:$0xff]  }
 0x33a   :  { %v3558_v14 = vrot.slane %v1842_v36, 4  ;;  %2058 = vmatmul.mubr.bf16.gmra.mrb[32].mxu0 %v14070_v56  ;;  %v12354_v56 = vld [vmem:[%s17475_s3 + $0x100] ss:$8 sps:$4 sm:$0xff]  }
 0x33b   :  { %2159 = vmatpush1.bf16.msra.mxu0 %v12348_v59  ;;  %2178 = vmatprep.mubr.bf16.mxu0 %v13567_v43 }
 0x33c   :  { %v14411_v57 = vsel %vm1903_vm12, %v3557_v58, %v3558_v14  ;;  %2160 = vmatprep.subr.bf16.mxu0 %v12353_v24  ;;  %v12359_v58 = vld [vmem:[%s17475_s3 + $0x114] ss:$8 sps:$4 sm:$0xff]  }
 0x33d   :  { %v1627_v28 = vpop.f32.mrb[184].mxu0 }
 0x33e   :  { %v1629_v7 = vpop.f32.mrb[185].mxu0 }
 0x33f   :  { %v1630_v36 = vpop.f32.mrb[186].mxu0  ;;  %2161 = vmatpush1.bf16.msra.mxu0 %v12351_v53  ;;  %v12357_v53 = vld [vmem:[%s17475_s3 + $0x110] ss:$8 sps:$4 sm:$0xff]  }
 0x340   :  { %v1843_v59 = vpack.c.bf16 %v1630_v36, %v1627_v28  ;;  %2314 = vmatprep.subr.bf16.mxu0 %v12356_v41  ;;  %v1632_v48 = vpop.f32.mrb[187].mxu0  ;;  %v12362_v41 = vld [vmem:[%s17475_s3 + $0x124] ss:$8 sps:$4 sm:$0xff]  }
 0x341   :  { %v12363_v48 = vld [vmem:[%s17475_s3 + $0x130] ss:$8 sps:$4 sm:$0xff]  }
 0x342   :  { %v3560_v24 = vrot.slane %v1843_v59, 4  ;;  %2179 = vmatmul.mubr.bf16.vlgmr.msra.gmra.mrb[20].mxu0 %v1810_v6 }
 0x343   :  { %2315 = vmatpush1.bf16.msra.mxu0 %v12354_v56  ;;  %2188 = vmatprep.mubr.bf16.mxu0 %v13567_v43 }
 0x344   :  { %v14430_v28 = vsel %vm1903_vm12, %v3558_v14, %v3560_v24  ;;  %2316 = vmatprep.subr.bf16.mxu0 %v12359_v58  ;;  %v12365_v14 = vld [vmem:[%s17475_s3 + $0x134] ss:$8 sps:$4 sm:$0xff]  }
 0x345   :  { %v1635_v7 = vpop.f32.mrb[188].mxu0 }
 0x346   :  { %v1637_v36 = vpop.f32.mrb[189].mxu0 }
 0x347   :  { %v1638_v59 = vpop.f32.mrb[190].mxu0  ;;  %2317 = vmatpush1.bf16.msra.mxu0 %v12357_v53  ;;  %v12368_v53 = vld [vmem:[%s17475_s3 + $0x144] ss:$8 sps:$4 sm:$0xff]   ;;  %v12371_v36 = vld [vmem:[%s17475_s3 + $0x154] ss:$8 sps:$4 sm:$0xff]  }
 0x348   :  { %v1844_v4 = vpack.c.bf16 %v1638_v59, %v1635_v7  ;;  %2318 = vmatprep.subr.bf16.mxu0 %v12362_v41  ;;  %v1640_v6 = vpop.f32.mrb[191].mxu0  ;;  %v12369_v59 = vld [vmem:[%s17475_s3 + $0x150] ss:$8 sps:$4 sm:$0xff]   ;;  %v17488_v7 = vpack.c.bf16 %v14255_v9, %v14250_v0  ;;  %v12480_v0 = vld [vmem:[%s17475_s3 + $0x3a0] ss:$8 sps:$4 sm:$0xff]  }
 0x34a   :  { %v14441_v56 = vrot.slane %v1844_v4, 4  ;;  %2189 = vmatmul.mubr.bf16.gmra.mrb[24].mxu0 %v1811_v13  ;;  %v12366_v13 = vld [vmem:[%s17475_s3 + $0x140] ss:$8 sps:$4 sm:$0xff]  }
 0x34b   :  { %2319 = vmatpush1.bf16.msra.mxu0 %v12360_v1  ;;  %2198 = vmatprep.mubr.bf16.mxu0 %v13567_v43  ;;  %v12374_v1 = vld [vmem:[%s17475_s3 + $0x164] ss:$8 sps:$4 sm:$0xff]  }
 0x34c   :  { %v14452_v58 = vsel %vm1903_vm12, %v3560_v24, %v14441_v56  ;;  %2320 = vmatprep.subr.bf16.mxu0 %v12365_v14 }
 0x34d   :  { %v14457_v41 = vpop.f32.mrb[192].mxu0 }
 0x34e   :  { %v1645_v8 = vpop.f32.mrb[193].mxu0 }
 0x34f   :  { %2321 = vmatpush1.bf16.msra.mxu0 %v12363_v48  ;;  %v14459_v11 = vpop.f32.mrb[194].mxu0  ;;  %v12377_v48 = vld [vmem:[%s17475_s3 + $0x174] ss:$8 sps:$4 sm:$0xff]   ;;  %v12380_v8 = vld [vmem:[%s17475_s3 + $0x184] ss:$8 sps:$4 sm:$0xff]  }
 0x350   :  { %2322 = vmatprep.subr.bf16.mxu0 %v12368_v53  ;;  %v1648_v24 = vpop.f32.mrb[195].mxu0  ;;  %v12375_v53 = vld [vmem:[%s17475_s3 + $0x170] ss:$8 sps:$4 sm:$0xff]  }
 0x352   :  { %2199 = vmatmul.mubr.bf16.gmra.mrb[28].mxu0 %v1812_v20 }
 0x353   :  { %2323 = vmatpush1.bf16.msra.mxu0 %v12366_v13  ;;  %2208 = vmatprep.mubr.bf16.mxu0 %v13567_v43 }
 0x354   :  { %2324 = vmatprep.subr.bf16.mxu0 %v12371_v36 }
 0x355   :  { %v14479_v4 = vpop.f32.mrb[196].mxu0 }
 0x356   :  { %v1653_v6 = vpop.f32.mrb[197].mxu0 }
 0x357   :  { %2325 = vmatpush1.bf16.msra.mxu0 %v12369_v59  ;;  %v14481_v14 = vpop.f32.mrb[198].mxu0  ;;  %v12383_v6 = vld [vmem:[%s17475_s3 + $0x194] ss:$8 sps:$4 sm:$0xff]   ;;  %v17486_v59 = vpack.c.bf16 %v14186_v34, %v14181_v30  ;;  %v12438_v30 = vld [vmem:[%s17475_s3 + $0x2c0] ss:$8 sps:$4 sm:$0xff]  }
 0x358   :  { %2326 = vmatprep.subr.bf16.mxu0 %v12374_v1  ;;  %v1656_v20 = vpop.f32.mrb[199].mxu0 }
 0x359   :  { %v12386_v20 = vld [vmem:[%s17475_s3 + $0x1a4] ss:$8 sps:$4 sm:$0xff]  }
 0x35a   :  { %2209 = vmatmul.mubr.bf16.gmra.mrb[36].mxu0 %v14040_v27  ;;  %v12378_v27 = vld [vmem:[%s17475_s3 + $0x180] ss:$8 sps:$4 sm:$0xff]  }
 0x35b   :  { %2327 = vmatpush1.bf16.msra.mxu0 %v12372_v15  ;;  %2346 = vmatprep.mubr.bf16.mxu0 %v13567_v43  ;;  %v12381_v15 = vld [vmem:[%s17475_s3 + $0x190] ss:$8 sps:$4 sm:$0xff]  }
 0x35c   :  { %2328 = vmatprep.subr.bf16.mxu0 %v12377_v48 }
 0x35d   :  { %v14499_v13 = vpop.f32.mrb[200].mxu0 }
 0x35e   :  { %v1661_v24 = vpop.f32.mrb[201].mxu0 }
 0x35f   :  { %2329 = vmatpush1.bf16.msra.mxu0 %v12375_v53  ;;  %v14501_v36 = vpop.f32.mrb[202].mxu0  ;;  %v12389_v24 = vld [vmem:[%s17475_s3 + $0x1b4] ss:$8 sps:$4 sm:$0xff]  }
 0x360   :  { %2511 = vmatprep.subr.bf16.mxu0 %v12380_v8  ;;  %v1664_v1 = vpop.f32.mrb[203].mxu0 }
 0x361   :  { %v12387_v1 = vld [vmem:[%s17475_s3 + $0x1b0] ss:$8 sps:$4 sm:$0xff]  }
 0x362   :  { %2347 = vmatmul.mubr.bf16.vlgmr.msra.gmra.mrb[20].mxu0 %v1817_v2 }
 0x363   :  { %2512 = vmatpush1.bf16.msra.mxu0 %v12378_v27  ;;  %2356 = vmatprep.mubr.bf16.mxu0 %v13567_v43  ;;  %v17483_v27 = vpack.c.bf16 %v14101_v10, %v14096_v5  ;;  %v12390_v5 = vld [vmem:[%s17475_s3 + $0x1c0] ss:$8 sps:$4 sm:$0xff]  }
 0x364   :  { %2513 = vmatprep.subr.bf16.mxu0 %v12383_v6  ;;  %v12392_v6 = vld [vmem:[%s17475_s3 + $0x1c4] ss:$8 sps:$4 sm:$0xff]  }
 0x365   :  { %v1667_v48 = vpop.f32.mrb[204].mxu0 }
 0x366   :  { %v1669_v53 = vpop.f32.mrb[205].mxu0 }
 0x367   :  { %2514 = vmatpush1.bf16.msra.mxu0 %v12381_v15  ;;  %v1670_v8 = vpop.f32.mrb[206].mxu0 }
 0x368   :  { %v14524_v63 = vpack.c.bf16 %v1670_v8, %v1667_v48  ;;  %2515 = vmatprep.subr.bf16.mxu0 %v12386_v20  ;;  %v1672_v2 = vpop.f32.mrb[207].mxu0  ;;  %v12395_v8 = vld [vmem:[%s17475_s3 + $0x1d4] ss:$8 sps:$4 sm:$0xff]  }
 0x36a   :  { %2357 = vmatmul.mubr.bf16.gmra.mrb[24].mxu0 %v17483_v27  ;;  %v12393_v27 = vld [vmem:[%s17475_s3 + $0x1d0] ss:$8 sps:$4 sm:$0xff]  }
 0x36b   :  { %2516 = vmatpush1.bf16.msra.mxu0 %v12384_v60  ;;  %2366 = vmatprep.mubr.bf16.mxu0 %v13567_v43  ;;  %v3936_v60 = vrot.slane %v14524_v63, 4 }
 0x36c   :  { %2517 = vmatprep.subr.bf16.mxu0 %v12389_v24  ;;  %v17484_v24 = vpack.c.bf16 %v14114_v22, %v14109_v17  ;;  %v12396_v17 = vld [vmem:[%s17475_s3 + $0x1e0] ss:$8 sps:$4 sm:$0xff]  }
 0x36d   :  { %v1675_v15 = vpop.f32.mrb[208].mxu0 }
 0x36e   :  { %v1677_v20 = vpop.f32.mrb[209].mxu0 }
 0x36f   :  { %v1678_v48 = vpop.f32.mrb[210].mxu0  ;;  %2518 = vmatpush1.bf16.msra.mxu0 %v12387_v1 }
 0x370   :  { %v1849_v10 = vpack.c.bf16 %v1678_v48, %v1675_v15  ;;  %2519 = vmatprep.subr.bf16.mxu0 %v12392_v6  ;;  %v1680_v53 = vpop.f32.mrb[211].mxu0  ;;  %v12398_v6 = vld [vmem:[%s17475_s3 + $0x1e4] ss:$8 sps:$4 sm:$0xff]  }
 0x372   :  { %v3937_v2 = vrot.slane %v1849_v10, 4  ;;  %2367 = vmatmul.mubr.bf16.gmra.mrb[28].mxu0 %v17484_v24  ;;  %v12401_v10 = vld [vmem:[%s17475_s3 + $0x1f4] ss:$8 sps:$4 sm:$0xff]   ;;  %v12404_v24 = vld [vmem:[%s17475_s3 + $0x204] ss:$8 sps:$4 sm:$0xff]  }
 0x373   :  { %2520 = vmatpush1.bf16.msra.mxu0 %v12390_v5  ;;  %2376 = vmatprep.mubr.bf16.mxu0 %v13567_v43 }
 0x374   :  { %v14554_v1 = vsel %vm1903_vm12, %v3936_v60, %v3937_v2  ;;  %2521 = vmatprep.subr.bf16.mxu0 %v12395_v8  ;;  %v12399_v8 = vld [vmem:[%s17475_s3 + $0x1f0] ss:$8 sps:$4 sm:$0xff]  }
 0x375   :  { %v1683_v15 = vpop.f32.mrb[212].mxu0 }
 0x376   :  { %v1685_v20 = vpop.f32.mrb[213].mxu0 }
 0x377   :  { %v1686_v48 = vpop.f32.mrb[214].mxu0  ;;  %2522 = vmatpush1.bf16.msra.mxu0 %v12393_v27 }
 0x378   :  { %v1850_v22 = vpack.c.bf16 %v1686_v48, %v1683_v15  ;;  %2523 = vmatprep.subr.bf16.mxu0 %v12398_v6  ;;  %v1688_v5 = vpop.f32.mrb[215].mxu0 }
 0x37a   :  { %v3939_v53 = vrot.slane %v1850_v22, 4  ;;  %2377 = vmatmul.mubr.bf16.gmra.mrb[40].mxu0 %v14128_v32  ;;  %v12402_v32 = vld [vmem:[%s17475_s3 + $0x200] ss:$8 sps:$4 sm:$0xff]   ;;  %v12405_v22 = vld [vmem:[%s17475_s3 + $0x210] ss:$8 sps:$4 sm:$0xff]  }
 0x37b   :  { %2524 = vmatpush1.bf16.msra.mxu0 %v12396_v17  ;;  %2543 = vmatprep.mubr.bf16.mxu0 %v13567_v43 }
 0x37c   :  { %v14571_v60 = vsel %vm1903_vm12, %v3937_v2, %v3939_v53  ;;  %2525 = vmatprep.subr.bf16.mxu0 %v12401_v10  ;;  %v12407_v2 = vld [vmem:[%s17475_s3 + $0x214] ss:$8 sps:$4 sm:$0xff]   ;;  %v12410_v10 = vld [vmem:[%s17475_s3 + $0x224] ss:$8 sps:$4 sm:$0xff]  }
 0x37d   :  { %v1691_v27 = vpop.f32.mrb[216].mxu0 }
 0x37e   :  { %v1693_v6 = vpop.f32.mrb[217].mxu0 }
 0x37f   :  { %v1694_v15 = vpop.f32.mrb[218].mxu0  ;;  %2526 = vmatpush1.bf16.msra.mxu0 %v12399_v8  ;;  %v17485_v6 = vpack.c.bf16 %v14173_v25, %v14168_v19  ;;  %v12432_v19 = vld [vmem:[%s17475_s3 + $0x2a0] ss:$8 sps:$4 sm:$0xff]  }
 0x380   :  { %v1851_v20 = vpack.c.bf16 %v1694_v15, %v1691_v27  ;;  %2693 = vmatprep.subr.bf16.mxu0 %v12404_v24  ;;  %v1696_v48 = vpop.f32.mrb[219].mxu0  ;;  %v12408_v27 = vld [vmem:[%s17475_s3 + $0x220] ss:$8 sps:$4 sm:$0xff]   ;;  %v12413_v15 = vld [vmem:[%s17475_s3 + $0x234] ss:$8 sps:$4 sm:$0xff]  }
 0x382   :  { %v14582_v17 = vrot.slane %v1851_v20, 4  ;;  %2544 = vmatmul.mubr.bf16.vlgmr.msra.gmra.mrb[20].mxu0 %v14140_v45  ;;  %v12416_v20 = vld [vmem:[%s17475_s3 + $0x244] ss:$8 sps:$4 sm:$0xff]  }
 0x383   :  { %2694 = vmatpush1.bf16.msra.mxu0 %v12402_v32  ;;  %2553 = vmatprep.mubr.bf16.mxu0 %v13567_v43  ;;  %v12411_v32 = vld [vmem:[%s17475_s3 + $0x230] ss:$8 sps:$4 sm:$0xff]  }
 0x384   :  { %v14591_v5 = vsel %vm1903_vm12, %v3939_v53, %v14582_v17  ;;  %2695 = vmatprep.subr.bf16.mxu0 %v12407_v2 }
 0x385   :  { %v14596_v8 = vpop.f32.mrb[220].mxu0 }
 0x386   :  { %v1701_v24 = vpop.f32.mrb[221].mxu0 }
 0x387   :  { %2696 = vmatpush1.bf16.msra.mxu0 %v12405_v22  ;;  %v14598_v45 = vpop.f32.mrb[222].mxu0 }
 0x388   :  { %2697 = vmatprep.subr.bf16.mxu0 %v12410_v10  ;;  %v1704_v53 = vpop.f32.mrb[223].mxu0 }
 0x389   :  { %v12417_v53 = vld [vmem:[%s17475_s3 + $0x250] ss:$8 sps:$4 sm:$0xff]  }
 0x38a   :  { %2554 = vmatmul.mubr.bf16.gmra.mrb[24].mxu0 %v14150_v55  ;;  %v12414_v55 = vld [vmem:[%s17475_s3 + $0x240] ss:$8 sps:$4 sm:$0xff]  }
 0x38b   :  { %2698 = vmatpush1.bf16.msra.mxu0 %v12408_v27  ;;  %2563 = vmatprep.mubr.bf16.mxu0 %v13567_v43  ;;  %v12419_v27 = vld [vmem:[%s17475_s3 + $0x254] ss:$8 sps:$4 sm:$0xff]  }
 0x38c   :  { %2699 = vmatprep.subr.bf16.mxu0 %v12413_v15  ;;  %v12422_v15 = vld [vmem:[%s17475_s3 + $0x264] ss:$8 sps:$4 sm:$0xff]  }
 0x38d   :  { %v14616_v48 = vpop.f32.mrb[224].mxu0 }
 0x38e   :  { %v1709_v2 = vpop.f32.mrb[225].mxu0 }
 0x38f   :  { %2700 = vmatpush1.bf16.msra.mxu0 %v12411_v32  ;;  %v14618_v22 = vpop.f32.mrb[226].mxu0 }
 0x390   :  { %2701 = vmatprep.subr.bf16.mxu0 %v12416_v20  ;;  %v1712_v24 = vpop.f32.mrb[227].mxu0 }
 0x392   :  { %2564 = vmatmul.mubr.bf16.gmra.mrb[28].mxu0 %v14166_v16  ;;  %v12420_v16 = vld [vmem:[%s17475_s3 + $0x260] ss:$8 sps:$4 sm:$0xff]  }
 0x393   :  { %2702 = vmatpush1.bf16.msra.mxu0 %v12414_v55  ;;  %2573 = vmatprep.mubr.bf16.mxu0 %v13567_v43 }
 0x394   :  { %2703 = vmatprep.subr.bf16.mxu0 %v12419_v27  ;;  %v12425_v27 = vld [vmem:[%s17475_s3 + $0x274] ss:$8 sps:$4 sm:$0xff]  }
 0x395   :  { %v14636_v32 = vpop.f32.mrb[228].mxu0 }
 0x396   :  { %v1717_v20 = vpop.f32.mrb[229].mxu0 }
 0x397   :  { %2704 = vmatpush1.bf16.msra.mxu0 %v12417_v53  ;;  %v14638_v2 = vpop.f32.mrb[230].mxu0  ;;  %v12423_v53 = vld [vmem:[%s17475_s3 + $0x270] ss:$8 sps:$4 sm:$0xff]   ;;  %v12428_v20 = vld [vmem:[%s17475_s3 + $0x284] ss:$8 sps:$4 sm:$0xff]  }
 0x398   :  { %2705 = vmatprep.subr.bf16.mxu0 %v12422_v15  ;;  %v1720_v24 = vpop.f32.mrb[231].mxu0 }
 0x39a   :  { %2574 = vmatmul.mubr.bf16.gmra.mrb[44].mxu0 %v14161_v12  ;;  %v12426_v12 = vld [vmem:[%s17475_s3 + $0x280] ss:$8 sps:$4 sm:$0xff]  }
 0x39b   :  { %2706 = vmatpush1.bf16.msra.mxu0 %v12420_v16  ;;  %2725 = vmatprep.mubr.bf16.mxu0 %v13567_v43 }
 0x39c   :  { %2707 = vmatprep.subr.bf16.mxu0 %v12425_v27  ;;  %v12431_v27 = vld [vmem:[%s17475_s3 + $0x294] ss:$8 sps:$4 sm:$0xff]  }
 0x39d   :  { %v1723_v15 = vpop.f32.mrb[232].mxu0 }
 0x39e   :  { %v1725_v24 = vpop.f32.mrb[233].mxu0 }
 0x39f   :  { %2708 = vmatpush1.bf16.msra.mxu0 %v12423_v53  ;;  %v1726_v55 = vpop.f32.mrb[234].mxu0  ;;  %v12429_v53 = vld [vmem:[%s17475_s3 + $0x290] ss:$8 sps:$4 sm:$0xff]   ;;  %v12437_v24 = vld [vmem:[%s17475_s3 + $0x2b4] ss:$8 sps:$4 sm:$0xff]  }
 0x3a0   :  { %v14659_v16 = vpack.c.bf16 %v1726_v55, %v1723_v15  ;;  %2890 = vmatprep.subr.bf16.mxu0 %v12428_v20  ;;  %v1728_v10 = vpop.f32.mrb[235].mxu0 }
 0x3a1   :  { %v12434_v10 = vld [vmem:[%s17475_s3 + $0x2a4] ss:$8 sps:$4 sm:$0xff]  }
 0x3a2   :  { %2726 = vmatmul.mubr.bf16.vlgmr.msra.gmra.mrb[20].mxu0 %v17485_v6 }
 0x3a3   :  { %2891 = vmatpush1.bf16.msra.mxu0 %v12426_v12  ;;  %2735 = vmatprep.mubr.bf16.mxu0 %v13567_v43  ;;  %v4315_v12 = vrot.slane %v14659_v16, 4 }
 0x3a4   :  { %2892 = vmatprep.subr.bf16.mxu0 %v12431_v27 }
 0x3a5   :  { %v1731_v55 = vpop.f32.mrb[236].mxu0 }
 0x3a6   :  { %v1733_v20 = vpop.f32.mrb[237].mxu0 }
 0x3a7   :  { %v1734_v15 = vpop.f32.mrb[238].mxu0  ;;  %2893 = vmatpush1.bf16.msra.mxu0 %v12429_v53  ;;  %v12435_v53 = vld [vmem:[%s17475_s3 + $0x2b0] ss:$8 sps:$4 sm:$0xff]  }
 0x3a8   :  { %v1856_v25 = vpack.c.bf16 %v1734_v15, %v1731_v55  ;;  %2894 = vmatprep.subr.bf16.mxu0 %v12434_v10  ;;  %v1736_v6 = vpop.f32.mrb[239].mxu0  ;;  %v12440_v55 = vld [vmem:[%s17475_s3 + $0x2c4] ss:$8 sps:$4 sm:$0xff]  }
 0x3aa   :  { %v4316_v27 = vrot.slane %v1856_v25, 4  ;;  %2736 = vmatmul.mubr.bf16.gmra.mrb[24].mxu0 %v17486_v59 }
 0x3ab   :  { %2895 = vmatpush1.bf16.msra.mxu0 %v12432_v19  ;;  %2745 = vmatprep.mubr.bf16.mxu0 %v13567_v43  ;;  %v12443_v19 = vld [vmem:[%s17475_s3 + $0x2d4] ss:$8 sps:$4 sm:$0xff]  }
 0x3ac   :  { %v14689_v10 = vsel %vm1903_vm12, %v4315_v12, %v4316_v27  ;;  %2896 = vmatprep.subr.bf16.mxu0 %v12437_v24  ;;  %v17487_v24 = vpack.c.bf16 %v14199_v42, %v14194_v39  ;;  %v12441_v12 = vld [vmem:[%s17475_s3 + $0x2d0] ss:$8 sps:$4 sm:$0xff]   ;;  %v12444_v39 = vld [vmem:[%s17475_s3 + $0x2e0] ss:$8 sps:$4 sm:$0xff]  }
 0x3ad   :  { %v1739_v20 = vpop.f32.mrb[240].mxu0 }
 0x3ae   :  { %v1741_v15 = vpop.f32.mrb[241].mxu0 }
 0x3af   :  { %v1742_v25 = vpop.f32.mrb[242].mxu0  ;;  %2897 = vmatpush1.bf16.msra.mxu0 %v12435_v53 }
 0x3b0   :  { %v1857_v34 = vpack.c.bf16 %v1742_v25, %v1739_v20  ;;  %2898 = vmatprep.subr.bf16.mxu0 %v12440_v55  ;;  %v1744_v59 = vpop.f32.mrb[243].mxu0  ;;  %v12446_v55 = vld [vmem:[%s17475_s3 + $0x2e4] ss:$8 sps:$4 sm:$0xff]  }
 0x3b1   :  { %v12447_v59 = vld [vmem:[%s17475_s3 + $0x2f0] ss:$8 sps:$4 sm:$0xff]  }
 0x3b2   :  { %v4318_v6 = vrot.slane %v1857_v34, 4  ;;  %2746 = vmatmul.mubr.bf16.gmra.mrb[28].mxu0 %v17487_v24  ;;  %v12452_v24 = vld [vmem:[%s17475_s3 + $0x304] ss:$8 sps:$4 sm:$0xff]  }
 0x3b3   :  { %2899 = vmatpush1.bf16.msra.mxu0 %v12438_v30  ;;  %2755 = vmatprep.mubr.bf16.mxu0 %v13567_v43 }
 0x3b4   :  { %v14708_v53 = vsel %vm1903_vm12, %v4316_v27, %v4318_v6  ;;  %2900 = vmatprep.subr.bf16.mxu0 %v12443_v19  ;;  %v12449_v27 = vld [vmem:[%s17475_s3 + $0x2f4] ss:$8 sps:$4 sm:$0xff]  }
 0x3b5   :  { %v1747_v20 = vpop.f32.mrb[244].mxu0 }
 0x3b6   :  { %v1749_v15 = vpop.f32.mrb[245].mxu0 }
 0x3b7   :  { %v1750_v25 = vpop.f32.mrb[246].mxu0  ;;  %2901 = vmatpush1.bf16.msra.mxu0 %v12441_v12  ;;  %v12479_v15 = vld [vmem:[%s17475_s3 + $0x394] ss:$8 sps:$4 sm:$0xff]  }
 0x3b8   :  { %v1858_v42 = vpack.c.bf16 %v1750_v25, %v1747_v20  ;;  %2902 = vmatprep.subr.bf16.mxu0 %v12446_v55  ;;  %v1752_v30 = vpop.f32.mrb[247].mxu0  ;;  %v12450_v20 = vld [vmem:[%s17475_s3 + $0x300] ss:$8 sps:$4 sm:$0xff]   ;;  %v12455_v25 = vld [vmem:[%s17475_s3 + $0x314] ss:$8 sps:$4 sm:$0xff]  }
 0x3ba   :  { %v14719_v34 = vrot.slane %v1858_v42, 4  ;;  %2756 = vmatmul.mubr.bf16.gmra.mrb[48].mxu0 %v14213_v54  ;;  %v12458_v42 = vld [vmem:[%s17475_s3 + $0x324] ss:$8 sps:$4 sm:$0xff]  }
 0x3bb   :  { %2903 = vmatpush1.bf16.msra.mxu0 %v12444_v39  ;;  %2922 = vmatprep.mubr.bf16.mxu0 %v13567_v43  ;;  %v12453_v39 = vld [vmem:[%s17475_s3 + $0x310] ss:$8 sps:$4 sm:$0xff]  }
 0x3bc   :  { %v14728_v19 = vsel %vm1903_vm12, %v4318_v6, %v14719_v34  ;;  %2904 = vmatprep.subr.bf16.mxu0 %v12449_v27 }
 0x3bd   :  { %v14733_v12 = vpop.f32.mrb[248].mxu0 }
 0x3be   :  { %v1757_v55 = vpop.f32.mrb[249].mxu0 }
 0x3bf   :  { %2905 = vmatpush1.bf16.msra.mxu0 %v12447_v59  ;;  %v14735_v54 = vpop.f32.mrb[250].mxu0 }
 0x3c0   :  { %3072 = vmatprep.subr.bf16.mxu0 %v12452_v24  ;;  %v1760_v6 = vpop.f32.mrb[251].mxu0 }
 0x3c1   :  { %v12459_v6 = vld [vmem:[%s17475_s3 + $0x330] ss:$8 sps:$4 sm:$0xff]  }
 0x3c2   :  { %2923 = vmatmul.mubr.bf16.vlgmr.msra.gmra.mrb[20].mxu0 %v14225_v26  ;;  %v12456_v26 = vld [vmem:[%s17475_s3 + $0x320] ss:$8 sps:$4 sm:$0xff]  }
 0x3c3   :  { %3073 = vmatpush1.bf16.msra.mxu0 %v12450_v20  ;;  %2932 = vmatprep.mubr.bf16.mxu0 %v13567_v43  ;;  %v12461_v20 = vld [vmem:[%s17475_s3 + $0x334] ss:$8 sps:$4 sm:$0xff]  }
 0x3c4   :  { %3074 = vmatprep.subr.bf16.mxu0 %v12455_v25  ;;  %v12464_v25 = vld [vmem:[%s17475_s3 + $0x344] ss:$8 sps:$4 sm:$0xff]  }
 0x3c5   :  { %v14753_v30 = vpop.f32.mrb[252].mxu0 }
 0x3c6   :  { %v1765_v27 = vpop.f32.mrb[253].mxu0 }
 0x3c7   :  { %3075 = vmatpush1.bf16.msra.mxu0 %v12453_v39  ;;  %v14755_v59 = vpop.f32.mrb[254].mxu0 }
 0x3c8   :  { %3076 = vmatprep.subr.bf16.mxu0 %v12458_v42  ;;  %v1768_v55 = vpop.f32.mrb[255].mxu0 }
 0x3ca   :  { %2933 = vmatmul.mubr.bf16.gmra.mrb[24].mxu0 %v14235_v47  ;;  %v12462_v47 = vld [vmem:[%s17475_s3 + $0x340] ss:$8 sps:$4 sm:$0xff]  }
 0x3cb   :  { %3077 = vmatpush1.bf16.msra.mxu0 %v12456_v26  ;;  %2942 = vmatprep.mubr.bf16.mxu0 %v13567_v43 }
 0x3cc   :  { %3078 = vmatprep.subr.bf16.mxu0 %v12461_v20  ;;  %v12467_v20 = vld [vmem:[%s17475_s3 + $0x354] ss:$8 sps:$4 sm:$0xff]  }
 0x3cd   :  { %v14773_v39 = vpop.f32.mrb[0].mxu0 }
 0x3ce   :  { %v1773_v42 = vpop.f32.mrb[1].mxu0 }
 0x3cf   :  { %3079 = vmatpush1.bf16.msra.mxu0 %v12459_v6  ;;  %v14775_v27 = vpop.f32.mrb[2].mxu0  ;;  %v12465_v6 = vld [vmem:[%s17475_s3 + $0x350] ss:$8 sps:$4 sm:$0xff]   ;;  %v12470_v42 = vld [vmem:[%s17475_s3 + $0x364] ss:$8 sps:$4 sm:$0xff]  }
 0x3d0   :  { %3080 = vmatprep.subr.bf16.mxu0 %v12464_v25  ;;  %v1776_v55 = vpop.f32.mrb[3].mxu0 }
 0x3d2   :  { %2943 = vmatmul.mubr.bf16.gmra.mrb[28].mxu0 %v14248_v62  ;;  %v12468_v62 = vld [vmem:[%s17475_s3 + $0x360] ss:$8 sps:$4 sm:$0xff]  }
 0x3d3   :  { %3081 = vmatpush1.bf16.msra.mxu0 %v12462_v47  ;;  %2952 = vmatprep.mubr.bf16.mxu0 %v13567_v43 }
 0x3d4   :  { %3082 = vmatprep.subr.bf16.mxu0 %v12467_v20  ;;  %v12473_v20 = vld [vmem:[%s17475_s3 + $0x374] ss:$8 sps:$4 sm:$0xff]  }
 0x3d5   :  { %v1779_v25 = vpop.f32.mrb[4].mxu0 }
 0x3d6   :  { %v1781_v55 = vpop.f32.mrb[5].mxu0 }
 0x3d7   :  { %3083 = vmatpush1.bf16.msra.mxu0 %v12465_v6  ;;  %v1782_v26 = vpop.f32.mrb[6].mxu0  ;;  %v12471_v6 = vld [vmem:[%s17475_s3 + $0x370] ss:$8 sps:$4 sm:$0xff]  }
 0x3d8   :  { %v14796_v47 = vpack.c.bf16 %v1782_v26, %v1779_v25  ;;  %3084 = vmatprep.subr.bf16.mxu0 %v12470_v42  ;;  %v1784_v24 = vpop.f32.mrb[7].mxu0  ;;  %v12476_v26 = vld [vmem:[%s17475_s3 + $0x384] ss:$8 sps:$4 sm:$0xff]  }
 0x3da   :  { %2953 = vmatmul.mubr.bf16.gmra.mrb[52].mxu0 %v14243_v61  ;;  %v12474_v61 = vld [vmem:[%s17475_s3 + $0x380] ss:$8 sps:$4 sm:$0xff]  }
 0x3db   :  { %3085 = vmatpush1.bf16.msra.mxu0 %v12468_v62  ;;  %3104 = vmatprep.mubr.bf16.mxu0 %v13567_v43 }
 0x3dc   :  { %3086 = vmatprep.subr.bf16.mxu0 %v12473_v20  ;;  %v4694_v20 = vrot.slane %v14796_v47, 4 }
 0x3dd   :  { %v1787_v42 = vpop.f32.mrb[8].mxu0 }
 0x3de   :  { %v1789_v24 = vpop.f32.mrb[9].mxu0 }
 0x3df   :  { %v1790_v25 = vpop.f32.mrb[10].mxu0  ;;  %3087 = vmatpush1.bf16.msra.mxu0 %v12471_v6  ;;  %v12477_v6 = vld [vmem:[%s17475_s3 + $0x390] ss:$8 sps:$4 sm:$0xff]  }
 0x3e0   :  { %v1863_v55 = vpack.c.bf16 %v1790_v25, %v1787_v42  ;;  %3269 = vmatprep.subr.bf16.mxu0 %v12476_v26  ;;  %v1792_v62 = vpop.f32.mrb[11].mxu0  ;;  %v12482_v42 = vld [vmem:[%s17475_s3 + $0x3a4] ss:$8 sps:$4 sm:$0xff]  }
 0x3e1   :  { %v17489_v62 = vpack.c.bf16 %v14268_v37, %v14263_v31  ;;  %v12486_v31 = vld [vmem:[%s17475_s3 + $0x3c0] ss:$8 sps:$4 sm:$0xff]  }
 0x3e2   :  { %v4695_v18 = vrot.slane %v1863_v55, 4  ;;  %3105 = vmatmul.mubr.bf16.vlgmr.msra.gmra.mrb[20].mxu0 %v17488_v7 }
 0x3e3   :  { %3270 = vmatpush1.bf16.msra.mxu0 %v12474_v61  ;;  %3114 = vmatprep.mubr.bf16.mxu0 %v13567_v43  ;;  %v12485_v61 = vld [vmem:[%s17475_s3 + $0x3b4] ss:$8 sps:$4 sm:$0xff]  }
 0x3e4   :  { %v14824_v26 = vsel %vm1903_vm12, %v4694_v20, %v4695_v18  ;;  %3271 = vmatprep.subr.bf16.mxu0 %v12479_v15  ;;  %v12483_v20 = vld [vmem:[%s17475_s3 + $0x3b0] ss:$8 sps:$4 sm:$0xff]  }
 0x3e5   :  { %v1795_v24 = vpop.f32.mrb[12].mxu0 }
 0x3e6   :  { %v1797_v25 = vpop.f32.mrb[13].mxu0 }
 0x3e7   :  { %v1798_v55 = vpop.f32.mrb[14].mxu0  ;;  %3272 = vmatpush1.bf16.msra.mxu0 %v12477_v6 }
 0x3e8   :  { %v1864_v9 = vpack.c.bf16 %v1798_v55, %v1795_v24  ;;  %3273 = vmatprep.subr.bf16.mxu0 %v12482_v42  ;;  %v1800_v7 = vpop.f32.mrb[15].mxu0  ;;  %v12488_v42 = vld [vmem:[%s17475_s3 + $0x3c4] ss:$8 sps:$4 sm:$0xff]  }
 0x3e9   :  { %v17490_v7 = vpack.c.bf16 %v14281_v52, %v14276_v49  ;;  %v12492_v49 = vld [vmem:[%s17475_s3 + $0x3e0] ss:$8 sps:$4 sm:$0xff]   ;;  %v12497_v52 = vld [vmem:[%s17475_s3 + $0x3f4] ss:$8 sps:$4 sm:$0xff]  }
 0x3ea   :  { %v4697_v15 = vrot.slane %v1864_v9, 4  ;;  %3115 = vmatmul.mubr.bf16.gmra.mrb[24].mxu0 %v17489_v62 }
 0x3eb   :  { %3274 = vmatpush1.bf16.msra.mxu0 %v12480_v0  ;;  %3124 = vmatprep.mubr.bf16.mxu0 %v13567_v43 }
 0x3ec   :  { %v14843_v6 = vsel %vm1903_vm12, %v4695_v18, %v4697_v15  ;;  %3275 = vmatprep.subr.bf16.mxu0 %v12485_v61  ;;  %v12491_v18 = vld [vmem:[%s17475_s3 + $0x3d4] ss:$8 sps:$4 sm:$0xff]   ;;  %v12489_v61 = vld [vmem:[%s17475_s3 + $0x3d0] ss:$8 sps:$4 sm:$0xff]  }
 0x3ed   :  { %v1803_v24 = vpop.f32.mrb[16].mxu0 }
 0x3ee   :  { %v1805_v25 = vpop.f32.mrb[17].mxu0 }
 0x3ef   :  { %v1806_v55 = vpop.f32.mrb[18].mxu0  ;;  %3276 = vmatpush1.bf16.msra.mxu0 %v12483_v20  ;;  %v12494_v20 = vld [vmem:[%s17475_s3 + $0x3e4] ss:$8 sps:$4 sm:$0xff]   ;;  %v12501_v25 = vld [vmem:[%s17475_s3 + $0x410] ss:$8 sps:$4 sm:$0xff]  }
 0x3f0   :  { %v1865_v37 = vpack.c.bf16 %v1806_v55, %v1803_v24  ;;  %3277 = vmatprep.subr.bf16.mxu0 %v12488_v42  ;;  %v1808_v0 = vpop.f32.mrb[19].mxu0  ;;  %v12500_v42 = vld [vmem:[%s17475_s3 + $0x404] ss:$8 sps:$4 sm:$0xff]   ;;  %v12498_v24 = vld [vmem:[%s17475_s3 + $0x400] ss:$8 sps:$4 sm:$0xff]  }
 0x3f1   :  { %v12506_v55 = vld [vmem:[%s17475_s3 + $0x424] ss:$8 sps:$4 sm:$0xff]  }
 0x3f2   :  { %v14854_v9 = vrot.slane %v1865_v37, 4  ;;  %3125 = vmatmul.mubr.bf16.gmra.mrb[28].mxu0 %v17490_v7  ;;  %v12507_v37 = vld [vmem:[%s17475_s3 + $0x430] ss:$8 sps:$4 sm:$0xff]   ;;  %v12512_v0 = vld [vmem:[%s17475_s3 + $0x444] ss:$8 sps:$4 sm:$0xff]  }
 0x3f3   :  { %3278 = vmatpush1.bf16.msra.mxu0 %v12486_v31  ;;  %3134 = vmatprep.mubr.bf16.mxu0 %v13567_v43  ;;  %v12504_v31 = vld [vmem:[%s17475_s3 + $0x420] ss:$8 sps:$4 sm:$0xff]  }
 0x3f4   :  { %v14865_v62 = vsel %vm1903_vm12, %v4697_v15, %v14854_v9  ;;  %3279 = vmatprep.subr.bf16.mxu0 %v12491_v18  ;;  %v12495_v15 = vld [vmem:[%s17475_s3 + $0x3f0] ss:$8 sps:$4 sm:$0xff]  }
 0x3f7   :  { %3280 = vmatpush1.bf16.msra.mxu0 %v12489_v61 }
 0x3f8   :  { %3281 = vmatprep.subr.bf16.mxu0 %v12494_v20 }
 0x3fa   :  { %3135 = vmatmul.mubr.bf16.gmra.mrb[56].mxu0 %v14295_v35  ;;  %v12503_v35 = vld [vmem:[%s17475_s3 + $0x414] ss:$8 sps:$4 sm:$0xff]  }
 0x3fb   :  { %3282 = vmatpush1.bf16.msra.mxu0 %v12492_v49  ;;  %3301 = vmatprep.mubr.bf16.mxu0 %v13567_v43  ;;  %v12515_v49 = vld [vmem:[%s17475_s3 + $0x454] ss:$8 sps:$4 sm:$0xff]  }
 0x3fc   :  { %3283 = vmatprep.subr.bf16.mxu0 %v12497_v52  ;;  %v12513_v52 = vld [vmem:[%s17475_s3 + $0x450] ss:$8 sps:$4 sm:$0xff]  }
 0x3ff   :  { %3284 = vmatpush1.bf16.msra.mxu0 %v12495_v15  ;;  %v12518_v15 = vld [vmem:[%s17475_s3 + $0x464] ss:$8 sps:$4 sm:$0xff]  }
 0x400   :  { %3451 = vmatprep.subr.bf16.mxu0 %v12500_v42  ;;  %v12516_v42 = vld [vmem:[%s17475_s3 + $0x460] ss:$8 sps:$4 sm:$0xff]  }
 0x402   :  { %3302 = vmatmul.mubr.bf16.vlgmr.msra.gmra.mrb[20].mxu0 %v14307_v21  ;;  %v12509_v21 = vld [vmem:[%s17475_s3 + $0x434] ss:$8 sps:$4 sm:$0xff]  }
 0x403   :  { %3452 = vmatpush1.bf16.msra.mxu0 %v12498_v24  ;;  %3311 = vmatprep.mubr.bf16.mxu0 %v13567_v43  ;;  %v12519_v24 = vld [vmem:[%s17475_s3 + $0x470] ss:$8 sps:$4 sm:$0xff]  }
 0x404   :  { %3453 = vmatprep.subr.bf16.mxu0 %v12503_v35  ;;  %v12524_v35 = vld [vmem:[%s17475_s3 + $0x484] ss:$8 sps:$4 sm:$0xff]  }
 0x407   :  { %3454 = vmatpush1.bf16.msra.mxu0 %v12501_v25  ;;  %v12522_v25 = vld [vmem:[%s17475_s3 + $0x480] ss:$8 sps:$4 sm:$0xff]  }
 0x408   :  { %3455 = vmatprep.subr.bf16.mxu0 %v12506_v55  ;;  %v17491_v55 = vpack.c.bf16 %v14337_v3, %v14332_v50  ;;  %v12533_v50 = vld [vmem:[%s17475_s3 + $0x4b4] ss:$8 sps:$4 sm:$0xff]   ;;  %v17492_v3 = vpack.c.bf16 %v14344_v40, %v14342_v46  ;;  %v12534_v46 = vld [vmem:[%s17475_s3 + $0x4c0] ss:$8 sps:$4 sm:$0xff]  }
 0x40a   :  { %3312 = vmatmul.mubr.bf16.gmra.mrb[24].mxu0 %v14317_v51  ;;  %v12510_v51 = vld [vmem:[%s17475_s3 + $0x440] ss:$8 sps:$4 sm:$0xff]  }
 0x40b   :  { %3456 = vmatpush1.bf16.msra.mxu0 %v12504_v31  ;;  %3321 = vmatprep.mubr.bf16.mxu0 %v13567_v43  ;;  %v12525_v31 = vld [vmem:[%s17475_s3 + $0x490] ss:$8 sps:$4 sm:$0xff]  }
 0x40c   :  { %3457 = vmatprep.subr.bf16.mxu0 %v12509_v21  ;;  %v12530_v21 = vld [vmem:[%s17475_s3 + $0x4a4] ss:$8 sps:$4 sm:$0xff]  }
 0x40d   :  { %v2059_v18 = vpop.f32.mrb[32].mxu0 }
 0x40e   :  { %v2061_v7 = vpop.f32.mrb[33].mxu0 }
 0x40f   :  { %v2063_v61 = vpop.f32.mrb[34].mxu0  ;;  %3458 = vmatpush1.bf16.msra.mxu0 %v12507_v37  ;;  %v12528_v37 = vld [vmem:[%s17475_s3 + $0x4a0] ss:$8 sps:$4 sm:$0xff]  }
 0x410   :  { %v2064_v20 = vpop.f32.mrb[35].mxu0  ;;  %3459 = vmatprep.subr.bf16.mxu0 %v12512_v0  ;;  %v12531_v0 = vld [vmem:[%s17475_s3 + $0x4b0] ss:$8 sps:$4 sm:$0xff]   ;;  %v12536_v61 = vld [vmem:[%s17475_s3 + $0x4c4] ss:$8 sps:$4 sm:$0xff]  }
 0x412   :  { %3322 = vmatmul.mubr.bf16.gmra.mrb[28].mxu0 %v14330_v29  ;;  %v12521_v29 = vld [vmem:[%s17475_s3 + $0x474] ss:$8 sps:$4 sm:$0xff]  }
 0x413   :  { %3460 = vmatpush1.bf16.msra.mxu0 %v12510_v51  ;;  %3331 = vmatprep.mubr.bf16.mxu0 %v13567_v43 }
 0x414   :  { %3461 = vmatprep.subr.bf16.mxu0 %v12515_v49 }
 0x417   :  { %3462 = vmatpush1.bf16.msra.mxu0 %v12513_v52 }
 0x418   :  { %3463 = vmatprep.subr.bf16.mxu0 %v12518_v15 }
 0x41a   :  { %3332 = vmatmul.mubr.bf16.gmra.mrb[60].mxu0 %v14325_v44  ;;  %v12527_v44 = vld [vmem:[%s17475_s3 + $0x494] ss:$8 sps:$4 sm:$0xff]  }
 0x41b   :  { %3464 = vmatpush1.bf16.msra.mxu0 %v12516_v42  ;;  %3483 = vmatprep.mubr.bf16.mxu0 %v13567_v43  ;;  %v12539_v42 = vld [vmem:[%s17475_s3 + $0x4d4] ss:$8 sps:$4 sm:$0xff]  }
 0x41c   :  { %3465 = vmatprep.subr.bf16.mxu0 %v12521_v29  ;;  %v17493_v29 = vpack.c.bf16 %v14364_v23, %v14362_v33  ;;  %v12545_v23 = vld [vmem:[%s17475_s3 + $0x4f4] ss:$8 sps:$4 sm:$0xff]   ;;  %v12543_v33 = vld [vmem:[%s17475_s3 + $0x4f0] ss:$8 sps:$4 sm:$0xff]  }
 0x41f   :  { %3466 = vmatpush1.bf16.msra.mxu0 %v12519_v24  ;;  %v12540_v24 = vld [vmem:[%s17475_s3 + $0x4e0] ss:$8 sps:$4 sm:$0xff]  }
 0x420   :  { %3648 = vmatprep.subr.bf16.mxu0 %v12524_v35  ;;  %v12548_v35 = vld [vmem:[%s17475_s3 + $0x504] ss:$8 sps:$4 sm:$0xff]  }
 0x422   :  { %3484 = vmatmul.mubr.bf16.vlgmr.msra.gmra.mrb[20].mxu0 %v17491_v55  ;;  %v12554_v55 = vld [vmem:[%s17475_s3 + $0x524] ss:$8 sps:$4 sm:$0xff]  }
 0x423   :  { %3649 = vmatpush1.bf16.msra.mxu0 %v12522_v25  ;;  %3493 = vmatprep.mubr.bf16.mxu0 %v13567_v43  ;;  %v12546_v25 = vld [vmem:[%s17475_s3 + $0x500] ss:$8 sps:$4 sm:$0xff]  }
 0x424   :  { %3650 = vmatprep.subr.bf16.mxu0 %v12527_v44  ;;  %v12549_v44 = vld [vmem:[%s17475_s3 + $0x510] ss:$8 sps:$4 sm:$0xff]  }
 0x427   :  { %3651 = vmatpush1.bf16.msra.mxu0 %v12525_v31  ;;  %v12552_v31 = vld [vmem:[%s17475_s3 + $0x520] ss:$8 sps:$4 sm:$0xff]  }
 0x428   :  { %3652 = vmatprep.subr.bf16.mxu0 %v12530_v21  ;;  %v12555_v21 = vld [vmem:[%s17475_s3 + $0x530] ss:$8 sps:$4 sm:$0xff]  }
 0x42a   :  { %3494 = vmatmul.mubr.bf16.gmra.mrb[24].mxu0 %v17492_v3 }
 0x42b   :  { %3653 = vmatpush1.bf16.msra.mxu0 %v12528_v37  ;;  %3503 = vmatprep.mubr.bf16.mxu0 %v13567_v43  ;;  %v12560_v37 = vld [vmem:[%s17475_s3 + $0x544] ss:$8 sps:$4 sm:$0xff]  }
 0x42c   :  { %3654 = vmatprep.subr.bf16.mxu0 %v12533_v50 }
 0x42d   :  { %v2210_v51 = vpop.f32.mrb[36].mxu0 }
 0x42e   :  { %v2211_v20 = vadd.f32 %v2210_v51, %v2059_v18  ;;  %v2212_v49 = vpop.f32.mrb[37].mxu0  ;;  %v12537_v18 = vld [vmem:[%s17475_s3 + $0x4d0] ss:$8 sps:$4 sm:$0xff]  }
 0x42f   :  { %v2213_v52 = vadd.f32 %v2212_v49, %v2061_v7  ;;  %v2214_v15 = vpop.f32.mrb[38].mxu0  ;;  %3655 = vmatpush1.bf16.msra.mxu0 %v12531_v0  ;;  %v12542_v7 = vld [vmem:[%s17475_s3 + $0x4e4] ss:$8 sps:$4 sm:$0xff]  }
 0x430   :  { %v2215_v40 = vpop.f32.mrb[39].mxu0  ;;  %3656 = vmatprep.subr.bf16.mxu0 %v12536_v61  ;;  %v12563_v15 = vld [vmem:[%s17475_s3 + $0x554] ss:$8 sps:$4 sm:$0xff]  }
 0x431   :  { %v12567_v40 = vld [vmem:[%s17475_s3 + $0x570] ss:$8 sps:$4 sm:$0xff]  }
 0x432   :  { %3504 = vmatmul.mubr.bf16.gmra.mrb[28].mxu0 %v17493_v29  ;;  %v12570_v29 = vld [vmem:[%s17475_s3 + $0x580] ss:$8 sps:$4 sm:$0xff]  }
 0x433   :  { %3657 = vmatpush1.bf16.msra.mxu0 %v12534_v46  ;;  %3513 = vmatprep.mubr.bf16.mxu0 %v13567_v43  ;;  %v12564_v46 = vld [vmem:[%s17475_s3 + $0x560] ss:$8 sps:$4 sm:$0xff]  }
 0x434   :  { %3658 = vmatprep.subr.bf16.mxu0 %v12539_v42  ;;  %v12572_v42 = vld [vmem:[%s17475_s3 + $0x584] ss:$8 sps:$4 sm:$0xff]  }
 0x437   :  { %3659 = vmatpush1.bf16.msra.mxu0 %v12537_v18  ;;  %v17494_v18 = vpack.c.bf16 %v14459_v11, %v14457_v41  ;;  %v12581_v41 = vld [vmem:[%s17475_s3 + $0x5b4] ss:$8 sps:$4 sm:$0xff]   ;;  %v17495_v11 = vpack.c.bf16 %v14481_v14, %v14479_v4  ;;  %v12582_v4 = vld [vmem:[%s17475_s3 + $0x5c0] ss:$8 sps:$4 sm:$0xff]  }
 0x438   :  { %3660 = vmatprep.subr.bf16.mxu0 %v12542_v7  ;;  %v12573_v7 = vld [vmem:[%s17475_s3 + $0x590] ss:$8 sps:$4 sm:$0xff]  }
 0x43a   :  { %3514 = vmatmul.mubr.bf16.gmra.mrb[64].mxu0 %v14385_v38  ;;  %v12551_v38 = vld [vmem:[%s17475_s3 + $0x514] ss:$8 sps:$4 sm:$0xff]  }
 0x43b   :  { %3661 = vmatpush1.bf16.msra.mxu0 %v12540_v24  ;;  %3680 = vmatprep.mubr.bf16.mxu0 %v13567_v43  ;;  %v12578_v24 = vld [vmem:[%s17475_s3 + $0x5a4] ss:$8 sps:$4 sm:$0xff]  }
 0x43c   :  { %3662 = vmatprep.subr.bf16.mxu0 %v12545_v23  ;;  %v12576_v23 = vld [vmem:[%s17475_s3 + $0x5a0] ss:$8 sps:$4 sm:$0xff]  }
 0x43f   :  { %3663 = vmatpush1.bf16.msra.mxu0 %v12543_v33  ;;  %v12579_v33 = vld [vmem:[%s17475_s3 + $0x5b0] ss:$8 sps:$4 sm:$0xff]  }
 0x440   :  { %3830 = vmatprep.subr.bf16.mxu0 %v12548_v35  ;;  %v12584_v35 = vld [vmem:[%s17475_s3 + $0x5c4] ss:$8 sps:$4 sm:$0xff]  }
 0x442   :  { %3681 = vmatmul.mubr.bf16.vlgmr.msra.gmra.mrb[20].mxu0 %v14411_v57  ;;  %v12557_v57 = vld [vmem:[%s17475_s3 + $0x534] ss:$8 sps:$4 sm:$0xff]  }
 0x443   :  { %3831 = vmatpush1.bf16.msra.mxu0 %v12546_v25  ;;  %3690 = vmatprep.mubr.bf16.mxu0 %v13567_v43 }
 0x444   :  { %3832 = vmatprep.subr.bf16.mxu0 %v12551_v38 }
 0x447   :  { %3833 = vmatpush1.bf16.msra.mxu0 %v12549_v44 }
 0x448   :  { %3834 = vmatprep.subr.bf16.mxu0 %v12554_v55 }
 0x44a   :  { %3691 = vmatmul.mubr.bf16.gmra.mrb[24].mxu0 %v14430_v28  ;;  %v12558_v28 = vld [vmem:[%s17475_s3 + $0x540] ss:$8 sps:$4 sm:$0xff]  }
 0x44b   :  { %3835 = vmatpush1.bf16.msra.mxu0 %v12552_v31  ;;  %3700 = vmatprep.mubr.bf16.mxu0 %v13567_v43 }
 0x44c   :  { %3836 = vmatprep.subr.bf16.mxu0 %v12557_v57  ;;  %v12587_v57 = vld [vmem:[%s17475_s3 + $0x5d4] ss:$8 sps:$4 sm:$0xff]  }
 0x44d   :  { %v2378_v50 = vpop.f32.mrb[40].mxu0 }
 0x44e   :  { %v2397_v3 = vadd.f32 %v2378_v50, %v2211_v20  ;;  %v2380_v0 = vpop.f32.mrb[41].mxu0  ;;  %v12561_v20 = vld [vmem:[%s17475_s3 + $0x550] ss:$8 sps:$4 sm:$0xff]   ;;  %v12590_v50 = vld [vmem:[%s17475_s3 + $0x5e4] ss:$8 sps:$4 sm:$0xff]  }
 0x44f   :  { %v2398_v61 = vadd.f32 %v2380_v0, %v2213_v52  ;;  %v2382_v51 = vpop.f32.mrb[42].mxu0  ;;  %3837 = vmatpush1.bf16.msra.mxu0 %v12555_v21  ;;  %v12566_v52 = vld [vmem:[%s17475_s3 + $0x564] ss:$8 sps:$4 sm:$0xff]   ;;  %v17496_v21 = vpack.c.bf16 %v14501_v36, %v14499_v13  ;;  %v12593_v13 = vld [vmem:[%s17475_s3 + $0x5f4] ss:$8 sps:$4 sm:$0xff]  }
 0x450   :  { %v2383_v49 = vpop.f32.mrb[43].mxu0  ;;  %3838 = vmatprep.subr.bf16.mxu0 %v12560_v37  ;;  %v12585_v37 = vld [vmem:[%s17475_s3 + $0x5d0] ss:$8 sps:$4 sm:$0xff]   ;;  %v12596_v0 = vld [vmem:[%s17475_s3 + $0x604] ss:$8 sps:$4 sm:$0xff]  }
 0x451   :  { %v12591_v36 = vld [vmem:[%s17475_s3 + $0x5f0] ss:$8 sps:$4 sm:$0xff]   ;;  %v12600_v49 = vld [vmem:[%s17475_s3 + $0x620] ss:$8 sps:$4 sm:$0xff]  }
 0x452   :  { %3701 = vmatmul.mubr.bf16.gmra.mrb[28].mxu0 %v14452_v58  ;;  %v12569_v58 = vld [vmem:[%s17475_s3 + $0x574] ss:$8 sps:$4 sm:$0xff]   ;;  %v12597_v51 = vld [vmem:[%s17475_s3 + $0x610] ss:$8 sps:$4 sm:$0xff]  }
 0x453   :  { %3839 = vmatpush1.bf16.msra.mxu0 %v12558_v28  ;;  %3710 = vmatprep.mubr.bf16.mxu0 %v13567_v43  ;;  %v12602_v28 = vld [vmem:[%s17475_s3 + $0x624] ss:$8 sps:$4 sm:$0xff]  }
 0x454   :  { %3840 = vmatprep.subr.bf16.mxu0 %v12563_v15  ;;  %v12603_v15 = vld [vmem:[%s17475_s3 + $0x630] ss:$8 sps:$4 sm:$0xff]  }
 0x457   :  { %3841 = vmatpush1.bf16.msra.mxu0 %v12561_v20  ;;  %v12608_v20 = vld [vmem:[%s17475_s3 + $0x644] ss:$8 sps:$4 sm:$0xff]  }
 0x458   :  { %3842 = vmatprep.subr.bf16.mxu0 %v12566_v52 }
 0x45a   :  { %3711 = vmatmul.mubr.bf16.gmra.mrb[68].mxu0 %v14441_v56  ;;  %v12575_v56 = vld [vmem:[%s17475_s3 + $0x594] ss:$8 sps:$4 sm:$0xff]  }
 0x45b   :  { %3843 = vmatpush1.bf16.msra.mxu0 %v12564_v46  ;;  %3862 = vmatprep.mubr.bf16.mxu0 %v13567_v43 }
 0x45c   :  { %3844 = vmatprep.subr.bf16.mxu0 %v12569_v58 }
 0x45f   :  { %3845 = vmatpush1.bf16.msra.mxu0 %v12567_v40 }
 0x460   :  { %4027 = vmatprep.subr.bf16.mxu0 %v12572_v42 }
 0x462   :  { %3863 = vmatmul.mubr.bf16.vlgmr.msra.gmra.mrb[20].mxu0 %v17494_v18  ;;  %v12609_v18 = vld [vmem:[%s17475_s3 + $0x650] ss:$8 sps:$4 sm:$0xff]  }
 0x463   :  { %4028 = vmatpush1.bf16.msra.mxu0 %v12570_v29  ;;  %3872 = vmatprep.mubr.bf16.mxu0 %v13567_v43 }
 0x464   :  { %4029 = vmatprep.subr.bf16.mxu0 %v12575_v56  ;;  %v12611_v56 = vld [vmem:[%s17475_s3 + $0x654] ss:$8 sps:$4 sm:$0xff]  }
 0x467   :  { %4030 = vmatpush1.bf16.msra.mxu0 %v12573_v7  ;;  %v12614_v7 = vld [vmem:[%s17475_s3 + $0x664] ss:$8 sps:$4 sm:$0xff]  }
 0x468   :  { %4031 = vmatprep.subr.bf16.mxu0 %v12578_v24  ;;  %v12612_v24 = vld [vmem:[%s17475_s3 + $0x660] ss:$8 sps:$4 sm:$0xff]  }
 0x46a   :  { %3873 = vmatmul.mubr.bf16.gmra.mrb[24].mxu0 %v17495_v11  ;;  %v12618_v11 = vld [vmem:[%s17475_s3 + $0x680] ss:$8 sps:$4 sm:$0xff]  }
 0x46b   :  { %4032 = vmatpush1.bf16.msra.mxu0 %v12576_v23  ;;  %3882 = vmatprep.mubr.bf16.mxu0 %v13567_v43  ;;  %v12615_v23 = vld [vmem:[%s17475_s3 + $0x670] ss:$8 sps:$4 sm:$0xff]  }
 0x46c   :  { %4033 = vmatprep.subr.bf16.mxu0 %v12581_v41  ;;  %v12620_v41 = vld [vmem:[%s17475_s3 + $0x684] ss:$8 sps:$4 sm:$0xff]  }
 0x46d   :  { %v2575_v25 = vpop.f32.mrb[44].mxu0 }
 0x46e   :  { %v2594_v38 = vadd.f32 %v2575_v25, %v2397_v3  ;;  %v2577_v44 = vpop.f32.mrb[45].mxu0  ;;  %v12588_v3 = vld [vmem:[%s17475_s3 + $0x5e0] ss:$8 sps:$4 sm:$0xff]   ;;  %v12626_v25 = vld [vmem:[%s17475_s3 + $0x6a4] ss:$8 sps:$4 sm:$0xff]  }
 0x46f   :  { %v2595_v55 = vadd.f32 %v2577_v44, %v2398_v61  ;;  %v2579_v31 = vpop.f32.mrb[46].mxu0  ;;  %4034 = vmatpush1.bf16.msra.mxu0 %v12579_v33  ;;  %v12594_v61 = vld [vmem:[%s17475_s3 + $0x600] ss:$8 sps:$4 sm:$0xff]   ;;  %v17497_v33 = vpack.c.bf16 %v14598_v45, %v14596_v8  ;;  %v12629_v8 = vld [vmem:[%s17475_s3 + $0x6b4] ss:$8 sps:$4 sm:$0xff]   ;;  %v17498_v45 = vpack.c.bf16 %v14618_v22, %v14616_v48 }
 0x470   :  { %v2580_v14 = vpop.f32.mrb[47].mxu0  ;;  %4035 = vmatprep.subr.bf16.mxu0 %v12584_v35  ;;  %v12621_v35 = vld [vmem:[%s17475_s3 + $0x690] ss:$8 sps:$4 sm:$0xff]   ;;  %v12630_v48 = vld [vmem:[%s17475_s3 + $0x6c0] ss:$8 sps:$4 sm:$0xff]  }
 0x471   :  { %v12627_v44 = vld [vmem:[%s17475_s3 + $0x6b0] ss:$8 sps:$4 sm:$0xff]  }
 0x472   :  { %3883 = vmatmul.mubr.bf16.gmra.mrb[28].mxu0 %v17496_v21 }
 0x473   :  { %4036 = vmatpush1.bf16.msra.mxu0 %v12582_v4  ;;  %3892 = vmatprep.mubr.bf16.mxu0 %v13567_v43 }
 0x474   :  { %4037 = vmatprep.subr.bf16.mxu0 %v12587_v57 }
 0x477   :  { %4038 = vmatpush1.bf16.msra.mxu0 %v12585_v37  ;;  %v12635_v37 = vld [vmem:[%s17475_s3 + $0x6d4] ss:$8 sps:$4 sm:$0xff]  }
 0x478   :  { %4039 = vmatprep.subr.bf16.mxu0 %v12590_v50  ;;  %v17499_v50 = vpack.c.bf16 %v14638_v2, %v14636_v32  ;;  %v12641_v32 = vld [vmem:[%s17475_s3 + $0x6f4] ss:$8 sps:$4 sm:$0xff]   ;;  %v12639_v2 = vld [vmem:[%s17475_s3 + $0x6f0] ss:$8 sps:$4 sm:$0xff]  }
 0x47a   :  { %3893 = vmatmul.mubr.bf16.gmra.mrb[72].mxu0 %v14524_v63  ;;  %v12599_v63 = vld [vmem:[%s17475_s3 + $0x614] ss:$8 sps:$4 sm:$0xff]  }
 0x47b   :  { %4040 = vmatpush1.bf16.msra.mxu0 %v12588_v3  ;;  %4059 = vmatprep.mubr.bf16.mxu0 %v13567_v43  ;;  %v12633_v3 = vld [vmem:[%s17475_s3 + $0x6d0] ss:$8 sps:$4 sm:$0xff]  }
 0x47c   :  { %4041 = vmatprep.subr.bf16.mxu0 %v12593_v13  ;;  %v12638_v13 = vld [vmem:[%s17475_s3 + $0x6e4] ss:$8 sps:$4 sm:$0xff]  }
 0x47f   :  { %4042 = vmatpush1.bf16.msra.mxu0 %v12591_v36  ;;  %v12636_v36 = vld [vmem:[%s17475_s3 + $0x6e0] ss:$8 sps:$4 sm:$0xff]  }
 0x480   :  { %4209 = vmatprep.subr.bf16.mxu0 %v12596_v0  ;;  %v12644_v0 = vld [vmem:[%s17475_s3 + $0x704] ss:$8 sps:$4 sm:$0xff]  }
 0x482   :  { %4060 = vmatmul.mubr.bf16.vlgmr.msra.gmra.mrb[20].mxu0 %v14554_v1  ;;  %v12605_v1 = vld [vmem:[%s17475_s3 + $0x634] ss:$8 sps:$4 sm:$0xff]  }
 0x483   :  { %4210 = vmatpush1.bf16.msra.mxu0 %v12594_v61  ;;  %4069 = vmatprep.mubr.bf16.mxu0 %v13567_v43  ;;  %v12642_v61 = vld [vmem:[%s17475_s3 + $0x700] ss:$8 sps:$4 sm:$0xff]  }
 0x484   :  { %4211 = vmatprep.subr.bf16.mxu0 %v12599_v63  ;;  %v12645_v63 = vld [vmem:[%s17475_s3 + $0x710] ss:$8 sps:$4 sm:$0xff]  }
 0x487   :  { %4212 = vmatpush1.bf16.msra.mxu0 %v12597_v51  ;;  %v12650_v51 = vld [vmem:[%s17475_s3 + $0x724] ss:$8 sps:$4 sm:$0xff]  }
 0x488   :  { %4213 = vmatprep.subr.bf16.mxu0 %v12602_v28  ;;  %v12648_v28 = vld [vmem:[%s17475_s3 + $0x720] ss:$8 sps:$4 sm:$0xff]  }
 0x48a   :  { %4070 = vmatmul.mubr.bf16.gmra.mrb[24].mxu0 %v14571_v60  ;;  %v12606_v60 = vld [vmem:[%s17475_s3 + $0x640] ss:$8 sps:$4 sm:$0xff]  }
 0x48b   :  { %4214 = vmatpush1.bf16.msra.mxu0 %v12600_v49  ;;  %4079 = vmatprep.mubr.bf16.mxu0 %v13567_v43  ;;  %v12651_v49 = vld [vmem:[%s17475_s3 + $0x730] ss:$8 sps:$4 sm:$0xff]  }
 0x48c   :  { %4215 = vmatprep.subr.bf16.mxu0 %v12605_v1  ;;  %v12656_v1 = vld [vmem:[%s17475_s3 + $0x744] ss:$8 sps:$4 sm:$0xff]  }
 0x48d   :  { %v2757_v52 = vpop.f32.mrb[48].mxu0 }
 0x48e   :  { %v2776_v46 = vadd.f32 %v2757_v52, %v2594_v38  ;;  %v2759_v58 = vpop.f32.mrb[49].mxu0  ;;  %v12624_v38 = vld [vmem:[%s17475_s3 + $0x6a0] ss:$8 sps:$4 sm:$0xff]  }
 0x48f   :  { %v2777_v40 = vadd.f32 %v2759_v58, %v2595_v55  ;;  %v2761_v42 = vpop.f32.mrb[50].mxu0  ;;  %4216 = vmatpush1.bf16.msra.mxu0 %v12603_v15  ;;  %v12632_v55 = vld [vmem:[%s17475_s3 + $0x6c4] ss:$8 sps:$4 sm:$0xff]  }
 0x490   :  { %v2762_v29 = vpop.f32.mrb[51].mxu0  ;;  %4217 = vmatprep.subr.bf16.mxu0 %v12608_v20  ;;  %v12659_v42 = vld [vmem:[%s17475_s3 + $0x754] ss:$8 sps:$4 sm:$0xff]  }
 0x491   :  { %v12662_v29 = vld [vmem:[%s17475_s3 + $0x764] ss:$8 sps:$4 sm:$0xff]  }
 0x492   :  { %4080 = vmatmul.mubr.bf16.gmra.mrb[28].mxu0 %v14591_v5  ;;  %v12617_v5 = vld [vmem:[%s17475_s3 + $0x674] ss:$8 sps:$4 sm:$0xff]  }
 0x493   :  { %4218 = vmatpush1.bf16.msra.mxu0 %v12606_v60  ;;  %4089 = vmatprep.mubr.bf16.mxu0 %v13567_v43  ;;  %v12657_v60 = vld [vmem:[%s17475_s3 + $0x750] ss:$8 sps:$4 sm:$0xff]  }
 0x494   :  { %4219 = vmatprep.subr.bf16.mxu0 %v12611_v56  ;;  %v12660_v56 = vld [vmem:[%s17475_s3 + $0x760] ss:$8 sps:$4 sm:$0xff]  }
 0x497   :  { %4220 = vmatpush1.bf16.msra.mxu0 %v12609_v18  ;;  %v12663_v18 = vld [vmem:[%s17475_s3 + $0x770] ss:$8 sps:$4 sm:$0xff]  }
 0x498   :  { %4221 = vmatprep.subr.bf16.mxu0 %v12614_v7  ;;  %v12668_v7 = vld [vmem:[%s17475_s3 + $0x784] ss:$8 sps:$4 sm:$0xff]  }
 0x49a   :  { %4090 = vmatmul.mubr.bf16.gmra.mrb[76].mxu0 %v14582_v17  ;;  %v12623_v17 = vld [vmem:[%s17475_s3 + $0x694] ss:$8 sps:$4 sm:$0xff]  }
 0x49b   :  { %4222 = vmatpush1.bf16.msra.mxu0 %v12612_v24  ;;  %4241 = vmatprep.mubr.bf16.mxu0 %v13567_v43  ;;  %v12666_v24 = vld [vmem:[%s17475_s3 + $0x780] ss:$8 sps:$4 sm:$0xff]  }
 0x49c   :  { %4223 = vmatprep.subr.bf16.mxu0 %v12617_v5  ;;  %v17500_v5 = vpack.c.bf16 %v14735_v54, %v14733_v12  ;;  %v12677_v12 = vld [vmem:[%s17475_s3 + $0x7b4] ss:$8 sps:$4 sm:$0xff]   ;;  %v17501_v54 = vpack.c.bf16 %v14755_v59, %v14753_v30  ;;  %v12678_v30 = vld [vmem:[%s17475_s3 + $0x7c0] ss:$8 sps:$4 sm:$0xff]  }
 0x49f   :  { %4224 = vmatpush1.bf16.msra.mxu0 %v12615_v23  ;;  %v12669_v23 = vld [vmem:[%s17475_s3 + $0x790] ss:$8 sps:$4 sm:$0xff]  }
 0x4a0   :  { %4406 = vmatprep.subr.bf16.mxu0 %v12620_v41  ;;  %v12674_v41 = vld [vmem:[%s17475_s3 + $0x7a4] ss:$8 sps:$4 sm:$0xff]  }
 0x4a2   :  { %4242 = vmatmul.mubr.bf16.vlgmr.msra.gmra.mrb[20].mxu0 %v17497_v33  ;;  %v12680_v33 = vld [vmem:[%s17475_s3 + $0x7c4] ss:$8 sps:$4 sm:$0xff]  }
 0x4a3   :  { %4407 = vmatpush1.bf16.msra.mxu0 %v12618_v11  ;;  %4251 = vmatprep.mubr.bf16.mxu0 %v13567_v43  ;;  %v12672_v11 = vld [vmem:[%s17475_s3 + $0x7a0] ss:$8 sps:$4 sm:$0xff]  }
 0x4a4   :  { %4408 = vmatprep.subr.bf16.mxu0 %v12623_v17  ;;  %v12675_v17 = vld [vmem:[%s17475_s3 + $0x7b0] ss:$8 sps:$4 sm:$0xff]  }
 0x4a7   :  { %4409 = vmatpush1.bf16.msra.mxu0 %v12621_v35 }
 0x4a8   :  { %4410 = vmatprep.subr.bf16.mxu0 %v12626_v25 }
 0x4aa   :  { %4252 = vmatmul.mubr.bf16.gmra.mrb[24].mxu0 %v17498_v45 }
 0x4ab   :  { %4411 = vmatpush1.bf16.msra.mxu0 %v12624_v38  ;;  %4261 = vmatprep.mubr.bf16.mxu0 %v13567_v43 }
 0x4ac   :  { %4412 = vmatprep.subr.bf16.mxu0 %v12629_v8 }
 0x4ad   :  { %v2954_v31 = vpop.f32.mrb[52].mxu0 }
 0x4ae   :  { %v2973_v4 = vadd.f32 %v2954_v31, %v2776_v46  ;;  %v2956_v14 = vpop.f32.mrb[53].mxu0  ;;  %v12681_v31 = vld [vmem:[%s17475_s3 + $0x7d0] ss:$8 sps:$4 sm:$0xff]  }
 0x4af   :  { %v2974_v57 = vadd.f32 %v2956_v14, %v2777_v40  ;;  %v2958_v21 = vpop.f32.mrb[54].mxu0  ;;  %4413 = vmatpush1.bf16.msra.mxu0 %v12627_v44  ;;  %v12683_v44 = vld [vmem:[%s17475_s3 + $0x7d4] ss:$8 sps:$4 sm:$0xff]   ;;  %v12684_v14 = vld [vmem:[%s17475_s3 + $0x7e0] ss:$8 sps:$4 sm:$0xff]  }
 0x4b0   :  { %v2959_v22 = vpop.f32.mrb[55].mxu0  ;;  %4414 = vmatprep.subr.bf16.mxu0 %v12632_v55  ;;  %v17502_v55 = vpack.c.bf16 %v14775_v27, %v14773_v39  ;;  %v12689_v39 = vld [vmem:[%s17475_s3 + $0x7f4] ss:$8 sps:$4 sm:$0xff]   ;;  %v12687_v27 = vld [vmem:[%s17475_s3 + $0x7f0] ss:$8 sps:$4 sm:$0xff]  }
 0x4b2   :  { %4262 = vmatmul.mubr.bf16.gmra.mrb[28].mxu0 %v17499_v50 }
 0x4b3   :  { %4415 = vmatpush1.bf16.msra.mxu0 %v12630_v48  ;;  %4271 = vmatprep.mubr.bf16.mxu0 %v13567_v43 }
 0x4b4   :  { %4416 = vmatprep.subr.bf16.mxu0 %v12635_v37 }
 0x4b7   :  { %4417 = vmatpush1.bf16.msra.mxu0 %v12633_v3 }
 0x4b8   :  { %4418 = vmatprep.subr.bf16.mxu0 %v12638_v13 }
 0x4ba   :  { %4272 = vmatmul.mubr.bf16.gmra.mrb[80].mxu0 %v14659_v16  ;;  %v12647_v16 = vld [vmem:[%s17475_s3 + $0x714] ss:$8 sps:$4 sm:$0xff]  }
 0x4bb   :  { %4419 = vmatpush1.bf16.msra.mxu0 %v12636_v36  ;;  %4438 = vmatprep.mubr.bf16.mxu0 %v13567_v43 }
 0x4bc   :  { %4420 = vmatprep.subr.bf16.mxu0 %v12641_v32 }
 0x4bf   :  { %4421 = vmatpush1.bf16.msra.mxu0 %v12639_v2 }
 0x4c0   :  { %4588 = vmatprep.subr.bf16.mxu0 %v12644_v0 }
 0x4c2   :  { %4439 = vmatmul.mubr.bf16.vlgmr.msra.gmra.mrb[20].mxu0 %v14689_v10  ;;  %v12653_v10 = vld [vmem:[%s17475_s3 + $0x734] ss:$8 sps:$4 sm:$0xff]  }
 0x4c3   :  { %4589 = vmatpush1.bf16.msra.mxu0 %v12642_v61  ;;  %4448 = vmatprep.mubr.bf16.mxu0 %v13567_v43 }
 0x4c4   :  { %4590 = vmatprep.subr.bf16.mxu0 %v12647_v16 }
 0x4c7   :  { %4591 = vmatpush1.bf16.msra.mxu0 %v12645_v63 }
 0x4c8   :  { %4592 = vmatprep.subr.bf16.mxu0 %v12650_v51 }
 0x4ca   :  { %4449 = vmatmul.mubr.bf16.gmra.mrb[24].mxu0 %v14708_v53  ;;  %v12654_v53 = vld [vmem:[%s17475_s3 + $0x740] ss:$8 sps:$4 sm:$0xff]  }
 0x4cb   :  { %4593 = vmatpush1.bf16.msra.mxu0 %v12648_v28  ;;  %4458 = vmatprep.mubr.bf16.mxu0 %v13567_v43 }
 0x4cc   :  { %4594 = vmatprep.subr.bf16.mxu0 %v12653_v10 }
 0x4cd   :  { %v3136_v15 = vpop.f32.mrb[56].mxu0 }
 0x4ce   :  { %v3155_v20 = vadd.f32 %v3136_v15, %v2973_v4  ;;  %v3138_v52 = vpop.f32.mrb[57].mxu0  ;;  %v12686_v4 = vld [vmem:[%s17475_s3 + $0x7e4] ss:$8 sps:$4 sm:$0xff]  }
 0x4cf   :  { %v3156_v46 = vadd.f32 %v3138_v52, %v2974_v57  ;;  %v3140_v58 = vpop.f32.mrb[58].mxu0  ;;  %4595 = vmatpush1.bf16.msra.mxu0 %v12651_v49 }
 0x4d0   :  { %v3141_v40 = vpop.f32.mrb[59].mxu0  ;;  %4596 = vmatprep.subr.bf16.mxu0 %v12656_v1 }
 0x4d2   :  { %4459 = vmatmul.mubr.bf16.gmra.mrb[28].mxu0 %v14728_v19  ;;  %v12665_v19 = vld [vmem:[%s17475_s3 + $0x774] ss:$8 sps:$4 sm:$0xff]  }
 0x4d3   :  { %4597 = vmatpush1.bf16.msra.mxu0 %v12654_v53  ;;  %4468 = vmatprep.mubr.bf16.mxu0 %v13567_v43 }
 0x4d4   :  { %4598 = vmatprep.subr.bf16.mxu0 %v12659_v42 }
 0x4d7   :  { %4599 = vmatpush1.bf16.msra.mxu0 %v12657_v60 }
 0x4d8   :  { %4600 = vmatprep.subr.bf16.mxu0 %v12662_v29 }
 0x4da   :  { %4469 = vmatmul.mubr.bf16.gmra.mrb[84].mxu0 %v14719_v34  ;;  %v12671_v34 = vld [vmem:[%s17475_s3 + $0x794] ss:$8 sps:$4 sm:$0xff]  }
 0x4db   :  { %4601 = vmatpush1.bf16.msra.mxu0 %v12660_v56  ;;  %4620 = vmatprep.mubr.bf16.mxu0 %v13567_v43 }
 0x4dc   :  { %4602 = vmatprep.subr.bf16.mxu0 %v12665_v19  ;;  %v4872_v19 = vlaneseq }
 0x4df   :  { %4603 = vmatpush1.bf16.msra.mxu0 %v12663_v18  ;;  %v15361_v18 = vshrl.u32 %v4872_v19, 7 }
 0x4e0   :  { %4785 = vmatprep.subr.bf16.mxu0 %v12668_v7 }
 0x4e2   :  { %4621 = vmatmul.mubr.bf16.vlgmr.msra.gmra.mrb[20].mxu0 %v17500_v5 }
 0x4e3   :  { %4786 = vmatpush1.bf16.msra.mxu0 %v12666_v24  ;;  %4630 = vmatprep.mubr.bf16.mxu0 %v13567_v43  ;;  %v4870_v24 = vld [vmem:[%s17478_s4] sm:$0x3] }
 0x4e4   :  { %4787 = vmatprep.subr.bf16.mxu0 %v12671_v34 }
 0x4e7   :  { %4788 = vmatpush1.bf16.msra.mxu0 %v12669_v23  ;;  %v4874_v23 = vsub.s32 0, %v15361_v18 }
 0x4e8   :  { %4789 = vmatprep.subr.bf16.mxu0 %v12674_v41 }
 0x4ea   :  { %4631 = vmatmul.mubr.bf16.gmra.mrb[24].mxu0 %v17501_v54 }
 0x4eb   :  { %4790 = vmatpush1.bf16.msra.mxu0 %v12672_v11  ;;  %4640 = vmatprep.mubr.bf16.mxu0 %v13567_v43 }
 0x4ec   :  { %4791 = vmatprep.subr.bf16.mxu0 %v12677_v12  ;;  %v4878_v12 = vsub.s32 1, %v15361_v18 }
 0x4ed   :  { %v3333_v35 = vpop.f32.mrb[60].mxu0 }
 0x4ee   :  { %v3352_v25 = vadd.f32 %v3333_v35, %v3155_v20  ;;  %v3335_v38 = vpop.f32.mrb[61].mxu0 }
 0x4ef   :  { %v3353_v8 = vadd.f32 %v3335_v38, %v3156_v46  ;;  %v3337_v45 = vpop.f32.mrb[62].mxu0  ;;  %4792 = vmatpush1.bf16.msra.mxu0 %v12675_v17  ;;  %v15374_v17 = vrot.slane %v4870_v24, %v4874_v23 }
 0x4f0   :  { %v3338_v59 = vpop.f32.mrb[63].mxu0  ;;  %4793 = vmatprep.subr.bf16.mxu0 %v12680_v33  ;;  %v15378_v33 = vrot.slane %v4870_v24, %v4878_v12 }
 0x4f2   :  { %4641 = vmatmul.mubr.bf16.gmra.mrb[28].mxu0 %v17502_v55 }
 0x4f3   :  { %4794 = vmatpush1.bf16.msra.mxu0 %v12678_v30  ;;  %4650 = vmatprep.mubr.bf16.mxu0 %v13567_v43 }
 0x4f4   :  { %4795 = vmatprep.subr.bf16.mxu0 %v12683_v44 }
 0x4f7   :  { %4796 = vmatpush1.bf16.msra.mxu0 %v12681_v31 }
 0x4f8   :  { %4797 = vmatprep.subr.bf16.mxu0 %v12686_v4 }
 0x4fa   :  { %4651 = vmatmul.mubr.bf16.gmra.mrb[88].mxu0 %v14796_v47 }
 0x4fb   :  { %4798 = vmatpush1.bf16.msra.mxu0 %v12684_v14  ;;  %4817 = vmatprep.mubr.bf16.mxu0 %v13567_v43 }
 0x4fc   :  { %4799 = vmatprep.subr.bf16.mxu0 %v12689_v39 }
 0x4ff   :  { %4800 = vmatpush1.bf16.msra.mxu0 %v12687_v27 }
 0x502   :  { %4818 = vmatmul.mubr.bf16.vlgmr.msra.gmra.mrb[20].mxu0 %v14824_v26 }
 0x503   :  { %4827 = vmatprep.mubr.bf16.mxu0 %v13567_v43 }
 0x50a   :  { %4828 = vmatmul.mubr.bf16.gmra.mrb[24].mxu0 %v14843_v6 }
 0x50b   :  { %4837 = vmatprep.mubr.bf16.mxu0 %v13567_v43 }
 0x50d   :  { %v3515_v57 = vpop.f32.mrb[64].mxu0 }
 0x50e   :  { %v3534_v21 = vadd.f32 %v3515_v57, %v3352_v25  ;;  %v3517_v47 = vpop.f32.mrb[65].mxu0 }
 0x50f   :  { %v3535_v48 = vadd.f32 %v3517_v47, %v3353_v8  ;;  %v3519_v22 = vpop.f32.mrb[66].mxu0 }
 0x510   :  { %v3520_v37 = vpop.f32.mrb[67].mxu0 }
 0x512   :  { %4838 = vmatmul.mubr.bf16.gmra.mrb[28].mxu0 %v14865_v62 }
 0x513   :  { %4847 = vmatprep.mubr.bf16.mxu0 %v13567_v43 }
 0x51a   :  { %4848 = vmatmul.mubr.bf16.gmra.mrb[92].mxu0 %v14854_v9 }
 0x51b   :  { %5076 = vmatprep.mubr.bf16.mxu0 %v13567_v43 }
 0x52d   :  { %v3712_v26 = vpop.f32.mrb[68].mxu0 }
 0x52e   :  { %v3731_v50 = vadd.f32 %v3712_v26, %v3534_v21  ;;  %v3714_v3 = vpop.f32.mrb[69].mxu0 }
 0x52f   :  { %v3732_v6 = vadd.f32 %v3714_v3, %v3535_v48  ;;  %v3716_v13 = vpop.f32.mrb[70].mxu0 }
 0x530   :  { %v3717_v36 = vpop.f32.mrb[71].mxu0 }
 0x54d   :  { %v3894_v32 = vpop.f32.mrb[72].mxu0 }
 0x54e   :  { %v3913_v2 = vadd.f32 %v3894_v32, %v3731_v50  ;;  %v3896_v0 = vpop.f32.mrb[73].mxu0 }
 0x54f   :  { %v3914_v61 = vadd.f32 %v3896_v0, %v3732_v6  ;;  %v3898_v16 = vpop.f32.mrb[74].mxu0 }
 0x550   :  { %v3899_v63 = vpop.f32.mrb[75].mxu0 }
 0x56d   :  { %v4091_v51 = vpop.f32.mrb[76].mxu0 }
 0x56e   :  { %v4110_v62 = vadd.f32 %v4091_v51, %v3913_v2  ;;  %v4093_v28 = vpop.f32.mrb[77].mxu0 }
 0x56f   :  { %v4111_v10 = vadd.f32 %v4093_v28, %v3914_v61  ;;  %v4095_v49 = vpop.f32.mrb[78].mxu0 }
 0x570   :  { %v4096_v9 = vpop.f32.mrb[79].mxu0 }
 0x58d   :  { %v4273_v1 = vpop.f32.mrb[80].mxu0 }
 0x58e   :  { %v4292_v15 = vadd.f32 %v4273_v1, %v4110_v62  ;;  %v4275_v20 = vpop.f32.mrb[81].mxu0 }
 0x58f   :  { %v4293_v52 = vadd.f32 %v4275_v20, %v4111_v10  ;;  %v4277_v46 = vpop.f32.mrb[82].mxu0 }
 0x590   :  { %v4278_v58 = vpop.f32.mrb[83].mxu0 }
 0x5ad   :  { %v4470_v53 = vpop.f32.mrb[84].mxu0 }
 0x5ae   :  { %v4489_v40 = vadd.f32 %v4470_v53, %v4292_v15  ;;  %v4472_v42 = vpop.f32.mrb[85].mxu0 }
 0x5af   :  { %v4490_v60 = vadd.f32 %v4472_v42, %v4293_v52  ;;  %v4474_v29 = vpop.f32.mrb[86].mxu0 }
 0x5b0   :  { %v4475_v56 = vpop.f32.mrb[87].mxu0 }
 0x5cd   :  { %v4652_v7 = vpop.f32.mrb[88].mxu0 }
 0x5ce   :  { %v15366_v34 = vadd.f32 %v4652_v7, %v4489_v40  ;;  %v4654_v5 = vpop.f32.mrb[89].mxu0 }
 0x5cf   :  { %v15369_v41 = vadd.f32 %v4654_v5, %v4490_v60  ;;  %v4656_v11 = vpop.f32.mrb[90].mxu0 }
 0x5d0   :  { %v4657_v54 = vpop.f32.mrb[91].mxu0 }
 0x5d5   :  { %v4819_v35 = vpop.f32.mrb[20].mxu0 }
 0x5d6   :  { %v4882_v25 = vadd.f32 %v15374_v17, %v4819_v35  ;;  %v4821_v38 = vpop.f32.mrb[21].mxu0 }
 0x5d7   :  { %v4883_v8 = vadd.f32 %v15378_v33, %v4821_v38  ;;  %v4823_v45 = vpop.f32.mrb[22].mxu0 }
 0x5d8   :  { %vm4896_vm0 = vcmp.ge.f32.partialorder %v4882_v25, 0.0  ;;  %v4910_v30 = vmul.f32 0.2, %v4882_v25  ;;  %v4884_v59 = vadd.f32 %v15374_v17, %v4823_v45  ;;  %v4825_v44 = vpop.f32.mrb[23].mxu0 }
 0x5d9   :  { %vm4897_vm13 = vcmp.ge.f32.partialorder %v4883_v8, 0.0  ;;  %v4911_v55 = vmul.f32 0.2, %v4883_v8  ;;  %v4885_v31 = vadd.f32 %v15378_v33, %v4825_v44 }
 0x5da   :  { %vm4898_vm14 = vcmp.ge.f32.partialorder %v4884_v59, 0.0  ;;  %v4912_v4 = vmul.f32 0.2, %v4884_v59  ;;  %v4924_v39 = vsel %vm4896_vm0, %v4882_v25, %v4910_v30 }
 0x5db   :  { %vm4899_vm15 = vcmp.ge.f32.partialorder %v4885_v31, 0.0  ;;  %v4913_v14 = vmul.f32 0.2, %v4885_v31  ;;  %v4925_v47 = vsel %vm4897_vm13, %v4883_v8, %v4911_v55 }
 0x5dc   :  { %v4926_v27 = vsel %vm4898_vm14, %v4884_v59, %v4912_v4 }
 0x5dd   :  { %v4938_v57 = vpack.c.bf16 %v4926_v27, %v4924_v39  ;;  %v4829_v21 = vpop.f32.mrb[24].mxu0  ;;  %v4927_v48 = vsel %vm4899_vm15, %v4885_v31, %v4913_v14  ;;  %v12692_v39 = vld [vmem:[%s17477_s6 + $0x200] ss:$16 sps:$4 sm:$0xff]   ;;  %v12697_v27 = vld [vmem:[%s17477_s6 + $0x224] ss:$16 sps:$4 sm:$0xff]  }
 0x5de   :  { %v4886_v22 = vadd.f32 %v15374_v17, %v4829_v21  ;;  %v4831_v37 = vpop.f32.mrb[25].mxu0  ;;  %v4939_v26 = vpack.c.bf16 %v4927_v48, %v4925_v47  ;;  %v12700_v21 = vld [vmem:[%s17477_s6 + $0x244] ss:$16 sps:$4 sm:$0xff]   ;;  %v12698_v48 = vld [vmem:[%s17477_s6 + $0x240] ss:$16 sps:$4 sm:$0xff]  }
 0x5df   :  { %v4887_v50 = vadd.f32 %v15378_v33, %v4831_v37  ;;  %v4833_v3 = vpop.f32.mrb[26].mxu0  ;;  %v12701_v47 = vld [vmem:[%s17476_s5 + $0x10] sm:$0xff]  }
 0x5e0   :  { %vm4900_vm1 = vcmp.ge.f32.partialorder %v4886_v22, 0.0  ;;  %v4914_v6 = vmul.f32 0.2, %v4886_v22  ;;  %v4888_v13 = vadd.f32 %v15374_v17, %v4833_v3  ;;  %v4835_v36 = vpop.f32.mrb[27].mxu0  ;;  %5044 = vmatprep.subr.bf16.mxu0 %v4939_v26  ;;  %11831 = vmatprep.subr.bf16.mxu1 %v4939_v26  ;;  %v12702_v37 = vld [vmem:[%s17477_s6 + $0x260] ss:$16 sps:$4 sm:$0xff]  }
 0x5e1   :  { %vm4901_vm2 = vcmp.ge.f32.partialorder %v4887_v50, 0.0  ;;  %v4915_v32 = vmul.f32 0.2, %v4887_v50  ;;  %v4889_v2 = vadd.f32 %v15378_v33, %v4835_v36  ;;  %5045 = vmatpush1.bf16.msra.mxu0 %v4938_v57  ;;  %11835 = vmatpush1.bf16.msra.mxu1 %v4938_v57  ;;  %v12695_v57 = vld [vmem:[%s17477_s6 + $0x220] ss:$16 sps:$4 sm:$0xff]  }
 0x5e2   :  { %vm4902_vm3 = vcmp.ge.f32.partialorder %v4888_v13, 0.0  ;;  %v4916_v0 = vmul.f32 0.2, %v4888_v13  ;;  %v4928_v16 = vsel %vm4900_vm1, %v4886_v22, %v4914_v6  ;;  %v12704_v22 = vld [vmem:[%s17477_s6 + $0x264] ss:$16 sps:$4 sm:$0xff]  }
 0x5e3   :  { %vm4903_vm4 = vcmp.ge.f32.partialorder %v4889_v2, 0.0  ;;  %v4917_v61 = vmul.f32 0.2, %v4889_v2  ;;  %v4929_v28 = vsel %vm4901_vm2, %v4887_v50, %v4915_v32  ;;  %v12707_v26 = vld [vmem:[%s17477_s6 + $0x284] ss:$16 sps:$4 sm:$0xff]   ;;  %v12708_v50 = vld [vmem:[%s17476_s5 + $0x18] sm:$0xff]  }
 0x5e4   :  { %v4930_v63 = vsel %vm4902_vm3, %v4888_v13, %v4916_v0  ;;  %v12705_v3 = vld [vmem:[%s17477_s6 + $0x280] ss:$16 sps:$4 sm:$0xff]   ;;  %v12711_v6 = vld [vmem:[%s17477_s6 + $0x2a4] ss:$16 sps:$4 sm:$0xff]  }
 0x5e5   :  { %v4940_v51 = vpack.c.bf16 %v4930_v63, %v4928_v16  ;;  %v4839_v62 = vpop.f32.mrb[28].mxu0  ;;  %v4931_v10 = vsel %vm4903_vm4, %v4889_v2, %v4917_v61  ;;  %v12709_v13 = vld [vmem:[%s17477_s6 + $0x2a0] ss:$16 sps:$4 sm:$0xff]   ;;  %v12714_v36 = vld [vmem:[%s17477_s6 + $0x2c4] ss:$16 sps:$4 sm:$0xff]   ;;  %v12722_v63 = vld [vmem:[%s17476_s5 + $0x28] sm:$0xff]  }
 0x5e6   :  { %v4890_v49 = vadd.f32 %v15374_v17, %v4839_v62  ;;  %v4841_v9 = vpop.f32.mrb[29].mxu0  ;;  %v4941_v1 = vpack.c.bf16 %v4931_v10, %v4929_v28  ;;  %v12715_v32 = vld [vmem:[%s17476_s5 + $0x20] sm:$0xff]  }
 0x5e7   :  { %v4891_v15 = vadd.f32 %v15378_v33, %v4841_v9  ;;  %v4843_v20 = vpop.f32.mrb[30].mxu0  ;;  %v12712_v2 = vld [vmem:[%s17477_s6 + $0x2c0] ss:$16 sps:$4 sm:$0xff]   ;;  %v12718_v0 = vld [vmem:[%s17477_s6 + $0x2e4] ss:$16 sps:$4 sm:$0xff]  }
 0x5e8   :  { %vm4904_vm5 = vcmp.ge.f32.partialorder %v4890_v49, 0.0  ;;  %v4918_v52 = vmul.f32 0.2, %v4890_v49  ;;  %v4892_v46 = vadd.f32 %v15374_v17, %v4843_v20  ;;  %v4845_v58 = vpop.f32.mrb[31].mxu0  ;;  %5046 = vmatprep.subr.bf16.mxu0 %v4941_v1  ;;  %11832 = vmatprep.subr.bf16.mxu1 %v4941_v1  ;;  %v12716_v61 = vld [vmem:[%s17477_s6 + $0x2e0] ss:$16 sps:$4 sm:$0xff]  }
 0x5e9   :  { %vm4905_vm6 = vcmp.ge.f32.partialorder %v4891_v15, 0.0  ;;  %v4919_v53 = vmul.f32 0.2, %v4891_v15  ;;  %v4893_v40 = vadd.f32 %v15378_v33, %v4845_v58  ;;  %5047 = vmatpush1.bf16.msra.mxu0 %v4940_v51  ;;  %11836 = vmatpush1.bf16.msra.mxu1 %v4940_v51  ;;  %v12721_v16 = vld [vmem:[%s17477_s6 + $0x304] ss:$16 sps:$4 sm:$0xff]  }
 0x5ea   :  { %vm4906_vm7 = vcmp.ge.f32.partialorder %v4892_v46, 0.0  ;;  %v4920_v42 = vmul.f32 0.2, %v4892_v46  ;;  %v4932_v29 = vsel %vm4904_vm5, %v4890_v49, %v4918_v52  ;;  %v12719_v51 = vld [vmem:[%s17477_s6 + $0x300] ss:$16 sps:$4 sm:$0xff]   ;;  %v12736_v52 = vld [vmem:[%s17476_s5 + $0x38] sm:$0xff]  }
 0x5eb   :  { %vm4907_vm8 = vcmp.ge.f32.partialorder %v4893_v40, 0.0  ;;  %v4921_v60 = vmul.f32 0.2, %v4893_v40  ;;  %v4933_v24 = vsel %vm4905_vm6, %v4891_v15, %v4919_v53  ;;  %v12725_v62 = vld [vmem:[%s17477_s6 + $0x324] ss:$16 sps:$4 sm:$0xff]  }
 0x5ec   :  { %v4934_v56 = vsel %vm4906_vm7, %v4892_v46, %v4920_v42  ;;  %v12723_v28 = vld [vmem:[%s17477_s6 + $0x320] ss:$16 sps:$4 sm:$0xff]   ;;  %v12728_v10 = vld [vmem:[%s17477_s6 + $0x344] ss:$16 sps:$4 sm:$0xff]  }
 0x5ed   :  { %v4942_v19 = vpack.c.bf16 %v4934_v56, %v4932_v29  ;;  %v4849_v7 = vpop.f32.mrb[92].mxu0  ;;  %v4935_v5 = vsel %vm4907_vm8, %v4893_v40, %v4921_v60  ;;  %v12729_v49 = vld [vmem:[%s17476_s5 + $0x30] sm:$0xff]   ;;  %v12743_v42 = vld [vmem:[%s17476_s5 + $0x40] sm:$0xff]   ;;  %v12749_v56 = vld [vmem:[%s17477_s6 + $0x20c] ss:$16 sps:$4 sm:$0xff]  }
 0x5ee   :  { %v4868_v11 = vadd.f32 %v4849_v7, %v15366_v34  ;;  %v4851_v54 = vpop.f32.mrb[93].mxu0  ;;  %v4943_v35 = vpack.c.bf16 %v4935_v5, %v4933_v24  ;;  %v12694_v34 = vld [vmem:[%s17477_s6 + $0x204] ss:$16 sps:$4 sm:$0xff]   ;;  %v12726_v9 = vld [vmem:[%s17477_s6 + $0x340] ss:$16 sps:$4 sm:$0xff]  }
 0x5ef   :  { %v4869_v25 = vadd.f32 %v4851_v54, %v15369_v41  ;;  %v4853_v38 = vpop.f32.mrb[94].mxu0  ;;  %v12732_v1 = vld [vmem:[%s17477_s6 + $0x364] ss:$16 sps:$4 sm:$0xff]   ;;  %v12730_v15 = vld [vmem:[%s17477_s6 + $0x360] ss:$16 sps:$4 sm:$0xff]  }
 0x5f0   :  { %v4894_v8 = vadd.f32 %v15374_v17, %v4868_v11  ;;  %v4854_v45 = vpop.f32.mrb[95].mxu0  ;;  %5048 = vmatprep.subr.bf16.mxu0 %v4943_v35  ;;  %11833 = vmatprep.subr.bf16.mxu1 %v4943_v35  ;;  %v12690_v17 = vld [vmem:[%s17476_s5 + $0x8] sm:$0xff]   ;;  %v12735_v20 = vld [vmem:[%s17477_s6 + $0x384] ss:$16 sps:$4 sm:$0xff]   ;;  %v12733_v46 = vld [vmem:[%s17477_s6 + $0x380] ss:$16 sps:$4 sm:$0xff]  }
 0x5f1   :  { %v4895_v30 = vadd.f32 %v15378_v33, %v4869_v25  ;;  %5049 = vmatpush1.bf16.msra.mxu0 %v4942_v19  ;;  %11837 = vmatpush1.bf16.msra.mxu1 %v4942_v19  ;;  %v12691_v33 = vld [vmem:[%s17476_s5] sm:$0xff]  }
 0x5f2   :  { %vm4908_vm9 = vcmp.ge.f32.partialorder %v4894_v8, 0.0  ;;  %v4922_v59 = vmul.f32 0.2, %v4894_v8  ;;  %v12739_v58 = vld [vmem:[%s17477_s6 + $0x3a4] ss:$16 sps:$4 sm:$0xff]  }
 0x5f3   :  { %vm4909_vm10 = vcmp.ge.f32.partialorder %v4895_v30, 0.0  ;;  %v4923_v44 = vmul.f32 0.2, %v4895_v30  ;;  %v12737_v53 = vld [vmem:[%s17477_s6 + $0x3a0] ss:$16 sps:$4 sm:$0xff]  }
 0x5f4   :  { %v4936_v55 = vsel %vm4908_vm9, %v4894_v8, %v4922_v59  ;;  %v12742_v40 = vld [vmem:[%s17477_s6 + $0x3c4] ss:$16 sps:$4 sm:$0xff]   ;;  %v12740_v60 = vld [vmem:[%s17477_s6 + $0x3c0] ss:$16 sps:$4 sm:$0xff]  }
 0x5f5   :  { %v4937_v41 = vsel %vm4909_vm10, %v4895_v30, %v4923_v44  ;;  %v4944_v31 = vpack.c.bf16 %v4936_v55, %v4936_v55  ;;  %v12746_v29 = vld [vmem:[%s17477_s6 + $0x3e4] ss:$16 sps:$4 sm:$0xff]   ;;  %v12747_v30 = vld [vmem:[%s17477_s6 + $0x208] ss:$16 sps:$4 sm:$0xff]   ;;  %v12752_v44 = vld [vmem:[%s17477_s6 + $0x22c] ss:$16 sps:$4 sm:$0xff]  }
 0x5f6   :  { %v4945_v4 = vpack.c.bf16 %v4937_v41, %v4937_v41  ;;  %v12750_v55 = vld [vmem:[%s17477_s6 + $0x228] ss:$16 sps:$4 sm:$0xff]  }
 0x5f7   :  { %v5039_v14 = vsel %vm1903_vm12, %v4944_v31, 0  ;;  %v12753_v41 = vld [vmem:[%s17477_s6 + $0x248] ss:$16 sps:$4 sm:$0xff]   ;;  %v12758_v31 = vld [vmem:[%s17477_s6 + $0x26c] ss:$16 sps:$4 sm:$0xff]  }
 0x5f8   :  { %10499 = vmatprep.subr.msk.bf16.mxu0 %vm1903_vm12, %v4945_v4  ;;  %11834 = vmatprep.subr.msk.bf16.mxu1 %vm1903_vm12, %v4945_v4  ;;  %v12756_v4 = vld [vmem:[%s17477_s6 + $0x268] ss:$16 sps:$4 sm:$0xff]  }
 0x5f9   :  { %5051 = vmatpush1.bf16.msra.mxu0 %v5039_v14  ;;  %11838 = vmatpush1.bf16.msra.mxu1 %v5039_v14  ;;  %v12764_v14 = vld [vmem:[%s17477_s6 + $0x2ac] ss:$16 sps:$4 sm:$0xff]  }
 0x5fa   :  { %5634 = vmatprep.subr.bf16.mxu1 %v12694_v34  ;;  %v12755_v34 = vld [vmem:[%s17477_s6 + $0x24c] ss:$16 sps:$4 sm:$0xff]  }
 0x5fc   :  { %10501 = vmatmul.mubr.msk.bf16.vlgmr.msra.gmra.mrb[0].mxu1 %vm5009_vm11, %v12690_v17  ;;  %10500 = vmatmul.mubr.msk.bf16.vlgmr.msra.gmra.mrb[96].mxu0 %vm5009_vm11, %v12691_v33  ;;  %v12761_v17 = vld [vmem:[%s17477_s6 + $0x28c] ss:$16 sps:$4 sm:$0xff]   ;;  %v12759_v33 = vld [vmem:[%s17477_s6 + $0x288] ss:$16 sps:$4 sm:$0xff]  }
 0x5fd   :  { %5635 = vmatpush1.bf16.msra.mxu1 %v12692_v39  ;;  %5096 = vmatprep.mubr.bf16.mxu1 %v13567_v43  ;;  %v12762_v39 = vld [vmem:[%s17477_s6 + $0x2a8] ss:$16 sps:$4 sm:$0xff]  }
 0x5fe   :  { %5636 = vmatprep.subr.bf16.mxu1 %v12697_v27  ;;  %v12767_v27 = vld [vmem:[%s17477_s6 + $0x2cc] ss:$16 sps:$4 sm:$0xff]  }
 0x601   :  { %5637 = vmatpush1.bf16.msra.mxu1 %v12695_v57  ;;  %v12765_v57 = vld [vmem:[%s17477_s6 + $0x2c8] ss:$16 sps:$4 sm:$0xff]  }
 0x602   :  { %5638 = vmatprep.subr.bf16.mxu1 %v12700_v21  ;;  %v12770_v21 = vld [vmem:[%s17477_s6 + $0x2ec] ss:$16 sps:$4 sm:$0xff]  }
 0x604   :  { %10502 = vmatmul.mubr.msk.bf16.gmra.mrb[4].mxu1 %vm5009_vm11, %v12701_v47  ;;  %v12768_v47 = vld [vmem:[%s17477_s6 + $0x2e8] ss:$16 sps:$4 sm:$0xff]  }
 0x605   :  { %5639 = vmatpush1.bf16.msra.mxu1 %v12698_v48  ;;  %5106 = vmatprep.mubr.bf16.mxu1 %v13567_v43 }
 0x606   :  { %5640 = vmatprep.subr.bf16.mxu1 %v12704_v22  ;;  %v12773_v22 = vld [vmem:[%s17477_s6 + $0x30c] ss:$16 sps:$4 sm:$0xff]  }
 0x609   :  { %5641 = vmatpush1.bf16.msra.mxu1 %v12702_v37 }
 0x60a   :  { %5642 = vmatprep.subr.bf16.mxu1 %v12707_v26 }
 0x60c   :  { %10503 = vmatmul.mubr.msk.bf16.gmra.mrb[8].mxu1 %vm5009_vm11, %v12708_v50 }
 0x60d   :  { %5643 = vmatpush1.bf16.msra.mxu1 %v12705_v3  ;;  %5116 = vmatprep.mubr.bf16.mxu1 %v13567_v43  ;;  %v12771_v3 = vld [vmem:[%s17477_s6 + $0x308] ss:$16 sps:$4 sm:$0xff]  }
 0x60e   :  { %5644 = vmatprep.subr.bf16.mxu1 %v12711_v6 }
 0x611   :  { %5645 = vmatpush1.bf16.msra.mxu1 %v12709_v13 }
 0x612   :  { %5646 = vmatprep.subr.bf16.mxu1 %v12714_v36  ;;  %v12776_v36 = vld [vmem:[%s17477_s6 + $0x32c] ss:$16 sps:$4 sm:$0xff]  }
 0x614   :  { %10504 = vmatmul.mubr.msk.bf16.gmra.mrb[12].mxu1 %vm5009_vm11, %v12715_v32  ;;  %v12774_v32 = vld [vmem:[%s17477_s6 + $0x328] ss:$16 sps:$4 sm:$0xff]  }
 0x615   :  { %5647 = vmatpush1.bf16.msra.mxu1 %v12712_v2  ;;  %5126 = vmatprep.mubr.bf16.mxu1 %v13567_v43 }
 0x616   :  { %5648 = vmatprep.subr.bf16.mxu1 %v12718_v0  ;;  %v12779_v0 = vld [vmem:[%s17477_s6 + $0x34c] ss:$16 sps:$4 sm:$0xff]  }
 0x619   :  { %5649 = vmatpush1.bf16.msra.mxu1 %v12716_v61 }
 0x61a   :  { %5650 = vmatprep.subr.bf16.mxu1 %v12721_v16 }
 0x61c   :  { %10505 = vmatmul.mubr.msk.bf16.gmra.mrb[16].mxu1 %vm5009_vm11, %v12722_v63 }
 0x61d   :  { %5651 = vmatpush1.bf16.msra.mxu1 %v12719_v51  ;;  %5136 = vmatprep.mubr.bf16.mxu1 %v13567_v43  ;;  %v12777_v51 = vld [vmem:[%s17477_s6 + $0x348] ss:$16 sps:$4 sm:$0xff]  }
 0x61e   :  { %5652 = vmatprep.subr.bf16.mxu1 %v12725_v62 }
 0x621   :  { %5653 = vmatpush1.bf16.msra.mxu1 %v12723_v28 }
 0x622   :  { %5654 = vmatprep.subr.bf16.mxu1 %v12728_v10  ;;  %v12782_v10 = vld [vmem:[%s17477_s6 + $0x36c] ss:$16 sps:$4 sm:$0xff]  }
 0x624   :  { %10506 = vmatmul.mubr.msk.bf16.gmra.mrb[20].mxu1 %vm5009_vm11, %v12729_v49  ;;  %v12780_v49 = vld [vmem:[%s17477_s6 + $0x368] ss:$16 sps:$4 sm:$0xff]  }
 0x625   :  { %5655 = vmatpush1.bf16.msra.mxu1 %v12726_v9  ;;  %5146 = vmatprep.mubr.bf16.mxu1 %v13567_v43 }
 0x626   :  { %5656 = vmatprep.subr.bf16.mxu1 %v12732_v1  ;;  %v12785_v1 = vld [vmem:[%s17477_s6 + $0x38c] ss:$16 sps:$4 sm:$0xff]  }
 0x629   :  { %5657 = vmatpush1.bf16.msra.mxu1 %v12730_v15 }
 0x62a   :  { %5658 = vmatprep.subr.bf16.mxu1 %v12735_v20 }
 0x62c   :  { %10507 = vmatmul.mubr.msk.bf16.gmra.mrb[24].mxu1 %vm5009_vm11, %v12736_v52 }
 0x62d   :  { %5659 = vmatpush1.bf16.msra.mxu1 %v12733_v46  ;;  %5156 = vmatprep.mubr.bf16.mxu1 %v13567_v43  ;;  %v12744_v43 = vld [vmem:[%s17477_s6 + $0x3e0] ss:$16 sps:$4 sm:$0xff]   ;;  %v12783_v46 = vld [vmem:[%s17477_s6 + $0x388] ss:$16 sps:$4 sm:$0xff]  }
 0x62e   :  { %5660 = vmatprep.subr.bf16.mxu1 %v12739_v58 }
 0x631   :  { %5661 = vmatpush1.bf16.msra.mxu1 %v12737_v53 }
 0x632   :  { %5662 = vmatprep.subr.bf16.mxu1 %v12742_v40  ;;  %v12788_v40 = vld [vmem:[%s17477_s6 + $0x3ac] ss:$16 sps:$4 sm:$0xff]  }
 0x634   :  { %10508 = vmatmul.mubr.msk.bf16.gmra.mrb[28].mxu1 %vm5009_vm11, %v12743_v42  ;;  %v12786_v42 = vld [vmem:[%s17477_s6 + $0x3a8] ss:$16 sps:$4 sm:$0xff]  }
 0x635   :  { %5663 = vmatpush1.bf16.msra.mxu1 %v12740_v60 }
 0x636   :  { %5664 = vmatprep.subr.bf16.mxu1 %v12746_v29  ;;  %v12791_v29 = vld [vmem:[%s17477_s6 + $0x3cc] ss:$16 sps:$4 sm:$0xff]  }
 0x639   :  { %5665 = vmatpush1.bf16.msra.mxu1 %v12744_v43 }
 0x63a   :  { %5677 = vmatprep.subr.bf16.mxu1 %v12749_v56 }
 0x6cf   :  { %v5088_v19 = vpop.f32.mrb[0].mxu1  ;;  %v5078_v7 = vpop.f32.mrb[96].mxu0 }
 0x6d0   :  { %v5090_v24 = vpop.f32.mrb[1].mxu1  ;;  %v5080_v5 = vpop.f32.mrb[97].mxu0 }
 0x6d1   :  { %v5092_v11 = vpop.f32.mrb[2].mxu1  ;;  %v5082_v54 = vpop.f32.mrb[98].mxu0 }
 0x6d2   :  { %v15541_v35 = vpack.c.bf16 %v5092_v11, %v5088_v19  ;;  %v5094_v25 = vpop.f32.mrb[3].mxu1  ;;  %v15543_v38 = vpack.c.bf16 %v5082_v54, %v5078_v7  ;;  %v5084_v8 = vpop.f32.mrb[99].mxu0  ;;  %v12789_v7 = vld [vmem:[%s17477_s6 + $0x3c8] ss:$16 sps:$4 sm:$0xff]   ;;  %v12794_v11 = vld [vmem:[%s17477_s6 + $0x3ec] ss:$16 sps:$4 sm:$0xff]  }
 0x6d3   :  { %v5170_v45 = vpack.c.bf16 %v5094_v25, %v5090_v24  ;;  %v15548_v59 = vpack.c.bf16 %v5084_v8, %v5080_v5  ;;  %v12792_v54 = vld [vmem:[%s17477_s6 + $0x3e8] ss:$16 sps:$4 sm:$0xff]   ;;  %v12797_v8 = vld [vmem:[%s17477_s6 + $0x4] ss:$16 sps:$4 sm:$0xff]  }
 0x6d5   :  { %5666 = vmatprep.mubr.bf16.mxu1 %v5170_v45 }
 0x6d6   :  { %5667 = vmatmul.mubr.bf16.vlgmr.msra.gmra.mrb[32].mxu1 %v15541_v35 }
 0x6d7   :  { %5678 = vmatpush1.bf16.msra.mxu1 %v12747_v30  ;;  %5709 = vmatprep.mubr.bf16.mxu1 %v5170_v45  ;;  %v5098_v48 = vpop.f32.mrb[4].mxu1 }
 0x6d8   :  { %5679 = vmatprep.subr.bf16.mxu1 %v12752_v44  ;;  %v5100_v37 = vpop.f32.mrb[5].mxu1 }
 0x6d9   :  { %v5102_v26 = vpop.f32.mrb[6].mxu1 }
 0x6da   :  { %v5104_v50 = vpop.f32.mrb[7].mxu1  ;;  %v15599_v6 = vpack.c.bf16 %v5102_v26, %v5098_v48  ;;  %v12804_v48 = vld [vmem:[%s17477_s6 + $0x60] ss:$16 sps:$4 sm:$0xff]  }
 0x6db   :  { %5680 = vmatpush1.bf16.msra.mxu1 %v12750_v55  ;;  %v15601_v13 = vpack.c.bf16 %v5104_v50, %v5100_v37  ;;  %v12795_v55 = vld [vmem:[%s17477_s6] ss:$16 sps:$4 sm:$0xff]   ;;  %v12809_v37 = vld [vmem:[%s17477_s6 + $0x84] ss:$16 sps:$4 sm:$0xff]  }
 0x6dc   :  { %5681 = vmatprep.subr.bf16.mxu1 %v12755_v34 }
 0x6df   :  { %5682 = vmatpush1.bf16.msra.mxu1 %v12753_v41  ;;  %v5108_v2 = vpop.f32.mrb[8].mxu1 }
 0x6e0   :  { %5683 = vmatprep.subr.bf16.mxu1 %v12758_v31  ;;  %v5110_v61 = vpop.f32.mrb[9].mxu1  ;;  %v12800_v31 = vld [vmem:[%s17477_s6 + $0x24] ss:$16 sps:$4 sm:$0xff]  }
 0x6e1   :  { %v5112_v16 = vpop.f32.mrb[10].mxu1 }
 0x6e2   :  { %v5114_v63 = vpop.f32.mrb[11].mxu1  ;;  %v15615_v62 = vpack.c.bf16 %v5112_v16, %v5108_v2  ;;  %v12815_v16 = vld [vmem:[%s17477_s6 + $0xc4] ss:$16 sps:$4 sm:$0xff]  }
 0x6e3   :  { %5684 = vmatpush1.bf16.msra.mxu1 %v12756_v4  ;;  %v15617_v28 = vpack.c.bf16 %v5114_v63, %v5110_v61  ;;  %v12798_v4 = vld [vmem:[%s17477_s6 + $0x20] ss:$16 sps:$4 sm:$0xff]  }
 0x6e4   :  { %5685 = vmatprep.subr.bf16.mxu1 %v12761_v17  ;;  %v12810_v61 = vld [vmem:[%s17477_s6 + $0xa0] ss:$16 sps:$4 sm:$0xff]  }
 0x6e5   :  { %v12813_v63 = vld [vmem:[%s17477_s6 + $0xc0] ss:$16 sps:$4 sm:$0xff]  }
 0x6e7   :  { %5686 = vmatpush1.bf16.msra.mxu1 %v12759_v33  ;;  %v5118_v9 = vpop.f32.mrb[12].mxu1  ;;  %v12803_v33 = vld [vmem:[%s17477_s6 + $0x44] ss:$16 sps:$4 sm:$0xff]  }
 0x6e8   :  { %5687 = vmatprep.subr.bf16.mxu1 %v12764_v14  ;;  %v5120_v15 = vpop.f32.mrb[13].mxu1 }
 0x6e9   :  { %v5122_v20 = vpop.f32.mrb[14].mxu1 }
 0x6ea   :  { %v5124_v52 = vpop.f32.mrb[15].mxu1  ;;  %v15631_v58 = vpack.c.bf16 %v5122_v20, %v5118_v9  ;;  %v12819_v9 = vld [vmem:[%s17477_s6 + $0x100] ss:$16 sps:$4 sm:$0xff]   ;;  %v12827_v20 = vld [vmem:[%s17477_s6 + $0x144] ss:$16 sps:$4 sm:$0xff]  }
 0x6eb   :  { %5688 = vmatpush1.bf16.msra.mxu1 %v12762_v39  ;;  %v15633_v53 = vpack.c.bf16 %v5124_v52, %v5120_v15  ;;  %v12822_v15 = vld [vmem:[%s17477_s6 + $0x120] ss:$16 sps:$4 sm:$0xff]  }
 0x6ec   :  { %5689 = vmatprep.subr.bf16.mxu1 %v12767_v27  ;;  %v12825_v52 = vld [vmem:[%s17477_s6 + $0x140] ss:$16 sps:$4 sm:$0xff]  }
 0x6ef   :  { %5690 = vmatpush1.bf16.msra.mxu1 %v12765_v57  ;;  %v5128_v60 = vpop.f32.mrb[16].mxu1 }
 0x6f0   :  { %5691 = vmatprep.subr.bf16.mxu1 %v12770_v21  ;;  %v5130_v43 = vpop.f32.mrb[17].mxu1 }
 0x6f1   :  { %v5132_v56 = vpop.f32.mrb[18].mxu1 }
 0x6f2   :  { %v5134_v19 = vpop.f32.mrb[19].mxu1  ;;  %v15647_v24 = vpack.c.bf16 %v5132_v56, %v5128_v60  ;;  %v12831_v60 = vld [vmem:[%s17477_s6 + $0x180] ss:$16 sps:$4 sm:$0xff]   ;;  %v12839_v56 = vld [vmem:[%s17477_s6 + $0x1c4] ss:$16 sps:$4 sm:$0xff]  }
 0x6f3   :  { %5692 = vmatpush1.bf16.msra.mxu1 %v12768_v47  ;;  %v15649_v5 = vpack.c.bf16 %v5134_v19, %v5130_v43  ;;  %v12806_v47 = vld [vmem:[%s17477_s6 + $0x64] ss:$16 sps:$4 sm:$0xff]   ;;  %v12834_v43 = vld [vmem:[%s17477_s6 + $0x1a0] ss:$16 sps:$4 sm:$0xff]  }
 0x6f4   :  { %5693 = vmatprep.subr.bf16.mxu1 %v12773_v22  ;;  %v12837_v19 = vld [vmem:[%s17477_s6 + $0x1c0] ss:$16 sps:$4 sm:$0xff]  }
 0x6f7   :  { %5694 = vmatpush1.bf16.msra.mxu1 %v12771_v3  ;;  %v5138_v25 = vpop.f32.mrb[20].mxu1 }
 0x6f8   :  { %5695 = vmatprep.subr.bf16.mxu1 %v12776_v36  ;;  %v5140_v45 = vpop.f32.mrb[21].mxu1  ;;  %v12807_v36 = vld [vmem:[%s17477_s6 + $0x80] ss:$16 sps:$4 sm:$0xff]  }
 0x6f9   :  { %v5142_v30 = vpop.f32.mrb[22].mxu1 }
 0x6fa   :  { %v5144_v44 = vpop.f32.mrb[23].mxu1  ;;  %v15663_v34 = vpack.c.bf16 %v5142_v30, %v5138_v25  ;;  %v12843_v25 = vld [vmem:[%s17477_s6 + $0x8] ss:$16 sps:$4 sm:$0xff]   ;;  %v12851_v30 = vld [vmem:[%s17477_s6 + $0x4c] ss:$16 sps:$4 sm:$0xff]  }
 0x6fb   :  { %5696 = vmatpush1.bf16.msra.mxu1 %v12774_v32  ;;  %v15665_v41 = vpack.c.bf16 %v5144_v44, %v5140_v45  ;;  %v12846_v45 = vld [vmem:[%s17477_s6 + $0x28] ss:$16 sps:$4 sm:$0xff]  }
 0x6fc   :  { %5697 = vmatprep.subr.bf16.mxu1 %v12779_v0  ;;  %v12812_v0 = vld [vmem:[%s17477_s6 + $0xa4] ss:$16 sps:$4 sm:$0xff]   ;;  %v12849_v44 = vld [vmem:[%s17477_s6 + $0x48] ss:$16 sps:$4 sm:$0xff]  }
 0x6ff   :  { %5698 = vmatpush1.bf16.msra.mxu1 %v12777_v51  ;;  %v5148_v17 = vpop.f32.mrb[24].mxu1  ;;  %v12818_v51 = vld [vmem:[%s17477_s6 + $0xe4] ss:$16 sps:$4 sm:$0xff]  }
 0x700   :  { %5699 = vmatprep.subr.bf16.mxu1 %v12782_v10  ;;  %v5150_v14 = vpop.f32.mrb[25].mxu1  ;;  %v12816_v10 = vld [vmem:[%s17477_s6 + $0xe0] ss:$16 sps:$4 sm:$0xff]  }
 0x701   :  { %v5152_v39 = vpop.f32.mrb[26].mxu1 }
 0x702   :  { %v5154_v27 = vpop.f32.mrb[27].mxu1  ;;  %v15681_v57 = vpack.c.bf16 %v5152_v39, %v5148_v17  ;;  %v12860_v17 = vld [vmem:[%s17477_s6 + $0xac] ss:$16 sps:$4 sm:$0xff]   ;;  %v12861_v39 = vld [vmem:[%s17477_s6 + $0xc8] ss:$16 sps:$4 sm:$0xff]  }
 0x703   :  { %5700 = vmatpush1.bf16.msra.mxu1 %v12780_v49  ;;  %v15683_v21 = vpack.c.bf16 %v5154_v27, %v5150_v14  ;;  %v12821_v49 = vld [vmem:[%s17477_s6 + $0x104] ss:$16 sps:$4 sm:$0xff]   ;;  %v12863_v14 = vld [vmem:[%s17477_s6 + $0xcc] ss:$16 sps:$4 sm:$0xff]  }
 0x704   :  { %5701 = vmatprep.subr.bf16.mxu1 %v12785_v1  ;;  %v12824_v1 = vld [vmem:[%s17477_s6 + $0x124] ss:$16 sps:$4 sm:$0xff]   ;;  %v12866_v27 = vld [vmem:[%s17477_s6 + $0xec] ss:$16 sps:$4 sm:$0xff]  }
 0x707   :  { %5702 = vmatpush1.bf16.msra.mxu1 %v12783_v46  ;;  %v5158_v22 = vpop.f32.mrb[28].mxu1  ;;  %v12830_v46 = vld [vmem:[%s17477_s6 + $0x164] ss:$16 sps:$4 sm:$0xff]  }
 0x708   :  { %5703 = vmatprep.subr.bf16.mxu1 %v12788_v40  ;;  %v5160_v26 = vpop.f32.mrb[29].mxu1  ;;  %v12828_v40 = vld [vmem:[%s17477_s6 + $0x160] ss:$16 sps:$4 sm:$0xff]  }
 0x709   :  { %v5162_v50 = vpop.f32.mrb[30].mxu1 }
 0x70a   :  { %v5164_v3 = vpop.f32.mrb[31].mxu1  ;;  %v15697_v32 = vpack.c.bf16 %v5162_v50, %v5158_v22  ;;  %v12872_v22 = vld [vmem:[%s17477_s6 + $0x12c] ss:$16 sps:$4 sm:$0xff]   ;;  %v12873_v50 = vld [vmem:[%s17477_s6 + $0x148] ss:$16 sps:$4 sm:$0xff]  }
 0x70b   :  { %5704 = vmatpush1.bf16.msra.mxu1 %v12786_v42  ;;  %v15699_v2 = vpack.c.bf16 %v5164_v3, %v5160_v26  ;;  %v12833_v42 = vld [vmem:[%s17477_s6 + $0x184] ss:$16 sps:$4 sm:$0xff]   ;;  %v12875_v26 = vld [vmem:[%s17477_s6 + $0x14c] ss:$16 sps:$4 sm:$0xff]  }
 0x70c   :  { %5705 = vmatprep.subr.bf16.mxu1 %v12791_v29  ;;  %v12836_v29 = vld [vmem:[%s17477_s6 + $0x1a4] ss:$16 sps:$4 sm:$0xff]   ;;  %v12878_v3 = vld [vmem:[%s17477_s6 + $0x16c] ss:$16 sps:$4 sm:$0xff]  }
 0x70f   :  { %5706 = vmatpush1.bf16.msra.mxu1 %v12789_v7  ;;  %v12842_v7 = vld [vmem:[%s17477_s6 + $0x1e4] ss:$16 sps:$4 sm:$0xff]  }
 0x710   :  { %5707 = vmatprep.subr.bf16.mxu1 %v12794_v11  ;;  %v12840_v11 = vld [vmem:[%s17477_s6 + $0x1e0] ss:$16 sps:$4 sm:$0xff]  }
 0x713   :  { %5708 = vmatpush1.bf16.msra.mxu1 %v12792_v54  ;;  %v12845_v54 = vld [vmem:[%s17477_s6 + $0xc] ss:$16 sps:$4 sm:$0xff]  }
 0x714   :  { %6040 = vmatprep.subr.bf16.mxu1 %v12797_v8  ;;  %v12848_v8 = vld [vmem:[%s17477_s6 + $0x2c] ss:$16 sps:$4 sm:$0xff]  }
 0x716   :  { %5710 = vmatmul.mubr.bf16.vlgmr.msra.gmra.mrb[36].mxu1 %v15541_v35  ;;  %v12801_v35 = vld [vmem:[%s17477_s6 + $0x40] ss:$16 sps:$4 sm:$0xff]  }
 0x717   :  { %6041 = vmatpush1.bf16.msra.mxu1 %v12795_v55  ;;  %6072 = vmatprep.mubr.bf16.mxu1 %v15548_v59  ;;  %v12854_v55 = vld [vmem:[%s17477_s6 + $0x6c] ss:$16 sps:$4 sm:$0xff]  }
 0x718   :  { %6042 = vmatprep.subr.bf16.mxu1 %v12800_v31  ;;  %v12857_v31 = vld [vmem:[%s17477_s6 + $0x8c] ss:$16 sps:$4 sm:$0xff]  }
 0x71b   :  { %6043 = vmatpush1.bf16.msra.mxu1 %v12798_v4  ;;  %v12855_v4 = vld [vmem:[%s17477_s6 + $0x88] ss:$16 sps:$4 sm:$0xff]  }
 0x71c   :  { %6044 = vmatprep.subr.bf16.mxu1 %v12803_v33  ;;  %v12858_v33 = vld [vmem:[%s17477_s6 + $0xa8] ss:$16 sps:$4 sm:$0xff]  }
 0x71f   :  { %6045 = vmatpush1.bf16.msra.mxu1 %v12801_v35  ;;  %v12864_v35 = vld [vmem:[%s17477_s6 + $0xe8] ss:$16 sps:$4 sm:$0xff]  }
 0x720   :  { %6046 = vmatprep.subr.bf16.mxu1 %v12806_v47  ;;  %v12869_v47 = vld [vmem:[%s17477_s6 + $0x10c] ss:$16 sps:$4 sm:$0xff]  }
 0x723   :  { %6047 = vmatpush1.bf16.msra.mxu1 %v12804_v48  ;;  %v12867_v48 = vld [vmem:[%s17477_s6 + $0x108] ss:$16 sps:$4 sm:$0xff]  }
 0x724   :  { %6048 = vmatprep.subr.bf16.mxu1 %v12809_v37  ;;  %v12870_v37 = vld [vmem:[%s17477_s6 + $0x128] ss:$16 sps:$4 sm:$0xff]  }
 0x727   :  { %6049 = vmatpush1.bf16.msra.mxu1 %v12807_v36  ;;  %v12876_v36 = vld [vmem:[%s17477_s6 + $0x168] ss:$16 sps:$4 sm:$0xff]  }
 0x728   :  { %6050 = vmatprep.subr.bf16.mxu1 %v12812_v0  ;;  %v12881_v0 = vld [vmem:[%s17477_s6 + $0x18c] ss:$16 sps:$4 sm:$0xff]  }
 0x72b   :  { %6051 = vmatpush1.bf16.msra.mxu1 %v12810_v61  ;;  %v12879_v61 = vld [vmem:[%s17477_s6 + $0x188] ss:$16 sps:$4 sm:$0xff]  }
 0x72c   :  { %6052 = vmatprep.subr.bf16.mxu1 %v12815_v16  ;;  %v12884_v16 = vld [vmem:[%s17477_s6 + $0x1ac] ss:$16 sps:$4 sm:$0xff]  }
 0x72f   :  { %6053 = vmatpush1.bf16.msra.mxu1 %v12813_v63  ;;  %v12882_v63 = vld [vmem:[%s17477_s6 + $0x1a8] ss:$16 sps:$4 sm:$0xff]  }
 0x730   :  { %6054 = vmatprep.subr.bf16.mxu1 %v12818_v51  ;;  %v12887_v51 = vld [vmem:[%s17477_s6 + $0x1cc] ss:$16 sps:$4 sm:$0xff]  }
 0x733   :  { %6055 = vmatpush1.bf16.msra.mxu1 %v12816_v10  ;;  %v12885_v10 = vld [vmem:[%s17477_s6 + $0x1c8] ss:$16 sps:$4 sm:$0xff]  }
 0x734   :  { %6056 = vmatprep.subr.bf16.mxu1 %v12821_v49  ;;  %v12890_v49 = vld [vmem:[%s17477_s6 + $0x1ec] ss:$16 sps:$4 sm:$0xff]  }
 0x737   :  { %6057 = vmatpush1.bf16.msra.mxu1 %v12819_v9  ;;  %v12888_v9 = vld [vmem:[%s17477_s6 + $0x1e8] ss:$16 sps:$4 sm:$0xff]  }
 0x738   :  { %6058 = vmatprep.subr.bf16.mxu1 %v12824_v1  ;;  %v12893_v1 = vld [vmem:[%s17477_s6 + $0x404] ss:$16 sps:$4 sm:$0xff]  }
 0x73b   :  { %6059 = vmatpush1.bf16.msra.mxu1 %v12822_v15  ;;  %v12891_v15 = vld [vmem:[%s17477_s6 + $0x400] ss:$16 sps:$4 sm:$0xff]  }
 0x73c   :  { %6060 = vmatprep.subr.bf16.mxu1 %v12827_v20  ;;  %v12896_v20 = vld [vmem:[%s17477_s6 + $0x424] ss:$16 sps:$4 sm:$0xff]  }
 0x73f   :  { %6061 = vmatpush1.bf16.msra.mxu1 %v12825_v52  ;;  %v12894_v52 = vld [vmem:[%s17477_s6 + $0x420] ss:$16 sps:$4 sm:$0xff]  }
 0x740   :  { %6062 = vmatprep.subr.bf16.mxu1 %v12830_v46  ;;  %v12899_v46 = vld [vmem:[%s17477_s6 + $0x444] ss:$16 sps:$4 sm:$0xff]  }
 0x743   :  { %6063 = vmatpush1.bf16.msra.mxu1 %v12828_v40  ;;  %v12897_v40 = vld [vmem:[%s17477_s6 + $0x440] ss:$16 sps:$4 sm:$0xff]  }
 0x744   :  { %6064 = vmatprep.subr.bf16.mxu1 %v12833_v42  ;;  %v12900_v42 = vld [vmem:[%s17477_s6 + $0x460] ss:$16 sps:$4 sm:$0xff]  }
 0x747   :  { %6065 = vmatpush1.bf16.msra.mxu1 %v12831_v60  ;;  %v12905_v60 = vld [vmem:[%s17477_s6 + $0x484] ss:$16 sps:$4 sm:$0xff]  }
 0x748   :  { %6066 = vmatprep.subr.bf16.mxu1 %v12836_v29  ;;  %v12903_v29 = vld [vmem:[%s17477_s6 + $0x480] ss:$16 sps:$4 sm:$0xff]  }
 0x74b   :  { %6067 = vmatpush1.bf16.msra.mxu1 %v12834_v43  ;;  %v12908_v43 = vld [vmem:[%s17477_s6 + $0x4a4] ss:$16 sps:$4 sm:$0xff]  }
 0x74c   :  { %6068 = vmatprep.subr.bf16.mxu1 %v12839_v56  ;;  %v12906_v56 = vld [vmem:[%s17477_s6 + $0x4a0] ss:$16 sps:$4 sm:$0xff]  }
 0x74f   :  { %6069 = vmatpush1.bf16.msra.mxu1 %v12837_v19  ;;  %v12911_v19 = vld [vmem:[%s17477_s6 + $0x4c4] ss:$16 sps:$4 sm:$0xff]  }
 0x750   :  { %6070 = vmatprep.subr.bf16.mxu1 %v12842_v7  ;;  %v12909_v7 = vld [vmem:[%s17477_s6 + $0x4c0] ss:$16 sps:$4 sm:$0xff]  }
 0x753   :  { %6071 = vmatpush1.bf16.msra.mxu1 %v12840_v11  ;;  %v12914_v11 = vld [vmem:[%s17477_s6 + $0x4e4] ss:$16 sps:$4 sm:$0xff]  }
 0x754   :  { %6083 = vmatprep.subr.bf16.mxu1 %v12845_v54  ;;  %v12912_v54 = vld [vmem:[%s17477_s6 + $0x4e0] ss:$16 sps:$4 sm:$0xff]  }
 0x756   :  { %6073 = vmatmul.mubr.bf16.vlgmr.msra.gmra.mrb[32].mxu1 %v15543_v38 }
 0x757   :  { %6084 = vmatpush1.bf16.msra.mxu1 %v12843_v25  ;;  %6115 = vmatprep.mubr.bf16.mxu1 %v15548_v59  ;;  %v12852_v59 = vld [vmem:[%s17477_s6 + $0x68] ss:$16 sps:$4 sm:$0xff]   ;;  %v12917_v25 = vld [vmem:[%s17477_s6 + $0x504] ss:$16 sps:$4 sm:$0xff]  }
 0x758   :  { %6085 = vmatprep.subr.bf16.mxu1 %v12848_v8  ;;  %v12915_v8 = vld [vmem:[%s17477_s6 + $0x500] ss:$16 sps:$4 sm:$0xff]  }
 0x75b   :  { %6086 = vmatpush1.bf16.msra.mxu1 %v12846_v45  ;;  %v12920_v45 = vld [vmem:[%s17477_s6 + $0x524] ss:$16 sps:$4 sm:$0xff]  }
 0x75c   :  { %6087 = vmatprep.subr.bf16.mxu1 %v12851_v30  ;;  %v12918_v30 = vld [vmem:[%s17477_s6 + $0x520] ss:$16 sps:$4 sm:$0xff]  }
 0x75f   :  { %6088 = vmatpush1.bf16.msra.mxu1 %v12849_v44  ;;  %v12923_v44 = vld [vmem:[%s17477_s6 + $0x544] ss:$16 sps:$4 sm:$0xff]  }
 0x760   :  { %6089 = vmatprep.subr.bf16.mxu1 %v12854_v55  ;;  %v12921_v55 = vld [vmem:[%s17477_s6 + $0x540] ss:$16 sps:$4 sm:$0xff]  }
 0x763   :  { %6090 = vmatpush1.bf16.msra.mxu1 %v12852_v59  ;;  %v12926_v59 = vld [vmem:[%s17477_s6 + $0x564] ss:$16 sps:$4 sm:$0xff]  }
 0x764   :  { %6091 = vmatprep.subr.bf16.mxu1 %v12857_v31  ;;  %v12924_v31 = vld [vmem:[%s17477_s6 + $0x560] ss:$16 sps:$4 sm:$0xff]  }
 0x767   :  { %6092 = vmatpush1.bf16.msra.mxu1 %v12855_v4  ;;  %v12929_v4 = vld [vmem:[%s17477_s6 + $0x584] ss:$16 sps:$4 sm:$0xff]  }
 0x768   :  { %6093 = vmatprep.subr.bf16.mxu1 %v12860_v17  ;;  %v12927_v17 = vld [vmem:[%s17477_s6 + $0x580] ss:$16 sps:$4 sm:$0xff]  }
 0x76b   :  { %6094 = vmatpush1.bf16.msra.mxu1 %v12858_v33  ;;  %v12932_v33 = vld [vmem:[%s17477_s6 + $0x5a4] ss:$16 sps:$4 sm:$0xff]  }
 0x76c   :  { %6095 = vmatprep.subr.bf16.mxu1 %v12863_v14  ;;  %v12930_v14 = vld [vmem:[%s17477_s6 + $0x5a0] ss:$16 sps:$4 sm:$0xff]  }
 0x76f   :  { %6096 = vmatpush1.bf16.msra.mxu1 %v12861_v39  ;;  %v12935_v39 = vld [vmem:[%s17477_s6 + $0x5c4] ss:$16 sps:$4 sm:$0xff]  }
 0x770   :  { %6097 = vmatprep.subr.bf16.mxu1 %v12866_v27  ;;  %v12933_v27 = vld [vmem:[%s17477_s6 + $0x5c0] ss:$16 sps:$4 sm:$0xff]  }
 0x773   :  { %6098 = vmatpush1.bf16.msra.mxu1 %v12864_v35  ;;  %v12938_v35 = vld [vmem:[%s17477_s6 + $0x5e4] ss:$16 sps:$4 sm:$0xff]  }
 0x774   :  { %6099 = vmatprep.subr.bf16.mxu1 %v12869_v47  ;;  %v12936_v47 = vld [vmem:[%s17477_s6 + $0x5e0] ss:$16 sps:$4 sm:$0xff]  }
 0x777   :  { %6100 = vmatpush1.bf16.msra.mxu1 %v12867_v48  ;;  %v12941_v48 = vld [vmem:[%s17477_s6 + $0x40c] ss:$16 sps:$4 sm:$0xff]  }
 0x778   :  { %6101 = vmatprep.subr.bf16.mxu1 %v12872_v22  ;;  %v12939_v22 = vld [vmem:[%s17477_s6 + $0x408] ss:$16 sps:$4 sm:$0xff]  }
 0x77b   :  { %6102 = vmatpush1.bf16.msra.mxu1 %v12870_v37  ;;  %v12944_v37 = vld [vmem:[%s17477_s6 + $0x42c] ss:$16 sps:$4 sm:$0xff]  }
 0x77c   :  { %6103 = vmatprep.subr.bf16.mxu1 %v12875_v26  ;;  %v12942_v26 = vld [vmem:[%s17477_s6 + $0x428] ss:$16 sps:$4 sm:$0xff]  }
 0x77f   :  { %6104 = vmatpush1.bf16.msra.mxu1 %v12873_v50  ;;  %v12947_v50 = vld [vmem:[%s17477_s6 + $0x44c] ss:$16 sps:$4 sm:$0xff]  }
 0x780   :  { %6105 = vmatprep.subr.bf16.mxu1 %v12878_v3  ;;  %v12945_v3 = vld [vmem:[%s17477_s6 + $0x448] ss:$16 sps:$4 sm:$0xff]  }
 0x783   :  { %6106 = vmatpush1.bf16.msra.mxu1 %v12876_v36  ;;  %v12950_v36 = vld [vmem:[%s17477_s6 + $0x46c] ss:$16 sps:$4 sm:$0xff]  }
 0x784   :  { %6107 = vmatprep.subr.bf16.mxu1 %v12881_v0  ;;  %v12953_v0 = vld [vmem:[%s17477_s6 + $0x48c] ss:$16 sps:$4 sm:$0xff]  }
 0x787   :  { %6108 = vmatpush1.bf16.msra.mxu1 %v12879_v61  ;;  %v12951_v61 = vld [vmem:[%s17477_s6 + $0x488] ss:$16 sps:$4 sm:$0xff]  }
 0x788   :  { %6109 = vmatprep.subr.bf16.mxu1 %v12884_v16  ;;  %v12956_v16 = vld [vmem:[%s17477_s6 + $0x4ac] ss:$16 sps:$4 sm:$0xff]  }
 0x78b   :  { %6110 = vmatpush1.bf16.msra.mxu1 %v12882_v63  ;;  %v12954_v63 = vld [vmem:[%s17477_s6 + $0x4a8] ss:$16 sps:$4 sm:$0xff]  }
 0x78c   :  { %6111 = vmatprep.subr.bf16.mxu1 %v12887_v51  ;;  %v12959_v51 = vld [vmem:[%s17477_s6 + $0x4cc] ss:$16 sps:$4 sm:$0xff]  }
 0x78f   :  { %6112 = vmatpush1.bf16.msra.mxu1 %v12885_v10  ;;  %v12957_v10 = vld [vmem:[%s17477_s6 + $0x4c8] ss:$16 sps:$4 sm:$0xff]  }
 0x790   :  { %6113 = vmatprep.subr.bf16.mxu1 %v12890_v49  ;;  %v12962_v49 = vld [vmem:[%s17477_s6 + $0x4ec] ss:$16 sps:$4 sm:$0xff]  }
 0x793   :  { %6114 = vmatpush1.bf16.msra.mxu1 %v12888_v9  ;;  %v12960_v9 = vld [vmem:[%s17477_s6 + $0x4e8] ss:$16 sps:$4 sm:$0xff]  }
 0x794   :  { %6511 = vmatprep.subr.bf16.mxu1 %v12893_v1  ;;  %v12965_v1 = vld [vmem:[%s17477_s6 + $0x50c] ss:$16 sps:$4 sm:$0xff]  }
 0x796   :  { %6116 = vmatmul.mubr.bf16.vlgmr.msra.gmra.mrb[36].mxu1 %v15543_v38  ;;  %v12902_v38 = vld [vmem:[%s17477_s6 + $0x464] ss:$16 sps:$4 sm:$0xff]  }
 0x797   :  { %6512 = vmatpush1.bf16.msra.mxu1 %v12891_v15  ;;  %6543 = vmatprep.mubr.bf16.mxu1 %v15601_v13  ;;  %v12963_v15 = vld [vmem:[%s17477_s6 + $0x508] ss:$16 sps:$4 sm:$0xff]  }
 0x798   :  { %6513 = vmatprep.subr.bf16.mxu1 %v12896_v20  ;;  %v12968_v20 = vld [vmem:[%s17477_s6 + $0x52c] ss:$16 sps:$4 sm:$0xff]  }
 0x79b   :  { %6514 = vmatpush1.bf16.msra.mxu1 %v12894_v52  ;;  %v12966_v52 = vld [vmem:[%s17477_s6 + $0x528] ss:$16 sps:$4 sm:$0xff]  }
 0x79c   :  { %6515 = vmatprep.subr.bf16.mxu1 %v12899_v46  ;;  %v12971_v46 = vld [vmem:[%s17477_s6 + $0x54c] ss:$16 sps:$4 sm:$0xff]  }
 0x79f   :  { %6516 = vmatpush1.bf16.msra.mxu1 %v12897_v40  ;;  %v12969_v40 = vld [vmem:[%s17477_s6 + $0x548] ss:$16 sps:$4 sm:$0xff]  }
 0x7a0   :  { %6517 = vmatprep.subr.bf16.mxu1 %v12902_v38  ;;  %v12974_v38 = vld [vmem:[%s17477_s6 + $0x56c] ss:$16 sps:$4 sm:$0xff]  }
 0x7a3   :  { %6518 = vmatpush1.bf16.msra.mxu1 %v12900_v42  ;;  %v12972_v42 = vld [vmem:[%s17477_s6 + $0x568] ss:$16 sps:$4 sm:$0xff]  }
 0x7a4   :  { %6519 = vmatprep.subr.bf16.mxu1 %v12905_v60  ;;  %v12977_v60 = vld [vmem:[%s17477_s6 + $0x58c] ss:$16 sps:$4 sm:$0xff]  }
 0x7a7   :  { %6520 = vmatpush1.bf16.msra.mxu1 %v12903_v29  ;;  %v12975_v29 = vld [vmem:[%s17477_s6 + $0x588] ss:$16 sps:$4 sm:$0xff]  }
 0x7a8   :  { %6521 = vmatprep.subr.bf16.mxu1 %v12908_v43  ;;  %v12980_v43 = vld [vmem:[%s17477_s6 + $0x5ac] ss:$16 sps:$4 sm:$0xff]  }
 0x7ab   :  { %6522 = vmatpush1.bf16.msra.mxu1 %v12906_v56  ;;  %v12978_v56 = vld [vmem:[%s17477_s6 + $0x5a8] ss:$16 sps:$4 sm:$0xff]  }
 0x7ac   :  { %6523 = vmatprep.subr.bf16.mxu1 %v12911_v19  ;;  %v12983_v19 = vld [vmem:[%s17477_s6 + $0x5cc] ss:$16 sps:$4 sm:$0xff]  }
 0x7af   :  { %6524 = vmatpush1.bf16.msra.mxu1 %v12909_v7  ;;  %v12981_v7 = vld [vmem:[%s17477_s6 + $0x5c8] ss:$16 sps:$4 sm:$0xff]  }
 0x7b0   :  { %6525 = vmatprep.subr.bf16.mxu1 %v12914_v11  ;;  %v12986_v11 = vld [vmem:[%s17477_s6 + $0x5ec] ss:$16 sps:$4 sm:$0xff]  }
 0x7b3   :  { %6526 = vmatpush1.bf16.msra.mxu1 %v12912_v54  ;;  %v12984_v54 = vld [vmem:[%s17477_s6 + $0x5e8] ss:$16 sps:$4 sm:$0xff]  }
 0x7b4   :  { %6527 = vmatprep.subr.bf16.mxu1 %v12917_v25  ;;  %v12989_v25 = vld [vmem:[%s17477_s6 + $0x604] ss:$16 sps:$4 sm:$0xff]  }
 0x7b7   :  { %6528 = vmatpush1.bf16.msra.mxu1 %v12915_v8  ;;  %v12987_v8 = vld [vmem:[%s17477_s6 + $0x600] ss:$16 sps:$4 sm:$0xff]  }
 0x7b8   :  { %6529 = vmatprep.subr.bf16.mxu1 %v12920_v45  ;;  %v12992_v45 = vld [vmem:[%s17477_s6 + $0x624] ss:$16 sps:$4 sm:$0xff]  }
 0x7bb   :  { %6530 = vmatpush1.bf16.msra.mxu1 %v12918_v30  ;;  %v12990_v30 = vld [vmem:[%s17477_s6 + $0x620] ss:$16 sps:$4 sm:$0xff]  }
 0x7bc   :  { %6531 = vmatprep.subr.bf16.mxu1 %v12923_v44  ;;  %v12995_v44 = vld [vmem:[%s17477_s6 + $0x644] ss:$16 sps:$4 sm:$0xff]  }
 0x7bf   :  { %6532 = vmatpush1.bf16.msra.mxu1 %v12921_v55  ;;  %v12993_v55 = vld [vmem:[%s17477_s6 + $0x640] ss:$16 sps:$4 sm:$0xff]  }
 0x7c0   :  { %6533 = vmatprep.subr.bf16.mxu1 %v12926_v59  ;;  %v12996_v59 = vld [vmem:[%s17477_s6 + $0x660] ss:$16 sps:$4 sm:$0xff]  }
 0x7c3   :  { %6534 = vmatpush1.bf16.msra.mxu1 %v12924_v31  ;;  %v13001_v31 = vld [vmem:[%s17477_s6 + $0x684] ss:$16 sps:$4 sm:$0xff]  }
 0x7c4   :  { %6535 = vmatprep.subr.bf16.mxu1 %v12929_v4  ;;  %v12999_v4 = vld [vmem:[%s17477_s6 + $0x680] ss:$16 sps:$4 sm:$0xff]  }
 0x7c7   :  { %6536 = vmatpush1.bf16.msra.mxu1 %v12927_v17  ;;  %v13004_v17 = vld [vmem:[%s17477_s6 + $0x6a4] ss:$16 sps:$4 sm:$0xff]  }
 0x7c8   :  { %6537 = vmatprep.subr.bf16.mxu1 %v12932_v33  ;;  %v13002_v33 = vld [vmem:[%s17477_s6 + $0x6a0] ss:$16 sps:$4 sm:$0xff]  }
 0x7cb   :  { %6538 = vmatpush1.bf16.msra.mxu1 %v12930_v14  ;;  %v13007_v14 = vld [vmem:[%s17477_s6 + $0x6c4] ss:$16 sps:$4 sm:$0xff]  }
 0x7cc   :  { %6539 = vmatprep.subr.bf16.mxu1 %v12935_v39  ;;  %v13005_v39 = vld [vmem:[%s17477_s6 + $0x6c0] ss:$16 sps:$4 sm:$0xff]  }
 0x7cf   :  { %6540 = vmatpush1.bf16.msra.mxu1 %v12933_v27  ;;  %v13010_v27 = vld [vmem:[%s17477_s6 + $0x6e4] ss:$16 sps:$4 sm:$0xff]  }
 0x7d0   :  { %6541 = vmatprep.subr.bf16.mxu1 %v12938_v35  ;;  %v13008_v35 = vld [vmem:[%s17477_s6 + $0x6e0] ss:$16 sps:$4 sm:$0xff]  }
 0x7d3   :  { %6542 = vmatpush1.bf16.msra.mxu1 %v12936_v47  ;;  %v13013_v47 = vld [vmem:[%s17477_s6 + $0x704] ss:$16 sps:$4 sm:$0xff]  }
 0x7d4   :  { %6554 = vmatprep.subr.bf16.mxu1 %v12941_v48  ;;  %v13011_v48 = vld [vmem:[%s17477_s6 + $0x700] ss:$16 sps:$4 sm:$0xff]  }
 0x7d6   :  { %6544 = vmatmul.mubr.bf16.vlgmr.msra.gmra.mrb[32].mxu1 %v15599_v6 }
 0x7d7   :  { %6555 = vmatpush1.bf16.msra.mxu1 %v12939_v22  ;;  %6586 = vmatprep.mubr.bf16.mxu1 %v15601_v13  ;;  %v12948_v13 = vld [vmem:[%s17477_s6 + $0x468] ss:$16 sps:$4 sm:$0xff]   ;;  %v13016_v22 = vld [vmem:[%s17477_s6 + $0x724] ss:$16 sps:$4 sm:$0xff]  }
 0x7d8   :  { %6556 = vmatprep.subr.bf16.mxu1 %v12944_v37  ;;  %v13014_v37 = vld [vmem:[%s17477_s6 + $0x720] ss:$16 sps:$4 sm:$0xff]  }
 0x7db   :  { %6557 = vmatpush1.bf16.msra.mxu1 %v12942_v26  ;;  %v13019_v26 = vld [vmem:[%s17477_s6 + $0x744] ss:$16 sps:$4 sm:$0xff]  }
 0x7dc   :  { %6558 = vmatprep.subr.bf16.mxu1 %v12947_v50  ;;  %v13017_v50 = vld [vmem:[%s17477_s6 + $0x740] ss:$16 sps:$4 sm:$0xff]  }
 0x7df   :  { %6559 = vmatpush1.bf16.msra.mxu1 %v12945_v3  ;;  %v13022_v3 = vld [vmem:[%s17477_s6 + $0x764] ss:$16 sps:$4 sm:$0xff]  }
 0x7e0   :  { %6560 = vmatprep.subr.bf16.mxu1 %v12950_v36  ;;  %v13020_v36 = vld [vmem:[%s17477_s6 + $0x760] ss:$16 sps:$4 sm:$0xff]  }
 0x7e3   :  { %6561 = vmatpush1.bf16.msra.mxu1 %v12948_v13  ;;  %v13025_v13 = vld [vmem:[%s17477_s6 + $0x784] ss:$16 sps:$4 sm:$0xff]  }
 0x7e4   :  { %6562 = vmatprep.subr.bf16.mxu1 %v12953_v0  ;;  %v13023_v0 = vld [vmem:[%s17477_s6 + $0x780] ss:$16 sps:$4 sm:$0xff]  }
 0x7e7   :  { %6563 = vmatpush1.bf16.msra.mxu1 %v12951_v61  ;;  %v13028_v61 = vld [vmem:[%s17477_s6 + $0x7a4] ss:$16 sps:$4 sm:$0xff]  }
 0x7e8   :  { %6564 = vmatprep.subr.bf16.mxu1 %v12956_v16  ;;  %v13026_v16 = vld [vmem:[%s17477_s6 + $0x7a0] ss:$16 sps:$4 sm:$0xff]  }
 0x7eb   :  { %6565 = vmatpush1.bf16.msra.mxu1 %v12954_v63  ;;  %v13031_v63 = vld [vmem:[%s17477_s6 + $0x7c4] ss:$16 sps:$4 sm:$0xff]  }
 0x7ec   :  { %6566 = vmatprep.subr.bf16.mxu1 %v12959_v51  ;;  %v13029_v51 = vld [vmem:[%s17477_s6 + $0x7c0] ss:$16 sps:$4 sm:$0xff]  }
 0x7ef   :  { %6567 = vmatpush1.bf16.msra.mxu1 %v12957_v10  ;;  %v13034_v10 = vld [vmem:[%s17477_s6 + $0x7e4] ss:$16 sps:$4 sm:$0xff]  }
 0x7f0   :  { %6568 = vmatprep.subr.bf16.mxu1 %v12962_v49  ;;  %v13032_v49 = vld [vmem:[%s17477_s6 + $0x7e0] ss:$16 sps:$4 sm:$0xff]  }
 0x7f3   :  { %6569 = vmatpush1.bf16.msra.mxu1 %v12960_v9  ;;  %v13037_v9 = vld [vmem:[%s17477_s6 + $0x60c] ss:$16 sps:$4 sm:$0xff]  }
 0x7f4   :  { %6570 = vmatprep.subr.bf16.mxu1 %v12965_v1  ;;  %v13035_v1 = vld [vmem:[%s17477_s6 + $0x608] ss:$16 sps:$4 sm:$0xff]  }
 0x7f7   :  { %6571 = vmatpush1.bf16.msra.mxu1 %v12963_v15  ;;  %v13040_v15 = vld [vmem:[%s17477_s6 + $0x62c] ss:$16 sps:$4 sm:$0xff]  }
 0x7f8   :  { %6572 = vmatprep.subr.bf16.mxu1 %v12968_v20  ;;  %v13038_v20 = vld [vmem:[%s17477_s6 + $0x628] ss:$16 sps:$4 sm:$0xff]  }
 0x7fb   :  { %6573 = vmatpush1.bf16.msra.mxu1 %v12966_v52  ;;  %v13043_v52 = vld [vmem:[%s17477_s6 + $0x64c] ss:$16 sps:$4 sm:$0xff]  }
 0x7fc   :  { %6574 = vmatprep.subr.bf16.mxu1 %v12971_v46  ;;  %v13041_v46 = vld [vmem:[%s17477_s6 + $0x648] ss:$16 sps:$4 sm:$0xff]  }
 0x7ff   :  { %6575 = vmatpush1.bf16.msra.mxu1 %v12969_v40  ;;  %v13046_v40 = vld [vmem:[%s17477_s6 + $0x66c] ss:$16 sps:$4 sm:$0xff]  }
 0x800   :  { %6576 = vmatprep.subr.bf16.mxu1 %v12974_v38  ;;  %v13049_v38 = vld [vmem:[%s17477_s6 + $0x68c] ss:$16 sps:$4 sm:$0xff]  }
 0x803   :  { %6577 = vmatpush1.bf16.msra.mxu1 %v12972_v42  ;;  %v13047_v42 = vld [vmem:[%s17477_s6 + $0x688] ss:$16 sps:$4 sm:$0xff]  }
 0x804   :  { %6578 = vmatprep.subr.bf16.mxu1 %v12977_v60  ;;  %v13052_v60 = vld [vmem:[%s17477_s6 + $0x6ac] ss:$16 sps:$4 sm:$0xff]  }
 0x807   :  { %6579 = vmatpush1.bf16.msra.mxu1 %v12975_v29  ;;  %v13050_v29 = vld [vmem:[%s17477_s6 + $0x6a8] ss:$16 sps:$4 sm:$0xff]  }
 0x808   :  { %6580 = vmatprep.subr.bf16.mxu1 %v12980_v43  ;;  %v13055_v43 = vld [vmem:[%s17477_s6 + $0x6cc] ss:$16 sps:$4 sm:$0xff]  }
 0x80b   :  { %6581 = vmatpush1.bf16.msra.mxu1 %v12978_v56  ;;  %v13053_v56 = vld [vmem:[%s17477_s6 + $0x6c8] ss:$16 sps:$4 sm:$0xff]  }
 0x80c   :  { %6582 = vmatprep.subr.bf16.mxu1 %v12983_v19  ;;  %v13058_v19 = vld [vmem:[%s17477_s6 + $0x6ec] ss:$16 sps:$4 sm:$0xff]  }
 0x80f   :  { %6583 = vmatpush1.bf16.msra.mxu1 %v12981_v7  ;;  %v13056_v7 = vld [vmem:[%s17477_s6 + $0x6e8] ss:$16 sps:$4 sm:$0xff]  }
 0x810   :  { %6584 = vmatprep.subr.bf16.mxu1 %v12986_v11  ;;  %v13061_v11 = vld [vmem:[%s17477_s6 + $0x70c] ss:$16 sps:$4 sm:$0xff]  }
 0x813   :  { %6585 = vmatpush1.bf16.msra.mxu1 %v12984_v54  ;;  %v13059_v54 = vld [vmem:[%s17477_s6 + $0x708] ss:$16 sps:$4 sm:$0xff]  }
 0x814   :  { %6990 = vmatprep.subr.bf16.mxu1 %v12989_v25  ;;  %v13064_v25 = vld [vmem:[%s17477_s6 + $0x72c] ss:$16 sps:$4 sm:$0xff]  }
 0x816   :  { %6587 = vmatmul.mubr.bf16.vlgmr.msra.gmra.mrb[36].mxu1 %v15599_v6  ;;  %v12998_v6 = vld [vmem:[%s17477_s6 + $0x664] ss:$16 sps:$4 sm:$0xff]  }
 0x817   :  { %6991 = vmatpush1.bf16.msra.mxu1 %v12987_v8  ;;  %7022 = vmatprep.mubr.bf16.mxu1 %v15617_v28  ;;  %v13062_v8 = vld [vmem:[%s17477_s6 + $0x728] ss:$16 sps:$4 sm:$0xff]  }
 0x818   :  { %6992 = vmatprep.subr.bf16.mxu1 %v12992_v45  ;;  %v13067_v45 = vld [vmem:[%s17477_s6 + $0x74c] ss:$16 sps:$4 sm:$0xff]  }
 0x81b   :  { %6993 = vmatpush1.bf16.msra.mxu1 %v12990_v30  ;;  %v13065_v30 = vld [vmem:[%s17477_s6 + $0x748] ss:$16 sps:$4 sm:$0xff]  }
 0x81c   :  { %6994 = vmatprep.subr.bf16.mxu1 %v12995_v44  ;;  %v13070_v44 = vld [vmem:[%s17477_s6 + $0x76c] ss:$16 sps:$4 sm:$0xff]  }
 0x81f   :  { %6995 = vmatpush1.bf16.msra.mxu1 %v12993_v55  ;;  %v13068_v55 = vld [vmem:[%s17477_s6 + $0x768] ss:$16 sps:$4 sm:$0xff]  }
 0x820   :  { %6996 = vmatprep.subr.bf16.mxu1 %v12998_v6  ;;  %v13073_v6 = vld [vmem:[%s17477_s6 + $0x78c] ss:$16 sps:$4 sm:$0xff]  }
 0x823   :  { %6997 = vmatpush1.bf16.msra.mxu1 %v12996_v59  ;;  %v13071_v59 = vld [vmem:[%s17477_s6 + $0x788] ss:$16 sps:$4 sm:$0xff]  }
 0x824   :  { %6998 = vmatprep.subr.bf16.mxu1 %v13001_v31  ;;  %v13076_v31 = vld [vmem:[%s17477_s6 + $0x7ac] ss:$16 sps:$4 sm:$0xff]  }
 0x827   :  { %6999 = vmatpush1.bf16.msra.mxu1 %v12999_v4  ;;  %v13074_v4 = vld [vmem:[%s17477_s6 + $0x7a8] ss:$16 sps:$4 sm:$0xff]  }
 0x828   :  { %7000 = vmatprep.subr.bf16.mxu1 %v13004_v17  ;;  %v13079_v17 = vld [vmem:[%s17477_s6 + $0x7cc] ss:$16 sps:$4 sm:$0xff]  }
 0x82b   :  { %7001 = vmatpush1.bf16.msra.mxu1 %v13002_v33  ;;  %v13077_v33 = vld [vmem:[%s17477_s6 + $0x7c8] ss:$16 sps:$4 sm:$0xff]  }
 0x82c   :  { %7002 = vmatprep.subr.bf16.mxu1 %v13007_v14  ;;  %v13082_v14 = vld [vmem:[%s17477_s6 + $0x7ec] ss:$16 sps:$4 sm:$0xff]  }
 0x82f   :  { %7003 = vmatpush1.bf16.msra.mxu1 %v13005_v39  ;;  %v13080_v39 = vld [vmem:[%s17477_s6 + $0x7e8] ss:$16 sps:$4 sm:$0xff]  }
 0x830   :  { %7004 = vmatprep.subr.bf16.mxu1 %v13010_v27  ;;  %v13085_v27 = vld [vmem:[%s17477_s6 + $0x804] ss:$16 sps:$4 sm:$0xff]  }
 0x833   :  { %7005 = vmatpush1.bf16.msra.mxu1 %v13008_v35  ;;  %v13083_v35 = vld [vmem:[%s17477_s6 + $0x800] ss:$16 sps:$4 sm:$0xff]  }
 0x834   :  { %7006 = vmatprep.subr.bf16.mxu1 %v13013_v47  ;;  %v13088_v47 = vld [vmem:[%s17477_s6 + $0x824] ss:$16 sps:$4 sm:$0xff]  }
 0x837   :  { %7007 = vmatpush1.bf16.msra.mxu1 %v13011_v48  ;;  %v13086_v48 = vld [vmem:[%s17477_s6 + $0x820] ss:$16 sps:$4 sm:$0xff]  }
 0x838   :  { %7008 = vmatprep.subr.bf16.mxu1 %v13016_v22  ;;  %v13091_v22 = vld [vmem:[%s17477_s6 + $0x844] ss:$16 sps:$4 sm:$0xff]  }
 0x83b   :  { %7009 = vmatpush1.bf16.msra.mxu1 %v13014_v37  ;;  %v13089_v37 = vld [vmem:[%s17477_s6 + $0x840] ss:$16 sps:$4 sm:$0xff]  }
 0x83c   :  { %7010 = vmatprep.subr.bf16.mxu1 %v13019_v26  ;;  %v13092_v26 = vld [vmem:[%s17477_s6 + $0x860] ss:$16 sps:$4 sm:$0xff]  }
 0x83f   :  { %7011 = vmatpush1.bf16.msra.mxu1 %v13017_v50  ;;  %v13097_v50 = vld [vmem:[%s17477_s6 + $0x884] ss:$16 sps:$4 sm:$0xff]  }
 0x840   :  { %7012 = vmatprep.subr.bf16.mxu1 %v13022_v3  ;;  %v13095_v3 = vld [vmem:[%s17477_s6 + $0x880] ss:$16 sps:$4 sm:$0xff]  }
 0x843   :  { %7013 = vmatpush1.bf16.msra.mxu1 %v13020_v36  ;;  %v13100_v36 = vld [vmem:[%s17477_s6 + $0x8a4] ss:$16 sps:$4 sm:$0xff]  }
 0x844   :  { %7014 = vmatprep.subr.bf16.mxu1 %v13025_v13  ;;  %v13098_v13 = vld [vmem:[%s17477_s6 + $0x8a0] ss:$16 sps:$4 sm:$0xff]  }
 0x847   :  { %7015 = vmatpush1.bf16.msra.mxu1 %v13023_v0  ;;  %v13103_v0 = vld [vmem:[%s17477_s6 + $0x8c4] ss:$16 sps:$4 sm:$0xff]  }
 0x848   :  { %7016 = vmatprep.subr.bf16.mxu1 %v13028_v61  ;;  %v13101_v61 = vld [vmem:[%s17477_s6 + $0x8c0] ss:$16 sps:$4 sm:$0xff]  }
 0x84b   :  { %7017 = vmatpush1.bf16.msra.mxu1 %v13026_v16  ;;  %v13106_v16 = vld [vmem:[%s17477_s6 + $0x8e4] ss:$16 sps:$4 sm:$0xff]  }
 0x84c   :  { %7018 = vmatprep.subr.bf16.mxu1 %v13031_v63  ;;  %v13104_v63 = vld [vmem:[%s17477_s6 + $0x8e0] ss:$16 sps:$4 sm:$0xff]  }
 0x84f   :  { %7019 = vmatpush1.bf16.msra.mxu1 %v13029_v51  ;;  %v13109_v51 = vld [vmem:[%s17477_s6 + $0x904] ss:$16 sps:$4 sm:$0xff]  }
 0x850   :  { %7020 = vmatprep.subr.bf16.mxu1 %v13034_v10  ;;  %v13107_v10 = vld [vmem:[%s17477_s6 + $0x900] ss:$16 sps:$4 sm:$0xff]  }
 0x853   :  { %7021 = vmatpush1.bf16.msra.mxu1 %v13032_v49  ;;  %v13112_v49 = vld [vmem:[%s17477_s6 + $0x924] ss:$16 sps:$4 sm:$0xff]  }
 0x854   :  { %7033 = vmatprep.subr.bf16.mxu1 %v13037_v9  ;;  %v13110_v9 = vld [vmem:[%s17477_s6 + $0x920] ss:$16 sps:$4 sm:$0xff]  }
 0x856   :  { %7023 = vmatmul.mubr.bf16.vlgmr.msra.gmra.mrb[32].mxu1 %v15615_v62 }
 0x857   :  { %7034 = vmatpush1.bf16.msra.mxu1 %v13035_v1  ;;  %7065 = vmatprep.mubr.bf16.mxu1 %v15617_v28  ;;  %v13044_v28 = vld [vmem:[%s17477_s6 + $0x668] ss:$16 sps:$4 sm:$0xff]   ;;  %v13115_v1 = vld [vmem:[%s17477_s6 + $0x944] ss:$16 sps:$4 sm:$0xff]  }
 0x858   :  { %7035 = vmatprep.subr.bf16.mxu1 %v13040_v15  ;;  %v13113_v15 = vld [vmem:[%s17477_s6 + $0x940] ss:$16 sps:$4 sm:$0xff]  }
 0x85b   :  { %7036 = vmatpush1.bf16.msra.mxu1 %v13038_v20  ;;  %v13118_v20 = vld [vmem:[%s17477_s6 + $0x964] ss:$16 sps:$4 sm:$0xff]  }
 0x85c   :  { %7037 = vmatprep.subr.bf16.mxu1 %v13043_v52  ;;  %v13116_v52 = vld [vmem:[%s17477_s6 + $0x960] ss:$16 sps:$4 sm:$0xff]  }
 0x85f   :  { %7038 = vmatpush1.bf16.msra.mxu1 %v13041_v46  ;;  %v13121_v46 = vld [vmem:[%s17477_s6 + $0x984] ss:$16 sps:$4 sm:$0xff]  }
 0x860   :  { %7039 = vmatprep.subr.bf16.mxu1 %v13046_v40  ;;  %v13119_v40 = vld [vmem:[%s17477_s6 + $0x980] ss:$16 sps:$4 sm:$0xff]  }
 0x863   :  { %7040 = vmatpush1.bf16.msra.mxu1 %v13044_v28  ;;  %v13124_v28 = vld [vmem:[%s17477_s6 + $0x9a4] ss:$16 sps:$4 sm:$0xff]  }
 0x864   :  { %7041 = vmatprep.subr.bf16.mxu1 %v13049_v38  ;;  %v13122_v38 = vld [vmem:[%s17477_s6 + $0x9a0] ss:$16 sps:$4 sm:$0xff]  }
 0x867   :  { %7042 = vmatpush1.bf16.msra.mxu1 %v13047_v42  ;;  %v13127_v42 = vld [vmem:[%s17477_s6 + $0x9c4] ss:$16 sps:$4 sm:$0xff]  }
 0x868   :  { %7043 = vmatprep.subr.bf16.mxu1 %v13052_v60  ;;  %v13125_v60 = vld [vmem:[%s17477_s6 + $0x9c0] ss:$16 sps:$4 sm:$0xff]  }
 0x86b   :  { %7044 = vmatpush1.bf16.msra.mxu1 %v13050_v29  ;;  %v13130_v29 = vld [vmem:[%s17477_s6 + $0x9e4] ss:$16 sps:$4 sm:$0xff]  }
 0x86c   :  { %7045 = vmatprep.subr.bf16.mxu1 %v13055_v43  ;;  %v13128_v43 = vld [vmem:[%s17477_s6 + $0x9e0] ss:$16 sps:$4 sm:$0xff]  }
 0x86f   :  { %7046 = vmatpush1.bf16.msra.mxu1 %v13053_v56  ;;  %v13133_v56 = vld [vmem:[%s17477_s6 + $0x80c] ss:$16 sps:$4 sm:$0xff]  }
 0x870   :  { %7047 = vmatprep.subr.bf16.mxu1 %v13058_v19  ;;  %v13131_v19 = vld [vmem:[%s17477_s6 + $0x808] ss:$16 sps:$4 sm:$0xff]  }
 0x873   :  { %7048 = vmatpush1.bf16.msra.mxu1 %v13056_v7  ;;  %v13136_v7 = vld [vmem:[%s17477_s6 + $0x82c] ss:$16 sps:$4 sm:$0xff]  }
 0x874   :  { %7049 = vmatprep.subr.bf16.mxu1 %v13061_v11  ;;  %v13134_v11 = vld [vmem:[%s17477_s6 + $0x828] ss:$16 sps:$4 sm:$0xff]  }
 0x877   :  { %7050 = vmatpush1.bf16.msra.mxu1 %v13059_v54  ;;  %v13139_v54 = vld [vmem:[%s17477_s6 + $0x84c] ss:$16 sps:$4 sm:$0xff]  }
 0x878   :  { %7051 = vmatprep.subr.bf16.mxu1 %v13064_v25  ;;  %v13137_v25 = vld [vmem:[%s17477_s6 + $0x848] ss:$16 sps:$4 sm:$0xff]  }
 0x87b   :  { %7052 = vmatpush1.bf16.msra.mxu1 %v13062_v8  ;;  %v13142_v8 = vld [vmem:[%s17477_s6 + $0x86c] ss:$16 sps:$4 sm:$0xff]  }
 0x87c   :  { %7053 = vmatprep.subr.bf16.mxu1 %v13067_v45  ;;  %v13145_v45 = vld [vmem:[%s17477_s6 + $0x88c] ss:$16 sps:$4 sm:$0xff]  }
 0x87f   :  { %7054 = vmatpush1.bf16.msra.mxu1 %v13065_v30  ;;  %v13143_v30 = vld [vmem:[%s17477_s6 + $0x888] ss:$16 sps:$4 sm:$0xff]  }
 0x880   :  { %7055 = vmatprep.subr.bf16.mxu1 %v13070_v44  ;;  %v13148_v44 = vld [vmem:[%s17477_s6 + $0x8ac] ss:$16 sps:$4 sm:$0xff]  }
 0x883   :  { %7056 = vmatpush1.bf16.msra.mxu1 %v13068_v55  ;;  %v13146_v55 = vld [vmem:[%s17477_s6 + $0x8a8] ss:$16 sps:$4 sm:$0xff]  }
 0x884   :  { %7057 = vmatprep.subr.bf16.mxu1 %v13073_v6  ;;  %v13151_v6 = vld [vmem:[%s17477_s6 + $0x8cc] ss:$16 sps:$4 sm:$0xff]  }
 0x887   :  { %7058 = vmatpush1.bf16.msra.mxu1 %v13071_v59  ;;  %v13149_v59 = vld [vmem:[%s17477_s6 + $0x8c8] ss:$16 sps:$4 sm:$0xff]  }
 0x888   :  { %7059 = vmatprep.subr.bf16.mxu1 %v13076_v31  ;;  %v13154_v31 = vld [vmem:[%s17477_s6 + $0x8ec] ss:$16 sps:$4 sm:$0xff]  }
 0x88b   :  { %7060 = vmatpush1.bf16.msra.mxu1 %v13074_v4  ;;  %v13152_v4 = vld [vmem:[%s17477_s6 + $0x8e8] ss:$16 sps:$4 sm:$0xff]  }
 0x88c   :  { %7061 = vmatprep.subr.bf16.mxu1 %v13079_v17  ;;  %v13157_v17 = vld [vmem:[%s17477_s6 + $0x90c] ss:$16 sps:$4 sm:$0xff]  }
 0x88f   :  { %7062 = vmatpush1.bf16.msra.mxu1 %v13077_v33  ;;  %v13155_v33 = vld [vmem:[%s17477_s6 + $0x908] ss:$16 sps:$4 sm:$0xff]  }
 0x890   :  { %7063 = vmatprep.subr.bf16.mxu1 %v13082_v14  ;;  %v13160_v14 = vld [vmem:[%s17477_s6 + $0x92c] ss:$16 sps:$4 sm:$0xff]  }
 0x893   :  { %7064 = vmatpush1.bf16.msra.mxu1 %v13080_v39  ;;  %v13158_v39 = vld [vmem:[%s17477_s6 + $0x928] ss:$16 sps:$4 sm:$0xff]  }
 0x894   :  { %7469 = vmatprep.subr.bf16.mxu1 %v13085_v27  ;;  %v13163_v27 = vld [vmem:[%s17477_s6 + $0x94c] ss:$16 sps:$4 sm:$0xff]  }
 0x896   :  { %7066 = vmatmul.mubr.bf16.vlgmr.msra.gmra.mrb[36].mxu1 %v15615_v62  ;;  %v13094_v62 = vld [vmem:[%s17477_s6 + $0x864] ss:$16 sps:$4 sm:$0xff]  }
 0x897   :  { %7470 = vmatpush1.bf16.msra.mxu1 %v13083_v35  ;;  %7501 = vmatprep.mubr.bf16.mxu1 %v15633_v53  ;;  %v13161_v35 = vld [vmem:[%s17477_s6 + $0x948] ss:$16 sps:$4 sm:$0xff]  }
 0x898   :  { %7471 = vmatprep.subr.bf16.mxu1 %v13088_v47  ;;  %v13166_v47 = vld [vmem:[%s17477_s6 + $0x96c] ss:$16 sps:$4 sm:$0xff]  }
 0x89b   :  { %7472 = vmatpush1.bf16.msra.mxu1 %v13086_v48  ;;  %v13164_v48 = vld [vmem:[%s17477_s6 + $0x968] ss:$16 sps:$4 sm:$0xff]  }
 0x89c   :  { %7473 = vmatprep.subr.bf16.mxu1 %v13091_v22  ;;  %v13169_v22 = vld [vmem:[%s17477_s6 + $0x98c] ss:$16 sps:$4 sm:$0xff]  }
 0x89f   :  { %7474 = vmatpush1.bf16.msra.mxu1 %v13089_v37  ;;  %v13167_v37 = vld [vmem:[%s17477_s6 + $0x988] ss:$16 sps:$4 sm:$0xff]  }
 0x8a0   :  { %7475 = vmatprep.subr.bf16.mxu1 %v13094_v62  ;;  %v13172_v62 = vld [vmem:[%s17477_s6 + $0x9ac] ss:$16 sps:$4 sm:$0xff]  }
 0x8a3   :  { %7476 = vmatpush1.bf16.msra.mxu1 %v13092_v26  ;;  %v13170_v26 = vld [vmem:[%s17477_s6 + $0x9a8] ss:$16 sps:$4 sm:$0xff]  }
 0x8a4   :  { %7477 = vmatprep.subr.bf16.mxu1 %v13097_v50  ;;  %v13175_v50 = vld [vmem:[%s17477_s6 + $0x9cc] ss:$16 sps:$4 sm:$0xff]  }
 0x8a7   :  { %7478 = vmatpush1.bf16.msra.mxu1 %v13095_v3  ;;  %v13173_v3 = vld [vmem:[%s17477_s6 + $0x9c8] ss:$16 sps:$4 sm:$0xff]  }
 0x8a8   :  { %7479 = vmatprep.subr.bf16.mxu1 %v13100_v36  ;;  %v13178_v36 = vld [vmem:[%s17477_s6 + $0x9ec] ss:$16 sps:$4 sm:$0xff]  }
 0x8ab   :  { %7480 = vmatpush1.bf16.msra.mxu1 %v13098_v13  ;;  %v13176_v13 = vld [vmem:[%s17477_s6 + $0x9e8] ss:$16 sps:$4 sm:$0xff]  }
 0x8ac   :  { %7481 = vmatprep.subr.bf16.mxu1 %v13103_v0  ;;  %v13181_v0 = vld [vmem:[%s17477_s6 + $0xa04] ss:$16 sps:$4 sm:$0xff]  }
 0x8af   :  { %7482 = vmatpush1.bf16.msra.mxu1 %v13101_v61  ;;  %v13179_v61 = vld [vmem:[%s17477_s6 + $0xa00] ss:$16 sps:$4 sm:$0xff]  }
 0x8b0   :  { %7483 = vmatprep.subr.bf16.mxu1 %v13106_v16  ;;  %v13184_v16 = vld [vmem:[%s17477_s6 + $0xa24] ss:$16 sps:$4 sm:$0xff]  }
 0x8b3   :  { %7484 = vmatpush1.bf16.msra.mxu1 %v13104_v63  ;;  %v13182_v63 = vld [vmem:[%s17477_s6 + $0xa20] ss:$16 sps:$4 sm:$0xff]  }
 0x8b4   :  { %7485 = vmatprep.subr.bf16.mxu1 %v13109_v51  ;;  %v13187_v51 = vld [vmem:[%s17477_s6 + $0xa44] ss:$16 sps:$4 sm:$0xff]  }
 0x8b7   :  { %7486 = vmatpush1.bf16.msra.mxu1 %v13107_v10  ;;  %v13185_v10 = vld [vmem:[%s17477_s6 + $0xa40] ss:$16 sps:$4 sm:$0xff]  }
 0x8b8   :  { %7487 = vmatprep.subr.bf16.mxu1 %v13112_v49  ;;  %v13188_v49 = vld [vmem:[%s17477_s6 + $0xa60] ss:$16 sps:$4 sm:$0xff]  }
 0x8bb   :  { %7488 = vmatpush1.bf16.msra.mxu1 %v13110_v9  ;;  %v13193_v9 = vld [vmem:[%s17477_s6 + $0xa84] ss:$16 sps:$4 sm:$0xff]  }
 0x8bc   :  { %7489 = vmatprep.subr.bf16.mxu1 %v13115_v1  ;;  %v13191_v1 = vld [vmem:[%s17477_s6 + $0xa80] ss:$16 sps:$4 sm:$0xff]  }
 0x8bf   :  { %7490 = vmatpush1.bf16.msra.mxu1 %v13113_v15  ;;  %v13196_v15 = vld [vmem:[%s17477_s6 + $0xaa4] ss:$16 sps:$4 sm:$0xff]  }
 0x8c0   :  { %7491 = vmatprep.subr.bf16.mxu1 %v13118_v20  ;;  %v13194_v20 = vld [vmem:[%s17477_s6 + $0xaa0] ss:$16 sps:$4 sm:$0xff]  }
 0x8c3   :  { %7492 = vmatpush1.bf16.msra.mxu1 %v13116_v52  ;;  %v13199_v52 = vld [vmem:[%s17477_s6 + $0xac4] ss:$16 sps:$4 sm:$0xff]  }
 0x8c4   :  { %7493 = vmatprep.subr.bf16.mxu1 %v13121_v46  ;;  %v13197_v46 = vld [vmem:[%s17477_s6 + $0xac0] ss:$16 sps:$4 sm:$0xff]  }
 0x8c7   :  { %7494 = vmatpush1.bf16.msra.mxu1 %v13119_v40  ;;  %v13202_v40 = vld [vmem:[%s17477_s6 + $0xae4] ss:$16 sps:$4 sm:$0xff]  }
 0x8c8   :  { %7495 = vmatprep.subr.bf16.mxu1 %v13124_v28  ;;  %v13200_v28 = vld [vmem:[%s17477_s6 + $0xae0] ss:$16 sps:$4 sm:$0xff]  }
 0x8cb   :  { %7496 = vmatpush1.bf16.msra.mxu1 %v13122_v38  ;;  %v13205_v38 = vld [vmem:[%s17477_s6 + $0xb04] ss:$16 sps:$4 sm:$0xff]  }
 0x8cc   :  { %7497 = vmatprep.subr.bf16.mxu1 %v13127_v42  ;;  %v13203_v42 = vld [vmem:[%s17477_s6 + $0xb00] ss:$16 sps:$4 sm:$0xff]  }
 0x8cf   :  { %7498 = vmatpush1.bf16.msra.mxu1 %v13125_v60  ;;  %v13208_v60 = vld [vmem:[%s17477_s6 + $0xb24] ss:$16 sps:$4 sm:$0xff]  }
 0x8d0   :  { %7499 = vmatprep.subr.bf16.mxu1 %v13130_v29  ;;  %v13206_v29 = vld [vmem:[%s17477_s6 + $0xb20] ss:$16 sps:$4 sm:$0xff]  }
 0x8d3   :  { %7500 = vmatpush1.bf16.msra.mxu1 %v13128_v43  ;;  %v13211_v43 = vld [vmem:[%s17477_s6 + $0xb44] ss:$16 sps:$4 sm:$0xff]  }
 0x8d4   :  { %7512 = vmatprep.subr.bf16.mxu1 %v13133_v56  ;;  %v13209_v56 = vld [vmem:[%s17477_s6 + $0xb40] ss:$16 sps:$4 sm:$0xff]  }
 0x8d6   :  { %7502 = vmatmul.mubr.bf16.vlgmr.msra.gmra.mrb[32].mxu1 %v15631_v58 }
 0x8d7   :  { %7513 = vmatpush1.bf16.msra.mxu1 %v13131_v19  ;;  %7544 = vmatprep.mubr.bf16.mxu1 %v15633_v53  ;;  %v13140_v53 = vld [vmem:[%s17477_s6 + $0x868] ss:$16 sps:$4 sm:$0xff]   ;;  %v13214_v19 = vld [vmem:[%s17477_s6 + $0xb64] ss:$16 sps:$4 sm:$0xff]  }
 0x8d8   :  { %7514 = vmatprep.subr.bf16.mxu1 %v13136_v7  ;;  %v13212_v7 = vld [vmem:[%s17477_s6 + $0xb60] ss:$16 sps:$4 sm:$0xff]  }
 0x8db   :  { %7515 = vmatpush1.bf16.msra.mxu1 %v13134_v11  ;;  %v13217_v11 = vld [vmem:[%s17477_s6 + $0xb84] ss:$16 sps:$4 sm:$0xff]  }
 0x8dc   :  { %7516 = vmatprep.subr.bf16.mxu1 %v13139_v54  ;;  %v13215_v54 = vld [vmem:[%s17477_s6 + $0xb80] ss:$16 sps:$4 sm:$0xff]  }
 0x8df   :  { %7517 = vmatpush1.bf16.msra.mxu1 %v13137_v25  ;;  %v13220_v25 = vld [vmem:[%s17477_s6 + $0xba4] ss:$16 sps:$4 sm:$0xff]  }
 0x8e0   :  { %7518 = vmatprep.subr.bf16.mxu1 %v13142_v8  ;;  %v13218_v8 = vld [vmem:[%s17477_s6 + $0xba0] ss:$16 sps:$4 sm:$0xff]  }
 0x8e3   :  { %7519 = vmatpush1.bf16.msra.mxu1 %v13140_v53  ;;  %v13223_v53 = vld [vmem:[%s17477_s6 + $0xbc4] ss:$16 sps:$4 sm:$0xff]  }
 0x8e4   :  { %7520 = vmatprep.subr.bf16.mxu1 %v13145_v45  ;;  %v13221_v45 = vld [vmem:[%s17477_s6 + $0xbc0] ss:$16 sps:$4 sm:$0xff]  }
 0x8e7   :  { %7521 = vmatpush1.bf16.msra.mxu1 %v13143_v30  ;;  %v13226_v30 = vld [vmem:[%s17477_s6 + $0xbe4] ss:$16 sps:$4 sm:$0xff]  }
 0x8e8   :  { %7522 = vmatprep.subr.bf16.mxu1 %v13148_v44  ;;  %v13224_v44 = vld [vmem:[%s17477_s6 + $0xbe0] ss:$16 sps:$4 sm:$0xff]  }
 0x8eb   :  { %7523 = vmatpush1.bf16.msra.mxu1 %v13146_v55  ;;  %v13229_v55 = vld [vmem:[%s17477_s6 + $0xa0c] ss:$16 sps:$4 sm:$0xff]  }
 0x8ec   :  { %7524 = vmatprep.subr.bf16.mxu1 %v13151_v6  ;;  %v13227_v6 = vld [vmem:[%s17477_s6 + $0xa08] ss:$16 sps:$4 sm:$0xff]  }
 0x8ef   :  { %7525 = vmatpush1.bf16.msra.mxu1 %v13149_v59  ;;  %v13232_v59 = vld [vmem:[%s17477_s6 + $0xa2c] ss:$16 sps:$4 sm:$0xff]  }
 0x8f0   :  { %7526 = vmatprep.subr.bf16.mxu1 %v13154_v31  ;;  %v13230_v31 = vld [vmem:[%s17477_s6 + $0xa28] ss:$16 sps:$4 sm:$0xff]  }
 0x8f3   :  { %7527 = vmatpush1.bf16.msra.mxu1 %v13152_v4  ;;  %v13235_v4 = vld [vmem:[%s17477_s6 + $0xa4c] ss:$16 sps:$4 sm:$0xff]  }
 0x8f4   :  { %7528 = vmatprep.subr.bf16.mxu1 %v13157_v17  ;;  %v13233_v17 = vld [vmem:[%s17477_s6 + $0xa48] ss:$16 sps:$4 sm:$0xff]  }
 0x8f7   :  { %7529 = vmatpush1.bf16.msra.mxu1 %v13155_v33  ;;  %v13238_v33 = vld [vmem:[%s17477_s6 + $0xa6c] ss:$16 sps:$4 sm:$0xff]  }
 0x8f8   :  { %7530 = vmatprep.subr.bf16.mxu1 %v13160_v14  ;;  %v13241_v14 = vld [vmem:[%s17477_s6 + $0xa8c] ss:$16 sps:$4 sm:$0xff]  }
 0x8fb   :  { %7531 = vmatpush1.bf16.msra.mxu1 %v13158_v39  ;;  %v13239_v39 = vld [vmem:[%s17477_s6 + $0xa88] ss:$16 sps:$4 sm:$0xff]  }
 0x8fc   :  { %7532 = vmatprep.subr.bf16.mxu1 %v13163_v27  ;;  %v13244_v27 = vld [vmem:[%s17477_s6 + $0xaac] ss:$16 sps:$4 sm:$0xff]  }
 0x8ff   :  { %7533 = vmatpush1.bf16.msra.mxu1 %v13161_v35  ;;  %v13242_v35 = vld [vmem:[%s17477_s6 + $0xaa8] ss:$16 sps:$4 sm:$0xff]  }
 0x900   :  { %7534 = vmatprep.subr.bf16.mxu1 %v13166_v47  ;;  %v13247_v47 = vld [vmem:[%s17477_s6 + $0xacc] ss:$16 sps:$4 sm:$0xff]  }
 0x903   :  { %7535 = vmatpush1.bf16.msra.mxu1 %v13164_v48  ;;  %v13245_v48 = vld [vmem:[%s17477_s6 + $0xac8] ss:$16 sps:$4 sm:$0xff]  }
 0x904   :  { %7536 = vmatprep.subr.bf16.mxu1 %v13169_v22  ;;  %v13250_v22 = vld [vmem:[%s17477_s6 + $0xaec] ss:$16 sps:$4 sm:$0xff]  }
 0x907   :  { %7537 = vmatpush1.bf16.msra.mxu1 %v13167_v37  ;;  %v13248_v37 = vld [vmem:[%s17477_s6 + $0xae8] ss:$16 sps:$4 sm:$0xff]  }
 0x908   :  { %7538 = vmatprep.subr.bf16.mxu1 %v13172_v62  ;;  %v13253_v62 = vld [vmem:[%s17477_s6 + $0xb0c] ss:$16 sps:$4 sm:$0xff]  }
 0x90b   :  { %7539 = vmatpush1.bf16.msra.mxu1 %v13170_v26  ;;  %v13251_v26 = vld [vmem:[%s17477_s6 + $0xb08] ss:$16 sps:$4 sm:$0xff]  }
 0x90c   :  { %7540 = vmatprep.subr.bf16.mxu1 %v13175_v50  ;;  %v13256_v50 = vld [vmem:[%s17477_s6 + $0xb2c] ss:$16 sps:$4 sm:$0xff]  }
 0x90f   :  { %7541 = vmatpush1.bf16.msra.mxu1 %v13173_v3  ;;  %v13254_v3 = vld [vmem:[%s17477_s6 + $0xb28] ss:$16 sps:$4 sm:$0xff]  }
 0x910   :  { %7542 = vmatprep.subr.bf16.mxu1 %v13178_v36  ;;  %v13259_v36 = vld [vmem:[%s17477_s6 + $0xb4c] ss:$16 sps:$4 sm:$0xff]  }
 0x913   :  { %7543 = vmatpush1.bf16.msra.mxu1 %v13176_v13  ;;  %v13257_v13 = vld [vmem:[%s17477_s6 + $0xb48] ss:$16 sps:$4 sm:$0xff]  }
 0x914   :  { %7948 = vmatprep.subr.bf16.mxu1 %v13181_v0  ;;  %v13262_v0 = vld [vmem:[%s17477_s6 + $0xb6c] ss:$16 sps:$4 sm:$0xff]  }
 0x916   :  { %7545 = vmatmul.mubr.bf16.vlgmr.msra.gmra.mrb[36].mxu1 %v15631_v58  ;;  %v13190_v58 = vld [vmem:[%s17477_s6 + $0xa64] ss:$16 sps:$4 sm:$0xff]  }
 0x917   :  { %7949 = vmatpush1.bf16.msra.mxu1 %v13179_v61  ;;  %7980 = vmatprep.mubr.bf16.mxu1 %v15649_v5  ;;  %v13260_v61 = vld [vmem:[%s17477_s6 + $0xb68] ss:$16 sps:$4 sm:$0xff]  }
 0x918   :  { %7950 = vmatprep.subr.bf16.mxu1 %v13184_v16  ;;  %v13265_v16 = vld [vmem:[%s17477_s6 + $0xb8c] ss:$16 sps:$4 sm:$0xff]  }
 0x91b   :  { %7951 = vmatpush1.bf16.msra.mxu1 %v13182_v63  ;;  %v13263_v63 = vld [vmem:[%s17477_s6 + $0xb88] ss:$16 sps:$4 sm:$0xff]  }
 0x91c   :  { %7952 = vmatprep.subr.bf16.mxu1 %v13187_v51  ;;  %v13268_v51 = vld [vmem:[%s17477_s6 + $0xbac] ss:$16 sps:$4 sm:$0xff]  }
 0x91f   :  { %7953 = vmatpush1.bf16.msra.mxu1 %v13185_v10  ;;  %v13266_v10 = vld [vmem:[%s17477_s6 + $0xba8] ss:$16 sps:$4 sm:$0xff]  }
 0x920   :  { %7954 = vmatprep.subr.bf16.mxu1 %v13190_v58  ;;  %v13271_v58 = vld [vmem:[%s17477_s6 + $0xbcc] ss:$16 sps:$4 sm:$0xff]  }
 0x923   :  { %7955 = vmatpush1.bf16.msra.mxu1 %v13188_v49  ;;  %v13269_v49 = vld [vmem:[%s17477_s6 + $0xbc8] ss:$16 sps:$4 sm:$0xff]  }
 0x924   :  { %7956 = vmatprep.subr.bf16.mxu1 %v13193_v9  ;;  %v13274_v9 = vld [vmem:[%s17477_s6 + $0xbec] ss:$16 sps:$4 sm:$0xff]  }
 0x927   :  { %7957 = vmatpush1.bf16.msra.mxu1 %v13191_v1  ;;  %v13272_v1 = vld [vmem:[%s17477_s6 + $0xbe8] ss:$16 sps:$4 sm:$0xff]  }
 0x928   :  { %7958 = vmatprep.subr.bf16.mxu1 %v13196_v15  ;;  %v13277_v15 = vld [vmem:[%s17477_s6 + $0xc04] ss:$16 sps:$4 sm:$0xff]  }
 0x92b   :  { %7959 = vmatpush1.bf16.msra.mxu1 %v13194_v20  ;;  %v13275_v20 = vld [vmem:[%s17477_s6 + $0xc00] ss:$16 sps:$4 sm:$0xff]  }
 0x92c   :  { %7960 = vmatprep.subr.bf16.mxu1 %v13199_v52  ;;  %v13280_v52 = vld [vmem:[%s17477_s6 + $0xc24] ss:$16 sps:$4 sm:$0xff]  }
 0x92f   :  { %7961 = vmatpush1.bf16.msra.mxu1 %v13197_v46  ;;  %v13278_v46 = vld [vmem:[%s17477_s6 + $0xc20] ss:$16 sps:$4 sm:$0xff]  }
 0x930   :  { %7962 = vmatprep.subr.bf16.mxu1 %v13202_v40  ;;  %v13283_v40 = vld [vmem:[%s17477_s6 + $0xc44] ss:$16 sps:$4 sm:$0xff]  }
 0x933   :  { %7963 = vmatpush1.bf16.msra.mxu1 %v13200_v28  ;;  %v13281_v28 = vld [vmem:[%s17477_s6 + $0xc40] ss:$16 sps:$4 sm:$0xff]  }
 0x934   :  { %7964 = vmatprep.subr.bf16.mxu1 %v13205_v38  ;;  %v13284_v38 = vld [vmem:[%s17477_s6 + $0xc60] ss:$16 sps:$4 sm:$0xff]  }
 0x937   :  { %7965 = vmatpush1.bf16.msra.mxu1 %v13203_v42  ;;  %v13289_v42 = vld [vmem:[%s17477_s6 + $0xc84] ss:$16 sps:$4 sm:$0xff]  }
 0x938   :  { %7966 = vmatprep.subr.bf16.mxu1 %v13208_v60  ;;  %v13287_v60 = vld [vmem:[%s17477_s6 + $0xc80] ss:$16 sps:$4 sm:$0xff]  }
 0x93b   :  { %7967 = vmatpush1.bf16.msra.mxu1 %v13206_v29  ;;  %v13292_v29 = vld [vmem:[%s17477_s6 + $0xca4] ss:$16 sps:$4 sm:$0xff]  }
 0x93c   :  { %7968 = vmatprep.subr.bf16.mxu1 %v13211_v43  ;;  %v13290_v43 = vld [vmem:[%s17477_s6 + $0xca0] ss:$16 sps:$4 sm:$0xff]  }
 0x93f   :  { %7969 = vmatpush1.bf16.msra.mxu1 %v13209_v56  ;;  %v13295_v56 = vld [vmem:[%s17477_s6 + $0xcc4] ss:$16 sps:$4 sm:$0xff]  }
 0x940   :  { %7970 = vmatprep.subr.bf16.mxu1 %v13214_v19  ;;  %v13293_v19 = vld [vmem:[%s17477_s6 + $0xcc0] ss:$16 sps:$4 sm:$0xff]  }
 0x943   :  { %7971 = vmatpush1.bf16.msra.mxu1 %v13212_v7  ;;  %v13298_v7 = vld [vmem:[%s17477_s6 + $0xce4] ss:$16 sps:$4 sm:$0xff]  }
 0x944   :  { %7972 = vmatprep.subr.bf16.mxu1 %v13217_v11  ;;  %v13296_v11 = vld [vmem:[%s17477_s6 + $0xce0] ss:$16 sps:$4 sm:$0xff]  }
 0x947   :  { %7973 = vmatpush1.bf16.msra.mxu1 %v13215_v54  ;;  %v13301_v54 = vld [vmem:[%s17477_s6 + $0xd04] ss:$16 sps:$4 sm:$0xff]  }
 0x948   :  { %7974 = vmatprep.subr.bf16.mxu1 %v13220_v25  ;;  %v13299_v25 = vld [vmem:[%s17477_s6 + $0xd00] ss:$16 sps:$4 sm:$0xff]  }
 0x94b   :  { %7975 = vmatpush1.bf16.msra.mxu1 %v13218_v8  ;;  %v13304_v8 = vld [vmem:[%s17477_s6 + $0xd24] ss:$16 sps:$4 sm:$0xff]  }
 0x94c   :  { %7976 = vmatprep.subr.bf16.mxu1 %v13223_v53  ;;  %v13302_v53 = vld [vmem:[%s17477_s6 + $0xd20] ss:$16 sps:$4 sm:$0xff]  }
 0x94f   :  { %7977 = vmatpush1.bf16.msra.mxu1 %v13221_v45  ;;  %v13307_v45 = vld [vmem:[%s17477_s6 + $0xd44] ss:$16 sps:$4 sm:$0xff]  }
 0x950   :  { %7978 = vmatprep.subr.bf16.mxu1 %v13226_v30  ;;  %v13305_v30 = vld [vmem:[%s17477_s6 + $0xd40] ss:$16 sps:$4 sm:$0xff]  }
 0x953   :  { %7979 = vmatpush1.bf16.msra.mxu1 %v13224_v44  ;;  %v13310_v44 = vld [vmem:[%s17477_s6 + $0xd64] ss:$16 sps:$4 sm:$0xff]  }
 0x954   :  { %7991 = vmatprep.subr.bf16.mxu1 %v13229_v55  ;;  %v13308_v55 = vld [vmem:[%s17477_s6 + $0xd60] ss:$16 sps:$4 sm:$0xff]  }
 0x956   :  { %7981 = vmatmul.mubr.bf16.vlgmr.msra.gmra.mrb[32].mxu1 %v15647_v24 }
 0x957   :  { %7992 = vmatpush1.bf16.msra.mxu1 %v13227_v6  ;;  %8023 = vmatprep.mubr.bf16.mxu1 %v15649_v5  ;;  %v13236_v5 = vld [vmem:[%s17477_s6 + $0xa68] ss:$16 sps:$4 sm:$0xff]   ;;  %v13313_v6 = vld [vmem:[%s17477_s6 + $0xd84] ss:$16 sps:$4 sm:$0xff]  }
 0x958   :  { %7993 = vmatprep.subr.bf16.mxu1 %v13232_v59  ;;  %v13311_v59 = vld [vmem:[%s17477_s6 + $0xd80] ss:$16 sps:$4 sm:$0xff]  }
 0x95b   :  { %7994 = vmatpush1.bf16.msra.mxu1 %v13230_v31  ;;  %v13316_v31 = vld [vmem:[%s17477_s6 + $0xda4] ss:$16 sps:$4 sm:$0xff]  }
 0x95c   :  { %7995 = vmatprep.subr.bf16.mxu1 %v13235_v4  ;;  %v13314_v4 = vld [vmem:[%s17477_s6 + $0xda0] ss:$16 sps:$4 sm:$0xff]  }
 0x95f   :  { %7996 = vmatpush1.bf16.msra.mxu1 %v13233_v17  ;;  %v13319_v17 = vld [vmem:[%s17477_s6 + $0xdc4] ss:$16 sps:$4 sm:$0xff]  }
 0x960   :  { %7997 = vmatprep.subr.bf16.mxu1 %v13238_v33  ;;  %v13317_v33 = vld [vmem:[%s17477_s6 + $0xdc0] ss:$16 sps:$4 sm:$0xff]  }
 0x963   :  { %7998 = vmatpush1.bf16.msra.mxu1 %v13236_v5  ;;  %v13322_v5 = vld [vmem:[%s17477_s6 + $0xde4] ss:$16 sps:$4 sm:$0xff]  }
 0x964   :  { %7999 = vmatprep.subr.bf16.mxu1 %v13241_v14  ;;  %v13320_v14 = vld [vmem:[%s17477_s6 + $0xde0] ss:$16 sps:$4 sm:$0xff]  }
 0x967   :  { %8000 = vmatpush1.bf16.msra.mxu1 %v13239_v39  ;;  %v13325_v39 = vld [vmem:[%s17477_s6 + $0xc0c] ss:$16 sps:$4 sm:$0xff]  }
 0x968   :  { %8001 = vmatprep.subr.bf16.mxu1 %v13244_v27  ;;  %v13323_v27 = vld [vmem:[%s17477_s6 + $0xc08] ss:$16 sps:$4 sm:$0xff]  }
 0x96b   :  { %8002 = vmatpush1.bf16.msra.mxu1 %v13242_v35  ;;  %v13328_v35 = vld [vmem:[%s17477_s6 + $0xc2c] ss:$16 sps:$4 sm:$0xff]  }
 0x96c   :  { %8003 = vmatprep.subr.bf16.mxu1 %v13247_v47  ;;  %v13326_v47 = vld [vmem:[%s17477_s6 + $0xc28] ss:$16 sps:$4 sm:$0xff]  }
 0x96f   :  { %8004 = vmatpush1.bf16.msra.mxu1 %v13245_v48  ;;  %v13331_v48 = vld [vmem:[%s17477_s6 + $0xc4c] ss:$16 sps:$4 sm:$0xff]  }
 0x970   :  { %8005 = vmatprep.subr.bf16.mxu1 %v13250_v22  ;;  %v13329_v22 = vld [vmem:[%s17477_s6 + $0xc48] ss:$16 sps:$4 sm:$0xff]  }
 0x973   :  { %8006 = vmatpush1.bf16.msra.mxu1 %v13248_v37  ;;  %v13334_v37 = vld [vmem:[%s17477_s6 + $0xc6c] ss:$16 sps:$4 sm:$0xff]  }
 0x974   :  { %8007 = vmatprep.subr.bf16.mxu1 %v13253_v62  ;;  %v13337_v62 = vld [vmem:[%s17477_s6 + $0xc8c] ss:$16 sps:$4 sm:$0xff]  }
 0x977   :  { %8008 = vmatpush1.bf16.msra.mxu1 %v13251_v26  ;;  %v13335_v26 = vld [vmem:[%s17477_s6 + $0xc88] ss:$16 sps:$4 sm:$0xff]  }
 0x978   :  { %8009 = vmatprep.subr.bf16.mxu1 %v13256_v50  ;;  %v13340_v50 = vld [vmem:[%s17477_s6 + $0xcac] ss:$16 sps:$4 sm:$0xff]  }
 0x97b   :  { %8010 = vmatpush1.bf16.msra.mxu1 %v13254_v3  ;;  %v13338_v3 = vld [vmem:[%s17477_s6 + $0xca8] ss:$16 sps:$4 sm:$0xff]  }
 0x97c   :  { %8011 = vmatprep.subr.bf16.mxu1 %v13259_v36  ;;  %v13343_v36 = vld [vmem:[%s17477_s6 + $0xccc] ss:$16 sps:$4 sm:$0xff]  }
 0x97f   :  { %8012 = vmatpush1.bf16.msra.mxu1 %v13257_v13  ;;  %v13341_v13 = vld [vmem:[%s17477_s6 + $0xcc8] ss:$16 sps:$4 sm:$0xff]  }
 0x980   :  { %8013 = vmatprep.subr.bf16.mxu1 %v13262_v0  ;;  %v13346_v0 = vld [vmem:[%s17477_s6 + $0xcec] ss:$16 sps:$4 sm:$0xff]  }
 0x983   :  { %8014 = vmatpush1.bf16.msra.mxu1 %v13260_v61  ;;  %v13344_v61 = vld [vmem:[%s17477_s6 + $0xce8] ss:$16 sps:$4 sm:$0xff]  }
 0x984   :  { %8015 = vmatprep.subr.bf16.mxu1 %v13265_v16  ;;  %v13349_v16 = vld [vmem:[%s17477_s6 + $0xd0c] ss:$16 sps:$4 sm:$0xff]  }
 0x987   :  { %8016 = vmatpush1.bf16.msra.mxu1 %v13263_v63  ;;  %v13347_v63 = vld [vmem:[%s17477_s6 + $0xd08] ss:$16 sps:$4 sm:$0xff]  }
 0x988   :  { %8017 = vmatprep.subr.bf16.mxu1 %v13268_v51  ;;  %v13352_v51 = vld [vmem:[%s17477_s6 + $0xd2c] ss:$16 sps:$4 sm:$0xff]  }
 0x98b   :  { %8018 = vmatpush1.bf16.msra.mxu1 %v13266_v10  ;;  %v13350_v10 = vld [vmem:[%s17477_s6 + $0xd28] ss:$16 sps:$4 sm:$0xff]  }
 0x98c   :  { %8019 = vmatprep.subr.bf16.mxu1 %v13271_v58  ;;  %v13355_v58 = vld [vmem:[%s17477_s6 + $0xd4c] ss:$16 sps:$4 sm:$0xff]  }
 0x98f   :  { %8020 = vmatpush1.bf16.msra.mxu1 %v13269_v49  ;;  %v13353_v49 = vld [vmem:[%s17477_s6 + $0xd48] ss:$16 sps:$4 sm:$0xff]  }
 0x990   :  { %8021 = vmatprep.subr.bf16.mxu1 %v13274_v9  ;;  %v13358_v9 = vld [vmem:[%s17477_s6 + $0xd6c] ss:$16 sps:$4 sm:$0xff]  }
 0x993   :  { %8022 = vmatpush1.bf16.msra.mxu1 %v13272_v1  ;;  %v13356_v1 = vld [vmem:[%s17477_s6 + $0xd68] ss:$16 sps:$4 sm:$0xff]  }
 0x994   :  { %8427 = vmatprep.subr.bf16.mxu1 %v13277_v15  ;;  %v13361_v15 = vld [vmem:[%s17477_s6 + $0xd8c] ss:$16 sps:$4 sm:$0xff]  }
 0x996   :  { %8024 = vmatmul.mubr.bf16.vlgmr.msra.gmra.mrb[36].mxu1 %v15647_v24  ;;  %v13286_v24 = vld [vmem:[%s17477_s6 + $0xc64] ss:$16 sps:$4 sm:$0xff]  }
 0x997   :  { %8428 = vmatpush1.bf16.msra.mxu1 %v13275_v20  ;;  %8459 = vmatprep.mubr.bf16.mxu1 %v15665_v41  ;;  %v13359_v20 = vld [vmem:[%s17477_s6 + $0xd88] ss:$16 sps:$4 sm:$0xff]  }
 0x998   :  { %8429 = vmatprep.subr.bf16.mxu1 %v13280_v52  ;;  %v13364_v52 = vld [vmem:[%s17477_s6 + $0xdac] ss:$16 sps:$4 sm:$0xff]  }
 0x99b   :  { %8430 = vmatpush1.bf16.msra.mxu1 %v13278_v46  ;;  %v13362_v46 = vld [vmem:[%s17477_s6 + $0xda8] ss:$16 sps:$4 sm:$0xff]  }
 0x99c   :  { %8431 = vmatprep.subr.bf16.mxu1 %v13283_v40  ;;  %v13367_v40 = vld [vmem:[%s17477_s6 + $0xdcc] ss:$16 sps:$4 sm:$0xff]  }
 0x99f   :  { %8432 = vmatpush1.bf16.msra.mxu1 %v13281_v28  ;;  %v13365_v28 = vld [vmem:[%s17477_s6 + $0xdc8] ss:$16 sps:$4 sm:$0xff]  }
 0x9a0   :  { %8433 = vmatprep.subr.bf16.mxu1 %v13286_v24  ;;  %v13370_v24 = vld [vmem:[%s17477_s6 + $0xdec] ss:$16 sps:$4 sm:$0xff]  }
 0x9a3   :  { %8434 = vmatpush1.bf16.msra.mxu1 %v13284_v38  ;;  %v13368_v38 = vld [vmem:[%s17477_s6 + $0xde8] ss:$16 sps:$4 sm:$0xff]  }
 0x9a4   :  { %8435 = vmatprep.subr.bf16.mxu1 %v13289_v42  ;;  %v13373_v42 = vld [vmem:[%s17477_s6 + $0xe04] ss:$16 sps:$4 sm:$0xff]  }
 0x9a7   :  { %8436 = vmatpush1.bf16.msra.mxu1 %v13287_v60  ;;  %v13371_v60 = vld [vmem:[%s17477_s6 + $0xe00] ss:$16 sps:$4 sm:$0xff]  }
 0x9a8   :  { %8437 = vmatprep.subr.bf16.mxu1 %v13292_v29  ;;  %v13376_v29 = vld [vmem:[%s17477_s6 + $0xe24] ss:$16 sps:$4 sm:$0xff]  }
 0x9ab   :  { %8438 = vmatpush1.bf16.msra.mxu1 %v13290_v43  ;;  %v13374_v43 = vld [vmem:[%s17477_s6 + $0xe20] ss:$16 sps:$4 sm:$0xff]  }
 0x9ac   :  { %8439 = vmatprep.subr.bf16.mxu1 %v13295_v56  ;;  %v13379_v56 = vld [vmem:[%s17477_s6 + $0xe44] ss:$16 sps:$4 sm:$0xff]  }
 0x9af   :  { %8440 = vmatpush1.bf16.msra.mxu1 %v13293_v19  ;;  %v13377_v19 = vld [vmem:[%s17477_s6 + $0xe40] ss:$16 sps:$4 sm:$0xff]  }
 0x9b0   :  { %8441 = vmatprep.subr.bf16.mxu1 %v13298_v7  ;;  %v13380_v7 = vld [vmem:[%s17477_s6 + $0xe60] ss:$16 sps:$4 sm:$0xff]  }
 0x9b3   :  { %8442 = vmatpush1.bf16.msra.mxu1 %v13296_v11  ;;  %v13385_v11 = vld [vmem:[%s17477_s6 + $0xe84] ss:$16 sps:$4 sm:$0xff]  }
 0x9b4   :  { %8443 = vmatprep.subr.bf16.mxu1 %v13301_v54  ;;  %v13383_v54 = vld [vmem:[%s17477_s6 + $0xe80] ss:$16 sps:$4 sm:$0xff]  }
 0x9b7   :  { %8444 = vmatpush1.bf16.msra.mxu1 %v13299_v25  ;;  %v13388_v25 = vld [vmem:[%s17477_s6 + $0xea4] ss:$16 sps:$4 sm:$0xff]  }
 0x9b8   :  { %8445 = vmatprep.subr.bf16.mxu1 %v13304_v8  ;;  %v13386_v8 = vld [vmem:[%s17477_s6 + $0xea0] ss:$16 sps:$4 sm:$0xff]  }
 0x9bb   :  { %8446 = vmatpush1.bf16.msra.mxu1 %v13302_v53  ;;  %v13391_v53 = vld [vmem:[%s17477_s6 + $0xec4] ss:$16 sps:$4 sm:$0xff]  }
 0x9bc   :  { %8447 = vmatprep.subr.bf16.mxu1 %v13307_v45  ;;  %v13389_v45 = vld [vmem:[%s17477_s6 + $0xec0] ss:$16 sps:$4 sm:$0xff]  }
 0x9bf   :  { %8448 = vmatpush1.bf16.msra.mxu1 %v13305_v30  ;;  %v13394_v30 = vld [vmem:[%s17477_s6 + $0xee4] ss:$16 sps:$4 sm:$0xff]  }
 0x9c0   :  { %8449 = vmatprep.subr.bf16.mxu1 %v13310_v44  ;;  %v13392_v44 = vld [vmem:[%s17477_s6 + $0xee0] ss:$16 sps:$4 sm:$0xff]  }
 0x9c3   :  { %8450 = vmatpush1.bf16.msra.mxu1 %v13308_v55  ;;  %v13397_v55 = vld [vmem:[%s17477_s6 + $0xf04] ss:$16 sps:$4 sm:$0xff]  }
 0x9c4   :  { %8451 = vmatprep.subr.bf16.mxu1 %v13313_v6  ;;  %v13395_v6 = vld [vmem:[%s17477_s6 + $0xf00] ss:$16 sps:$4 sm:$0xff]  }
 0x9c7   :  { %8452 = vmatpush1.bf16.msra.mxu1 %v13311_v59  ;;  %v13400_v59 = vld [vmem:[%s17477_s6 + $0xf24] ss:$16 sps:$4 sm:$0xff]  }
 0x9c8   :  { %8453 = vmatprep.subr.bf16.mxu1 %v13316_v31  ;;  %v13398_v31 = vld [vmem:[%s17477_s6 + $0xf20] ss:$16 sps:$4 sm:$0xff]  }
 0x9cb   :  { %8454 = vmatpush1.bf16.msra.mxu1 %v13314_v4  ;;  %v13403_v4 = vld [vmem:[%s17477_s6 + $0xf44] ss:$16 sps:$4 sm:$0xff]  }
 0x9cc   :  { %8455 = vmatprep.subr.bf16.mxu1 %v13319_v17  ;;  %v13401_v17 = vld [vmem:[%s17477_s6 + $0xf40] ss:$16 sps:$4 sm:$0xff]  }
 0x9cf   :  { %8456 = vmatpush1.bf16.msra.mxu1 %v13317_v33  ;;  %v13406_v33 = vld [vmem:[%s17477_s6 + $0xf64] ss:$16 sps:$4 sm:$0xff]  }
 0x9d0   :  { %8457 = vmatprep.subr.bf16.mxu1 %v13322_v5  ;;  %v13404_v5 = vld [vmem:[%s17477_s6 + $0xf60] ss:$16 sps:$4 sm:$0xff]  }
 0x9d3   :  { %8458 = vmatpush1.bf16.msra.mxu1 %v13320_v14  ;;  %v13409_v14 = vld [vmem:[%s17477_s6 + $0xf84] ss:$16 sps:$4 sm:$0xff]  }
 0x9d4   :  { %8470 = vmatprep.subr.bf16.mxu1 %v13325_v39  ;;  %v13407_v39 = vld [vmem:[%s17477_s6 + $0xf80] ss:$16 sps:$4 sm:$0xff]  }
 0x9d6   :  { %8460 = vmatmul.mubr.bf16.vlgmr.msra.gmra.mrb[32].mxu1 %v15663_v34 }
 0x9d7   :  { %8471 = vmatpush1.bf16.msra.mxu1 %v13323_v27  ;;  %8502 = vmatprep.mubr.bf16.mxu1 %v15665_v41  ;;  %v13332_v41 = vld [vmem:[%s17477_s6 + $0xc68] ss:$16 sps:$4 sm:$0xff]   ;;  %v13412_v27 = vld [vmem:[%s17477_s6 + $0xfa4] ss:$16 sps:$4 sm:$0xff]  }
 0x9d8   :  { %8472 = vmatprep.subr.bf16.mxu1 %v13328_v35  ;;  %v13410_v35 = vld [vmem:[%s17477_s6 + $0xfa0] ss:$16 sps:$4 sm:$0xff]  }
 0x9db   :  { %8473 = vmatpush1.bf16.msra.mxu1 %v13326_v47  ;;  %v13415_v47 = vld [vmem:[%s17477_s6 + $0xfc4] ss:$16 sps:$4 sm:$0xff]  }
 0x9dc   :  { %8474 = vmatprep.subr.bf16.mxu1 %v13331_v48  ;;  %v13413_v48 = vld [vmem:[%s17477_s6 + $0xfc0] ss:$16 sps:$4 sm:$0xff]  }
 0x9df   :  { %8475 = vmatpush1.bf16.msra.mxu1 %v13329_v22  ;;  %v13418_v22 = vld [vmem:[%s17477_s6 + $0xfe4] ss:$16 sps:$4 sm:$0xff]  }
 0x9e0   :  { %8476 = vmatprep.subr.bf16.mxu1 %v13334_v37  ;;  %v13416_v37 = vld [vmem:[%s17477_s6 + $0xfe0] ss:$16 sps:$4 sm:$0xff]  }
 0x9e3   :  { %8477 = vmatpush1.bf16.msra.mxu1 %v13332_v41  ;;  %v13421_v41 = vld [vmem:[%s17477_s6 + $0xe0c] ss:$16 sps:$4 sm:$0xff]  }
 0x9e4   :  { %8478 = vmatprep.subr.bf16.mxu1 %v13337_v62  ;;  %v13419_v62 = vld [vmem:[%s17477_s6 + $0xe08] ss:$16 sps:$4 sm:$0xff]  }
 0x9e7   :  { %8479 = vmatpush1.bf16.msra.mxu1 %v13335_v26  ;;  %v13424_v26 = vld [vmem:[%s17477_s6 + $0xe2c] ss:$16 sps:$4 sm:$0xff]  }
 0x9e8   :  { %8480 = vmatprep.subr.bf16.mxu1 %v13340_v50  ;;  %v13422_v50 = vld [vmem:[%s17477_s6 + $0xe28] ss:$16 sps:$4 sm:$0xff]  }
 0x9eb   :  { %8481 = vmatpush1.bf16.msra.mxu1 %v13338_v3  ;;  %v13427_v3 = vld [vmem:[%s17477_s6 + $0xe4c] ss:$16 sps:$4 sm:$0xff]  }
 0x9ec   :  { %8482 = vmatprep.subr.bf16.mxu1 %v13343_v36  ;;  %v13425_v36 = vld [vmem:[%s17477_s6 + $0xe48] ss:$16 sps:$4 sm:$0xff]  }
 0x9ef   :  { %8483 = vmatpush1.bf16.msra.mxu1 %v13341_v13  ;;  %v13430_v13 = vld [vmem:[%s17477_s6 + $0xe6c] ss:$16 sps:$4 sm:$0xff]  }
 0x9f0   :  { %8484 = vmatprep.subr.bf16.mxu1 %v13346_v0  ;;  %v13433_v0 = vld [vmem:[%s17477_s6 + $0xe8c] ss:$16 sps:$4 sm:$0xff]  }
 0x9f3   :  { %8485 = vmatpush1.bf16.msra.mxu1 %v13344_v61  ;;  %v13431_v61 = vld [vmem:[%s17477_s6 + $0xe88] ss:$16 sps:$4 sm:$0xff]  }
 0x9f4   :  { %8486 = vmatprep.subr.bf16.mxu1 %v13349_v16  ;;  %v13436_v16 = vld [vmem:[%s17477_s6 + $0xeac] ss:$16 sps:$4 sm:$0xff]  }
 0x9f7   :  { %8487 = vmatpush1.bf16.msra.mxu1 %v13347_v63  ;;  %v13434_v63 = vld [vmem:[%s17477_s6 + $0xea8] ss:$16 sps:$4 sm:$0xff]  }
 0x9f8   :  { %8488 = vmatprep.subr.bf16.mxu1 %v13352_v51  ;;  %v13439_v51 = vld [vmem:[%s17477_s6 + $0xecc] ss:$16 sps:$4 sm:$0xff]  }
 0x9fb   :  { %8489 = vmatpush1.bf16.msra.mxu1 %v13350_v10  ;;  %v13437_v10 = vld [vmem:[%s17477_s6 + $0xec8] ss:$16 sps:$4 sm:$0xff]  }
 0x9fc   :  { %8490 = vmatprep.subr.bf16.mxu1 %v13355_v58  ;;  %v13442_v58 = vld [vmem:[%s17477_s6 + $0xeec] ss:$16 sps:$4 sm:$0xff]  }
 0x9ff   :  { %8491 = vmatpush1.bf16.msra.mxu1 %v13353_v49  ;;  %v13440_v49 = vld [vmem:[%s17477_s6 + $0xee8] ss:$16 sps:$4 sm:$0xff]  }
 0xa00   :  { %8492 = vmatprep.subr.bf16.mxu1 %v13358_v9  ;;  %v13445_v9 = vld [vmem:[%s17477_s6 + $0xf0c] ss:$16 sps:$4 sm:$0xff]  }
 0xa03   :  { %8493 = vmatpush1.bf16.msra.mxu1 %v13356_v1  ;;  %v13443_v1 = vld [vmem:[%s17477_s6 + $0xf08] ss:$16 sps:$4 sm:$0xff]  }
 0xa04   :  { %8494 = vmatprep.subr.bf16.mxu1 %v13361_v15  ;;  %v13448_v15 = vld [vmem:[%s17477_s6 + $0xf2c] ss:$16 sps:$4 sm:$0xff]  }
 0xa07   :  { %8495 = vmatpush1.bf16.msra.mxu1 %v13359_v20  ;;  %v13446_v20 = vld [vmem:[%s17477_s6 + $0xf28] ss:$16 sps:$4 sm:$0xff]  }
 0xa08   :  { %8496 = vmatprep.subr.bf16.mxu1 %v13364_v52  ;;  %v13451_v52 = vld [vmem:[%s17477_s6 + $0xf4c] ss:$16 sps:$4 sm:$0xff]  }
 0xa0b   :  { %8497 = vmatpush1.bf16.msra.mxu1 %v13362_v46  ;;  %v13449_v46 = vld [vmem:[%s17477_s6 + $0xf48] ss:$16 sps:$4 sm:$0xff]  }
 0xa0c   :  { %8498 = vmatprep.subr.bf16.mxu1 %v13367_v40  ;;  %v13454_v40 = vld [vmem:[%s17477_s6 + $0xf6c] ss:$16 sps:$4 sm:$0xff]  }
 0xa0f   :  { %8499 = vmatpush1.bf16.msra.mxu1 %v13365_v28  ;;  %v13452_v28 = vld [vmem:[%s17477_s6 + $0xf68] ss:$16 sps:$4 sm:$0xff]  }
 0xa10   :  { %8500 = vmatprep.subr.bf16.mxu1 %v13370_v24  ;;  %v13457_v24 = vld [vmem:[%s17477_s6 + $0xf8c] ss:$16 sps:$4 sm:$0xff]  }
 0xa13   :  { %8501 = vmatpush1.bf16.msra.mxu1 %v13368_v38  ;;  %v13455_v38 = vld [vmem:[%s17477_s6 + $0xf88] ss:$16 sps:$4 sm:$0xff]  }
 0xa14   :  { %8906 = vmatprep.subr.bf16.mxu1 %v13373_v42  ;;  %v13460_v42 = vld [vmem:[%s17477_s6 + $0xfac] ss:$16 sps:$4 sm:$0xff]  }
 0xa16   :  { %8503 = vmatmul.mubr.bf16.vlgmr.msra.gmra.mrb[36].mxu1 %v15663_v34  ;;  %v13382_v34 = vld [vmem:[%s17477_s6 + $0xe64] ss:$16 sps:$4 sm:$0xff]  }
 0xa17   :  { %8907 = vmatpush1.bf16.msra.mxu1 %v13371_v60  ;;  %8938 = vmatprep.mubr.bf16.mxu1 %v15683_v21  ;;  %v13458_v60 = vld [vmem:[%s17477_s6 + $0xfa8] ss:$16 sps:$4 sm:$0xff]  }
 0xa18   :  { %8908 = vmatprep.subr.bf16.mxu1 %v13376_v29  ;;  %v13463_v29 = vld [vmem:[%s17477_s6 + $0xfcc] ss:$16 sps:$4 sm:$0xff]  }
 0xa1b   :  { %8909 = vmatpush1.bf16.msra.mxu1 %v13374_v43  ;;  %v13461_v43 = vld [vmem:[%s17477_s6 + $0xfc8] ss:$16 sps:$4 sm:$0xff]  }
 0xa1c   :  { %8910 = vmatprep.subr.bf16.mxu1 %v13379_v56  ;;  %v13466_v56 = vld [vmem:[%s17477_s6 + $0xfec] ss:$16 sps:$4 sm:$0xff]  }
 0xa1f   :  { %8911 = vmatpush1.bf16.msra.mxu1 %v13377_v19  ;;  %v13464_v19 = vld [vmem:[%s17477_s6 + $0xfe8] ss:$16 sps:$4 sm:$0xff]  }
 0xa20   :  { %8912 = vmatprep.subr.bf16.mxu1 %v13382_v34  ;;  %v13469_v34 = vld [vmem:[%s17477_s6 + $0x1004] ss:$16 sps:$4 sm:$0xff]  }
 0xa23   :  { %8913 = vmatpush1.bf16.msra.mxu1 %v13380_v7  ;;  %v13467_v7 = vld [vmem:[%s17477_s6 + $0x1000] ss:$16 sps:$4 sm:$0xff]  }
 0xa24   :  { %8914 = vmatprep.subr.bf16.mxu1 %v13385_v11  ;;  %v13472_v11 = vld [vmem:[%s17477_s6 + $0x1024] ss:$16 sps:$4 sm:$0xff]  }
 0xa27   :  { %8915 = vmatpush1.bf16.msra.mxu1 %v13383_v54  ;;  %v13470_v54 = vld [vmem:[%s17477_s6 + $0x1020] ss:$16 sps:$4 sm:$0xff]  }
 0xa28   :  { %8916 = vmatprep.subr.bf16.mxu1 %v13388_v25  ;;  %v13475_v25 = vld [vmem:[%s17477_s6 + $0x1044] ss:$16 sps:$4 sm:$0xff]  }
 0xa2b   :  { %8917 = vmatpush1.bf16.msra.mxu1 %v13386_v8  ;;  %v9565_v8 = vld [vmem:[%s17479_s9 + $0x80] sm:$0xff] }
 0xa2c   :  { %8918 = vmatprep.subr.bf16.mxu1 %v13391_v53  ;;  %v9566_v53 = vld [vmem:[%s17479_s9 + $0x88] sm:$0xff] }
 0xa2f   :  { %8919 = vmatpush1.bf16.msra.mxu1 %v13389_v45  ;;  %v11767_v45 = vpack.c.bf16 %v9566_v53, %v9565_v8  ;;  %v13511_v8 = vld [vmem:[%s17477_s6 + $0x11c4] ss:$16 sps:$4 sm:$0xff]   ;;  %v13509_v53 = vld [vmem:[%s17477_s6 + $0x11c0] ss:$16 sps:$4 sm:$0xff]  }
 0xa30   :  { %8920 = vmatprep.subr.bf16.mxu1 %v13394_v30  ;;  %v9550_v30 = vld [vmem:[%s17479_s9 + $0x8] sm:$0xff] }
 0xa31   :  { %11768 = vmatprep.subr.bf16.mxu0 %v11767_v45  ;;  %v13512_v45 = vld [vmem:[%s17477_s6 + $0x11e0] ss:$16 sps:$4 sm:$0xff]  }
 0xa33   :  { %8921 = vmatpush1.bf16.msra.mxu1 %v13392_v44  ;;  %v9567_v44 = vld [vmem:[%s17479_s9 + $0x90] sm:$0xff] }
 0xa34   :  { %8922 = vmatprep.subr.bf16.mxu1 %v13397_v55  ;;  %v9568_v55 = vld [vmem:[%s17479_s9 + $0x98] sm:$0xff] }
 0xa37   :  { %8923 = vmatpush1.bf16.msra.mxu1 %v13395_v6 }
 0xa38   :  { %8924 = vmatprep.subr.bf16.mxu1 %v13400_v59  ;;  %v11771_v59 = vpack.c.bf16 %v9568_v55, %v9567_v44  ;;  %v13515_v44 = vld [vmem:[%s17477_s6 + $0x1008] ss:$16 sps:$4 sm:$0xff]   ;;  %v13520_v55 = vld [vmem:[%s17477_s6 + $0x102c] ss:$16 sps:$4 sm:$0xff]  }
 0xa3b   :  { %8925 = vmatpush1.bf16.msra.mxu1 %v13398_v31  ;;  %v9551_v31 = vld [vmem:[%s17479_s9 + $0x10] sm:$0xff] }
 0xa3c   :  { %8926 = vmatprep.subr.bf16.mxu1 %v13403_v4  ;;  %v9552_v4 = vld [vmem:[%s17479_s9 + $0x18] sm:$0xff] }
 0xa3f   :  { %8927 = vmatpush1.bf16.msra.mxu1 %v13401_v17  ;;  %v9569_v17 = vld [vmem:[%s17479_s9 + $0xa0] sm:$0xff] }
 0xa40   :  { %8928 = vmatprep.subr.bf16.mxu1 %v13406_v33  ;;  %v9570_v33 = vld [vmem:[%s17479_s9 + $0xa8] sm:$0xff] }
 0xa43   :  { %8929 = vmatpush1.bf16.msra.mxu1 %v13404_v5  ;;  %v13473_v5 = vld [vmem:[%s17477_s6 + $0x1040] ss:$16 sps:$4 sm:$0xff]  }
 0xa44   :  { %8930 = vmatprep.subr.bf16.mxu1 %v13409_v14  ;;  %v11773_v14 = vpack.c.bf16 %v9552_v4, %v9551_v31  ;;  %v13521_v31 = vld [vmem:[%s17477_s6 + $0x1048] ss:$16 sps:$4 sm:$0xff]   ;;  %v13526_v4 = vld [vmem:[%s17477_s6 + $0x106c] ss:$16 sps:$4 sm:$0xff]  }
 0xa47   :  { %8931 = vmatpush1.bf16.msra.mxu1 %v13407_v39  ;;  %v13478_v39 = vld [vmem:[%s17477_s6 + $0x1064] ss:$16 sps:$4 sm:$0xff]  }
 0xa48   :  { %8932 = vmatprep.subr.bf16.mxu1 %v13412_v27  ;;  %v11775_v27 = vpack.c.bf16 %v9570_v33, %v9569_v17  ;;  %v13529_v17 = vld [vmem:[%s17477_s6 + $0x108c] ss:$16 sps:$4 sm:$0xff]   ;;  %v13527_v33 = vld [vmem:[%s17477_s6 + $0x1088] ss:$16 sps:$4 sm:$0xff]  }
 0xa4b   :  { %8933 = vmatpush1.bf16.msra.mxu1 %v13410_v35  ;;  %v9553_v35 = vld [vmem:[%s17479_s9 + $0x20] sm:$0xff] }
 0xa4c   :  { %8934 = vmatprep.subr.bf16.mxu1 %v13415_v47  ;;  %v9554_v47 = vld [vmem:[%s17479_s9 + $0x28] sm:$0xff] }
 0xa4f   :  { %8935 = vmatpush1.bf16.msra.mxu1 %v13413_v48  ;;  %v9571_v48 = vld [vmem:[%s17479_s9 + $0xb0] sm:$0xff] }
 0xa50   :  { %8936 = vmatprep.subr.bf16.mxu1 %v13418_v22  ;;  %v9572_v22 = vld [vmem:[%s17479_s9 + $0xb8] sm:$0xff] }
 0xa53   :  { %8937 = vmatpush1.bf16.msra.mxu1 %v13416_v37  ;;  %v13476_v37 = vld [vmem:[%s17477_s6 + $0x1060] ss:$16 sps:$4 sm:$0xff]  }
 0xa54   :  { %8949 = vmatprep.subr.bf16.mxu1 %v13421_v41  ;;  %v11777_v41 = vpack.c.bf16 %v9554_v47, %v9553_v35  ;;  %v13538_v35 = vld [vmem:[%s17477_s6 + $0x10ec] ss:$16 sps:$4 sm:$0xff]   ;;  %v13536_v47 = vld [vmem:[%s17477_s6 + $0x10e8] ss:$16 sps:$4 sm:$0xff]  }
 0xa56   :  { %8939 = vmatmul.mubr.bf16.vlgmr.msra.gmra.mrb[32].mxu1 %v15681_v57 }
 0xa57   :  { %8950 = vmatpush1.bf16.msra.mxu1 %v13419_v62  ;;  %8981 = vmatprep.mubr.bf16.mxu1 %v15683_v21  ;;  %v13428_v21 = vld [vmem:[%s17477_s6 + $0xe68] ss:$16 sps:$4 sm:$0xff]   ;;  %v13481_v62 = vld [vmem:[%s17477_s6 + $0x1084] ss:$16 sps:$4 sm:$0xff]  }
 0xa58   :  { %8951 = vmatprep.subr.bf16.mxu1 %v13424_v26  ;;  %v11779_v26 = vpack.c.bf16 %v9572_v22, %v9571_v48  ;;  %v13541_v48 = vld [vmem:[%s17477_s6 + $0x110c] ss:$16 sps:$4 sm:$0xff]   ;;  %v13539_v22 = vld [vmem:[%s17477_s6 + $0x1108] ss:$16 sps:$4 sm:$0xff]  }
 0xa5b   :  { %8952 = vmatpush1.bf16.msra.mxu1 %v13422_v50  ;;  %v9555_v50 = vld [vmem:[%s17479_s9 + $0x30] sm:$0xff] }
 0xa5c   :  { %8953 = vmatprep.subr.bf16.mxu1 %v13427_v3  ;;  %v9556_v3 = vld [vmem:[%s17479_s9 + $0x38] sm:$0xff] }
 0xa5f   :  { %8954 = vmatpush1.bf16.msra.mxu1 %v13425_v36  ;;  %v9573_v36 = vld [vmem:[%s17479_s9 + $0xc0] sm:$0xff] }
 0xa60   :  { %8955 = vmatprep.subr.bf16.mxu1 %v13430_v13  ;;  %v9574_v13 = vld [vmem:[%s17479_s9 + $0xc8] sm:$0xff] }
 0xa63   :  { %8956 = vmatpush1.bf16.msra.mxu1 %v13428_v21  ;;  %v13479_v21 = vld [vmem:[%s17477_s6 + $0x1080] ss:$16 sps:$4 sm:$0xff]  }
 0xa64   :  { %8957 = vmatprep.subr.bf16.mxu1 %v13433_v0  ;;  %v11781_v0 = vpack.c.bf16 %v9556_v3, %v9555_v50  ;;  %v13550_v50 = vld [vmem:[%s17477_s6 + $0x116c] ss:$16 sps:$4 sm:$0xff]   ;;  %v13548_v3 = vld [vmem:[%s17477_s6 + $0x1168] ss:$16 sps:$4 sm:$0xff]  }
 0xa67   :  { %8958 = vmatpush1.bf16.msra.mxu1 %v13431_v61  ;;  %v13484_v61 = vld [vmem:[%s17477_s6 + $0x10a4] ss:$16 sps:$4 sm:$0xff]  }
 0xa68   :  { %8959 = vmatprep.subr.bf16.mxu1 %v13436_v16  ;;  %v11783_v16 = vpack.c.bf16 %v9574_v13, %v9573_v36  ;;  %v13553_v36 = vld [vmem:[%s17477_s6 + $0x118c] ss:$16 sps:$4 sm:$0xff]   ;;  %v13551_v13 = vld [vmem:[%s17477_s6 + $0x1188] ss:$16 sps:$4 sm:$0xff]  }
 0xa6b   :  { %8960 = vmatpush1.bf16.msra.mxu1 %v13434_v63  ;;  %v9557_v63 = vld [vmem:[%s17479_s9 + $0x40] sm:$0xff] }
 0xa6c   :  { %8961 = vmatprep.subr.bf16.mxu1 %v13439_v51  ;;  %v9558_v51 = vld [vmem:[%s17479_s9 + $0x48] sm:$0xff] }
 0xa6f   :  { %8962 = vmatpush1.bf16.msra.mxu1 %v13437_v10  ;;  %v9575_v10 = vld [vmem:[%s17479_s9 + $0xd0] sm:$0xff] }
 0xa70   :  { %8963 = vmatprep.subr.bf16.mxu1 %v13442_v58  ;;  %v9576_v58 = vld [vmem:[%s17479_s9 + $0xd8] sm:$0xff] }
 0xa73   :  { %8964 = vmatpush1.bf16.msra.mxu1 %v13440_v49  ;;  %v13482_v49 = vld [vmem:[%s17477_s6 + $0x10a0] ss:$16 sps:$4 sm:$0xff]  }
 0xa74   :  { %8965 = vmatprep.subr.bf16.mxu1 %v13445_v9  ;;  %v11785_v9 = vpack.c.bf16 %v9558_v51, %v9557_v63  ;;  %v13562_v63 = vld [vmem:[%s17477_s6 + $0x11ec] ss:$16 sps:$4 sm:$0xff]   ;;  %v13560_v51 = vld [vmem:[%s17477_s6 + $0x11e8] ss:$16 sps:$4 sm:$0xff]  }
 0xa77   :  { %8966 = vmatpush1.bf16.msra.mxu1 %v13443_v1  ;;  %v13487_v1 = vld [vmem:[%s17477_s6 + $0x10c4] ss:$16 sps:$4 sm:$0xff]  }
 0xa78   :  { %8967 = vmatprep.subr.bf16.mxu1 %v13448_v15  ;;  %v11787_v15 = vpack.c.bf16 %v9576_v58, %v9575_v10  ;;  %v9577_v10 = vld [vmem:[%s17479_s9 + $0xe0] sm:$0xff]  ;;  %v9578_v58 = vld [vmem:[%s17479_s9 + $0xe8] sm:$0xff] }
 0xa7b   :  { %8968 = vmatpush1.bf16.msra.mxu1 %v13446_v20  ;;  %v9559_v20 = vld [vmem:[%s17479_s9 + $0x50] sm:$0xff] }
 0xa7c   :  { %8969 = vmatprep.subr.bf16.mxu1 %v13451_v52  ;;  %v9560_v52 = vld [vmem:[%s17479_s9 + $0x58] sm:$0xff] }
 0xa7f   :  { %8970 = vmatpush1.bf16.msra.mxu1 %v13449_v46  ;;  %v13485_v46 = vld [vmem:[%s17477_s6 + $0x10c0] ss:$16 sps:$4 sm:$0xff]  }
 0xa80   :  { %8971 = vmatprep.subr.bf16.mxu1 %v13454_v40  ;;  %v11789_v40 = vpack.c.bf16 %v9560_v52, %v9559_v20  ;;  %v9580_v20 = vld [vmem:[%s17479_s9 + $0xf8] sm:$0xff] }
 0xa83   :  { %8972 = vmatpush1.bf16.msra.mxu1 %v13452_v28  ;;  %v13490_v28 = vld [vmem:[%s17477_s6 + $0x10e4] ss:$16 sps:$4 sm:$0xff]  }
 0xa84   :  { %8973 = vmatprep.subr.bf16.mxu1 %v13457_v24  ;;  %v13488_v24 = vld [vmem:[%s17477_s6 + $0x10e0] ss:$16 sps:$4 sm:$0xff]  }
 0xa87   :  { %8974 = vmatpush1.bf16.msra.mxu1 %v13455_v38  ;;  %v13493_v38 = vld [vmem:[%s17477_s6 + $0x1104] ss:$16 sps:$4 sm:$0xff]  }
 0xa88   :  { %8975 = vmatprep.subr.bf16.mxu1 %v13460_v42  ;;  %v13491_v42 = vld [vmem:[%s17477_s6 + $0x1100] ss:$16 sps:$4 sm:$0xff]  }
 0xa8b   :  { %8976 = vmatpush1.bf16.msra.mxu1 %v13458_v60  ;;  %v13496_v60 = vld [vmem:[%s17477_s6 + $0x1124] ss:$16 sps:$4 sm:$0xff]  }
 0xa8c   :  { %8977 = vmatprep.subr.bf16.mxu1 %v13463_v29  ;;  %v13494_v29 = vld [vmem:[%s17477_s6 + $0x1120] ss:$16 sps:$4 sm:$0xff]  }
 0xa8f   :  { %8978 = vmatpush1.bf16.msra.mxu1 %v13461_v43  ;;  %v13499_v43 = vld [vmem:[%s17477_s6 + $0x1144] ss:$16 sps:$4 sm:$0xff]  }
 0xa90   :  { %8979 = vmatprep.subr.bf16.mxu1 %v13466_v56  ;;  %v13497_v56 = vld [vmem:[%s17477_s6 + $0x1140] ss:$16 sps:$4 sm:$0xff]  }
 0xa93   :  { %8980 = vmatpush1.bf16.msra.mxu1 %v13464_v19  ;;  %v13502_v19 = vld [vmem:[%s17477_s6 + $0x1164] ss:$16 sps:$4 sm:$0xff]  }
 0xa94   :  { %9385 = vmatprep.subr.bf16.mxu1 %v13469_v34  ;;  %v13500_v34 = vld [vmem:[%s17477_s6 + $0x1160] ss:$16 sps:$4 sm:$0xff]  }
 0xa96   :  { %8982 = vmatmul.mubr.bf16.vlgmr.msra.gmra.mrb[36].mxu1 %v15681_v57  ;;  %v9549_v57 = vld [vmem:[%s17479_s9] sm:$0xff] }
 0xa97   :  { %9386 = vmatpush1.bf16.msra.mxu1 %v13467_v7  ;;  %9417 = vmatprep.mubr.bf16.mxu1 %v15699_v2  ;;  %v11769_v6 = vpack.c.bf16 %v9550_v30, %v9549_v57  ;;  %v13505_v7 = vld [vmem:[%s17477_s6 + $0x1184] ss:$16 sps:$4 sm:$0xff]   ;;  %v13517_v30 = vld [vmem:[%s17477_s6 + $0x100c] ss:$16 sps:$4 sm:$0xff]  }
 0xa98   :  { %9387 = vmatprep.subr.bf16.mxu1 %v13472_v11  ;;  %v13503_v11 = vld [vmem:[%s17477_s6 + $0x1180] ss:$16 sps:$4 sm:$0xff]   ;;  %v13514_v57 = vld [vmem:[%s17477_s6 + $0x11e4] ss:$16 sps:$4 sm:$0xff]  }
 0xa99   :  { %11770 = vmatpush3.bf16.msra.mxu0 %v11769_v6  ;;  %v13518_v6 = vld [vmem:[%s17477_s6 + $0x1028] ss:$16 sps:$4 sm:$0xff]  }
 0xa9a   :  { %11772 = vmatprep.subr.bf16.mxu0 %v11771_v59  ;;  %v13523_v59 = vld [vmem:[%s17477_s6 + $0x104c] ss:$16 sps:$4 sm:$0xff]  }
 0xa9b   :  { %9388 = vmatpush1.bf16.msra.mxu1 %v13470_v54  ;;  %v13508_v54 = vld [vmem:[%s17477_s6 + $0x11a4] ss:$16 sps:$4 sm:$0xff]  }
 0xa9c   :  { %9389 = vmatprep.subr.bf16.mxu1 %v13475_v25  ;;  %v13506_v25 = vld [vmem:[%s17477_s6 + $0x11a0] ss:$16 sps:$4 sm:$0xff]  }
 0xa9d   :  { %11774 = vmatpush3.bf16.msra.mxu0 %v11773_v14  ;;  %v13530_v14 = vld [vmem:[%s17477_s6 + $0x10a8] ss:$16 sps:$4 sm:$0xff]  }
 0xa9e   :  { %11776 = vmatprep.subr.bf16.mxu0 %v11775_v27  ;;  %v13533_v27 = vld [vmem:[%s17477_s6 + $0x10c8] ss:$16 sps:$4 sm:$0xff]  }
 0xa9f   :  { %9390 = vmatpush1.bf16.msra.mxu1 %v13473_v5  ;;  %v13532_v5 = vld [vmem:[%s17477_s6 + $0x10ac] ss:$16 sps:$4 sm:$0xff]  }
 0xaa0   :  { %9391 = vmatprep.subr.bf16.mxu1 %v13478_v39  ;;  %v13535_v39 = vld [vmem:[%s17477_s6 + $0x10cc] ss:$16 sps:$4 sm:$0xff]  }
 0xaa1   :  { %11778 = vmatpush3.bf16.msra.mxu0 %v11777_v41  ;;  %v13542_v41 = vld [vmem:[%s17477_s6 + $0x1128] ss:$16 sps:$4 sm:$0xff]  }
 0xaa2   :  { %11780 = vmatprep.subr.bf16.mxu0 %v11779_v26  ;;  %v13545_v26 = vld [vmem:[%s17477_s6 + $0x1148] ss:$16 sps:$4 sm:$0xff]  }
 0xaa3   :  { %9392 = vmatpush1.bf16.msra.mxu1 %v13476_v37  ;;  %v13544_v37 = vld [vmem:[%s17477_s6 + $0x112c] ss:$16 sps:$4 sm:$0xff]  }
 0xaa4   :  { %9393 = vmatprep.subr.bf16.mxu1 %v13481_v62  ;;  %v13547_v62 = vld [vmem:[%s17477_s6 + $0x114c] ss:$16 sps:$4 sm:$0xff]  }
 0xaa5   :  { %11782 = vmatpush3.bf16.msra.mxu0 %v11781_v0  ;;  %v13554_v0 = vld [vmem:[%s17477_s6 + $0x11a8] ss:$16 sps:$4 sm:$0xff]  }
 0xaa6   :  { %11784 = vmatprep.subr.bf16.mxu0 %v11783_v16  ;;  %v13557_v16 = vld [vmem:[%s17477_s6 + $0x11c8] ss:$16 sps:$4 sm:$0xff]  }
 0xaa7   :  { %9394 = vmatpush1.bf16.msra.mxu1 %v13479_v21  ;;  %v13556_v21 = vld [vmem:[%s17477_s6 + $0x11ac] ss:$16 sps:$4 sm:$0xff]  }
 0xaa8   :  { %9395 = vmatprep.subr.bf16.mxu1 %v13484_v61  ;;  %v13559_v61 = vld [vmem:[%s17477_s6 + $0x11cc] ss:$16 sps:$4 sm:$0xff]  }
 0xaa9   :  { %11786 = vmatpush3.bf16.msra.mxu0 %v11785_v9  ;;  %v9561_v9 = vld [vmem:[%s17479_s9 + $0x60] sm:$0xff] }
 0xaaa   :  { %11788 = vmatprep.subr.bf16.mxu0 %v11787_v15 }
 0xaab   :  { %9396 = vmatpush1.bf16.msra.mxu1 %v13482_v49  ;;  %v11791_v49 = vpack.c.bf16 %v9578_v58, %v9577_v10  ;;  %v9606_v10 = vld [vmem:[%s17479_s9 + $0x1c8] sm:$0xff] }
 0xaac   :  { %9397 = vmatprep.subr.bf16.mxu1 %v13487_v1  ;;  %v9562_v1 = vld [vmem:[%s17479_s9 + $0x68] sm:$0xff] }
 0xaad   :  { %11790 = vmatpush3.bf16.msra.mxu0 %v11789_v40  ;;  %v11793_v15 = vpack.c.bf16 %v9562_v1, %v9561_v9  ;;  %v9564_v40 = vld [vmem:[%s17479_s9 + $0x78] sm:$0xff]  ;;  %v9589_v9 = vld [vmem:[%s17479_s9 + $0x140] sm:$0xff]  ;;  %v9590_v1 = vld [vmem:[%s17479_s9 + $0x148] sm:$0xff] }
 0xaae   :  { %11792 = vmatprep.subr.bf16.mxu0 %v11791_v49 }
 0xaaf   :  { %9398 = vmatpush1.bf16.msra.mxu1 %v13485_v46  ;;  %v9563_v46 = vld [vmem:[%s17479_s9 + $0x70] sm:$0xff] }
 0xab0   :  { %9399 = vmatprep.subr.bf16.mxu1 %v13490_v28  ;;  %v11797_v28 = vpack.c.bf16 %v9564_v40, %v9563_v46  ;;  %v9591_v46 = vld [vmem:[%s17479_s9 + $0x150] sm:$0xff]  ;;  %v9592_v40 = vld [vmem:[%s17479_s9 + $0x158] sm:$0xff] }
 0xab1   :  { %11794 = vmatpush3.bf16.msra.mxu0 %v11793_v15  ;;  %v9607_v15 = vld [vmem:[%s17479_s9 + $0x1d0] sm:$0xff] }
 0xab3   :  { %9400 = vmatpush1.bf16.msra.mxu1 %v13488_v24  ;;  %v9597_v24 = vld [vmem:[%s17479_s9 + $0x180] sm:$0xff] }
 0xab4   :  { %9401 = vmatprep.subr.bf16.mxu1 %v13493_v38  ;;  %v9598_v38 = vld [vmem:[%s17479_s9 + $0x188] sm:$0xff] }
 0xab7   :  { %9402 = vmatpush1.bf16.msra.mxu1 %v13491_v42  ;;  %v11799_v42 = vpack.c.bf16 %v9598_v38, %v9597_v24  ;;  %v9610_v24 = vld [vmem:[%s17479_s9 + $0x1e8] sm:$0xff]  ;;  %v11821_v38 = vpack.c.bf16 %v9592_v40, %v9591_v46 }
 0xab8   :  { %9403 = vmatprep.subr.bf16.mxu1 %v13496_v60  ;;  %v17343_v60 = vld [vmem:[%s17480_s7] sm:$0xf] }
 0xabb   :  { %9404 = vmatpush1.bf16.msra.mxu1 %v13494_v29  ;;  %v9484_v29 = vrot.slane %v17343_v60, %v4874_v23  ;;  %v9534_v23 = vld [vmem:[%s17481_s8 + $0x8] sm:$0xff] }
 0xabc   :  { %9405 = vmatprep.subr.bf16.mxu1 %v13499_v43  ;;  %v9488_v43 = vrot.slane %v17343_v60, %v4878_v12  ;;  %v9581_v12 = vld [vmem:[%s17479_s9 + $0x100] sm:$0xff] }
 0xabf   :  { %9406 = vmatpush1.bf16.msra.mxu1 %v13497_v56 }
 0xac0   :  { %9407 = vmatprep.subr.bf16.mxu1 %v13502_v19 }
 0xac3   :  { %9408 = vmatpush1.bf16.msra.mxu1 %v13500_v34 }
 0xac4   :  { %9409 = vmatprep.subr.bf16.mxu1 %v13505_v7 }
 0xac7   :  { %9410 = vmatpush1.bf16.msra.mxu1 %v13503_v11 }
 0xac8   :  { %9411 = vmatprep.subr.bf16.mxu1 %v13508_v54 }
 0xacb   :  { %9412 = vmatpush1.bf16.msra.mxu1 %v13506_v25 }
 0xacc   :  { %9413 = vmatprep.subr.bf16.mxu1 %v13511_v8 }
 0xacf   :  { %9414 = vmatpush1.bf16.msra.mxu1 %v13509_v53 }
 0xad0   :  { %9415 = vmatprep.subr.bf16.mxu1 %v13514_v57 }
 0xad3   :  { %9416 = vmatpush1.bf16.msra.mxu1 %v13512_v45  ;;  %v9582_v45 = vld [vmem:[%s17479_s9 + $0x108] sm:$0xff] }
 0xad4   :  { %9428 = vmatprep.subr.bf16.mxu1 %v13517_v30 }
 0xad6   :  { %9418 = vmatmul.mubr.bf16.vlgmr.msra.gmra.mrb[32].mxu1 %v15697_v32 }
 0xad7   :  { %9429 = vmatpush1.bf16.msra.mxu1 %v13515_v44  ;;  %9460 = vmatprep.mubr.bf16.mxu1 %v15699_v2  ;;  %v13524_v2 = vld [vmem:[%s17477_s6 + $0x1068] ss:$16 sps:$4 sm:$0xff]   ;;  %v9533_v44 = vld [vmem:[%s17481_s8] sm:$0xff] }
 0xad8   :  { %9430 = vmatprep.subr.bf16.mxu1 %v13520_v55 }
 0xadb   :  { %9431 = vmatpush1.bf16.msra.mxu1 %v13518_v6  ;;  %v9599_v6 = vld [vmem:[%s17479_s9 + $0x190] sm:$0xff] }
 0xadc   :  { %9432 = vmatprep.subr.bf16.mxu1 %v13523_v59  ;;  %v9600_v59 = vld [vmem:[%s17479_s9 + $0x198] sm:$0xff] }
 0xadf   :  { %9433 = vmatpush1.bf16.msra.mxu1 %v13521_v31 }
 0xae0   :  { %9434 = vmatprep.subr.bf16.mxu1 %v13526_v4 }
 0xae3   :  { %9435 = vmatpush1.bf16.msra.mxu1 %v13524_v2  ;;  %v9538_v2 = vld [vmem:[%s17481_s8 + $0x28] sm:$0xff] }
 0xae4   :  { %9436 = vmatprep.subr.bf16.mxu1 %v13529_v17 }
 0xae7   :  { %9437 = vmatpush1.bf16.msra.mxu1 %v13527_v33  ;;  %v11801_v33 = vpack.c.bf16 %v9582_v45, %v9581_v12 }
 0xae8   :  { %9438 = vmatprep.subr.bf16.mxu1 %v13532_v5 }
 0xaeb   :  { %9439 = vmatpush1.bf16.msra.mxu1 %v13530_v14 }
 0xaec   :  { %9440 = vmatprep.subr.bf16.mxu1 %v13535_v39  ;;  %v11803_v39 = vpack.c.bf16 %v9600_v59, %v9599_v6 }
 0xaef   :  { %9441 = vmatpush1.bf16.msra.mxu1 %v13533_v27  ;;  %v9583_v27 = vld [vmem:[%s17479_s9 + $0x110] sm:$0xff] }
 0xaf0   :  { %9442 = vmatprep.subr.bf16.mxu1 %v13538_v35  ;;  %v9584_v35 = vld [vmem:[%s17479_s9 + $0x118] sm:$0xff] }
 0xaf3   :  { %9443 = vmatpush1.bf16.msra.mxu1 %v13536_v47 }
 0xaf4   :  { %9444 = vmatprep.subr.bf16.mxu1 %v13541_v48  ;;  %v9537_v48 = vld [vmem:[%s17481_s8 + $0x20] sm:$0xff] }
 0xaf7   :  { %9445 = vmatpush1.bf16.msra.mxu1 %v13539_v22 }
 0xaf8   :  { %9446 = vmatprep.subr.bf16.mxu1 %v13544_v37  ;;  %v9601_v37 = vld [vmem:[%s17479_s9 + $0x1a0] sm:$0xff] }
 0xafb   :  { %9447 = vmatpush1.bf16.msra.mxu1 %v13542_v41  ;;  %v9602_v41 = vld [vmem:[%s17479_s9 + $0x1a8] sm:$0xff] }
 0xafc   :  { %9448 = vmatprep.subr.bf16.mxu1 %v13547_v62  ;;  %v11805_v62 = vpack.c.bf16 %v9584_v35, %v9583_v27 }
 0xaff   :  { %9449 = vmatpush1.bf16.msra.mxu1 %v13545_v26 }
 0xb00   :  { %9450 = vmatprep.subr.bf16.mxu1 %v13550_v50  ;;  %v11807_v50 = vpack.c.bf16 %v9602_v41, %v9601_v37 }
 0xb03   :  { %9451 = vmatpush1.bf16.msra.mxu1 %v13548_v3  ;;  %v9585_v3 = vld [vmem:[%s17479_s9 + $0x120] sm:$0xff] }
 0xb04   :  { %9452 = vmatprep.subr.bf16.mxu1 %v13553_v36  ;;  %v9586_v36 = vld [vmem:[%s17479_s9 + $0x128] sm:$0xff] }
 0xb07   :  { %9453 = vmatpush1.bf16.msra.mxu1 %v13551_v13  ;;  %v9603_v13 = vld [vmem:[%s17479_s9 + $0x1b0] sm:$0xff] }
 0xb08   :  { %9454 = vmatprep.subr.bf16.mxu1 %v13556_v21  ;;  %v9604_v21 = vld [vmem:[%s17479_s9 + $0x1b8] sm:$0xff] }
 0xb0b   :  { %9455 = vmatpush1.bf16.msra.mxu1 %v13554_v0  ;;  %v11809_v0 = vpack.c.bf16 %v9586_v36, %v9585_v3 }
 0xb0c   :  { %9456 = vmatprep.subr.bf16.mxu1 %v13559_v61  ;;  %v11811_v61 = vpack.c.bf16 %v9604_v21, %v9603_v13 }
 0xb0f   :  { %9457 = vmatpush1.bf16.msra.mxu1 %v13557_v16  ;;  %v9587_v16 = vld [vmem:[%s17479_s9 + $0x130] sm:$0xff] }
 0xb10   :  { %9458 = vmatprep.subr.bf16.mxu1 %v13562_v63  ;;  %v9588_v63 = vld [vmem:[%s17479_s9 + $0x138] sm:$0xff] }
 0xb11   :  { %v11813_v58 = vpack.c.bf16 %v9588_v63, %v9587_v16 }
 0xb13   :  { %9459 = vmatpush1.bf16.msra.mxu1 %v13560_v51  ;;  %v9605_v51 = vld [vmem:[%s17479_s9 + $0x1c0] sm:$0xff] }
 0xb14   :  { %v11815_v49 = vpack.c.bf16 %v9606_v10, %v9605_v51 }
 0xb16   :  { %9461 = vmatmul.mubr.bf16.vlgmr.msra.gmra.mrb[36].mxu1 %v15697_v32  ;;  %v9579_v32 = vld [vmem:[%s17479_s9 + $0xf0] sm:$0xff] }
 0xb17   :  { %v11795_v52 = vpack.c.bf16 %v9580_v20, %v9579_v32  ;;  %v9608_v32 = vld [vmem:[%s17479_s9 + $0x1d8] sm:$0xff]  ;;  %v11817_v20 = vpack.c.bf16 %v9590_v1, %v9589_v9 }
 0xb19   :  { %11796 = vmatprep.subr.bf16.mxu0 %v11795_v52  ;;  %v11819_v52 = vpack.c.bf16 %v9608_v32, %v9607_v15 }
 0xb1a   :  { %11798 = vmatpush3.bf16.msra.mxu0 %v11797_v28  ;;  %v9609_v28 = vld [vmem:[%s17479_s9 + $0x1e0] sm:$0xff] }
 0xb1b   :  { %11800 = vmatprep.subr.bf16.mxu0 %v11799_v42  ;;  %v11823_v42 = vpack.c.bf16 %v9610_v24, %v9609_v28 }
 0xba9   :  { %v9419_v56 = vpop.f32.mrb[32].mxu1 }
 0xbaa   :  { %v9501_v19 = vadd.f32 %v9484_v29, %v9419_v56  ;;  %v9421_v34 = vpop.f32.mrb[33].mxu1  ;;  %v9611_v56 = vld [vmem:[%s17479_s9 + $0x1f0] sm:$0xff] }
 0xbab   :  { %v9502_v7 = vadd.f32 %v9488_v43, %v9421_v34  ;;  %v9423_v11 = vpop.f32.mrb[34].mxu1 }
 0xbac   :  { %vm9509_vm12 = vcmp.ge.f32.partialorder %v9501_v19, 0.0  ;;  %v9517_v54 = vmul.f32 0.2, %v9501_v19  ;;  %v9505_v25 = vadd.f32 %v9484_v29, %v9423_v11  ;;  %v9425_v8 = vpop.f32.mrb[35].mxu1  ;;  %v9593_v29 = vld [vmem:[%s17479_s9 + $0x160] sm:$0xff]  ;;  %v9595_v11 = vld [vmem:[%s17479_s9 + $0x170] sm:$0xff] }
 0xbad   :  { %vm9510_vm0 = vcmp.ge.f32.partialorder %v9502_v7, 0.0  ;;  %v9518_v53 = vmul.f32 0.2, %v9502_v7  ;;  %v9506_v57 = vadd.f32 %v9488_v43, %v9425_v8  ;;  %v9594_v43 = vld [vmem:[%s17479_s9 + $0x168] sm:$0xff]  ;;  %v9491_v8 = vsub.s32 2, %v15361_v18 }
 0xbae   :  { %v9525_v30 = vsel %vm9509_vm12, %v9501_v19, %v9517_v54  ;;  %v9521_v55 = vmul.f32 0.2, %v9505_v25  ;;  %vm9513_vm13 = vcmp.ge.f32.partialorder %v9505_v25, 0.0  ;;  %v9612_v19 = vld [vmem:[%s17479_s9 + $0x1f8] sm:$0xff]  ;;  %v11825_v34 = vpack.c.bf16 %v9594_v43, %v9593_v29 }
 0xbaf   :  { %vm9514_vm14 = vcmp.ge.f32.partialorder %v9506_v57, 0.0  ;;  %v9522_v31 = vmul.f32 0.2, %v9506_v57  ;;  %v9526_v4 = vsel %vm9510_vm0, %v9502_v7, %v9518_v53  ;;  %v9541_v5 = vmul.f32 %v9533_v44, %v9525_v30  ;;  %v9596_v54 = vld [vmem:[%s17479_s9 + $0x178] sm:$0xff] }
 0xbb0   :  { %v9542_v17 = vmul.f32 %v9534_v23, %v9526_v4  ;;  %v9529_v47 = vsel %vm9513_vm13, %v9505_v25, %v9521_v55  ;;  %v11827_v7 = vpack.c.bf16 %v9612_v19, %v9611_v56  ;;  %v11829_v25 = vpack.c.bf16 %v9596_v54, %v9595_v11 }
 0xbb1   :  { %v9530_v14 = vsel %vm9514_vm14, %v9506_v57, %v9522_v31  ;;  %v9545_v26 = vmul.f32 %v9537_v48, %v9529_v47  ;;  %v9495_v53 = vsub.s32 3, %v15361_v18  ;;  %v9492_v57 = vrot.slane %v17343_v60, %v9491_v8  ;;  %v9536_v18 = vld [vmem:[%s17481_s8 + $0x18] sm:$0xff] }
 0xbb2   :  { %9677 = vmatprep.mubr.f32.mxu0 %v9542_v17  ;;  %v9546_v22 = vmul.f32 %v9538_v2, %v9530_v14 }
 0xbb3   :  { %9678 = vmatmul.mubr.f32.vlgmr.msra.gmra.mrb[100].mxu0 %v9541_v5  ;;  %v9496_v23 = vrot.slane %v17343_v60, %v9495_v53  ;;  %v9535_v60 = vld [vmem:[%s17481_s8 + $0x10] sm:$0xff] }
 0xbb4   :  { %9682 = vmatprep.mubr.f32.mxu0 %v9546_v22  ;;  %11802 = vmatpush3.bf16.msra.mxu0 %v11801_v33  ;;  %v9539_v22 = vld [vmem:[%s17481_s8 + $0x30] sm:$0xff] }
 0xbb5   :  { %11804 = vmatprep.subr.bf16.mxu0 %v11803_v39  ;;  %v9540_v39 = vld [vmem:[%s17481_s8 + $0x38] sm:$0xff] }
 0xbb7   :  { %9683 = vmatmul.mubr.f32.gmra.mrb[102].mxu0 %v9545_v26 }
 0xbb8   :  { %11806 = vmatpush3.bf16.msra.mxu0 %v11805_v62 }
 0xbb9   :  { %11808 = vmatprep.subr.bf16.mxu0 %v11807_v50 }
 0xbbc   :  { %11810 = vmatpush3.bf16.msra.mxu0 %v11809_v0 }
 0xbbd   :  { %11812 = vmatprep.subr.bf16.mxu0 %v11811_v61 }
 0xbc0   :  { %11814 = vmatpush3.bf16.msra.mxu0 %v11813_v58 }
 0xbc1   :  { %11816 = vmatprep.subr.bf16.mxu0 %v11815_v49 }
 0xbc4   :  { %11818 = vmatpush3.bf16.msra.mxu0 %v11817_v20 }
 0xbc5   :  { %11820 = vmatprep.subr.bf16.mxu0 %v11819_v52 }
 0xbc8   :  { %11822 = vmatpush3.bf16.msra.mxu0 %v11821_v38 }
 0xbc9   :  { %11824 = vmatprep.subr.bf16.mxu0 %v11823_v42 }
 0xbcc   :  { %11826 = vmatpush3.bf16.msra.mxu0 %v11825_v34 }
 0xbcd   :  { %11828 = vmatprep.subr.bf16.mxu0 %v11827_v7 }
 0xbd0   :  { %11830 = vmatpush3.bf16.msra.mxu0 %v11829_v25 }
 0xbe9   :  { %v9462_v12 = vpop.f32.mrb[36].mxu1 }
 0xbea   :  { %v9503_v45 = vadd.f32 %v9492_v57, %v9462_v12  ;;  %v9464_v30 = vpop.f32.mrb[37].mxu1 }
 0xbeb   :  { %v9504_v44 = vadd.f32 %v9496_v23, %v9464_v30  ;;  %v9466_v55 = vpop.f32.mrb[38].mxu1 }
 0xbec   :  { %vm9511_vm15 = vcmp.ge.f32.partialorder %v9503_v45, 0.0  ;;  %v9519_v6 = vmul.f32 0.2, %v9503_v45  ;;  %v9507_v59 = vadd.f32 %v9492_v57, %v9466_v55  ;;  %v9468_v31 = vpop.f32.mrb[39].mxu1 }
 0xbed   :  { %vm9512_vm1 = vcmp.ge.f32.partialorder %v9504_v44, 0.0  ;;  %v9520_v4 = vmul.f32 0.2, %v9504_v44  ;;  %v9508_v2 = vadd.f32 %v9496_v23, %v9468_v31 }
 0xbee   :  { %v9527_v17 = vsel %vm9511_vm15, %v9503_v45, %v9519_v6  ;;  %v9523_v33 = vmul.f32 0.2, %v9507_v59  ;;  %vm9515_vm2 = vcmp.ge.f32.partialorder %v9507_v59, 0.0 }
 0xbef   :  { %vm9516_vm3 = vcmp.ge.f32.partialorder %v9508_v2, 0.0  ;;  %v9524_v5 = vmul.f32 0.2, %v9508_v2  ;;  %v9528_v14 = vsel %vm9512_vm1, %v9504_v44, %v9520_v4  ;;  %v9543_v35 = vmul.f32 %v9535_v60, %v9527_v17 }
 0xbf0   :  { %v9544_v27 = vmul.f32 %v9536_v18, %v9528_v14  ;;  %v9531_v48 = vsel %vm9515_vm2, %v9507_v59, %v9523_v33 }
 0xbf1   :  { %v9532_v47 = vsel %vm9516_vm3, %v9508_v2, %v9524_v5  ;;  %v9547_v41 = vmul.f32 %v9539_v22, %v9531_v48 }
 0xbf2   :  { %9752 = vmatprep.mubr.f32.mxu0 %v9544_v27  ;;  %v9548_v37 = vmul.f32 %v9540_v39, %v9532_v47 }
 0xbf3   :  { %9753 = vmatmul.mubr.f32.vlgmr.msra.gmra.mrb[104].mxu0 %v9543_v35 }
 0xbf4   :  { %9757 = vmatprep.mubr.f32.mxu0 %v9548_v37 }
 0xbf7   :  { %9758 = vmatmul.mubr.f32.gmra.mrb[106].mxu0 %v9547_v41 }
 0xc86   :  { %v11723_v62 = vpop.f32.mrb[100].mxu0 }
 0xc87   :  { %v11724_v26 = vpop.f32.mrb[101].mxu0 }
 0xc88   :  { %v11725_v50 = vadd.f32 %v11724_v26, %v11723_v62 }
 0xc8a   :  { %v11726_v3 = vpop.f32.mrb[102].mxu0 }
 0xc8b   :  { %v11727_v36 = vpop.f32.mrb[103].mxu0 }
 0xc8c   :  { %v11728_v13 = vadd.f32 %v11727_v36, %v11726_v3 }
 0xcc6   :  { %v11761_v21 = vpop.f32.mrb[104].mxu0 }
 0xcc7   :  { %v11762_v0 = vpop.f32.mrb[105].mxu0 }
 0xcc8   :  { %v11763_v61 = vadd.f32 %v11762_v0, %v11761_v21 }
 0xcca   :  { %v9755_v16 = vadd.f32 %v11763_v61, %v11725_v50  ;;  %v11764_v63 = vpop.f32.mrb[106].mxu0 }
 0xccb   :  { %v11765_v51 = vpop.f32.mrb[107].mxu0 }
 0xccc   :  { %v11766_v10 = vadd.f32 %v11765_v51, %v11764_v63 }
 0xcce   :  { %v9760_v58 = vadd.f32 %v11766_v10, %v11728_v13 }
 0xcd0   :  { %v9763_v49 = vadd.f32 %v9760_v58, %v9755_v16 }
 0xcd2   :  { %v9764_v9 = vrot.slane %v9763_v49, 4 }
 0xcd4   :  { %v9765_v1 = vadd.f32 %v9764_v9, %v9763_v49 }
 0xcd6   :  { %v9766_v15 = vrot.slane %v9765_v1, 2 }
 0xcd8   :  { %v9767_v32 = vadd.f32 %v9766_v15, %v9765_v1 }
 0xcda   :  { %v9768_v20 = vrot.slane %v9767_v32, 1 }
 0xcdc   :  { %v9769_v52 = vadd.f32 %v9768_v20, %v9767_v32 }
 0xcde   :  { %v9770_v46 = vand.u32 2147483647, %v9769_v52  ;;  %vm9774_vm4 = vcmp.ge.f32.partialorder %v9769_v52, 0.0 }
 0xce0   :  { %v9771_v40 = vsub.f32 0.0, %v9770_v46 }
 0xce2   :  { %v9772_v28 = vmul.f32 1.442695, %v9771_v40 }
 0xce4   :  { %13563 = vpow2.f32 %v9772_v28 }
 0xcee   :  { %v13564_v24 = vpop.eup %13563 }
 0xcef   :  { %v9776_v38 = vadd.f32 1.0, %v13564_v24  ;;  %v9775_v29 = vsel %vm9774_vm4, 1.0, %v13564_v24 }
 0xcf1   :  { %13565 = vrcp.f32 %v9776_v38 }
 0xcfb   :  { %v13566_v42 = vpop.eup %13565 }
 0xcfc   :  { %v9778_v43 = vmul.f32 %v13566_v42, %v9775_v29 }
 0xcfe   :  { %9779 = vst [vmem:[%s17482_s10] sm:$0xff] %v9778_v43 }

</bundles_post_ra>
